<compile_context>
chip_gen: v7x
topology: tpu7x:2x2x1
jax: 0.10.0
libtpu: 0.0.40
codegen_flags: <defaults>
</compile_context>

<pallas_src>
import jax
import jax.numpy as jnp
from jax import lax
from jax.experimental import pallas as pl
from jax.experimental.pallas import tpu as pltpu

K_SIZE = 4                      # all ConvTranspose2d layers use kernel_size=4
BN_EPS = 1e-5                   # torch.nn.BatchNorm2d default eps
VMEM_LIMIT_BYTES = 48 * 1024 * 1024
TILE_BUDGET_BYTES = 12 * 1024 * 1024


# ------------------------------- helpers ------------------------------------

def _round_up(x, m):
    return ((x + m - 1) // m) * m


def _pick_batch_tile(n, per_sample_bytes, fixed_bytes,
                     budget_bytes=TILE_BUDGET_BYTES, cap=32):
    """Largest batch tile that divides n and keeps the (double-buffered)
    per-tile working set under the VMEM budget."""
    nt = min(n, cap)
    while nt > 1 and (n % nt != 0 or
                      2 * nt * per_sample_bytes + fixed_bytes > budget_bytes):
        nt -= 1
    return max(nt, 1)


# ----------------------------- Pallas kernels -------------------------------

def _first_layer_kernel(zc_ref, w_ref, g_ref, b_ref, o_ref):
    # zc: (N, Din) bf16; w: (16, Din, C) bf16, tap t = kh*4 + kw;
    # g, b: (1, C) f32; o: (N, 6, 6, C) bf16 (zero border, BN+ReLU interior).
    n = zc_ref.shape[0]
    c = w_ref.shape[-1]
    a = zc_ref[...]
    ys = []
    s1 = jnp.zeros((1, c), jnp.float32)
    s2 = jnp.zeros((1, c), jnp.float32)
    for t in range(16):
        y = jnp.dot(a, w_ref[t], preferred_element_type=jnp.float32)   # (N, C)
        ys.append(y)
        s1 = s1 + jnp.sum(y, axis=0, keepdims=True)
        s2 = s2 + jnp.sum(y * y, axis=0, keepdims=True)
    inv_count = 1.0 / float(n * 16)
    mean = s1 * inv_count
    var = s2 * inv_count - mean * mean                # biased batch variance
    scale = g_ref[...] * lax.rsqrt(var + BN_EPS)
    shift = b_ref[...] - mean * scale
    o_ref[...] = jnp.zeros_like(o_ref)                # zero border (conv pad)
    zcol = jnp.zeros((n, 1, c), jnp.float32)
    for kh in range(4):
        acts = [jnp.maximum(ys[kh * 4 + kw] * scale + shift, 0.0)[:, None, :]
                for kw in range(4)]
        row = jnp.concatenate([zcol] + acts + [zcol], axis=1)          # (N, 6, C)
        o_ref[:, 1 + kh, :, :] = row.astype(o_ref.dtype)


def _deconv_gemm_stats_kernel(xp_ref, w_ref, y_ref, s_ref):
    # xp: (nt, H+2, W+2, Cin) bf16 zero-padded activation (resident block)
    # w:  (16, Cin, Cout) bf16, tap index t = (ph*2+pw)*4 + dh*2 + dw
    # y:  (nt*H, 2, W, 2*Cout) bf16 -- reshapes for free to (nt, 2H, 2W, Cout)
    # s:  (1, 2, Cout) f32 partial (sum, sumsq) from the f32 accumulators
    nt, hp, wp, cin = xp_ref.shape
    h, w = hp - 2, wp - 2
    cout = w_ref.shape[-1]
    m = nt * h * w
    s1 = jnp.zeros((1, cout), jnp.float32)
    s2 = jnp.zeros((1, cout), jnp.float32)
    for ph in range(2):
        cols = []
        for pw in range(2):
            acc = None
            for dh in range(2):
                for dw in range(2):
                    t = (ph * 2 + pw) * 4 + dh * 2 + dw
                    a = xp_ref[:, ph + dh:ph + dh + h, pw + dw:pw + dw + w, :]
                    d = jnp.dot(a.reshape(m, cin), w_ref[t],
                                preferred_element_type=jnp.float32)
                    acc = d if acc is None else acc + d
            s1 = s1 + jnp.sum(acc, axis=0, keepdims=True)
            s2 = s2 + jnp.sum(acc * acc, axis=0, keepdims=True)
            cols.append(acc)
        row = jnp.concatenate(cols, axis=-1)                        # (m, 2*Cout)
        y_ref[:, ph, :, :] = row.reshape(nt * h, w, 2 * cout).astype(y_ref.dtype)
    s_ref[0] = jnp.concatenate([s1, s2], axis=0)


def _bn_relu_pad_kernel(y_ref, sc_ref, sh_ref, o_ref):
    # y: (nt, Ho, Wo, C) bf16 pre-BN; sc/sh: (1, C) f32 precomputed affine;
    # o: (nt, Ho+2, Wo+2, C) bf16 (zero border = next layer's conv padding).
    nt, ho, wo, c = y_ref.shape
    o_ref[...] = jnp.zeros_like(o_ref)
    act = jnp.maximum(
        y_ref[...].astype(jnp.float32) * sc_ref[...] + sh_ref[...], 0.0)
    zcol = jnp.zeros((nt, ho, 1, c), jnp.float32)
    actw = jnp.concatenate([zcol, act, zcol], axis=2)       # (nt, Ho, Wo+2, C)
    o_ref[:, 1:1 + ho, :, :] = actw.astype(o_ref.dtype)


def _deconv_gemm_tanh_kernel(xp_ref, w_ref, b_ref, y_ref):
    # Same GEMM structure as the stats kernel; adds bias + tanh, no stats.
    nt, hp, wp, cin = xp_ref.shape
    h, w = hp - 2, wp - 2
    cp = w_ref.shape[-1]
    m = nt * h * w
    for ph in range(2):
        cols = []
        for pw in range(2):
            acc = None
            for dh in range(2):
                for dw in range(2):
                    t = (ph * 2 + pw) * 4 + dh * 2 + dw
                    a = xp_ref[:, ph + dh:ph + dh + h, pw + dw:pw + dw + w, :]
                    d = jnp.dot(a.reshape(m, cin), w_ref[t],
                                preferred_element_type=jnp.float32)
                    acc = d if acc is None else acc + d
            cols.append(jnp.tanh(acc + b_ref[...]))
        row = jnp.concatenate(cols, axis=-1)                        # (m, 2*cp)
        y_ref[:, ph, :, :] = row.reshape(nt * h, w, 2 * cp).astype(y_ref.dtype)


# ------------------------------ layer wrappers -------------------------------

def pallas_first_layer(zc, w16, gamma, beta):
    """Fused z/c 1x1->4x4 deconvs + BN + ReLU; returns padded (N, 6, 6, C) bf16."""
    n, din = zc.shape
    c = w16.shape[-1]
    flops = 2 * n * din * 16 * c
    bytes_acc = n * din * 2 + 16 * din * c * 2 + n * 36 * c * 2 + 2 * c * 4
    return pl.pallas_call(
        _first_layer_kernel,
        out_shape=jax.ShapeDtypeStruct((n, 6, 6, c), jnp.bfloat16),
        grid=(1,),
        in_specs=[pl.BlockSpec((n, din), lambda i: (0, 0)),
                  pl.BlockSpec((16, din, c), lambda i: (0, 0, 0)),
                  pl.BlockSpec((1, c), lambda i: (0, 0)),
                  pl.BlockSpec((1, c), lambda i: (0, 0))],
        out_specs=pl.BlockSpec((n, 6, 6, c), lambda i: (0, 0, 0, 0)),
        compiler_params=pltpu.CompilerParams(
            dimension_semantics=("arbitrary",),
            vmem_limit_bytes=VMEM_LIMIT_BYTES),
        cost_estimate=pl.CostEstimate(flops=int(flops), transcendentals=int(c),
                                      bytes_accessed=int(bytes_acc)),
    )(zc.astype(jnp.bfloat16), w16.astype(jnp.bfloat16),
      gamma.reshape(1, -1).astype(jnp.float32),
      beta.reshape(1, -1).astype(jnp.float32))


def pallas_deconv_bn_relu(xp, w16, gamma, beta):
    """Stride-2 deconv (k=4, s=2, p=1) + BatchNorm + ReLU.
    xp: (N, H+2, W+2, Cin) bf16 padded activation.
    Returns the next padded activation (N, 2H+2, 2W+2, Cout) bf16."""
    n, hp, wp, cin = xp.shape
    h, w = hp - 2, wp - 2
    ho, wo = 2 * h, 2 * w
    cout = w16.shape[-1]

    per_sample = hp * wp * cin * 2 + 4 * h * w * cout * 2 + 2 * h * w * cout * 4
    fixed = 2 * 16 * cin * cout * 2 + 4 * cout * 4
    nt = _pick_batch_tile(n, per_sample, fixed)
    nb = n // nt

    flops = 2 * n * h * w * 16 * cin * cout
    bytes_acc = (n * hp * wp * cin * 2 + 16 * cin * cout * 2
                 + n * 4 * h * w * cout * 2 + nb * 2 * cout * 4)
    y, stats = pl.pallas_call(
        _deconv_gemm_stats_kernel,
        out_shape=(jax.ShapeDtypeStruct((n * h, 2, w, 2 * cout), jnp.bfloat16),
                   jax.ShapeDtypeStruct((nb, 2, cout), jnp.float32)),
        grid=(nb,),
        in_specs=[pl.BlockSpec((nt, hp, wp, cin), lambda i: (i, 0, 0, 0)),
                  pl.BlockSpec((16, cin, cout), lambda i: (0, 0, 0))],
        out_specs=(pl.BlockSpec((nt * h, 2, w, 2 * cout),
                                lambda i: (i, 0, 0, 0)),
                   pl.BlockSpec((1, 2, cout), lambda i: (i, 0, 0))),
        compiler_params=pltpu.CompilerParams(
            dimension_semantics=("parallel",),
            vmem_limit_bytes=VMEM_LIMIT_BYTES),
        cost_estimate=pl.CostEstimate(flops=int(flops), transcendentals=0,
                                      bytes_accessed=int(bytes_acc)),
    )(xp, w16.astype(jnp.bfloat16))

    # O(C) wrapper math: reduce partial stats, fold BN into one (scale, shift).
    count = float(n * ho * wo)
    tot = jnp.sum(stats, axis=0)                      # (2, Cout)
    mean = tot[0] / count
    var = tot[1] / count - mean * mean                # biased batch variance
    scale = gamma.astype(jnp.float32) * lax.rsqrt(var + BN_EPS)
    shift = beta.astype(jnp.float32) - mean * scale

    y4 = y.reshape(n, ho, wo, cout)                   # free contiguous reshape

    per_sample_bn = ho * wo * cout * (2 + 4) + (ho + 2) * (wo + 2) * cout * 2
    nt2 = _pick_batch_tile(n, per_sample_bn, 4 * cout * 4)
    nb2 = n // nt2
    return pl.pallas_call(
        _bn_relu_pad_kernel,
        out_shape=jax.ShapeDtypeStruct((n, ho + 2, wo + 2, cout), jnp.bfloat16),
        grid=(nb2,),
        in_specs=[pl.BlockSpec((nt2, ho, wo, cout), lambda i: (i, 0, 0, 0)),
                  pl.BlockSpec((1, cout), lambda i: (0, 0)),
                  pl.BlockSpec((1, cout), lambda i: (0, 0))],
        out_specs=pl.BlockSpec((nt2, ho + 2, wo + 2, cout),
                               lambda i: (i, 0, 0, 0)),
        compiler_params=pltpu.CompilerParams(
            dimension_semantics=("parallel",),
            vmem_limit_bytes=VMEM_LIMIT_BYTES),
        cost_estimate=pl.CostEstimate(
            flops=int(3 * n * ho * wo * cout), transcendentals=0,
            bytes_accessed=int(n * ho * wo * cout * 2
                               + n * (ho + 2) * (wo + 2) * cout * 2
                               + 2 * cout * 4)),
    )(y4, scale.reshape(1, -1), shift.reshape(1, -1))


def pallas_deconv_tanh(xp, w16p, bias_p, cout_real):
    """Output stride-2 deconv + bias + tanh (Cout lane-padded). Returns NCHW."""
    n, hp, wp, cin = xp.shape
    h, w = hp - 2, wp - 2
    cp = w16p.shape[-1]
    per_sample = hp * wp * cin * 2 + 4 * h * w * cp * 4 + 2 * h * w * cp * 4
    fixed = 2 * 16 * cin * cp * 2
    nt = _pick_batch_tile(n, per_sample, fixed)
    nb = n // nt
    flops = 2 * n * h * w * 16 * cin * cp
    y = pl.pallas_call(
        _deconv_gemm_tanh_kernel,
        out_shape=jax.ShapeDtypeStruct((n * h, 2, w, 2 * cp), jnp.float32),
        grid=(nb,),
        in_specs=[pl.BlockSpec((nt, hp, wp, cin), lambda i: (i, 0, 0, 0)),
                  pl.BlockSpec((16, cin, cp), lambda i: (0, 0, 0)),
                  pl.BlockSpec((1, cp), lambda i: (0, 0))],
        out_specs=pl.BlockSpec((nt * h, 2, w, 2 * cp), lambda i: (i, 0, 0, 0)),
        compiler_params=pltpu.CompilerParams(
            dimension_semantics=("parallel",),
            vmem_limit_bytes=VMEM_LIMIT_BYTES),
        cost_estimate=pl.CostEstimate(
            flops=int(flops), transcendentals=int(n * 4 * h * w * cp),
            bytes_accessed=int(n * hp * wp * cin * 2 + 16 * cin * cp * 2
                               + n * 4 * h * w * cp * 4)),
    )(xp, w16p.astype(jnp.bfloat16), bias_p.reshape(1, -1).astype(jnp.float32))
    img = y.reshape(n, 2 * h, 2 * w, cp)[..., :cout_real]
    return jnp.transpose(img, (0, 3, 1, 2))           # back to NCHW


# -------------------------- weight preparation (XLA) -------------------------

def _phase_tap_weights(w):
    # w: (Cin, Cout, 4, 4) -> (16, Cin, Cout); tap t = (ph*2+pw)*4 + dh*2 + dw,
    # kernel tap (kh, kw) = (3 - ph - 2*dh, 3 - pw - 2*dw).
    taps = []
    for ph in range(2):
        for pw in range(2):
            for dh in range(2):
                for dw in range(2):
                    taps.append(w[:, :, 3 - ph - 2 * dh, 3 - pw - 2 * dw])
    return jnp.stack(taps, axis=0)


def _first_layer_weight(w_z, w_c):
    # Block-diagonal fusion of the two 1x1->4x4 deconvs: (16, Dz+Dc, 2*half),
    # tap index t = kh*4 + kw, output channel order = [z-half | c-half].
    dz, half = w_z.shape[0], w_z.shape[1]
    dc = w_c.shape[0]
    wz = jnp.transpose(w_z, (2, 3, 0, 1)).reshape(16, dz, half)
    wc = jnp.transpose(w_c, (2, 3, 0, 1)).reshape(16, dc, half)
    wf = jnp.zeros((16, dz + dc, 2 * half), jnp.float32)
    wf = wf.at[:, :dz, :half].set(wz)
    wf = wf.at[:, dz:, half:].set(wc)
    return wf


# ------------------------------ Generator -----------------------------------

def init_generator_params(key, input_dim, label_dim, num_filters, output_dim):
    half = num_filters[0] // 2
    keys = iter(jax.random.split(key, 3 * (len(num_filters) + 1) + 1))

    def deconv_bn_params(cin, cout):
        w = 0.02 * jax.random.normal(next(keys), (cin, cout, K_SIZE, K_SIZE),
                                     jnp.float32)
        b = jnp.zeros((cout,), jnp.float32)        # ConvTranspose2d bias (init 0)
        gamma = 1.0 + 0.1 * jax.random.normal(next(keys), (cout,), jnp.float32)
        beta = 0.1 * jax.random.normal(next(keys), (cout,), jnp.float32)
        return (w, b, gamma, beta)

    params = {
        "input_deconv": deconv_bn_params(input_dim, half),
        "label_deconv": deconv_bn_params(label_dim, half),
        "hidden": [deconv_bn_params(num_filters[i - 1], num_filters[i])
                   for i in range(1, len(num_filters))],
    }
    w_out = 0.02 * jax.random.normal(next(keys),
                                     (num_filters[-1], output_dim, K_SIZE, K_SIZE),
                                     jnp.float32)
    params["out"] = (w_out, jnp.zeros((output_dim,), jnp.float32))
    return params


def generator_forward(params, z, c):
    # z: (N, input_dim, 1, 1), c: (N, label_dim, 1, 1)  (NCHW, like PyTorch)
    n = z.shape[0]
    zc = jnp.concatenate([z.reshape(n, -1), c.reshape(n, -1)],
                         axis=-1).astype(jnp.float32)

    wz, _bz, gz, bez = params["input_deconv"]
    wc, _bc, gc, bec = params["label_deconv"]
    wf = _first_layer_weight(wz, wc)                 # (16, Dz+Dc, nf0)
    gamma1 = jnp.concatenate([gz, gc])
    beta1 = jnp.concatenate([bez, bec])
    # conv bias omitted in every BN layer: it cancels exactly against the mean.
    x = pallas_first_layer(zc, wf, gamma1, beta1)    # (N, 6, 6, nf0) bf16, padded

    for (wt, _bt, gt, bet) in params["hidden"]:
        x = pallas_deconv_bn_relu(x, _phase_tap_weights(wt), gt, bet)

    w_out, b_out = params["out"]
    cout = w_out.shape[1]
    cpad = _round_up(max(cout, 64), 64)              # 2*cpad = dense 128-lane store
    w16p = jnp.pad(_phase_tap_weights(w_out), ((0, 0), (0, 0), (0, cpad - cout)))
    bias_p = jnp.pad(b_out, (0, cpad - cout))
    # TODO(synk): hidden-layer Cout lane padding (64/96 -> 128) not implemented;
    # only the tanh output layer is lane-padded.
    return pallas_deconv_tanh(x, w16p, bias_p, cout)


# -------------------- pure-XLA reference (for checking) ---------------------
# Mirrors the kernel's rounding (bf16 GEMM inputs, bf16-stored pre-BN
# activations in hidden layers, f32 accumulation) so the comparison stays tight.

def _q16(x):
    return x.astype(jnp.bfloat16).astype(jnp.float32)


def _deconv_ref(x, w, b, stride, pad):
    wm = jnp.transpose(_q16(w)[:, :, ::-1, ::-1], (2, 3, 0, 1))   # HWIO, flipped
    y = lax.conv_general_dilated(
        _q16(x), wm, window_strides=(1, 1),
        padding=[(K_SIZE - 1 - pad, K_SIZE - 1 - pad)] * 2,
        lhs_dilation=(stride, stride),
        dimension_numbers=("NHWC", "HWIO", "NHWC"),
        precision=lax.Precision.HIGHEST)
    return y + b


def _bn_relu_ref(y, gamma, beta, quant_pre_bn):
    mean = jnp.mean(y, axis=(0, 1, 2))
    var = jnp.mean(y * y, axis=(0, 1, 2)) - mean * mean
    scale = gamma * lax.rsqrt(var + BN_EPS)
    shift = beta - mean * scale
    ya = _q16(y) if quant_pre_bn else y
    return jnp.maximum(ya * scale + shift, 0.0)


def generator_forward_ref(params, z, c):
    zf = jnp.transpose(z, (0, 2, 3, 1)).astype(jnp.float32)
    cf = jnp.transpose(c, (0, 2, 3, 1)).astype(jnp.float32)

    def block(x, p, stride, pad, quant_pre_bn):
        w, b, g, be = p
        return _bn_relu_ref(_deconv_ref(x, w, b, stride, pad), g, be,
                            quant_pre_bn)

    h1 = block(zf, params["input_deconv"], 1, 0, False)
    h2 = block(cf, params["label_deconv"], 1, 0, False)
    x = jnp.concatenate([h1, h2], axis=-1)
    for p in params["hidden"]:
        x = block(x, p, 2, 1, True)
    w_out, b_out = params["out"]
    out = jnp.tanh(_deconv_ref(x, w_out, b_out, 2, 1))
    return jnp.transpose(out, (0, 3, 1, 2))


# ---------------------------------- main -------------------------------------

if __name__ == "__main__":
    key = jax.random.PRNGKey(0)
    k_params, k_z, k_c = jax.random.split(key, 3)

    N = 2
    input_dim, label_dim = 8, 4
    num_filters = [16, 8]
    output_dim = 3

    params = init_generator_params(k_params, input_dim, label_dim,
                                   num_filters, output_dim)
    z = jax.random.normal(k_z, (N, input_dim, 1, 1), jnp.float32)
    c = jax.random.normal(k_c, (N, label_dim, 1, 1), jnp.float32)

    out = jax.block_until_ready(jax.jit(generator_forward)(params, z, c))
    assert out.shape == (N, output_dim, 16, 16), out.shape

    ref = jax.block_until_ready(generator_forward_ref(params, z, c))
    max_err = float(jnp.max(jnp.abs(out - ref)))
    if not (max_err < 1e-2):
        raise AssertionError(f"Pallas/XLA mismatch, max abs err = {max_err}")

    print("KERNEL_OK")
</pallas_src>

<mosaic_0001>
module attributes {stable_mosaic.version = 11 : i64} {
  func.func @_first_layer_kernel(%arg0: i32, %arg1: memref<2x12xbf16, #tpu.memory_space<vmem>>, %arg2: memref<16x12x16xbf16, #tpu.memory_space<vmem>>, %arg3: memref<1x16xf32, #tpu.memory_space<vmem>>, %arg4: memref<1x16xf32, #tpu.memory_space<vmem>>, %arg5: memref<2x6x6x16xbf16, #tpu.memory_space<vmem>>) attributes {dimension_semantics = [#tpu.dimension_semantics<arbitrary>], iteration_bounds = array<i64: 1>, scalar_prefetch = 0 : i64, scratch_operands = 0 : i64, tpu.core_type = #tpu.core_type<tc>, window_params = [{pipeline_mode = #tpu.pipeline_mode<synchronous>, transform_indices = @transform_0, window_bounds = array<i64: 2, 12>}, {pipeline_mode = #tpu.pipeline_mode<synchronous>, transform_indices = @transform_1, window_bounds = array<i64: 16, 12, 16>}, {pipeline_mode = #tpu.pipeline_mode<synchronous>, transform_indices = @transform_2, window_bounds = array<i64: 1, 16>}, {pipeline_mode = #tpu.pipeline_mode<synchronous>, transform_indices = @transform_3, window_bounds = array<i64: 1, 16>}, {pipeline_mode = #tpu.pipeline_mode<synchronous>, transform_indices = @transform_4, window_bounds = array<i64: 2, 6, 6, 16>}]} {
    %c0 = arith.constant 0 : index
    %c0_0 = arith.constant 0 : index
    %0 = vector.load %arg1[%c0, %c0_0] : memref<2x12xbf16, #tpu.memory_space<vmem>>, vector<2x12xbf16>
    %cst = arith.constant 0.000000e+00 : f32
    %1 = vector.broadcast %cst : f32 to vector<1x16xf32>
    %cst_1 = arith.constant 0.000000e+00 : f32
    %2 = vector.broadcast %cst_1 : f32 to vector<1x16xf32>
    %c0_2 = arith.constant 0 : index
    %c0_3 = arith.constant 0 : index
    %c0_4 = arith.constant 0 : index
    %3 = vector.load %arg2[%c0_2, %c0_3, %c0_4] : memref<16x12x16xbf16, #tpu.memory_space<vmem>>, vector<1x12x16xbf16>
    %4 = vector.shape_cast %3 : vector<1x12x16xbf16> to vector<12x16xbf16>
    %cst_5 = arith.constant dense<0.000000e+00> : vector<2x16xf32>
    %5 = tpu.matmul %0, %4, %cst_5 {dimension_numbers = #tpu.dot_dimension_numbers<[1], [0], [0], [1], [0, 0, 1, 1], [], []>} : vector<2x12xbf16>, vector<12x16xbf16>, vector<2x16xf32> -> vector<2x16xf32>
    %cst_6 = arith.constant dense<0.000000e+00> : vector<16xf32>
    %6 = vector.multi_reduction <add>, %5, %cst_6 [0] : vector<2x16xf32> to vector<16xf32>
    %7 = vector.shape_cast %6 : vector<16xf32> to vector<1x16xf32>
    %8 = arith.addf %1, %7 : vector<1x16xf32>
    %9 = arith.mulf %5, %5 : vector<2x16xf32>
    %cst_7 = arith.constant dense<0.000000e+00> : vector<16xf32>
    %10 = vector.multi_reduction <add>, %9, %cst_7 [0] : vector<2x16xf32> to vector<16xf32>
    %11 = vector.shape_cast %10 : vector<16xf32> to vector<1x16xf32>
    %12 = arith.addf %2, %11 : vector<1x16xf32>
    %c1 = arith.constant 1 : index
    %c0_8 = arith.constant 0 : index
    %c0_9 = arith.constant 0 : index
    %13 = vector.load %arg2[%c1, %c0_8, %c0_9] : memref<16x12x16xbf16, #tpu.memory_space<vmem>>, vector<1x12x16xbf16>
    %14 = vector.shape_cast %13 : vector<1x12x16xbf16> to vector<12x16xbf16>
    %cst_10 = arith.constant dense<0.000000e+00> : vector<2x16xf32>
    %15 = tpu.matmul %0, %14, %cst_10 {dimension_numbers = #tpu.dot_dimension_numbers<[1], [0], [0], [1], [0, 0, 1, 1], [], []>} : vector<2x12xbf16>, vector<12x16xbf16>, vector<2x16xf32> -> vector<2x16xf32>
    %cst_11 = arith.constant dense<0.000000e+00> : vector<16xf32>
    %16 = vector.multi_reduction <add>, %15, %cst_11 [0] : vector<2x16xf32> to vector<16xf32>
    %17 = vector.shape_cast %16 : vector<16xf32> to vector<1x16xf32>
    %18 = arith.addf %8, %17 : vector<1x16xf32>
    %19 = arith.mulf %15, %15 : vector<2x16xf32>
    %cst_12 = arith.constant dense<0.000000e+00> : vector<16xf32>
    %20 = vector.multi_reduction <add>, %19, %cst_12 [0] : vector<2x16xf32> to vector<16xf32>
    %21 = vector.shape_cast %20 : vector<16xf32> to vector<1x16xf32>
    %22 = arith.addf %12, %21 : vector<1x16xf32>
    %c2 = arith.constant 2 : index
    %c0_13 = arith.constant 0 : index
    %c0_14 = arith.constant 0 : index
    %23 = vector.load %arg2[%c2, %c0_13, %c0_14] : memref<16x12x16xbf16, #tpu.memory_space<vmem>>, vector<1x12x16xbf16>
    %24 = vector.shape_cast %23 : vector<1x12x16xbf16> to vector<12x16xbf16>
    %cst_15 = arith.constant dense<0.000000e+00> : vector<2x16xf32>
    %25 = tpu.matmul %0, %24, %cst_15 {dimension_numbers = #tpu.dot_dimension_numbers<[1], [0], [0], [1], [0, 0, 1, 1], [], []>} : vector<2x12xbf16>, vector<12x16xbf16>, vector<2x16xf32> -> vector<2x16xf32>
    %cst_16 = arith.constant dense<0.000000e+00> : vector<16xf32>
    %26 = vector.multi_reduction <add>, %25, %cst_16 [0] : vector<2x16xf32> to vector<16xf32>
    %27 = vector.shape_cast %26 : vector<16xf32> to vector<1x16xf32>
    %28 = arith.addf %18, %27 : vector<1x16xf32>
    %29 = arith.mulf %25, %25 : vector<2x16xf32>
    %cst_17 = arith.constant dense<0.000000e+00> : vector<16xf32>
    %30 = vector.multi_reduction <add>, %29, %cst_17 [0] : vector<2x16xf32> to vector<16xf32>
    %31 = vector.shape_cast %30 : vector<16xf32> to vector<1x16xf32>
    %32 = arith.addf %22, %31 : vector<1x16xf32>
    %c3 = arith.constant 3 : index
    %c0_18 = arith.constant 0 : index
    %c0_19 = arith.constant 0 : index
    %33 = vector.load %arg2[%c3, %c0_18, %c0_19] : memref<16x12x16xbf16, #tpu.memory_space<vmem>>, vector<1x12x16xbf16>
    %34 = vector.shape_cast %33 : vector<1x12x16xbf16> to vector<12x16xbf16>
    %cst_20 = arith.constant dense<0.000000e+00> : vector<2x16xf32>
    %35 = tpu.matmul %0, %34, %cst_20 {dimension_numbers = #tpu.dot_dimension_numbers<[1], [0], [0], [1], [0, 0, 1, 1], [], []>} : vector<2x12xbf16>, vector<12x16xbf16>, vector<2x16xf32> -> vector<2x16xf32>
    %cst_21 = arith.constant dense<0.000000e+00> : vector<16xf32>
    %36 = vector.multi_reduction <add>, %35, %cst_21 [0] : vector<2x16xf32> to vector<16xf32>
    %37 = vector.shape_cast %36 : vector<16xf32> to vector<1x16xf32>
    %38 = arith.addf %28, %37 : vector<1x16xf32>
    %39 = arith.mulf %35, %35 : vector<2x16xf32>
    %cst_22 = arith.constant dense<0.000000e+00> : vector<16xf32>
    %40 = vector.multi_reduction <add>, %39, %cst_22 [0] : vector<2x16xf32> to vector<16xf32>
    %41 = vector.shape_cast %40 : vector<16xf32> to vector<1x16xf32>
    %42 = arith.addf %32, %41 : vector<1x16xf32>
    %c4 = arith.constant 4 : index
    %c0_23 = arith.constant 0 : index
    %c0_24 = arith.constant 0 : index
    %43 = vector.load %arg2[%c4, %c0_23, %c0_24] : memref<16x12x16xbf16, #tpu.memory_space<vmem>>, vector<1x12x16xbf16>
    %44 = vector.shape_cast %43 : vector<1x12x16xbf16> to vector<12x16xbf16>
    %cst_25 = arith.constant dense<0.000000e+00> : vector<2x16xf32>
    %45 = tpu.matmul %0, %44, %cst_25 {dimension_numbers = #tpu.dot_dimension_numbers<[1], [0], [0], [1], [0, 0, 1, 1], [], []>} : vector<2x12xbf16>, vector<12x16xbf16>, vector<2x16xf32> -> vector<2x16xf32>
    %cst_26 = arith.constant dense<0.000000e+00> : vector<16xf32>
    %46 = vector.multi_reduction <add>, %45, %cst_26 [0] : vector<2x16xf32> to vector<16xf32>
    %47 = vector.shape_cast %46 : vector<16xf32> to vector<1x16xf32>
    %48 = arith.addf %38, %47 : vector<1x16xf32>
    %49 = arith.mulf %45, %45 : vector<2x16xf32>
    %cst_27 = arith.constant dense<0.000000e+00> : vector<16xf32>
    %50 = vector.multi_reduction <add>, %49, %cst_27 [0] : vector<2x16xf32> to vector<16xf32>
    %51 = vector.shape_cast %50 : vector<16xf32> to vector<1x16xf32>
    %52 = arith.addf %42, %51 : vector<1x16xf32>
    %c5 = arith.constant 5 : index
    %c0_28 = arith.constant 0 : index
    %c0_29 = arith.constant 0 : index
    %53 = vector.load %arg2[%c5, %c0_28, %c0_29] : memref<16x12x16xbf16, #tpu.memory_space<vmem>>, vector<1x12x16xbf16>
    %54 = vector.shape_cast %53 : vector<1x12x16xbf16> to vector<12x16xbf16>
    %cst_30 = arith.constant dense<0.000000e+00> : vector<2x16xf32>
    %55 = tpu.matmul %0, %54, %cst_30 {dimension_numbers = #tpu.dot_dimension_numbers<[1], [0], [0], [1], [0, 0, 1, 1], [], []>} : vector<2x12xbf16>, vector<12x16xbf16>, vector<2x16xf32> -> vector<2x16xf32>
    %cst_31 = arith.constant dense<0.000000e+00> : vector<16xf32>
    %56 = vector.multi_reduction <add>, %55, %cst_31 [0] : vector<2x16xf32> to vector<16xf32>
    %57 = vector.shape_cast %56 : vector<16xf32> to vector<1x16xf32>
    %58 = arith.addf %48, %57 : vector<1x16xf32>
    %59 = arith.mulf %55, %55 : vector<2x16xf32>
    %cst_32 = arith.constant dense<0.000000e+00> : vector<16xf32>
    %60 = vector.multi_reduction <add>, %59, %cst_32 [0] : vector<2x16xf32> to vector<16xf32>
    %61 = vector.shape_cast %60 : vector<16xf32> to vector<1x16xf32>
    %62 = arith.addf %52, %61 : vector<1x16xf32>
    %c6 = arith.constant 6 : index
    %c0_33 = arith.constant 0 : index
    %c0_34 = arith.constant 0 : index
    %63 = vector.load %arg2[%c6, %c0_33, %c0_34] : memref<16x12x16xbf16, #tpu.memory_space<vmem>>, vector<1x12x16xbf16>
    %64 = vector.shape_cast %63 : vector<1x12x16xbf16> to vector<12x16xbf16>
    %cst_35 = arith.constant dense<0.000000e+00> : vector<2x16xf32>
    %65 = tpu.matmul %0, %64, %cst_35 {dimension_numbers = #tpu.dot_dimension_numbers<[1], [0], [0], [1], [0, 0, 1, 1], [], []>} : vector<2x12xbf16>, vector<12x16xbf16>, vector<2x16xf32> -> vector<2x16xf32>
    %cst_36 = arith.constant dense<0.000000e+00> : vector<16xf32>
    %66 = vector.multi_reduction <add>, %65, %cst_36 [0] : vector<2x16xf32> to vector<16xf32>
    %67 = vector.shape_cast %66 : vector<16xf32> to vector<1x16xf32>
    %68 = arith.addf %58, %67 : vector<1x16xf32>
    %69 = arith.mulf %65, %65 : vector<2x16xf32>
    %cst_37 = arith.constant dense<0.000000e+00> : vector<16xf32>
    %70 = vector.multi_reduction <add>, %69, %cst_37 [0] : vector<2x16xf32> to vector<16xf32>
    %71 = vector.shape_cast %70 : vector<16xf32> to vector<1x16xf32>
    %72 = arith.addf %62, %71 : vector<1x16xf32>
    %c7 = arith.constant 7 : index
    %c0_38 = arith.constant 0 : index
    %c0_39 = arith.constant 0 : index
    %73 = vector.load %arg2[%c7, %c0_38, %c0_39] : memref<16x12x16xbf16, #tpu.memory_space<vmem>>, vector<1x12x16xbf16>
    %74 = vector.shape_cast %73 : vector<1x12x16xbf16> to vector<12x16xbf16>
    %cst_40 = arith.constant dense<0.000000e+00> : vector<2x16xf32>
    %75 = tpu.matmul %0, %74, %cst_40 {dimension_numbers = #tpu.dot_dimension_numbers<[1], [0], [0], [1], [0, 0, 1, 1], [], []>} : vector<2x12xbf16>, vector<12x16xbf16>, vector<2x16xf32> -> vector<2x16xf32>
    %cst_41 = arith.constant dense<0.000000e+00> : vector<16xf32>
    %76 = vector.multi_reduction <add>, %75, %cst_41 [0] : vector<2x16xf32> to vector<16xf32>
    %77 = vector.shape_cast %76 : vector<16xf32> to vector<1x16xf32>
    %78 = arith.addf %68, %77 : vector<1x16xf32>
    %79 = arith.mulf %75, %75 : vector<2x16xf32>
    %cst_42 = arith.constant dense<0.000000e+00> : vector<16xf32>
    %80 = vector.multi_reduction <add>, %79, %cst_42 [0] : vector<2x16xf32> to vector<16xf32>
    %81 = vector.shape_cast %80 : vector<16xf32> to vector<1x16xf32>
    %82 = arith.addf %72, %81 : vector<1x16xf32>
    %c8 = arith.constant 8 : index
    %c0_43 = arith.constant 0 : index
    %c0_44 = arith.constant 0 : index
    %83 = vector.load %arg2[%c8, %c0_43, %c0_44] : memref<16x12x16xbf16, #tpu.memory_space<vmem>>, vector<1x12x16xbf16>
    %84 = vector.shape_cast %83 : vector<1x12x16xbf16> to vector<12x16xbf16>
    %cst_45 = arith.constant dense<0.000000e+00> : vector<2x16xf32>
    %85 = tpu.matmul %0, %84, %cst_45 {dimension_numbers = #tpu.dot_dimension_numbers<[1], [0], [0], [1], [0, 0, 1, 1], [], []>} : vector<2x12xbf16>, vector<12x16xbf16>, vector<2x16xf32> -> vector<2x16xf32>
    %cst_46 = arith.constant dense<0.000000e+00> : vector<16xf32>
    %86 = vector.multi_reduction <add>, %85, %cst_46 [0] : vector<2x16xf32> to vector<16xf32>
    %87 = vector.shape_cast %86 : vector<16xf32> to vector<1x16xf32>
    %88 = arith.addf %78, %87 : vector<1x16xf32>
    %89 = arith.mulf %85, %85 : vector<2x16xf32>
    %cst_47 = arith.constant dense<0.000000e+00> : vector<16xf32>
    %90 = vector.multi_reduction <add>, %89, %cst_47 [0] : vector<2x16xf32> to vector<16xf32>
    %91 = vector.shape_cast %90 : vector<16xf32> to vector<1x16xf32>
    %92 = arith.addf %82, %91 : vector<1x16xf32>
    %c9 = arith.constant 9 : index
    %c0_48 = arith.constant 0 : index
    %c0_49 = arith.constant 0 : index
    %93 = vector.load %arg2[%c9, %c0_48, %c0_49] : memref<16x12x16xbf16, #tpu.memory_space<vmem>>, vector<1x12x16xbf16>
    %94 = vector.shape_cast %93 : vector<1x12x16xbf16> to vector<12x16xbf16>
    %cst_50 = arith.constant dense<0.000000e+00> : vector<2x16xf32>
    %95 = tpu.matmul %0, %94, %cst_50 {dimension_numbers = #tpu.dot_dimension_numbers<[1], [0], [0], [1], [0, 0, 1, 1], [], []>} : vector<2x12xbf16>, vector<12x16xbf16>, vector<2x16xf32> -> vector<2x16xf32>
    %cst_51 = arith.constant dense<0.000000e+00> : vector<16xf32>
    %96 = vector.multi_reduction <add>, %95, %cst_51 [0] : vector<2x16xf32> to vector<16xf32>
    %97 = vector.shape_cast %96 : vector<16xf32> to vector<1x16xf32>
    %98 = arith.addf %88, %97 : vector<1x16xf32>
    %99 = arith.mulf %95, %95 : vector<2x16xf32>
    %cst_52 = arith.constant dense<0.000000e+00> : vector<16xf32>
    %100 = vector.multi_reduction <add>, %99, %cst_52 [0] : vector<2x16xf32> to vector<16xf32>
    %101 = vector.shape_cast %100 : vector<16xf32> to vector<1x16xf32>
    %102 = arith.addf %92, %101 : vector<1x16xf32>
    %c10 = arith.constant 10 : index
    %c0_53 = arith.constant 0 : index
    %c0_54 = arith.constant 0 : index
    %103 = vector.load %arg2[%c10, %c0_53, %c0_54] : memref<16x12x16xbf16, #tpu.memory_space<vmem>>, vector<1x12x16xbf16>
    %104 = vector.shape_cast %103 : vector<1x12x16xbf16> to vector<12x16xbf16>
    %cst_55 = arith.constant dense<0.000000e+00> : vector<2x16xf32>
    %105 = tpu.matmul %0, %104, %cst_55 {dimension_numbers = #tpu.dot_dimension_numbers<[1], [0], [0], [1], [0, 0, 1, 1], [], []>} : vector<2x12xbf16>, vector<12x16xbf16>, vector<2x16xf32> -> vector<2x16xf32>
    %cst_56 = arith.constant dense<0.000000e+00> : vector<16xf32>
    %106 = vector.multi_reduction <add>, %105, %cst_56 [0] : vector<2x16xf32> to vector<16xf32>
    %107 = vector.shape_cast %106 : vector<16xf32> to vector<1x16xf32>
    %108 = arith.addf %98, %107 : vector<1x16xf32>
    %109 = arith.mulf %105, %105 : vector<2x16xf32>
    %cst_57 = arith.constant dense<0.000000e+00> : vector<16xf32>
    %110 = vector.multi_reduction <add>, %109, %cst_57 [0] : vector<2x16xf32> to vector<16xf32>
    %111 = vector.shape_cast %110 : vector<16xf32> to vector<1x16xf32>
    %112 = arith.addf %102, %111 : vector<1x16xf32>
    %c11 = arith.constant 11 : index
    %c0_58 = arith.constant 0 : index
    %c0_59 = arith.constant 0 : index
    %113 = vector.load %arg2[%c11, %c0_58, %c0_59] : memref<16x12x16xbf16, #tpu.memory_space<vmem>>, vector<1x12x16xbf16>
    %114 = vector.shape_cast %113 : vector<1x12x16xbf16> to vector<12x16xbf16>
    %cst_60 = arith.constant dense<0.000000e+00> : vector<2x16xf32>
    %115 = tpu.matmul %0, %114, %cst_60 {dimension_numbers = #tpu.dot_dimension_numbers<[1], [0], [0], [1], [0, 0, 1, 1], [], []>} : vector<2x12xbf16>, vector<12x16xbf16>, vector<2x16xf32> -> vector<2x16xf32>
    %cst_61 = arith.constant dense<0.000000e+00> : vector<16xf32>
    %116 = vector.multi_reduction <add>, %115, %cst_61 [0] : vector<2x16xf32> to vector<16xf32>
    %117 = vector.shape_cast %116 : vector<16xf32> to vector<1x16xf32>
    %118 = arith.addf %108, %117 : vector<1x16xf32>
    %119 = arith.mulf %115, %115 : vector<2x16xf32>
    %cst_62 = arith.constant dense<0.000000e+00> : vector<16xf32>
    %120 = vector.multi_reduction <add>, %119, %cst_62 [0] : vector<2x16xf32> to vector<16xf32>
    %121 = vector.shape_cast %120 : vector<16xf32> to vector<1x16xf32>
    %122 = arith.addf %112, %121 : vector<1x16xf32>
    %c12 = arith.constant 12 : index
    %c0_63 = arith.constant 0 : index
    %c0_64 = arith.constant 0 : index
    %123 = vector.load %arg2[%c12, %c0_63, %c0_64] : memref<16x12x16xbf16, #tpu.memory_space<vmem>>, vector<1x12x16xbf16>
    %124 = vector.shape_cast %123 : vector<1x12x16xbf16> to vector<12x16xbf16>
    %cst_65 = arith.constant dense<0.000000e+00> : vector<2x16xf32>
    %125 = tpu.matmul %0, %124, %cst_65 {dimension_numbers = #tpu.dot_dimension_numbers<[1], [0], [0], [1], [0, 0, 1, 1], [], []>} : vector<2x12xbf16>, vector<12x16xbf16>, vector<2x16xf32> -> vector<2x16xf32>
    %cst_66 = arith.constant dense<0.000000e+00> : vector<16xf32>
    %126 = vector.multi_reduction <add>, %125, %cst_66 [0] : vector<2x16xf32> to vector<16xf32>
    %127 = vector.shape_cast %126 : vector<16xf32> to vector<1x16xf32>
    %128 = arith.addf %118, %127 : vector<1x16xf32>
    %129 = arith.mulf %125, %125 : vector<2x16xf32>
    %cst_67 = arith.constant dense<0.000000e+00> : vector<16xf32>
    %130 = vector.multi_reduction <add>, %129, %cst_67 [0] : vector<2x16xf32> to vector<16xf32>
    %131 = vector.shape_cast %130 : vector<16xf32> to vector<1x16xf32>
    %132 = arith.addf %122, %131 : vector<1x16xf32>
    %c13 = arith.constant 13 : index
    %c0_68 = arith.constant 0 : index
    %c0_69 = arith.constant 0 : index
    %133 = vector.load %arg2[%c13, %c0_68, %c0_69] : memref<16x12x16xbf16, #tpu.memory_space<vmem>>, vector<1x12x16xbf16>
    %134 = vector.shape_cast %133 : vector<1x12x16xbf16> to vector<12x16xbf16>
    %cst_70 = arith.constant dense<0.000000e+00> : vector<2x16xf32>
    %135 = tpu.matmul %0, %134, %cst_70 {dimension_numbers = #tpu.dot_dimension_numbers<[1], [0], [0], [1], [0, 0, 1, 1], [], []>} : vector<2x12xbf16>, vector<12x16xbf16>, vector<2x16xf32> -> vector<2x16xf32>
    %cst_71 = arith.constant dense<0.000000e+00> : vector<16xf32>
    %136 = vector.multi_reduction <add>, %135, %cst_71 [0] : vector<2x16xf32> to vector<16xf32>
    %137 = vector.shape_cast %136 : vector<16xf32> to vector<1x16xf32>
    %138 = arith.addf %128, %137 : vector<1x16xf32>
    %139 = arith.mulf %135, %135 : vector<2x16xf32>
    %cst_72 = arith.constant dense<0.000000e+00> : vector<16xf32>
    %140 = vector.multi_reduction <add>, %139, %cst_72 [0] : vector<2x16xf32> to vector<16xf32>
    %141 = vector.shape_cast %140 : vector<16xf32> to vector<1x16xf32>
    %142 = arith.addf %132, %141 : vector<1x16xf32>
    %c14 = arith.constant 14 : index
    %c0_73 = arith.constant 0 : index
    %c0_74 = arith.constant 0 : index
    %143 = vector.load %arg2[%c14, %c0_73, %c0_74] : memref<16x12x16xbf16, #tpu.memory_space<vmem>>, vector<1x12x16xbf16>
    %144 = vector.shape_cast %143 : vector<1x12x16xbf16> to vector<12x16xbf16>
    %cst_75 = arith.constant dense<0.000000e+00> : vector<2x16xf32>
    %145 = tpu.matmul %0, %144, %cst_75 {dimension_numbers = #tpu.dot_dimension_numbers<[1], [0], [0], [1], [0, 0, 1, 1], [], []>} : vector<2x12xbf16>, vector<12x16xbf16>, vector<2x16xf32> -> vector<2x16xf32>
    %cst_76 = arith.constant dense<0.000000e+00> : vector<16xf32>
    %146 = vector.multi_reduction <add>, %145, %cst_76 [0] : vector<2x16xf32> to vector<16xf32>
    %147 = vector.shape_cast %146 : vector<16xf32> to vector<1x16xf32>
    %148 = arith.addf %138, %147 : vector<1x16xf32>
    %149 = arith.mulf %145, %145 : vector<2x16xf32>
    %cst_77 = arith.constant dense<0.000000e+00> : vector<16xf32>
    %150 = vector.multi_reduction <add>, %149, %cst_77 [0] : vector<2x16xf32> to vector<16xf32>
    %151 = vector.shape_cast %150 : vector<16xf32> to vector<1x16xf32>
    %152 = arith.addf %142, %151 : vector<1x16xf32>
    %c15 = arith.constant 15 : index
    %c0_78 = arith.constant 0 : index
    %c0_79 = arith.constant 0 : index
    %153 = vector.load %arg2[%c15, %c0_78, %c0_79] : memref<16x12x16xbf16, #tpu.memory_space<vmem>>, vector<1x12x16xbf16>
    %154 = vector.shape_cast %153 : vector<1x12x16xbf16> to vector<12x16xbf16>
    %cst_80 = arith.constant dense<0.000000e+00> : vector<2x16xf32>
    %155 = tpu.matmul %0, %154, %cst_80 {dimension_numbers = #tpu.dot_dimension_numbers<[1], [0], [0], [1], [0, 0, 1, 1], [], []>} : vector<2x12xbf16>, vector<12x16xbf16>, vector<2x16xf32> -> vector<2x16xf32>
    %cst_81 = arith.constant dense<0.000000e+00> : vector<16xf32>
    %156 = vector.multi_reduction <add>, %155, %cst_81 [0] : vector<2x16xf32> to vector<16xf32>
    %157 = vector.shape_cast %156 : vector<16xf32> to vector<1x16xf32>
    %158 = arith.addf %148, %157 : vector<1x16xf32>
    %159 = arith.mulf %155, %155 : vector<2x16xf32>
    %cst_82 = arith.constant dense<0.000000e+00> : vector<16xf32>
    %160 = vector.multi_reduction <add>, %159, %cst_82 [0] : vector<2x16xf32> to vector<16xf32>
    %161 = vector.shape_cast %160 : vector<16xf32> to vector<1x16xf32>
    %162 = arith.addf %152, %161 : vector<1x16xf32>
    %cst_83 = arith.constant 3.125000e-02 : f32
    %163 = vector.broadcast %cst_83 : f32 to vector<1x16xf32>
    %164 = arith.mulf %158, %163 : vector<1x16xf32>
    %cst_84 = arith.constant 3.125000e-02 : f32
    %165 = vector.broadcast %cst_84 : f32 to vector<1x16xf32>
    %166 = arith.mulf %162, %165 : vector<1x16xf32>
    %167 = arith.mulf %164, %164 : vector<1x16xf32>
    %168 = arith.subf %166, %167 : vector<1x16xf32>
    %c0_85 = arith.constant 0 : index
    %c0_86 = arith.constant 0 : index
    %169 = vector.load %arg3[%c0_85, %c0_86] : memref<1x16xf32, #tpu.memory_space<vmem>>, vector<1x16xf32>
    %cst_87 = arith.constant 9.99999974E-6 : f32
    %170 = vector.broadcast %cst_87 : f32 to vector<1x16xf32>
    %171 = arith.addf %168, %170 : vector<1x16xf32>
    %172 = math.rsqrt %171 : vector<1x16xf32>
    %173 = arith.mulf %169, %172 : vector<1x16xf32>
    %c0_88 = arith.constant 0 : index
    %c0_89 = arith.constant 0 : index
    %174 = vector.load %arg4[%c0_88, %c0_89] : memref<1x16xf32, #tpu.memory_space<vmem>>, vector<1x16xf32>
    %175 = arith.mulf %164, %173 : vector<1x16xf32>
    %176 = arith.subf %174, %175 : vector<1x16xf32>
    %cst_90 = arith.constant 0.000000e+00 : bf16
    %177 = vector.broadcast %cst_90 : bf16 to vector<2x6x6x16xbf16>
    %c0_91 = arith.constant 0 : index
    %c0_92 = arith.constant 0 : index
    %c0_93 = arith.constant 0 : index
    %c0_94 = arith.constant 0 : index
    %178 = vector.load %arg5[%c0_91, %c0_92, %c0_93, %c0_94] : memref<2x6x6x16xbf16, #tpu.memory_space<vmem>>, vector<2x6x6x16xbf16>
    tpu.vector_store %arg5[%c0_91, %c0_92, %c0_93, %c0_94], %177 {strides = array<i32>} : memref<2x6x6x16xbf16, #tpu.memory_space<vmem>>, vector<2x6x6x16xbf16>,
    %cst_95 = arith.constant 0.000000e+00 : f32
    %179 = vector.broadcast %cst_95 : f32 to vector<2x1x16xf32>
    %180 = vector.broadcast %173 : vector<1x16xf32> to vector<2x16xf32>
    %181 = arith.mulf %5, %180 : vector<2x16xf32>
    %182 = vector.broadcast %176 : vector<1x16xf32> to vector<2x16xf32>
    %183 = arith.addf %181, %182 : vector<2x16xf32>
    %cst_96 = arith.constant 0.000000e+00 : f32
    %184 = vector.broadcast %cst_96 : f32 to vector<2x16xf32>
    %185 = arith.maximumf %183, %184 : vector<2x16xf32>
    %186 = vector.shape_cast %185 : vector<2x16xf32> to vector<2x1x16xf32>
    %187 = vector.broadcast %173 : vector<1x16xf32> to vector<2x16xf32>
    %188 = arith.mulf %15, %187 : vector<2x16xf32>
    %189 = vector.broadcast %176 : vector<1x16xf32> to vector<2x16xf32>
    %190 = arith.addf %188, %189 : vector<2x16xf32>
    %cst_97 = arith.constant 0.000000e+00 : f32
    %191 = vector.broadcast %cst_97 : f32 to vector<2x16xf32>
    %192 = arith.maximumf %190, %191 : vector<2x16xf32>
    %193 = vector.shape_cast %192 : vector<2x16xf32> to vector<2x1x16xf32>
    %194 = vector.broadcast %173 : vector<1x16xf32> to vector<2x16xf32>
    %195 = arith.mulf %25, %194 : vector<2x16xf32>
    %196 = vector.broadcast %176 : vector<1x16xf32> to vector<2x16xf32>
    %197 = arith.addf %195, %196 : vector<2x16xf32>
    %cst_98 = arith.constant 0.000000e+00 : f32
    %198 = vector.broadcast %cst_98 : f32 to vector<2x16xf32>
    %199 = arith.maximumf %197, %198 : vector<2x16xf32>
    %200 = vector.shape_cast %199 : vector<2x16xf32> to vector<2x1x16xf32>
    %201 = vector.broadcast %173 : vector<1x16xf32> to vector<2x16xf32>
    %202 = arith.mulf %35, %201 : vector<2x16xf32>
    %203 = vector.broadcast %176 : vector<1x16xf32> to vector<2x16xf32>
    %204 = arith.addf %202, %203 : vector<2x16xf32>
    %cst_99 = arith.constant 0.000000e+00 : f32
    %205 = vector.broadcast %cst_99 : f32 to vector<2x16xf32>
    %206 = arith.maximumf %204, %205 : vector<2x16xf32>
    %207 = vector.shape_cast %206 : vector<2x16xf32> to vector<2x1x16xf32>
    %208 = tpu.concatenate %179, %186, %193, %200, %207, %179 in 1 : vector<2x1x16xf32>, vector<2x1x16xf32>, vector<2x1x16xf32>, vector<2x1x16xf32>, vector<2x1x16xf32>, vector<2x1x16xf32> -> vector<2x6x16xf32>
    %209 = arith.truncf %208 : vector<2x6x16xf32> to vector<2x6x16xbf16>
    %c0_100 = arith.constant 0 : index
    %c1_101 = arith.constant 1 : index
    %c0_102 = arith.constant 0 : index
    %c0_103 = arith.constant 0 : index
    %210 = vector.load %arg5[%c0_100, %c1_101, %c0_102, %c0_103] : memref<2x6x6x16xbf16, #tpu.memory_space<vmem>>, vector<2x1x6x16xbf16>
    %211 = vector.shape_cast %210 : vector<2x1x6x16xbf16> to vector<2x6x16xbf16>
    %212 = vector.shape_cast %209 : vector<2x6x16xbf16> to vector<2x1x6x16xbf16>
    tpu.vector_store %arg5[%c0_100, %c1_101, %c0_102, %c0_103], %212 {strides = array<i32>} : memref<2x6x6x16xbf16, #tpu.memory_space<vmem>>, vector<2x1x6x16xbf16>,
    %213 = vector.broadcast %173 : vector<1x16xf32> to vector<2x16xf32>
    %214 = arith.mulf %45, %213 : vector<2x16xf32>
    %215 = vector.broadcast %176 : vector<1x16xf32> to vector<2x16xf32>
    %216 = arith.addf %214, %215 : vector<2x16xf32>
    %cst_104 = arith.constant 0.000000e+00 : f32
    %217 = vector.broadcast %cst_104 : f32 to vector<2x16xf32>
    %218 = arith.maximumf %216, %217 : vector<2x16xf32>
    %219 = vector.shape_cast %218 : vector<2x16xf32> to vector<2x1x16xf32>
    %220 = vector.broadcast %173 : vector<1x16xf32> to vector<2x16xf32>
    %221 = arith.mulf %55, %220 : vector<2x16xf32>
    %222 = vector.broadcast %176 : vector<1x16xf32> to vector<2x16xf32>
    %223 = arith.addf %221, %222 : vector<2x16xf32>
    %cst_105 = arith.constant 0.000000e+00 : f32
    %224 = vector.broadcast %cst_105 : f32 to vector<2x16xf32>
    %225 = arith.maximumf %223, %224 : vector<2x16xf32>
    %226 = vector.shape_cast %225 : vector<2x16xf32> to vector<2x1x16xf32>
    %227 = vector.broadcast %173 : vector<1x16xf32> to vector<2x16xf32>
    %228 = arith.mulf %65, %227 : vector<2x16xf32>
    %229 = vector.broadcast %176 : vector<1x16xf32> to vector<2x16xf32>
    %230 = arith.addf %228, %229 : vector<2x16xf32>
    %cst_106 = arith.constant 0.000000e+00 : f32
    %231 = vector.broadcast %cst_106 : f32 to vector<2x16xf32>
    %232 = arith.maximumf %230, %231 : vector<2x16xf32>
    %233 = vector.shape_cast %232 : vector<2x16xf32> to vector<2x1x16xf32>
    %234 = vector.broadcast %173 : vector<1x16xf32> to vector<2x16xf32>
    %235 = arith.mulf %75, %234 : vector<2x16xf32>
    %236 = vector.broadcast %176 : vector<1x16xf32> to vector<2x16xf32>
    %237 = arith.addf %235, %236 : vector<2x16xf32>
    %cst_107 = arith.constant 0.000000e+00 : f32
    %238 = vector.broadcast %cst_107 : f32 to vector<2x16xf32>
    %239 = arith.maximumf %237, %238 : vector<2x16xf32>
    %240 = vector.shape_cast %239 : vector<2x16xf32> to vector<2x1x16xf32>
    %241 = tpu.concatenate %179, %219, %226, %233, %240, %179 in 1 : vector<2x1x16xf32>, vector<2x1x16xf32>, vector<2x1x16xf32>, vector<2x1x16xf32>, vector<2x1x16xf32>, vector<2x1x16xf32> -> vector<2x6x16xf32>
    %242 = arith.truncf %241 : vector<2x6x16xf32> to vector<2x6x16xbf16>
    %c0_108 = arith.constant 0 : index
    %c2_109 = arith.constant 2 : index
    %c0_110 = arith.constant 0 : index
    %c0_111 = arith.constant 0 : index
    %243 = vector.load %arg5[%c0_108, %c2_109, %c0_110, %c0_111] : memref<2x6x6x16xbf16, #tpu.memory_space<vmem>>, vector<2x1x6x16xbf16>
    %244 = vector.shape_cast %243 : vector<2x1x6x16xbf16> to vector<2x6x16xbf16>
    %245 = vector.shape_cast %242 : vector<2x6x16xbf16> to vector<2x1x6x16xbf16>
    tpu.vector_store %arg5[%c0_108, %c2_109, %c0_110, %c0_111], %245 {strides = array<i32>} : memref<2x6x6x16xbf16, #tpu.memory_space<vmem>>, vector<2x1x6x16xbf16>,
    %246 = vector.broadcast %173 : vector<1x16xf32> to vector<2x16xf32>
    %247 = arith.mulf %85, %246 : vector<2x16xf32>
    %248 = vector.broadcast %176 : vector<1x16xf32> to vector<2x16xf32>
    %249 = arith.addf %247, %248 : vector<2x16xf32>
    %cst_112 = arith.constant 0.000000e+00 : f32
    %250 = vector.broadcast %cst_112 : f32 to vector<2x16xf32>
    %251 = arith.maximumf %249, %250 : vector<2x16xf32>
    %252 = vector.shape_cast %251 : vector<2x16xf32> to vector<2x1x16xf32>
    %253 = vector.broadcast %173 : vector<1x16xf32> to vector<2x16xf32>
    %254 = arith.mulf %95, %253 : vector<2x16xf32>
    %255 = vector.broadcast %176 : vector<1x16xf32> to vector<2x16xf32>
    %256 = arith.addf %254, %255 : vector<2x16xf32>
    %cst_113 = arith.constant 0.000000e+00 : f32
    %257 = vector.broadcast %cst_113 : f32 to vector<2x16xf32>
    %258 = arith.maximumf %256, %257 : vector<2x16xf32>
    %259 = vector.shape_cast %258 : vector<2x16xf32> to vector<2x1x16xf32>
    %260 = vector.broadcast %173 : vector<1x16xf32> to vector<2x16xf32>
    %261 = arith.mulf %105, %260 : vector<2x16xf32>
    %262 = vector.broadcast %176 : vector<1x16xf32> to vector<2x16xf32>
    %263 = arith.addf %261, %262 : vector<2x16xf32>
    %cst_114 = arith.constant 0.000000e+00 : f32
    %264 = vector.broadcast %cst_114 : f32 to vector<2x16xf32>
    %265 = arith.maximumf %263, %264 : vector<2x16xf32>
    %266 = vector.shape_cast %265 : vector<2x16xf32> to vector<2x1x16xf32>
    %267 = vector.broadcast %173 : vector<1x16xf32> to vector<2x16xf32>
    %268 = arith.mulf %115, %267 : vector<2x16xf32>
    %269 = vector.broadcast %176 : vector<1x16xf32> to vector<2x16xf32>
    %270 = arith.addf %268, %269 : vector<2x16xf32>
    %cst_115 = arith.constant 0.000000e+00 : f32
    %271 = vector.broadcast %cst_115 : f32 to vector<2x16xf32>
    %272 = arith.maximumf %270, %271 : vector<2x16xf32>
    %273 = vector.shape_cast %272 : vector<2x16xf32> to vector<2x1x16xf32>
    %274 = tpu.concatenate %179, %252, %259, %266, %273, %179 in 1 : vector<2x1x16xf32>, vector<2x1x16xf32>, vector<2x1x16xf32>, vector<2x1x16xf32>, vector<2x1x16xf32>, vector<2x1x16xf32> -> vector<2x6x16xf32>
    %275 = arith.truncf %274 : vector<2x6x16xf32> to vector<2x6x16xbf16>
    %c0_116 = arith.constant 0 : index
    %c3_117 = arith.constant 3 : index
    %c0_118 = arith.constant 0 : index
    %c0_119 = arith.constant 0 : index
    %276 = vector.load %arg5[%c0_116, %c3_117, %c0_118, %c0_119] : memref<2x6x6x16xbf16, #tpu.memory_space<vmem>>, vector<2x1x6x16xbf16>
    %277 = vector.shape_cast %276 : vector<2x1x6x16xbf16> to vector<2x6x16xbf16>
    %278 = vector.shape_cast %275 : vector<2x6x16xbf16> to vector<2x1x6x16xbf16>
    tpu.vector_store %arg5[%c0_116, %c3_117, %c0_118, %c0_119], %278 {strides = array<i32>} : memref<2x6x6x16xbf16, #tpu.memory_space<vmem>>, vector<2x1x6x16xbf16>,
    %279 = vector.broadcast %173 : vector<1x16xf32> to vector<2x16xf32>
    %280 = arith.mulf %125, %279 : vector<2x16xf32>
    %281 = vector.broadcast %176 : vector<1x16xf32> to vector<2x16xf32>
    %282 = arith.addf %280, %281 : vector<2x16xf32>
    %cst_120 = arith.constant 0.000000e+00 : f32
    %283 = vector.broadcast %cst_120 : f32 to vector<2x16xf32>
    %284 = arith.maximumf %282, %283 : vector<2x16xf32>
    %285 = vector.shape_cast %284 : vector<2x16xf32> to vector<2x1x16xf32>
    %286 = vector.broadcast %173 : vector<1x16xf32> to vector<2x16xf32>
    %287 = arith.mulf %135, %286 : vector<2x16xf32>
    %288 = vector.broadcast %176 : vector<1x16xf32> to vector<2x16xf32>
    %289 = arith.addf %287, %288 : vector<2x16xf32>
    %cst_121 = arith.constant 0.000000e+00 : f32
    %290 = vector.broadcast %cst_121 : f32 to vector<2x16xf32>
    %291 = arith.maximumf %289, %290 : vector<2x16xf32>
    %292 = vector.shape_cast %291 : vector<2x16xf32> to vector<2x1x16xf32>
    %293 = vector.broadcast %173 : vector<1x16xf32> to vector<2x16xf32>
    %294 = arith.mulf %145, %293 : vector<2x16xf32>
    %295 = vector.broadcast %176 : vector<1x16xf32> to vector<2x16xf32>
    %296 = arith.addf %294, %295 : vector<2x16xf32>
    %cst_122 = arith.constant 0.000000e+00 : f32
    %297 = vector.broadcast %cst_122 : f32 to vector<2x16xf32>
    %298 = arith.maximumf %296, %297 : vector<2x16xf32>
    %299 = vector.shape_cast %298 : vector<2x16xf32> to vector<2x1x16xf32>
    %300 = vector.broadcast %173 : vector<1x16xf32> to vector<2x16xf32>
    %301 = arith.mulf %155, %300 : vector<2x16xf32>
    %302 = vector.broadcast %176 : vector<1x16xf32> to vector<2x16xf32>
    %303 = arith.addf %301, %302 : vector<2x16xf32>
    %cst_123 = arith.constant 0.000000e+00 : f32
    %304 = vector.broadcast %cst_123 : f32 to vector<2x16xf32>
    %305 = arith.maximumf %303, %304 : vector<2x16xf32>
    %306 = vector.shape_cast %305 : vector<2x16xf32> to vector<2x1x16xf32>
    %307 = tpu.concatenate %179, %285, %292, %299, %306, %179 in 1 : vector<2x1x16xf32>, vector<2x1x16xf32>, vector<2x1x16xf32>, vector<2x1x16xf32>, vector<2x1x16xf32>, vector<2x1x16xf32> -> vector<2x6x16xf32>
    %308 = arith.truncf %307 : vector<2x6x16xf32> to vector<2x6x16xbf16>
    %c0_124 = arith.constant 0 : index
    %c4_125 = arith.constant 4 : index
    %c0_126 = arith.constant 0 : index
    %c0_127 = arith.constant 0 : index
    %309 = vector.load %arg5[%c0_124, %c4_125, %c0_126, %c0_127] : memref<2x6x6x16xbf16, #tpu.memory_space<vmem>>, vector<2x1x6x16xbf16>
    %310 = vector.shape_cast %309 : vector<2x1x6x16xbf16> to vector<2x6x16xbf16>
    %311 = vector.shape_cast %308 : vector<2x6x16xbf16> to vector<2x1x6x16xbf16>
    tpu.vector_store %arg5[%c0_124, %c4_125, %c0_126, %c0_127], %311 {strides = array<i32>} : memref<2x6x6x16xbf16, #tpu.memory_space<vmem>>, vector<2x1x6x16xbf16>,
    return
  }
  func.func @transform_0(%arg0: i32) -> (i32, i32) {
    %c0_i32 = arith.constant 0 : i32
    %c0_i32_0 = arith.constant 0 : i32
    %c0_i32_1 = arith.constant 0 : i32
    return %c0_i32, %c0_i32_0 : i32, i32
  }
  func.func @transform_1(%arg0: i32) -> (i32, i32, i32) {
    %c0_i32 = arith.constant 0 : i32
    %c0_i32_0 = arith.constant 0 : i32
    %c0_i32_1 = arith.constant 0 : i32
    %c0_i32_2 = arith.constant 0 : i32
    return %c0_i32, %c0_i32_0, %c0_i32_1 : i32, i32, i32
  }
  func.func @transform_2(%arg0: i32) -> (i32, i32) {
    %c0_i32 = arith.constant 0 : i32
    %c0_i32_0 = arith.constant 0 : i32
    %c0_i32_1 = arith.constant 0 : i32
    return %c0_i32, %c0_i32_0 : i32, i32
  }
  func.func @transform_3(%arg0: i32) -> (i32, i32) {
    %c0_i32 = arith.constant 0 : i32
    %c0_i32_0 = arith.constant 0 : i32
    %c0_i32_1 = arith.constant 0 : i32
    return %c0_i32, %c0_i32_0 : i32, i32
  }
  func.func @transform_4(%arg0: i32) -> (i32, i32, i32, i32) {
    %c0_i32 = arith.constant 0 : i32
    %c0_i32_0 = arith.constant 0 : i32
    %c0_i32_1 = arith.constant 0 : i32
    %c0_i32_2 = arith.constant 0 : i32
    %c0_i32_3 = arith.constant 0 : i32
    return %c0_i32, %c0_i32_0, %c0_i32_1, %c0_i32_2 : i32, i32, i32, i32
  }
}

module attributes {stable_mosaic.version = 11 : i64} {
  func.func @_deconv_gemm_stats_kernel(%arg0: i32, %arg1: memref<2x6x6x16xbf16, #tpu.memory_space<vmem>>, %arg2: memref<16x16x8xbf16, #tpu.memory_space<vmem>>, %arg3: memref<8x2x4x16xbf16, #tpu.memory_space<vmem>>, %arg4: memref<1x2x8xf32, #tpu.memory_space<vmem>>) attributes {dimension_semantics = [#tpu.dimension_semantics<parallel>], iteration_bounds = array<i64: 1>, scalar_prefetch = 0 : i64, scratch_operands = 0 : i64, tpu.core_type = #tpu.core_type<tc>, window_params = [{transform_indices = @transform_0, window_bounds = array<i64: 2, 6, 6, 16>}, {pipeline_mode = #tpu.pipeline_mode<synchronous>, transform_indices = @transform_1, window_bounds = array<i64: 16, 16, 8>}, {transform_indices = @transform_2, window_bounds = array<i64: 8, 2, 4, 16>}, {transform_indices = @transform_3, window_bounds = array<i64: 1, 2, 8>}]} {
    %cst = arith.constant 0.000000e+00 : f32
    %0 = vector.broadcast %cst : f32 to vector<1x8xf32>
    %cst_0 = arith.constant 0.000000e+00 : f32
    %1 = vector.broadcast %cst_0 : f32 to vector<1x8xf32>
    %c0 = arith.constant 0 : index
    %c0_1 = arith.constant 0 : index
    %c0_2 = arith.constant 0 : index
    %c0_3 = arith.constant 0 : index
    %2 = vector.load %arg1[%c0, %c0_1, %c0_2, %c0_3] : memref<2x6x6x16xbf16, #tpu.memory_space<vmem>>, vector<2x4x4x16xbf16>
    %3 = vector.shape_cast %2 : vector<2x4x4x16xbf16> to vector<32x16xbf16>
    %c0_4 = arith.constant 0 : index
    %c0_5 = arith.constant 0 : index
    %c0_6 = arith.constant 0 : index
    %4 = vector.load %arg2[%c0_4, %c0_5, %c0_6] : memref<16x16x8xbf16, #tpu.memory_space<vmem>>, vector<1x16x8xbf16>
    %5 = vector.shape_cast %4 : vector<1x16x8xbf16> to vector<16x8xbf16>
    %cst_7 = arith.constant dense<0.000000e+00> : vector<32x8xf32>
    %6 = tpu.matmul %3, %5, %cst_7 {dimension_numbers = #tpu.dot_dimension_numbers<[1], [0], [0], [1], [0, 0, 1, 1], [], []>} : vector<32x16xbf16>, vector<16x8xbf16>, vector<32x8xf32> -> vector<32x8xf32>
    %c0_8 = arith.constant 0 : index
    %c0_9 = arith.constant 0 : index
    %c1 = arith.constant 1 : index
    %c0_10 = arith.constant 0 : index
    %7 = vector.load %arg1[%c0_8, %c0_9, %c1, %c0_10] : memref<2x6x6x16xbf16, #tpu.memory_space<vmem>>, vector<2x4x4x16xbf16>
    %8 = vector.shape_cast %7 : vector<2x4x4x16xbf16> to vector<32x16xbf16>
    %c1_11 = arith.constant 1 : index
    %c0_12 = arith.constant 0 : index
    %c0_13 = arith.constant 0 : index
    %9 = vector.load %arg2[%c1_11, %c0_12, %c0_13] : memref<16x16x8xbf16, #tpu.memory_space<vmem>>, vector<1x16x8xbf16>
    %10 = vector.shape_cast %9 : vector<1x16x8xbf16> to vector<16x8xbf16>
    %cst_14 = arith.constant dense<0.000000e+00> : vector<32x8xf32>
    %11 = tpu.matmul %8, %10, %cst_14 {dimension_numbers = #tpu.dot_dimension_numbers<[1], [0], [0], [1], [0, 0, 1, 1], [], []>} : vector<32x16xbf16>, vector<16x8xbf16>, vector<32x8xf32> -> vector<32x8xf32>
    %12 = arith.addf %6, %11 : vector<32x8xf32>
    %c0_15 = arith.constant 0 : index
    %c1_16 = arith.constant 1 : index
    %c0_17 = arith.constant 0 : index
    %c0_18 = arith.constant 0 : index
    %13 = vector.load %arg1[%c0_15, %c1_16, %c0_17, %c0_18] : memref<2x6x6x16xbf16, #tpu.memory_space<vmem>>, vector<2x4x4x16xbf16>
    %14 = vector.shape_cast %13 : vector<2x4x4x16xbf16> to vector<32x16xbf16>
    %c2 = arith.constant 2 : index
    %c0_19 = arith.constant 0 : index
    %c0_20 = arith.constant 0 : index
    %15 = vector.load %arg2[%c2, %c0_19, %c0_20] : memref<16x16x8xbf16, #tpu.memory_space<vmem>>, vector<1x16x8xbf16>
    %16 = vector.shape_cast %15 : vector<1x16x8xbf16> to vector<16x8xbf16>
    %cst_21 = arith.constant dense<0.000000e+00> : vector<32x8xf32>
    %17 = tpu.matmul %14, %16, %cst_21 {dimension_numbers = #tpu.dot_dimension_numbers<[1], [0], [0], [1], [0, 0, 1, 1], [], []>} : vector<32x16xbf16>, vector<16x8xbf16>, vector<32x8xf32> -> vector<32x8xf32>
    %18 = arith.addf %12, %17 : vector<32x8xf32>
    %c0_22 = arith.constant 0 : index
    %c1_23 = arith.constant 1 : index
    %c1_24 = arith.constant 1 : index
    %c0_25 = arith.constant 0 : index
    %19 = vector.load %arg1[%c0_22, %c1_23, %c1_24, %c0_25] : memref<2x6x6x16xbf16, #tpu.memory_space<vmem>>, vector<2x4x4x16xbf16>
    %20 = vector.shape_cast %19 : vector<2x4x4x16xbf16> to vector<32x16xbf16>
    %c3 = arith.constant 3 : index
    %c0_26 = arith.constant 0 : index
    %c0_27 = arith.constant 0 : index
    %21 = vector.load %arg2[%c3, %c0_26, %c0_27] : memref<16x16x8xbf16, #tpu.memory_space<vmem>>, vector<1x16x8xbf16>
    %22 = vector.shape_cast %21 : vector<1x16x8xbf16> to vector<16x8xbf16>
    %cst_28 = arith.constant dense<0.000000e+00> : vector<32x8xf32>
    %23 = tpu.matmul %20, %22, %cst_28 {dimension_numbers = #tpu.dot_dimension_numbers<[1], [0], [0], [1], [0, 0, 1, 1], [], []>} : vector<32x16xbf16>, vector<16x8xbf16>, vector<32x8xf32> -> vector<32x8xf32>
    %24 = arith.addf %18, %23 : vector<32x8xf32>
    %cst_29 = arith.constant dense<0.000000e+00> : vector<8xf32>
    %25 = vector.multi_reduction <add>, %24, %cst_29 [0] : vector<32x8xf32> to vector<8xf32>
    %26 = vector.shape_cast %25 : vector<8xf32> to vector<1x8xf32>
    %27 = arith.addf %0, %26 : vector<1x8xf32>
    %28 = arith.mulf %24, %24 : vector<32x8xf32>
    %cst_30 = arith.constant dense<0.000000e+00> : vector<8xf32>
    %29 = vector.multi_reduction <add>, %28, %cst_30 [0] : vector<32x8xf32> to vector<8xf32>
    %30 = vector.shape_cast %29 : vector<8xf32> to vector<1x8xf32>
    %31 = arith.addf %1, %30 : vector<1x8xf32>
    %c0_31 = arith.constant 0 : index
    %c0_32 = arith.constant 0 : index
    %c1_33 = arith.constant 1 : index
    %c0_34 = arith.constant 0 : index
    %32 = vector.load %arg1[%c0_31, %c0_32, %c1_33, %c0_34] : memref<2x6x6x16xbf16, #tpu.memory_space<vmem>>, vector<2x4x4x16xbf16>
    %33 = vector.shape_cast %32 : vector<2x4x4x16xbf16> to vector<32x16xbf16>
    %c4 = arith.constant 4 : index
    %c0_35 = arith.constant 0 : index
    %c0_36 = arith.constant 0 : index
    %34 = vector.load %arg2[%c4, %c0_35, %c0_36] : memref<16x16x8xbf16, #tpu.memory_space<vmem>>, vector<1x16x8xbf16>
    %35 = vector.shape_cast %34 : vector<1x16x8xbf16> to vector<16x8xbf16>
    %cst_37 = arith.constant dense<0.000000e+00> : vector<32x8xf32>
    %36 = tpu.matmul %33, %35, %cst_37 {dimension_numbers = #tpu.dot_dimension_numbers<[1], [0], [0], [1], [0, 0, 1, 1], [], []>} : vector<32x16xbf16>, vector<16x8xbf16>, vector<32x8xf32> -> vector<32x8xf32>
    %c0_38 = arith.constant 0 : index
    %c0_39 = arith.constant 0 : index
    %c2_40 = arith.constant 2 : index
    %c0_41 = arith.constant 0 : index
    %37 = vector.load %arg1[%c0_38, %c0_39, %c2_40, %c0_41] : memref<2x6x6x16xbf16, #tpu.memory_space<vmem>>, vector<2x4x4x16xbf16>
    %38 = vector.shape_cast %37 : vector<2x4x4x16xbf16> to vector<32x16xbf16>
    %c5 = arith.constant 5 : index
    %c0_42 = arith.constant 0 : index
    %c0_43 = arith.constant 0 : index
    %39 = vector.load %arg2[%c5, %c0_42, %c0_43] : memref<16x16x8xbf16, #tpu.memory_space<vmem>>, vector<1x16x8xbf16>
    %40 = vector.shape_cast %39 : vector<1x16x8xbf16> to vector<16x8xbf16>
    %cst_44 = arith.constant dense<0.000000e+00> : vector<32x8xf32>
    %41 = tpu.matmul %38, %40, %cst_44 {dimension_numbers = #tpu.dot_dimension_numbers<[1], [0], [0], [1], [0, 0, 1, 1], [], []>} : vector<32x16xbf16>, vector<16x8xbf16>, vector<32x8xf32> -> vector<32x8xf32>
    %42 = arith.addf %36, %41 : vector<32x8xf32>
    %c0_45 = arith.constant 0 : index
    %c1_46 = arith.constant 1 : index
    %c1_47 = arith.constant 1 : index
    %c0_48 = arith.constant 0 : index
    %43 = vector.load %arg1[%c0_45, %c1_46, %c1_47, %c0_48] : memref<2x6x6x16xbf16, #tpu.memory_space<vmem>>, vector<2x4x4x16xbf16>
    %44 = vector.shape_cast %43 : vector<2x4x4x16xbf16> to vector<32x16xbf16>
    %c6 = arith.constant 6 : index
    %c0_49 = arith.constant 0 : index
    %c0_50 = arith.constant 0 : index
    %45 = vector.load %arg2[%c6, %c0_49, %c0_50] : memref<16x16x8xbf16, #tpu.memory_space<vmem>>, vector<1x16x8xbf16>
    %46 = vector.shape_cast %45 : vector<1x16x8xbf16> to vector<16x8xbf16>
    %cst_51 = arith.constant dense<0.000000e+00> : vector<32x8xf32>
    %47 = tpu.matmul %44, %46, %cst_51 {dimension_numbers = #tpu.dot_dimension_numbers<[1], [0], [0], [1], [0, 0, 1, 1], [], []>} : vector<32x16xbf16>, vector<16x8xbf16>, vector<32x8xf32> -> vector<32x8xf32>
    %48 = arith.addf %42, %47 : vector<32x8xf32>
    %c0_52 = arith.constant 0 : index
    %c1_53 = arith.constant 1 : index
    %c2_54 = arith.constant 2 : index
    %c0_55 = arith.constant 0 : index
    %49 = vector.load %arg1[%c0_52, %c1_53, %c2_54, %c0_55] : memref<2x6x6x16xbf16, #tpu.memory_space<vmem>>, vector<2x4x4x16xbf16>
    %50 = vector.shape_cast %49 : vector<2x4x4x16xbf16> to vector<32x16xbf16>
    %c7 = arith.constant 7 : index
    %c0_56 = arith.constant 0 : index
    %c0_57 = arith.constant 0 : index
    %51 = vector.load %arg2[%c7, %c0_56, %c0_57] : memref<16x16x8xbf16, #tpu.memory_space<vmem>>, vector<1x16x8xbf16>
    %52 = vector.shape_cast %51 : vector<1x16x8xbf16> to vector<16x8xbf16>
    %cst_58 = arith.constant dense<0.000000e+00> : vector<32x8xf32>
    %53 = tpu.matmul %50, %52, %cst_58 {dimension_numbers = #tpu.dot_dimension_numbers<[1], [0], [0], [1], [0, 0, 1, 1], [], []>} : vector<32x16xbf16>, vector<16x8xbf16>, vector<32x8xf32> -> vector<32x8xf32>
    %54 = arith.addf %48, %53 : vector<32x8xf32>
    %cst_59 = arith.constant dense<0.000000e+00> : vector<8xf32>
    %55 = vector.multi_reduction <add>, %54, %cst_59 [0] : vector<32x8xf32> to vector<8xf32>
    %56 = vector.shape_cast %55 : vector<8xf32> to vector<1x8xf32>
    %57 = arith.addf %27, %56 : vector<1x8xf32>
    %58 = arith.mulf %54, %54 : vector<32x8xf32>
    %cst_60 = arith.constant dense<0.000000e+00> : vector<8xf32>
    %59 = vector.multi_reduction <add>, %58, %cst_60 [0] : vector<32x8xf32> to vector<8xf32>
    %60 = vector.shape_cast %59 : vector<8xf32> to vector<1x8xf32>
    %61 = arith.addf %31, %60 : vector<1x8xf32>
    %62 = tpu.concatenate %24, %54 in 1 : vector<32x8xf32>, vector<32x8xf32> -> vector<32x16xf32>
    %63 = vector.shape_cast %62 : vector<32x16xf32> to vector<8x4x16xf32>
    %64 = arith.truncf %63 : vector<8x4x16xf32> to vector<8x4x16xbf16>
    %c0_61 = arith.constant 0 : index
    %c0_62 = arith.constant 0 : index
    %c0_63 = arith.constant 0 : index
    %c0_64 = arith.constant 0 : index
    %65 = vector.load %arg3[%c0_61, %c0_62, %c0_63, %c0_64] : memref<8x2x4x16xbf16, #tpu.memory_space<vmem>>, vector<8x1x4x16xbf16>
    %66 = vector.shape_cast %65 : vector<8x1x4x16xbf16> to vector<8x4x16xbf16>
    %67 = vector.shape_cast %64 : vector<8x4x16xbf16> to vector<8x1x4x16xbf16>
    tpu.vector_store %arg3[%c0_61, %c0_62, %c0_63, %c0_64], %67 {strides = array<i32>} : memref<8x2x4x16xbf16, #tpu.memory_space<vmem>>, vector<8x1x4x16xbf16>,
    %c0_65 = arith.constant 0 : index
    %c1_66 = arith.constant 1 : index
    %c0_67 = arith.constant 0 : index
    %c0_68 = arith.constant 0 : index
    %68 = vector.load %arg1[%c0_65, %c1_66, %c0_67, %c0_68] : memref<2x6x6x16xbf16, #tpu.memory_space<vmem>>, vector<2x4x4x16xbf16>
    %69 = vector.shape_cast %68 : vector<2x4x4x16xbf16> to vector<32x16xbf16>
    %c8 = arith.constant 8 : index
    %c0_69 = arith.constant 0 : index
    %c0_70 = arith.constant 0 : index
    %70 = vector.load %arg2[%c8, %c0_69, %c0_70] : memref<16x16x8xbf16, #tpu.memory_space<vmem>>, vector<1x16x8xbf16>
    %71 = vector.shape_cast %70 : vector<1x16x8xbf16> to vector<16x8xbf16>
    %cst_71 = arith.constant dense<0.000000e+00> : vector<32x8xf32>
    %72 = tpu.matmul %69, %71, %cst_71 {dimension_numbers = #tpu.dot_dimension_numbers<[1], [0], [0], [1], [0, 0, 1, 1], [], []>} : vector<32x16xbf16>, vector<16x8xbf16>, vector<32x8xf32> -> vector<32x8xf32>
    %c0_72 = arith.constant 0 : index
    %c1_73 = arith.constant 1 : index
    %c1_74 = arith.constant 1 : index
    %c0_75 = arith.constant 0 : index
    %73 = vector.load %arg1[%c0_72, %c1_73, %c1_74, %c0_75] : memref<2x6x6x16xbf16, #tpu.memory_space<vmem>>, vector<2x4x4x16xbf16>
    %74 = vector.shape_cast %73 : vector<2x4x4x16xbf16> to vector<32x16xbf16>
    %c9 = arith.constant 9 : index
    %c0_76 = arith.constant 0 : index
    %c0_77 = arith.constant 0 : index
    %75 = vector.load %arg2[%c9, %c0_76, %c0_77] : memref<16x16x8xbf16, #tpu.memory_space<vmem>>, vector<1x16x8xbf16>
    %76 = vector.shape_cast %75 : vector<1x16x8xbf16> to vector<16x8xbf16>
    %cst_78 = arith.constant dense<0.000000e+00> : vector<32x8xf32>
    %77 = tpu.matmul %74, %76, %cst_78 {dimension_numbers = #tpu.dot_dimension_numbers<[1], [0], [0], [1], [0, 0, 1, 1], [], []>} : vector<32x16xbf16>, vector<16x8xbf16>, vector<32x8xf32> -> vector<32x8xf32>
    %78 = arith.addf %72, %77 : vector<32x8xf32>
    %c0_79 = arith.constant 0 : index
    %c2_80 = arith.constant 2 : index
    %c0_81 = arith.constant 0 : index
    %c0_82 = arith.constant 0 : index
    %79 = vector.load %arg1[%c0_79, %c2_80, %c0_81, %c0_82] : memref<2x6x6x16xbf16, #tpu.memory_space<vmem>>, vector<2x4x4x16xbf16>
    %80 = vector.shape_cast %79 : vector<2x4x4x16xbf16> to vector<32x16xbf16>
    %c10 = arith.constant 10 : index
    %c0_83 = arith.constant 0 : index
    %c0_84 = arith.constant 0 : index
    %81 = vector.load %arg2[%c10, %c0_83, %c0_84] : memref<16x16x8xbf16, #tpu.memory_space<vmem>>, vector<1x16x8xbf16>
    %82 = vector.shape_cast %81 : vector<1x16x8xbf16> to vector<16x8xbf16>
    %cst_85 = arith.constant dense<0.000000e+00> : vector<32x8xf32>
    %83 = tpu.matmul %80, %82, %cst_85 {dimension_numbers = #tpu.dot_dimension_numbers<[1], [0], [0], [1], [0, 0, 1, 1], [], []>} : vector<32x16xbf16>, vector<16x8xbf16>, vector<32x8xf32> -> vector<32x8xf32>
    %84 = arith.addf %78, %83 : vector<32x8xf32>
    %c0_86 = arith.constant 0 : index
    %c2_87 = arith.constant 2 : index
    %c1_88 = arith.constant 1 : index
    %c0_89 = arith.constant 0 : index
    %85 = vector.load %arg1[%c0_86, %c2_87, %c1_88, %c0_89] : memref<2x6x6x16xbf16, #tpu.memory_space<vmem>>, vector<2x4x4x16xbf16>
    %86 = vector.shape_cast %85 : vector<2x4x4x16xbf16> to vector<32x16xbf16>
    %c11 = arith.constant 11 : index
    %c0_90 = arith.constant 0 : index
    %c0_91 = arith.constant 0 : index
    %87 = vector.load %arg2[%c11, %c0_90, %c0_91] : memref<16x16x8xbf16, #tpu.memory_space<vmem>>, vector<1x16x8xbf16>
    %88 = vector.shape_cast %87 : vector<1x16x8xbf16> to vector<16x8xbf16>
    %cst_92 = arith.constant dense<0.000000e+00> : vector<32x8xf32>
    %89 = tpu.matmul %86, %88, %cst_92 {dimension_numbers = #tpu.dot_dimension_numbers<[1], [0], [0], [1], [0, 0, 1, 1], [], []>} : vector<32x16xbf16>, vector<16x8xbf16>, vector<32x8xf32> -> vector<32x8xf32>
    %90 = arith.addf %84, %89 : vector<32x8xf32>
    %cst_93 = arith.constant dense<0.000000e+00> : vector<8xf32>
    %91 = vector.multi_reduction <add>, %90, %cst_93 [0] : vector<32x8xf32> to vector<8xf32>
    %92 = vector.shape_cast %91 : vector<8xf32> to vector<1x8xf32>
    %93 = arith.addf %57, %92 : vector<1x8xf32>
    %94 = arith.mulf %90, %90 : vector<32x8xf32>
    %cst_94 = arith.constant dense<0.000000e+00> : vector<8xf32>
    %95 = vector.multi_reduction <add>, %94, %cst_94 [0] : vector<32x8xf32> to vector<8xf32>
    %96 = vector.shape_cast %95 : vector<8xf32> to vector<1x8xf32>
    %97 = arith.addf %61, %96 : vector<1x8xf32>
    %c0_95 = arith.constant 0 : index
    %c1_96 = arith.constant 1 : index
    %c1_97 = arith.constant 1 : index
    %c0_98 = arith.constant 0 : index
    %98 = vector.load %arg1[%c0_95, %c1_96, %c1_97, %c0_98] : memref<2x6x6x16xbf16, #tpu.memory_space<vmem>>, vector<2x4x4x16xbf16>
    %99 = vector.shape_cast %98 : vector<2x4x4x16xbf16> to vector<32x16xbf16>
    %c12 = arith.constant 12 : index
    %c0_99 = arith.constant 0 : index
    %c0_100 = arith.constant 0 : index
    %100 = vector.load %arg2[%c12, %c0_99, %c0_100] : memref<16x16x8xbf16, #tpu.memory_space<vmem>>, vector<1x16x8xbf16>
    %101 = vector.shape_cast %100 : vector<1x16x8xbf16> to vector<16x8xbf16>
    %cst_101 = arith.constant dense<0.000000e+00> : vector<32x8xf32>
    %102 = tpu.matmul %99, %101, %cst_101 {dimension_numbers = #tpu.dot_dimension_numbers<[1], [0], [0], [1], [0, 0, 1, 1], [], []>} : vector<32x16xbf16>, vector<16x8xbf16>, vector<32x8xf32> -> vector<32x8xf32>
    %c0_102 = arith.constant 0 : index
    %c1_103 = arith.constant 1 : index
    %c2_104 = arith.constant 2 : index
    %c0_105 = arith.constant 0 : index
    %103 = vector.load %arg1[%c0_102, %c1_103, %c2_104, %c0_105] : memref<2x6x6x16xbf16, #tpu.memory_space<vmem>>, vector<2x4x4x16xbf16>
    %104 = vector.shape_cast %103 : vector<2x4x4x16xbf16> to vector<32x16xbf16>
    %c13 = arith.constant 13 : index
    %c0_106 = arith.constant 0 : index
    %c0_107 = arith.constant 0 : index
    %105 = vector.load %arg2[%c13, %c0_106, %c0_107] : memref<16x16x8xbf16, #tpu.memory_space<vmem>>, vector<1x16x8xbf16>
    %106 = vector.shape_cast %105 : vector<1x16x8xbf16> to vector<16x8xbf16>
    %cst_108 = arith.constant dense<0.000000e+00> : vector<32x8xf32>
    %107 = tpu.matmul %104, %106, %cst_108 {dimension_numbers = #tpu.dot_dimension_numbers<[1], [0], [0], [1], [0, 0, 1, 1], [], []>} : vector<32x16xbf16>, vector<16x8xbf16>, vector<32x8xf32> -> vector<32x8xf32>
    %108 = arith.addf %102, %107 : vector<32x8xf32>
    %c0_109 = arith.constant 0 : index
    %c2_110 = arith.constant 2 : index
    %c1_111 = arith.constant 1 : index
    %c0_112 = arith.constant 0 : index
    %109 = vector.load %arg1[%c0_109, %c2_110, %c1_111, %c0_112] : memref<2x6x6x16xbf16, #tpu.memory_space<vmem>>, vector<2x4x4x16xbf16>
    %110 = vector.shape_cast %109 : vector<2x4x4x16xbf16> to vector<32x16xbf16>
    %c14 = arith.constant 14 : index
    %c0_113 = arith.constant 0 : index
    %c0_114 = arith.constant 0 : index
    %111 = vector.load %arg2[%c14, %c0_113, %c0_114] : memref<16x16x8xbf16, #tpu.memory_space<vmem>>, vector<1x16x8xbf16>
    %112 = vector.shape_cast %111 : vector<1x16x8xbf16> to vector<16x8xbf16>
    %cst_115 = arith.constant dense<0.000000e+00> : vector<32x8xf32>
    %113 = tpu.matmul %110, %112, %cst_115 {dimension_numbers = #tpu.dot_dimension_numbers<[1], [0], [0], [1], [0, 0, 1, 1], [], []>} : vector<32x16xbf16>, vector<16x8xbf16>, vector<32x8xf32> -> vector<32x8xf32>
    %114 = arith.addf %108, %113 : vector<32x8xf32>
    %c0_116 = arith.constant 0 : index
    %c2_117 = arith.constant 2 : index
    %c2_118 = arith.constant 2 : index
    %c0_119 = arith.constant 0 : index
    %115 = vector.load %arg1[%c0_116, %c2_117, %c2_118, %c0_119] : memref<2x6x6x16xbf16, #tpu.memory_space<vmem>>, vector<2x4x4x16xbf16>
    %116 = vector.shape_cast %115 : vector<2x4x4x16xbf16> to vector<32x16xbf16>
    %c15 = arith.constant 15 : index
    %c0_120 = arith.constant 0 : index
    %c0_121 = arith.constant 0 : index
    %117 = vector.load %arg2[%c15, %c0_120, %c0_121] : memref<16x16x8xbf16, #tpu.memory_space<vmem>>, vector<1x16x8xbf16>
    %118 = vector.shape_cast %117 : vector<1x16x8xbf16> to vector<16x8xbf16>
    %cst_122 = arith.constant dense<0.000000e+00> : vector<32x8xf32>
    %119 = tpu.matmul %116, %118, %cst_122 {dimension_numbers = #tpu.dot_dimension_numbers<[1], [0], [0], [1], [0, 0, 1, 1], [], []>} : vector<32x16xbf16>, vector<16x8xbf16>, vector<32x8xf32> -> vector<32x8xf32>
    %120 = arith.addf %114, %119 : vector<32x8xf32>
    %cst_123 = arith.constant dense<0.000000e+00> : vector<8xf32>
    %121 = vector.multi_reduction <add>, %120, %cst_123 [0] : vector<32x8xf32> to vector<8xf32>
    %122 = vector.shape_cast %121 : vector<8xf32> to vector<1x8xf32>
    %123 = arith.addf %93, %122 : vector<1x8xf32>
    %124 = arith.mulf %120, %120 : vector<32x8xf32>
    %cst_124 = arith.constant dense<0.000000e+00> : vector<8xf32>
    %125 = vector.multi_reduction <add>, %124, %cst_124 [0] : vector<32x8xf32> to vector<8xf32>
    %126 = vector.shape_cast %125 : vector<8xf32> to vector<1x8xf32>
    %127 = arith.addf %97, %126 : vector<1x8xf32>
    %128 = tpu.concatenate %90, %120 in 1 : vector<32x8xf32>, vector<32x8xf32> -> vector<32x16xf32>
    %129 = vector.shape_cast %128 : vector<32x16xf32> to vector<8x4x16xf32>
    %130 = arith.truncf %129 : vector<8x4x16xf32> to vector<8x4x16xbf16>
    %c0_125 = arith.constant 0 : index
    %c1_126 = arith.constant 1 : index
    %c0_127 = arith.constant 0 : index
    %c0_128 = arith.constant 0 : index
    %131 = vector.load %arg3[%c0_125, %c1_126, %c0_127, %c0_128] : memref<8x2x4x16xbf16, #tpu.memory_space<vmem>>, vector<8x1x4x16xbf16>
    %132 = vector.shape_cast %131 : vector<8x1x4x16xbf16> to vector<8x4x16xbf16>
    %133 = vector.shape_cast %130 : vector<8x4x16xbf16> to vector<8x1x4x16xbf16>
    tpu.vector_store %arg3[%c0_125, %c1_126, %c0_127, %c0_128], %133 {strides = array<i32>} : memref<8x2x4x16xbf16, #tpu.memory_space<vmem>>, vector<8x1x4x16xbf16>,
    %134 = tpu.concatenate %123, %127 in 0 : vector<1x8xf32>, vector<1x8xf32> -> vector<2x8xf32>
    %c0_129 = arith.constant 0 : index
    %c0_130 = arith.constant 0 : index
    %c0_131 = arith.constant 0 : index
    %135 = vector.load %arg4[%c0_129, %c0_130, %c0_131] : memref<1x2x8xf32, #tpu.memory_space<vmem>>, vector<1x2x8xf32>
    %136 = vector.shape_cast %135 : vector<1x2x8xf32> to vector<2x8xf32>
    %137 = vector.shape_cast %134 : vector<2x8xf32> to vector<1x2x8xf32>
    tpu.vector_store %arg4[%c0_129, %c0_130, %c0_131], %137 {strides = array<i32>} : memref<1x2x8xf32, #tpu.memory_space<vmem>>, vector<1x2x8xf32>,
    return
  }
  func.func @transform_0(%arg0: i32) -> (i32, i32, i32, i32) {
    %c0_i32 = arith.constant 0 : i32
    %c0_i32_0 = arith.constant 0 : i32
    %c0_i32_1 = arith.constant 0 : i32
    %c0_i32_2 = arith.constant 0 : i32
    return %arg0, %c0_i32, %c0_i32_0, %c0_i32_1 : i32, i32, i32, i32
  }
  func.func @transform_1(%arg0: i32) -> (i32, i32, i32) {
    %c0_i32 = arith.constant 0 : i32
    %c0_i32_0 = arith.constant 0 : i32
    %c0_i32_1 = arith.constant 0 : i32
    %c0_i32_2 = arith.constant 0 : i32
    return %c0_i32, %c0_i32_0, %c0_i32_1 : i32, i32, i32
  }
  func.func @transform_2(%arg0: i32) -> (i32, i32, i32, i32) {
    %c0_i32 = arith.constant 0 : i32
    %c0_i32_0 = arith.constant 0 : i32
    %c0_i32_1 = arith.constant 0 : i32
    %c0_i32_2 = arith.constant 0 : i32
    return %arg0, %c0_i32, %c0_i32_0, %c0_i32_1 : i32, i32, i32, i32
  }
  func.func @transform_3(%arg0: i32) -> (i32, i32, i32) {
    %c0_i32 = arith.constant 0 : i32
    %c0_i32_0 = arith.constant 0 : i32
    %c0_i32_1 = arith.constant 0 : i32
    return %arg0, %c0_i32, %c0_i32_0 : i32, i32, i32
  }
}

module attributes {stable_mosaic.version = 11 : i64} {
  func.func @_bn_relu_pad_kernel(%arg0: i32, %arg1: memref<2x8x8x8xbf16, #tpu.memory_space<vmem>>, %arg2: memref<1x8xf32, #tpu.memory_space<vmem>>, %arg3: memref<1x8xf32, #tpu.memory_space<vmem>>, %arg4: memref<2x10x10x8xbf16, #tpu.memory_space<vmem>>) attributes {dimension_semantics = [#tpu.dimension_semantics<parallel>], iteration_bounds = array<i64: 1>, scalar_prefetch = 0 : i64, scratch_operands = 0 : i64, tpu.core_type = #tpu.core_type<tc>, window_params = [{transform_indices = @transform_0, window_bounds = array<i64: 2, 8, 8, 8>}, {pipeline_mode = #tpu.pipeline_mode<synchronous>, transform_indices = @transform_1, window_bounds = array<i64: 1, 8>}, {pipeline_mode = #tpu.pipeline_mode<synchronous>, transform_indices = @transform_2, window_bounds = array<i64: 1, 8>}, {transform_indices = @transform_3, window_bounds = array<i64: 2, 10, 10, 8>}]} {
    %cst = arith.constant 0.000000e+00 : bf16
    %0 = vector.broadcast %cst : bf16 to vector<2x10x10x8xbf16>
    %c0 = arith.constant 0 : index
    %c0_0 = arith.constant 0 : index
    %c0_1 = arith.constant 0 : index
    %c0_2 = arith.constant 0 : index
    %1 = vector.load %arg4[%c0, %c0_0, %c0_1, %c0_2] : memref<2x10x10x8xbf16, #tpu.memory_space<vmem>>, vector<2x10x10x8xbf16>
    tpu.vector_store %arg4[%c0, %c0_0, %c0_1, %c0_2], %0 {strides = array<i32>} : memref<2x10x10x8xbf16, #tpu.memory_space<vmem>>, vector<2x10x10x8xbf16>,
    %c0_3 = arith.constant 0 : index
    %c0_4 = arith.constant 0 : index
    %c0_5 = arith.constant 0 : index
    %c0_6 = arith.constant 0 : index
    %2 = vector.load %arg1[%c0_3, %c0_4, %c0_5, %c0_6] : memref<2x8x8x8xbf16, #tpu.memory_space<vmem>>, vector<2x8x8x8xbf16>
    %3 = arith.extf %2 : vector<2x8x8x8xbf16> to vector<2x8x8x8xf32>
    %c0_7 = arith.constant 0 : index
    %c0_8 = arith.constant 0 : index
    %4 = vector.load %arg2[%c0_7, %c0_8] : memref<1x8xf32, #tpu.memory_space<vmem>>, vector<1x8xf32>
    %5 = vector.shape_cast %4 : vector<1x8xf32> to vector<1x1x1x8xf32>
    %6 = vector.broadcast %5 : vector<1x1x1x8xf32> to vector<2x8x8x8xf32>
    %7 = arith.mulf %3, %6 : vector<2x8x8x8xf32>
    %c0_9 = arith.constant 0 : index
    %c0_10 = arith.constant 0 : index
    %8 = vector.load %arg3[%c0_9, %c0_10] : memref<1x8xf32, #tpu.memory_space<vmem>>, vector<1x8xf32>
    %9 = vector.shape_cast %8 : vector<1x8xf32> to vector<1x1x1x8xf32>
    %10 = vector.broadcast %9 : vector<1x1x1x8xf32> to vector<2x8x8x8xf32>
    %11 = arith.addf %7, %10 : vector<2x8x8x8xf32>
    %cst_11 = arith.constant 0.000000e+00 : f32
    %12 = vector.broadcast %cst_11 : f32 to vector<2x8x8x8xf32>
    %13 = arith.maximumf %11, %12 : vector<2x8x8x8xf32>
    %cst_12 = arith.constant 0.000000e+00 : f32
    %14 = vector.broadcast %cst_12 : f32 to vector<2x8x1x8xf32>
    %15 = tpu.concatenate %14, %13, %14 in 2 : vector<2x8x1x8xf32>, vector<2x8x8x8xf32>, vector<2x8x1x8xf32> -> vector<2x8x10x8xf32>
    %16 = arith.truncf %15 : vector<2x8x10x8xf32> to vector<2x8x10x8xbf16>
    %c0_13 = arith.constant 0 : index
    %c1 = arith.constant 1 : index
    %c0_14 = arith.constant 0 : index
    %c0_15 = arith.constant 0 : index
    %17 = vector.load %arg4[%c0_13, %c1, %c0_14, %c0_15] : memref<2x10x10x8xbf16, #tpu.memory_space<vmem>>, vector<2x8x10x8xbf16>
    tpu.vector_store %arg4[%c0_13, %c1, %c0_14, %c0_15], %16 {strides = array<i32>} : memref<2x10x10x8xbf16, #tpu.memory_space<vmem>>, vector<2x8x10x8xbf16>,
    return
  }
  func.func @transform_0(%arg0: i32) -> (i32, i32, i32, i32) {
    %c0_i32 = arith.constant 0 : i32
    %c0_i32_0 = arith.constant 0 : i32
    %c0_i32_1 = arith.constant 0 : i32
    %c0_i32_2 = arith.constant 0 : i32
    return %arg0, %c0_i32, %c0_i32_0, %c0_i32_1 : i32, i32, i32, i32
  }
  func.func @transform_1(%arg0: i32) -> (i32, i32) {
    %c0_i32 = arith.constant 0 : i32
    %c0_i32_0 = arith.constant 0 : i32
    %c0_i32_1 = arith.constant 0 : i32
    return %c0_i32, %c0_i32_0 : i32, i32
  }
  func.func @transform_2(%arg0: i32) -> (i32, i32) {
    %c0_i32 = arith.constant 0 : i32
    %c0_i32_0 = arith.constant 0 : i32
    %c0_i32_1 = arith.constant 0 : i32
    return %c0_i32, %c0_i32_0 : i32, i32
  }
  func.func @transform_3(%arg0: i32) -> (i32, i32, i32, i32) {
    %c0_i32 = arith.constant 0 : i32
    %c0_i32_0 = arith.constant 0 : i32
    %c0_i32_1 = arith.constant 0 : i32
    %c0_i32_2 = arith.constant 0 : i32
    return %arg0, %c0_i32, %c0_i32_0, %c0_i32_1 : i32, i32, i32, i32
  }
}

module attributes {stable_mosaic.version = 11 : i64} {
  func.func @_deconv_gemm_tanh_kernel(%arg0: i32, %arg1: memref<2x10x10x8xbf16, #tpu.memory_space<vmem>>, %arg2: memref<16x8x64xbf16, #tpu.memory_space<vmem>>, %arg3: memref<1x64xf32, #tpu.memory_space<vmem>>, %arg4: memref<16x2x8x128xf32, #tpu.memory_space<vmem>>) attributes {dimension_semantics = [#tpu.dimension_semantics<parallel>], iteration_bounds = array<i64: 1>, scalar_prefetch = 0 : i64, scratch_operands = 0 : i64, tpu.core_type = #tpu.core_type<tc>, window_params = [{transform_indices = @transform_0, window_bounds = array<i64: 2, 10, 10, 8>}, {pipeline_mode = #tpu.pipeline_mode<synchronous>, transform_indices = @transform_1, window_bounds = array<i64: 16, 8, 64>}, {pipeline_mode = #tpu.pipeline_mode<synchronous>, transform_indices = @transform_2, window_bounds = array<i64: 1, 64>}, {transform_indices = @transform_3, window_bounds = array<i64: 16, 2, 8, 128>}]} {
    %c0 = arith.constant 0 : index
    %c0_0 = arith.constant 0 : index
    %c0_1 = arith.constant 0 : index
    %c0_2 = arith.constant 0 : index
    %0 = vector.load %arg1[%c0, %c0_0, %c0_1, %c0_2] : memref<2x10x10x8xbf16, #tpu.memory_space<vmem>>, vector<2x8x8x8xbf16>
    %1 = vector.shape_cast %0 : vector<2x8x8x8xbf16> to vector<128x8xbf16>
    %c0_3 = arith.constant 0 : index
    %c0_4 = arith.constant 0 : index
    %c0_5 = arith.constant 0 : index
    %2 = vector.load %arg2[%c0_3, %c0_4, %c0_5] : memref<16x8x64xbf16, #tpu.memory_space<vmem>>, vector<1x8x64xbf16>
    %3 = vector.shape_cast %2 : vector<1x8x64xbf16> to vector<8x64xbf16>
    %cst = arith.constant dense<0.000000e+00> : vector<128x64xf32>
    %4 = tpu.matmul %1, %3, %cst {dimension_numbers = #tpu.dot_dimension_numbers<[1], [0], [0], [1], [0, 0, 1, 1], [], []>} : vector<128x8xbf16>, vector<8x64xbf16>, vector<128x64xf32> -> vector<128x64xf32>
    %c0_6 = arith.constant 0 : index
    %c0_7 = arith.constant 0 : index
    %c1 = arith.constant 1 : index
    %c0_8 = arith.constant 0 : index
    %5 = vector.load %arg1[%c0_6, %c0_7, %c1, %c0_8] : memref<2x10x10x8xbf16, #tpu.memory_space<vmem>>, vector<2x8x8x8xbf16>
    %6 = vector.shape_cast %5 : vector<2x8x8x8xbf16> to vector<128x8xbf16>
    %c1_9 = arith.constant 1 : index
    %c0_10 = arith.constant 0 : index
    %c0_11 = arith.constant 0 : index
    %7 = vector.load %arg2[%c1_9, %c0_10, %c0_11] : memref<16x8x64xbf16, #tpu.memory_space<vmem>>, vector<1x8x64xbf16>
    %8 = vector.shape_cast %7 : vector<1x8x64xbf16> to vector<8x64xbf16>
    %cst_12 = arith.constant dense<0.000000e+00> : vector<128x64xf32>
    %9 = tpu.matmul %6, %8, %cst_12 {dimension_numbers = #tpu.dot_dimension_numbers<[1], [0], [0], [1], [0, 0, 1, 1], [], []>} : vector<128x8xbf16>, vector<8x64xbf16>, vector<128x64xf32> -> vector<128x64xf32>
    %10 = arith.addf %4, %9 : vector<128x64xf32>
    %c0_13 = arith.constant 0 : index
    %c1_14 = arith.constant 1 : index
    %c0_15 = arith.constant 0 : index
    %c0_16 = arith.constant 0 : index
    %11 = vector.load %arg1[%c0_13, %c1_14, %c0_15, %c0_16] : memref<2x10x10x8xbf16, #tpu.memory_space<vmem>>, vector<2x8x8x8xbf16>
    %12 = vector.shape_cast %11 : vector<2x8x8x8xbf16> to vector<128x8xbf16>
    %c2 = arith.constant 2 : index
    %c0_17 = arith.constant 0 : index
    %c0_18 = arith.constant 0 : index
    %13 = vector.load %arg2[%c2, %c0_17, %c0_18] : memref<16x8x64xbf16, #tpu.memory_space<vmem>>, vector<1x8x64xbf16>
    %14 = vector.shape_cast %13 : vector<1x8x64xbf16> to vector<8x64xbf16>
    %cst_19 = arith.constant dense<0.000000e+00> : vector<128x64xf32>
    %15 = tpu.matmul %12, %14, %cst_19 {dimension_numbers = #tpu.dot_dimension_numbers<[1], [0], [0], [1], [0, 0, 1, 1], [], []>} : vector<128x8xbf16>, vector<8x64xbf16>, vector<128x64xf32> -> vector<128x64xf32>
    %16 = arith.addf %10, %15 : vector<128x64xf32>
    %c0_20 = arith.constant 0 : index
    %c1_21 = arith.constant 1 : index
    %c1_22 = arith.constant 1 : index
    %c0_23 = arith.constant 0 : index
    %17 = vector.load %arg1[%c0_20, %c1_21, %c1_22, %c0_23] : memref<2x10x10x8xbf16, #tpu.memory_space<vmem>>, vector<2x8x8x8xbf16>
    %18 = vector.shape_cast %17 : vector<2x8x8x8xbf16> to vector<128x8xbf16>
    %c3 = arith.constant 3 : index
    %c0_24 = arith.constant 0 : index
    %c0_25 = arith.constant 0 : index
    %19 = vector.load %arg2[%c3, %c0_24, %c0_25] : memref<16x8x64xbf16, #tpu.memory_space<vmem>>, vector<1x8x64xbf16>
    %20 = vector.shape_cast %19 : vector<1x8x64xbf16> to vector<8x64xbf16>
    %cst_26 = arith.constant dense<0.000000e+00> : vector<128x64xf32>
    %21 = tpu.matmul %18, %20, %cst_26 {dimension_numbers = #tpu.dot_dimension_numbers<[1], [0], [0], [1], [0, 0, 1, 1], [], []>} : vector<128x8xbf16>, vector<8x64xbf16>, vector<128x64xf32> -> vector<128x64xf32>
    %22 = arith.addf %16, %21 : vector<128x64xf32>
    %c0_27 = arith.constant 0 : index
    %c0_28 = arith.constant 0 : index
    %23 = vector.load %arg3[%c0_27, %c0_28] : memref<1x64xf32, #tpu.memory_space<vmem>>, vector<1x64xf32>
    %24 = vector.broadcast %23 : vector<1x64xf32> to vector<128x64xf32>
    %25 = arith.addf %22, %24 : vector<128x64xf32>
    %26 = math.tanh %25 : vector<128x64xf32>
    %c0_29 = arith.constant 0 : index
    %c0_30 = arith.constant 0 : index
    %c1_31 = arith.constant 1 : index
    %c0_32 = arith.constant 0 : index
    %27 = vector.load %arg1[%c0_29, %c0_30, %c1_31, %c0_32] : memref<2x10x10x8xbf16, #tpu.memory_space<vmem>>, vector<2x8x8x8xbf16>
    %28 = vector.shape_cast %27 : vector<2x8x8x8xbf16> to vector<128x8xbf16>
    %c4 = arith.constant 4 : index
    %c0_33 = arith.constant 0 : index
    %c0_34 = arith.constant 0 : index
    %29 = vector.load %arg2[%c4, %c0_33, %c0_34] : memref<16x8x64xbf16, #tpu.memory_space<vmem>>, vector<1x8x64xbf16>
    %30 = vector.shape_cast %29 : vector<1x8x64xbf16> to vector<8x64xbf16>
    %cst_35 = arith.constant dense<0.000000e+00> : vector<128x64xf32>
    %31 = tpu.matmul %28, %30, %cst_35 {dimension_numbers = #tpu.dot_dimension_numbers<[1], [0], [0], [1], [0, 0, 1, 1], [], []>} : vector<128x8xbf16>, vector<8x64xbf16>, vector<128x64xf32> -> vector<128x64xf32>
    %c0_36 = arith.constant 0 : index
    %c0_37 = arith.constant 0 : index
    %c2_38 = arith.constant 2 : index
    %c0_39 = arith.constant 0 : index
    %32 = vector.load %arg1[%c0_36, %c0_37, %c2_38, %c0_39] : memref<2x10x10x8xbf16, #tpu.memory_space<vmem>>, vector<2x8x8x8xbf16>
    %33 = vector.shape_cast %32 : vector<2x8x8x8xbf16> to vector<128x8xbf16>
    %c5 = arith.constant 5 : index
    %c0_40 = arith.constant 0 : index
    %c0_41 = arith.constant 0 : index
    %34 = vector.load %arg2[%c5, %c0_40, %c0_41] : memref<16x8x64xbf16, #tpu.memory_space<vmem>>, vector<1x8x64xbf16>
    %35 = vector.shape_cast %34 : vector<1x8x64xbf16> to vector<8x64xbf16>
    %cst_42 = arith.constant dense<0.000000e+00> : vector<128x64xf32>
    %36 = tpu.matmul %33, %35, %cst_42 {dimension_numbers = #tpu.dot_dimension_numbers<[1], [0], [0], [1], [0, 0, 1, 1], [], []>} : vector<128x8xbf16>, vector<8x64xbf16>, vector<128x64xf32> -> vector<128x64xf32>
    %37 = arith.addf %31, %36 : vector<128x64xf32>
    %c0_43 = arith.constant 0 : index
    %c1_44 = arith.constant 1 : index
    %c1_45 = arith.constant 1 : index
    %c0_46 = arith.constant 0 : index
    %38 = vector.load %arg1[%c0_43, %c1_44, %c1_45, %c0_46] : memref<2x10x10x8xbf16, #tpu.memory_space<vmem>>, vector<2x8x8x8xbf16>
    %39 = vector.shape_cast %38 : vector<2x8x8x8xbf16> to vector<128x8xbf16>
    %c6 = arith.constant 6 : index
    %c0_47 = arith.constant 0 : index
    %c0_48 = arith.constant 0 : index
    %40 = vector.load %arg2[%c6, %c0_47, %c0_48] : memref<16x8x64xbf16, #tpu.memory_space<vmem>>, vector<1x8x64xbf16>
    %41 = vector.shape_cast %40 : vector<1x8x64xbf16> to vector<8x64xbf16>
    %cst_49 = arith.constant dense<0.000000e+00> : vector<128x64xf32>
    %42 = tpu.matmul %39, %41, %cst_49 {dimension_numbers = #tpu.dot_dimension_numbers<[1], [0], [0], [1], [0, 0, 1, 1], [], []>} : vector<128x8xbf16>, vector<8x64xbf16>, vector<128x64xf32> -> vector<128x64xf32>
    %43 = arith.addf %37, %42 : vector<128x64xf32>
    %c0_50 = arith.constant 0 : index
    %c1_51 = arith.constant 1 : index
    %c2_52 = arith.constant 2 : index
    %c0_53 = arith.constant 0 : index
    %44 = vector.load %arg1[%c0_50, %c1_51, %c2_52, %c0_53] : memref<2x10x10x8xbf16, #tpu.memory_space<vmem>>, vector<2x8x8x8xbf16>
    %45 = vector.shape_cast %44 : vector<2x8x8x8xbf16> to vector<128x8xbf16>
    %c7 = arith.constant 7 : index
    %c0_54 = arith.constant 0 : index
    %c0_55 = arith.constant 0 : index
    %46 = vector.load %arg2[%c7, %c0_54, %c0_55] : memref<16x8x64xbf16, #tpu.memory_space<vmem>>, vector<1x8x64xbf16>
    %47 = vector.shape_cast %46 : vector<1x8x64xbf16> to vector<8x64xbf16>
    %cst_56 = arith.constant dense<0.000000e+00> : vector<128x64xf32>
    %48 = tpu.matmul %45, %47, %cst_56 {dimension_numbers = #tpu.dot_dimension_numbers<[1], [0], [0], [1], [0, 0, 1, 1], [], []>} : vector<128x8xbf16>, vector<8x64xbf16>, vector<128x64xf32> -> vector<128x64xf32>
    %49 = arith.addf %43, %48 : vector<128x64xf32>
    %c0_57 = arith.constant 0 : index
    %c0_58 = arith.constant 0 : index
    %50 = vector.load %arg3[%c0_57, %c0_58] : memref<1x64xf32, #tpu.memory_space<vmem>>, vector<1x64xf32>
    %51 = vector.broadcast %50 : vector<1x64xf32> to vector<128x64xf32>
    %52 = arith.addf %49, %51 : vector<128x64xf32>
    %53 = math.tanh %52 : vector<128x64xf32>
    %54 = tpu.concatenate %26, %53 in 1 : vector<128x64xf32>, vector<128x64xf32> -> vector<128x128xf32>
    %55 = vector.shape_cast %54 : vector<128x128xf32> to vector<16x8x128xf32>
    %c0_59 = arith.constant 0 : index
    %c0_60 = arith.constant 0 : index
    %c0_61 = arith.constant 0 : index
    %c0_62 = arith.constant 0 : index
    %56 = vector.load %arg4[%c0_59, %c0_60, %c0_61, %c0_62] : memref<16x2x8x128xf32, #tpu.memory_space<vmem>>, vector<16x1x8x128xf32>
    %57 = vector.shape_cast %56 : vector<16x1x8x128xf32> to vector<16x8x128xf32>
    %58 = vector.shape_cast %55 : vector<16x8x128xf32> to vector<16x1x8x128xf32>
    tpu.vector_store %arg4[%c0_59, %c0_60, %c0_61, %c0_62], %58 {strides = array<i32>} : memref<16x2x8x128xf32, #tpu.memory_space<vmem>>, vector<16x1x8x128xf32>,
    %c0_63 = arith.constant 0 : index
    %c1_64 = arith.constant 1 : index
    %c0_65 = arith.constant 0 : index
    %c0_66 = arith.constant 0 : index
    %59 = vector.load %arg1[%c0_63, %c1_64, %c0_65, %c0_66] : memref<2x10x10x8xbf16, #tpu.memory_space<vmem>>, vector<2x8x8x8xbf16>
    %60 = vector.shape_cast %59 : vector<2x8x8x8xbf16> to vector<128x8xbf16>
    %c8 = arith.constant 8 : index
    %c0_67 = arith.constant 0 : index
    %c0_68 = arith.constant 0 : index
    %61 = vector.load %arg2[%c8, %c0_67, %c0_68] : memref<16x8x64xbf16, #tpu.memory_space<vmem>>, vector<1x8x64xbf16>
    %62 = vector.shape_cast %61 : vector<1x8x64xbf16> to vector<8x64xbf16>
    %cst_69 = arith.constant dense<0.000000e+00> : vector<128x64xf32>
    %63 = tpu.matmul %60, %62, %cst_69 {dimension_numbers = #tpu.dot_dimension_numbers<[1], [0], [0], [1], [0, 0, 1, 1], [], []>} : vector<128x8xbf16>, vector<8x64xbf16>, vector<128x64xf32> -> vector<128x64xf32>
    %c0_70 = arith.constant 0 : index
    %c1_71 = arith.constant 1 : index
    %c1_72 = arith.constant 1 : index
    %c0_73 = arith.constant 0 : index
    %64 = vector.load %arg1[%c0_70, %c1_71, %c1_72, %c0_73] : memref<2x10x10x8xbf16, #tpu.memory_space<vmem>>, vector<2x8x8x8xbf16>
    %65 = vector.shape_cast %64 : vector<2x8x8x8xbf16> to vector<128x8xbf16>
    %c9 = arith.constant 9 : index
    %c0_74 = arith.constant 0 : index
    %c0_75 = arith.constant 0 : index
    %66 = vector.load %arg2[%c9, %c0_74, %c0_75] : memref<16x8x64xbf16, #tpu.memory_space<vmem>>, vector<1x8x64xbf16>
    %67 = vector.shape_cast %66 : vector<1x8x64xbf16> to vector<8x64xbf16>
    %cst_76 = arith.constant dense<0.000000e+00> : vector<128x64xf32>
    %68 = tpu.matmul %65, %67, %cst_76 {dimension_numbers = #tpu.dot_dimension_numbers<[1], [0], [0], [1], [0, 0, 1, 1], [], []>} : vector<128x8xbf16>, vector<8x64xbf16>, vector<128x64xf32> -> vector<128x64xf32>
    %69 = arith.addf %63, %68 : vector<128x64xf32>
    %c0_77 = arith.constant 0 : index
    %c2_78 = arith.constant 2 : index
    %c0_79 = arith.constant 0 : index
    %c0_80 = arith.constant 0 : index
    %70 = vector.load %arg1[%c0_77, %c2_78, %c0_79, %c0_80] : memref<2x10x10x8xbf16, #tpu.memory_space<vmem>>, vector<2x8x8x8xbf16>
    %71 = vector.shape_cast %70 : vector<2x8x8x8xbf16> to vector<128x8xbf16>
    %c10 = arith.constant 10 : index
    %c0_81 = arith.constant 0 : index
    %c0_82 = arith.constant 0 : index
    %72 = vector.load %arg2[%c10, %c0_81, %c0_82] : memref<16x8x64xbf16, #tpu.memory_space<vmem>>, vector<1x8x64xbf16>
    %73 = vector.shape_cast %72 : vector<1x8x64xbf16> to vector<8x64xbf16>
    %cst_83 = arith.constant dense<0.000000e+00> : vector<128x64xf32>
    %74 = tpu.matmul %71, %73, %cst_83 {dimension_numbers = #tpu.dot_dimension_numbers<[1], [0], [0], [1], [0, 0, 1, 1], [], []>} : vector<128x8xbf16>, vector<8x64xbf16>, vector<128x64xf32> -> vector<128x64xf32>
    %75 = arith.addf %69, %74 : vector<128x64xf32>
    %c0_84 = arith.constant 0 : index
    %c2_85 = arith.constant 2 : index
    %c1_86 = arith.constant 1 : index
    %c0_87 = arith.constant 0 : index
    %76 = vector.load %arg1[%c0_84, %c2_85, %c1_86, %c0_87] : memref<2x10x10x8xbf16, #tpu.memory_space<vmem>>, vector<2x8x8x8xbf16>
    %77 = vector.shape_cast %76 : vector<2x8x8x8xbf16> to vector<128x8xbf16>
    %c11 = arith.constant 11 : index
    %c0_88 = arith.constant 0 : index
    %c0_89 = arith.constant 0 : index
    %78 = vector.load %arg2[%c11, %c0_88, %c0_89] : memref<16x8x64xbf16, #tpu.memory_space<vmem>>, vector<1x8x64xbf16>
    %79 = vector.shape_cast %78 : vector<1x8x64xbf16> to vector<8x64xbf16>
    %cst_90 = arith.constant dense<0.000000e+00> : vector<128x64xf32>
    %80 = tpu.matmul %77, %79, %cst_90 {dimension_numbers = #tpu.dot_dimension_numbers<[1], [0], [0], [1], [0, 0, 1, 1], [], []>} : vector<128x8xbf16>, vector<8x64xbf16>, vector<128x64xf32> -> vector<128x64xf32>
    %81 = arith.addf %75, %80 : vector<128x64xf32>
    %c0_91 = arith.constant 0 : index
    %c0_92 = arith.constant 0 : index
    %82 = vector.load %arg3[%c0_91, %c0_92] : memref<1x64xf32, #tpu.memory_space<vmem>>, vector<1x64xf32>
    %83 = vector.broadcast %82 : vector<1x64xf32> to vector<128x64xf32>
    %84 = arith.addf %81, %83 : vector<128x64xf32>
    %85 = math.tanh %84 : vector<128x64xf32>
    %c0_93 = arith.constant 0 : index
    %c1_94 = arith.constant 1 : index
    %c1_95 = arith.constant 1 : index
    %c0_96 = arith.constant 0 : index
    %86 = vector.load %arg1[%c0_93, %c1_94, %c1_95, %c0_96] : memref<2x10x10x8xbf16, #tpu.memory_space<vmem>>, vector<2x8x8x8xbf16>
    %87 = vector.shape_cast %86 : vector<2x8x8x8xbf16> to vector<128x8xbf16>
    %c12 = arith.constant 12 : index
    %c0_97 = arith.constant 0 : index
    %c0_98 = arith.constant 0 : index
    %88 = vector.load %arg2[%c12, %c0_97, %c0_98] : memref<16x8x64xbf16, #tpu.memory_space<vmem>>, vector<1x8x64xbf16>
    %89 = vector.shape_cast %88 : vector<1x8x64xbf16> to vector<8x64xbf16>
    %cst_99 = arith.constant dense<0.000000e+00> : vector<128x64xf32>
    %90 = tpu.matmul %87, %89, %cst_99 {dimension_numbers = #tpu.dot_dimension_numbers<[1], [0], [0], [1], [0, 0, 1, 1], [], []>} : vector<128x8xbf16>, vector<8x64xbf16>, vector<128x64xf32> -> vector<128x64xf32>
    %c0_100 = arith.constant 0 : index
    %c1_101 = arith.constant 1 : index
    %c2_102 = arith.constant 2 : index
    %c0_103 = arith.constant 0 : index
    %91 = vector.load %arg1[%c0_100, %c1_101, %c2_102, %c0_103] : memref<2x10x10x8xbf16, #tpu.memory_space<vmem>>, vector<2x8x8x8xbf16>
    %92 = vector.shape_cast %91 : vector<2x8x8x8xbf16> to vector<128x8xbf16>
    %c13 = arith.constant 13 : index
    %c0_104 = arith.constant 0 : index
    %c0_105 = arith.constant 0 : index
    %93 = vector.load %arg2[%c13, %c0_104, %c0_105] : memref<16x8x64xbf16, #tpu.memory_space<vmem>>, vector<1x8x64xbf16>
    %94 = vector.shape_cast %93 : vector<1x8x64xbf16> to vector<8x64xbf16>
    %cst_106 = arith.constant dense<0.000000e+00> : vector<128x64xf32>
    %95 = tpu.matmul %92, %94, %cst_106 {dimension_numbers = #tpu.dot_dimension_numbers<[1], [0], [0], [1], [0, 0, 1, 1], [], []>} : vector<128x8xbf16>, vector<8x64xbf16>, vector<128x64xf32> -> vector<128x64xf32>
    %96 = arith.addf %90, %95 : vector<128x64xf32>
    %c0_107 = arith.constant 0 : index
    %c2_108 = arith.constant 2 : index
    %c1_109 = arith.constant 1 : index
    %c0_110 = arith.constant 0 : index
    %97 = vector.load %arg1[%c0_107, %c2_108, %c1_109, %c0_110] : memref<2x10x10x8xbf16, #tpu.memory_space<vmem>>, vector<2x8x8x8xbf16>
    %98 = vector.shape_cast %97 : vector<2x8x8x8xbf16> to vector<128x8xbf16>
    %c14 = arith.constant 14 : index
    %c0_111 = arith.constant 0 : index
    %c0_112 = arith.constant 0 : index
    %99 = vector.load %arg2[%c14, %c0_111, %c0_112] : memref<16x8x64xbf16, #tpu.memory_space<vmem>>, vector<1x8x64xbf16>
    %100 = vector.shape_cast %99 : vector<1x8x64xbf16> to vector<8x64xbf16>
    %cst_113 = arith.constant dense<0.000000e+00> : vector<128x64xf32>
    %101 = tpu.matmul %98, %100, %cst_113 {dimension_numbers = #tpu.dot_dimension_numbers<[1], [0], [0], [1], [0, 0, 1, 1], [], []>} : vector<128x8xbf16>, vector<8x64xbf16>, vector<128x64xf32> -> vector<128x64xf32>
    %102 = arith.addf %96, %101 : vector<128x64xf32>
    %c0_114 = arith.constant 0 : index
    %c2_115 = arith.constant 2 : index
    %c2_116 = arith.constant 2 : index
    %c0_117 = arith.constant 0 : index
    %103 = vector.load %arg1[%c0_114, %c2_115, %c2_116, %c0_117] : memref<2x10x10x8xbf16, #tpu.memory_space<vmem>>, vector<2x8x8x8xbf16>
    %104 = vector.shape_cast %103 : vector<2x8x8x8xbf16> to vector<128x8xbf16>
    %c15 = arith.constant 15 : index
    %c0_118 = arith.constant 0 : index
    %c0_119 = arith.constant 0 : index
    %105 = vector.load %arg2[%c15, %c0_118, %c0_119] : memref<16x8x64xbf16, #tpu.memory_space<vmem>>, vector<1x8x64xbf16>
    %106 = vector.shape_cast %105 : vector<1x8x64xbf16> to vector<8x64xbf16>
    %cst_120 = arith.constant dense<0.000000e+00> : vector<128x64xf32>
    %107 = tpu.matmul %104, %106, %cst_120 {dimension_numbers = #tpu.dot_dimension_numbers<[1], [0], [0], [1], [0, 0, 1, 1], [], []>} : vector<128x8xbf16>, vector<8x64xbf16>, vector<128x64xf32> -> vector<128x64xf32>
    %108 = arith.addf %102, %107 : vector<128x64xf32>
    %c0_121 = arith.constant 0 : index
    %c0_122 = arith.constant 0 : index
    %109 = vector.load %arg3[%c0_121, %c0_122] : memref<1x64xf32, #tpu.memory_space<vmem>>, vector<1x64xf32>
    %110 = vector.broadcast %109 : vector<1x64xf32> to vector<128x64xf32>
    %111 = arith.addf %108, %110 : vector<128x64xf32>
    %112 = math.tanh %111 : vector<128x64xf32>
    %113 = tpu.concatenate %85, %112 in 1 : vector<128x64xf32>, vector<128x64xf32> -> vector<128x128xf32>
    %114 = vector.shape_cast %113 : vector<128x128xf32> to vector<16x8x128xf32>
    %c0_123 = arith.constant 0 : index
    %c1_124 = arith.constant 1 : index
    %c0_125 = arith.constant 0 : index
    %c0_126 = arith.constant 0 : index
    %115 = vector.load %arg4[%c0_123, %c1_124, %c0_125, %c0_126] : memref<16x2x8x128xf32, #tpu.memory_space<vmem>>, vector<16x1x8x128xf32>
    %116 = vector.shape_cast %115 : vector<16x1x8x128xf32> to vector<16x8x128xf32>
    %117 = vector.shape_cast %114 : vector<16x8x128xf32> to vector<16x1x8x128xf32>
    tpu.vector_store %arg4[%c0_123, %c1_124, %c0_125, %c0_126], %117 {strides = array<i32>} : memref<16x2x8x128xf32, #tpu.memory_space<vmem>>, vector<16x1x8x128xf32>,
    return
  }
  func.func @transform_0(%arg0: i32) -> (i32, i32, i32, i32) {
    %c0_i32 = arith.constant 0 : i32
    %c0_i32_0 = arith.constant 0 : i32
    %c0_i32_1 = arith.constant 0 : i32
    %c0_i32_2 = arith.constant 0 : i32
    return %arg0, %c0_i32, %c0_i32_0, %c0_i32_1 : i32, i32, i32, i32
  }
  func.func @transform_1(%arg0: i32) -> (i32, i32, i32) {
    %c0_i32 = arith.constant 0 : i32
    %c0_i32_0 = arith.constant 0 : i32
    %c0_i32_1 = arith.constant 0 : i32
    %c0_i32_2 = arith.constant 0 : i32
    return %c0_i32, %c0_i32_0, %c0_i32_1 : i32, i32, i32
  }
  func.func @transform_2(%arg0: i32) -> (i32, i32) {
    %c0_i32 = arith.constant 0 : i32
    %c0_i32_0 = arith.constant 0 : i32
    %c0_i32_1 = arith.constant 0 : i32
    return %c0_i32, %c0_i32_0 : i32, i32
  }
  func.func @transform_3(%arg0: i32) -> (i32, i32, i32, i32) {
    %c0_i32 = arith.constant 0 : i32
    %c0_i32_0 = arith.constant 0 : i32
    %c0_i32_1 = arith.constant 0 : i32
    %c0_i32_2 = arith.constant 0 : i32
    return %arg0, %c0_i32, %c0_i32_0, %c0_i32_1 : i32, i32, i32, i32
  }
}

</mosaic_0001>

<bundles_post_ra>
// kernel: generator_forward.4
= control target key start
LH: loop header
LB: loop body
LE: loop exit
PB: predicated region body
PF: predicated region fallthrough
CT: control target
= control target key end

     0   :  { %vm30_vm0 = vcmask 1045504   ;;  %v2013_v0 = vmov 0.0   ;;  %vm2014_vm1 = vmmov 0   ;;  %vm26_vm2 = vcmask 97280   ;;  %s2585_s1 = inlined_call_operand.vmem [shape: bf16[16,12,16], index: 1, kind: input, shape index: {}]   ;;  %s2586_s0 = inlined_call_operand.vmem [shape: bf16[2,12], index: 0, kind: input, shape index: {}]   ;;  %s2587_s4 = inlined_call_operand.vmem [shape: bf16[2,6,6,16], index: 4, kind: output, shape index: {}]   ;;  %s2588_s2 = inlined_call_operand.vmem [shape: f32[1,16], index: 2, kind: input, shape index: {}]   ;;  %s2589_s3 = inlined_call_operand.vmem [shape: f32[1,16], index: 3, kind: input, shape index: {}]  }
   0x1   :  { %1895 = vmatprep.subr.bf16.mxu0 %v2013_v0  ;;  %1901 = vmatprep.subr.bf16.mxu1 %v2013_v0  ;;  %v1995_v1 = vld [vmem:[%s2585_s1] sm:$0x3f]   ;;  %v1996_v2 = vld [vmem:[%s2585_s1 + $0x8] sm:$0x3f]   ;;  %v1997_v6 = vld [vmem:[%s2585_s1 + $0x10] sm:$0x3f]  }
   0x2   :  { %1897 = vmatprep.mubr.msk.bf16.mxu0 %vm2014_vm1, %v2013_v0  ;;  %1903 = vmatprep.mubr.msk.bf16.mxu1 %vm2014_vm1, %v2013_v0  ;;  %v32_v3 = vsel %vm30_vm0, %v1995_v1, 0  ;;  %v2058_v4 = vld [vmem:[%s2586_s0] sm:$0x1]  ;;  %v101_v5 = vsel %vm30_vm0, %v1996_v2, 0  ;;  %v1998_v7 = vld [vmem:[%s2585_s1 + $0x18] sm:$0x3f]  }
   0x3   :  { %1896 = vmatpush3.bf16.msra.mxu0 %v32_v3  ;;  %1902 = vmatpush3.bf16.msra.mxu1 %v101_v5  ;;  %v169_v8 = vsel %vm30_vm0, %v1997_v6, 0  ;;  %v237_v9 = vsel %vm30_vm0, %v1998_v7, 0  ;;  %v1999_v10 = vld [vmem:[%s2585_s1 + $0x20] sm:$0x3f]   ;;  %v2000_v11 = vld [vmem:[%s2585_s1 + $0x28] sm:$0x3f]  }
   0x4   :  { %1907 = vmatprep.subr.bf16.mxu0 %v2013_v0  ;;  %1913 = vmatprep.subr.bf16.mxu1 %v2013_v0  ;;  %v305_v12 = vsel %vm30_vm0, %v1999_v10, 0  ;;  %v373_v13 = vsel %vm30_vm0, %v2000_v11, 0  ;;  %v2001_v14 = vld [vmem:[%s2585_s1 + $0x30] sm:$0x3f]   ;;  %v2002_v15 = vld [vmem:[%s2585_s1 + $0x38] sm:$0x3f]  }
   0x5   :  { %v441_v16 = vsel %vm30_vm0, %v2001_v14, 0  ;;  %v509_v17 = vsel %vm30_vm0, %v2002_v15, 0  ;;  %v2003_v18 = vld [vmem:[%s2585_s1 + $0x40] sm:$0x3f]   ;;  %v2004_v19 = vld [vmem:[%s2585_s1 + $0x48] sm:$0x3f]  }
   0x6   :  { %1898 = vmatmul.mubr.msk.bf16.vlgmr.msra.gmra.mrb[0].mxu0 %vm26_vm2, %v2058_v4  ;;  %1904 = vmatmul.mubr.msk.bf16.vlgmr.msra.gmra.mrb[0].mxu1 %vm26_vm2, %v2058_v4  ;;  %v577_v20 = vsel %vm30_vm0, %v2003_v18, 0  ;;  %v645_v21 = vsel %vm30_vm0, %v2004_v19, 0  ;;  %v2005_v22 = vld [vmem:[%s2585_s1 + $0x50] sm:$0x3f]   ;;  %v2006_v23 = vld [vmem:[%s2585_s1 + $0x58] sm:$0x3f]  }
   0x7   :  { %1908 = vmatpush3.bf16.msra.mxu0 %v169_v8  ;;  %1914 = vmatpush3.bf16.msra.mxu1 %v237_v9  ;;  %v713_v24 = vsel %vm30_vm0, %v2005_v22, 0  ;;  %v781_v25 = vsel %vm30_vm0, %v2006_v23, 0  ;;  %v2007_v26 = vld [vmem:[%s2585_s1 + $0x60] sm:$0x3f]   ;;  %v2008_v27 = vld [vmem:[%s2585_s1 + $0x68] sm:$0x3f]  }
   0x8   :  { %1909 = vmatprep.mubr.msk.bf16.mxu0 %vm2014_vm1, %v2013_v0  ;;  %1915 = vmatprep.mubr.msk.bf16.mxu1 %vm2014_vm1, %v2013_v0  ;;  %v849_v28 = vsel %vm30_vm0, %v2007_v26, 0  ;;  %v917_v29 = vsel %vm30_vm0, %v2008_v27, 0  ;;  %v2009_v30 = vld [vmem:[%s2585_s1 + $0x70] sm:$0x3f]   ;;  %v2010_v31 = vld [vmem:[%s2585_s1 + $0x78] sm:$0x3f]  }
   0x9   :  { %1919 = vmatprep.subr.bf16.mxu0 %v2013_v0  ;;  %1925 = vmatprep.subr.bf16.mxu1 %v2013_v0  ;;  %v985_v32 = vsel %vm30_vm0, %v2009_v30, 0  ;;  %v1053_v33 = vsel %vm30_vm0, %v2010_v31, 0  ;;  %vm1123_vm3 = vcmask 124928   ;;  %v2015_v34 = vmov 0  }
   0xa   :  { %1124 = vst.msk [vmem:[%s2587_s4] sm:$0x7] %vm1123_vm3, %v2015_v34  ;;  %1125 = vst.msk [vmem:[%s2587_s4 + $0x4] sm:$0x7] %vm1123_vm3, %v2015_v34  ;;  %vm74_vm4 = vcmask 123904   ;;  %vm1292_vm5 = vcmask 1040384  }
   0xb   :  { %1126 = vst.msk [vmem:[%s2587_s4 + $0x8] sm:$0x7] %vm1123_vm3, %v2015_v34  ;;  %1127 = vst.msk [vmem:[%s2587_s4 + $0xc] sm:$0x7] %vm1123_vm3, %v2015_v34  ;;  %vm1295_vm6 = vcmask 1041408   ;;  %vm1298_vm7 = vcmask 1042432  }
   0xc   :  { %1128 = vst.msk [vmem:[%s2587_s4 + $0x10] sm:$0x7] %vm1123_vm3, %v2015_v34  ;;  %1129 = vst.msk [vmem:[%s2587_s4 + $0x14] sm:$0x7] %vm1123_vm3, %v2015_v34  ;;  %vm1301_vm8 = vcmask 1043456   ;;  %vm1304_vm9 = vcmask 1044480  }
   0xd   :  { %1130 = vst.msk [vmem:[%s2587_s4 + $0x18] sm:$0x7] %vm1123_vm3, %v2015_v34  ;;  %1131 = vst.msk [vmem:[%s2587_s4 + $0x1c] sm:$0x7] %vm1123_vm3, %v2015_v34 }
   0xe   :  { %1910 = vmatmul.mubr.msk.bf16.vlgmr.msra.gmra.mrb[4].mxu0 %vm26_vm2, %v2058_v4  ;;  %1916 = vmatmul.mubr.msk.bf16.vlgmr.msra.gmra.mrb[4].mxu1 %vm26_vm2, %v2058_v4  ;;  %1132 = vst.msk [vmem:[%s2587_s4 + $0x20] sm:$0x7] %vm1123_vm3, %v2015_v34  ;;  %1133 = vst.msk [vmem:[%s2587_s4 + $0x24] sm:$0x7] %vm1123_vm3, %v2015_v34 }
   0xf   :  { %1920 = vmatpush3.bf16.msra.mxu0 %v305_v12  ;;  %1926 = vmatpush3.bf16.msra.mxu1 %v373_v13  ;;  %1134 = vst.msk [vmem:[%s2587_s4 + $0x28] sm:$0x7] %vm1123_vm3, %v2015_v34  ;;  %1135 = vst.msk [vmem:[%s2587_s4 + $0x2c] sm:$0x7] %vm1123_vm3, %v2015_v34 }
  0x10   :  { %1921 = vmatprep.mubr.msk.bf16.mxu0 %vm2014_vm1, %v2013_v0  ;;  %1927 = vmatprep.mubr.msk.bf16.mxu1 %vm2014_vm1, %v2013_v0 }
  0x11   :  { %1931 = vmatprep.subr.bf16.mxu0 %v2013_v0  ;;  %1937 = vmatprep.subr.bf16.mxu1 %v2013_v0 }
  0x16   :  { %1922 = vmatmul.mubr.msk.bf16.vlgmr.msra.gmra.mrb[8].mxu0 %vm26_vm2, %v2058_v4  ;;  %1928 = vmatmul.mubr.msk.bf16.vlgmr.msra.gmra.mrb[8].mxu1 %vm26_vm2, %v2058_v4 }
  0x17   :  { %1932 = vmatpush3.bf16.msra.mxu0 %v441_v16  ;;  %1938 = vmatpush3.bf16.msra.mxu1 %v509_v17 }
  0x18   :  { %1933 = vmatprep.mubr.msk.bf16.mxu0 %vm2014_vm1, %v2013_v0  ;;  %1939 = vmatprep.mubr.msk.bf16.mxu1 %vm2014_vm1, %v2013_v0 }
  0x19   :  { %1943 = vmatprep.subr.bf16.mxu0 %v2013_v0  ;;  %1949 = vmatprep.subr.bf16.mxu1 %v2013_v0 }
  0x1e   :  { %1934 = vmatmul.mubr.msk.bf16.vlgmr.msra.gmra.mrb[12].mxu0 %vm26_vm2, %v2058_v4  ;;  %1940 = vmatmul.mubr.msk.bf16.vlgmr.msra.gmra.mrb[12].mxu1 %vm26_vm2, %v2058_v4 }
  0x1f   :  { %1944 = vmatpush3.bf16.msra.mxu0 %v577_v20  ;;  %1950 = vmatpush3.bf16.msra.mxu1 %v645_v21 }
  0x20   :  { %1945 = vmatprep.mubr.msk.bf16.mxu0 %vm2014_vm1, %v2013_v0  ;;  %1951 = vmatprep.mubr.msk.bf16.mxu1 %vm2014_vm1, %v2013_v0 }
  0x21   :  { %1955 = vmatprep.subr.bf16.mxu0 %v2013_v0  ;;  %1961 = vmatprep.subr.bf16.mxu1 %v2013_v0 }
  0x26   :  { %1946 = vmatmul.mubr.msk.bf16.vlgmr.msra.gmra.mrb[16].mxu0 %vm26_vm2, %v2058_v4  ;;  %1952 = vmatmul.mubr.msk.bf16.vlgmr.msra.gmra.mrb[16].mxu1 %vm26_vm2, %v2058_v4 }
  0x27   :  { %1956 = vmatpush3.bf16.msra.mxu0 %v713_v24  ;;  %1962 = vmatpush3.bf16.msra.mxu1 %v781_v25 }
  0x28   :  { %1957 = vmatprep.mubr.msk.bf16.mxu0 %vm2014_vm1, %v2013_v0  ;;  %1963 = vmatprep.mubr.msk.bf16.mxu1 %vm2014_vm1, %v2013_v0 }
  0x29   :  { %1967 = vmatprep.subr.bf16.mxu0 %v2013_v0  ;;  %1973 = vmatprep.subr.bf16.mxu1 %v2013_v0 }
  0x2e   :  { %1958 = vmatmul.mubr.msk.bf16.vlgmr.msra.gmra.mrb[20].mxu0 %vm26_vm2, %v2058_v4  ;;  %1964 = vmatmul.mubr.msk.bf16.vlgmr.msra.gmra.mrb[20].mxu1 %vm26_vm2, %v2058_v4 }
  0x2f   :  { %1968 = vmatpush3.bf16.msra.mxu0 %v849_v28  ;;  %1974 = vmatpush3.bf16.msra.mxu1 %v917_v29 }
  0x30   :  { %1969 = vmatprep.mubr.msk.bf16.mxu0 %vm2014_vm1, %v2013_v0  ;;  %1975 = vmatprep.mubr.msk.bf16.mxu1 %vm2014_vm1, %v2013_v0 }
  0x31   :  { %1979 = vmatprep.subr.bf16.mxu0 %v2013_v0  ;;  %1985 = vmatprep.subr.bf16.mxu1 %v2013_v0 }
  0x36   :  { %1970 = vmatmul.mubr.msk.bf16.vlgmr.msra.gmra.mrb[24].mxu0 %vm26_vm2, %v2058_v4  ;;  %1976 = vmatmul.mubr.msk.bf16.vlgmr.msra.gmra.mrb[24].mxu1 %vm26_vm2, %v2058_v4 }
  0x37   :  { %1980 = vmatpush3.bf16.msra.mxu0 %v985_v32  ;;  %1986 = vmatpush3.bf16.msra.mxu1 %v1053_v33 }
  0x38   :  { %1981 = vmatprep.mubr.msk.bf16.mxu0 %vm2014_vm1, %v2013_v0  ;;  %1987 = vmatprep.mubr.msk.bf16.mxu1 %vm2014_vm1, %v2013_v0 }
  0x3e   :  { %1982 = vmatmul.mubr.msk.bf16.vlgmr.msra.gmra.mrb[28].mxu0 %vm26_vm2, %v2058_v4  ;;  %1988 = vmatmul.mubr.msk.bf16.vlgmr.msra.gmra.mrb[28].mxu1 %vm26_vm2, %v2058_v4 }
  0xd9   :  { %v2239_v35 = vpop.f32.mrb[0].mxu0  ;;  %v2245_v38 = vpop.f32.mrb[0].mxu1 }
  0xda   :  { %v75_v36 = vsel %vm74_vm4, %v2239_v35, 0.0  ;;  %v83_v37 = vmul.f32 %v2239_v35, %v2239_v35  ;;  %v1899_v39 = vpop.f32.mrb[1].mxu0  ;;  %v143_v41 = vsel %vm74_vm4, %v2245_v38, 0.0  ;;  %v151_v42 = vmul.f32 %v2245_v38, %v2245_v38  ;;  %v1905_v43 = vpop.f32.mrb[1].mxu1 }
  0xdb   :  { %v76_v40 = vrot.slane %v75_v36, 4  ;;  %v71_v44 = vpop.f32.mrb[2].mxu0  ;;  %v144_v46 = vrot.slane %v143_v41, 4  ;;  %v140_v47 = vpop.f32.mrb[2].mxu1 }
  0xdc   :  { %v84_v45 = vsel %vm74_vm4, %v83_v37, 0.0  ;;  %v1900_v48 = vpop.f32.mrb[3].mxu0  ;;  %v152_v51 = vsel %vm74_vm4, %v151_v42, 0.0  ;;  %v1906_v52 = vpop.f32.mrb[3].mxu1 }
  0xdd   :  { %v77_v49 = vadd.f32 %v76_v40, %v75_v36  ;;  %v85_v50 = vrot.slane %v84_v45, 4  ;;  %v145_v53 = vadd.f32 %v144_v46, %v143_v41  ;;  %v153_v54 = vrot.slane %v152_v51, 4 }
  0xdf   :  { %v78_v55 = vrot.slane %v77_v49, 2  ;;  %v86_v56 = vadd.f32 %v85_v50, %v84_v45  ;;  %v146_v57 = vrot.slane %v145_v53, 2  ;;  %v154_v58 = vadd.f32 %v153_v54, %v152_v51 }
  0xe1   :  { %v79_v59 = vadd.f32 %v78_v55, %v77_v49  ;;  %v87_v60 = vrot.slane %v86_v56, 2  ;;  %v2253_v61 = vpop.f32.mrb[4].mxu0  ;;  %v147_v62 = vadd.f32 %v146_v57, %v145_v53  ;;  %v155_v63 = vrot.slane %v154_v58, 2  ;;  %v2259_v2 = vpop.f32.mrb[4].mxu1 }
  0xe2   :  { %v211_v0 = vsel %vm74_vm4, %v2253_v61, 0.0  ;;  %v219_v1 = vmul.f32 %v2253_v61, %v2253_v61  ;;  %v1911_v3 = vpop.f32.mrb[5].mxu0  ;;  %v279_v7 = vsel %vm74_vm4, %v2259_v2, 0.0  ;;  %v1917_v8 = vpop.f32.mrb[5].mxu1  ;;  %v287_v24 = vmul.f32 %v2259_v2, %v2259_v2 }
  0xe3   :  { %v80_v4 = vrot.slane %v79_v59, 1  ;;  %v88_v5 = vadd.f32 %v87_v60, %v86_v56  ;;  %v212_v6 = vrot.slane %v211_v0, 4  ;;  %v208_v9 = vpop.f32.mrb[6].mxu0  ;;  %v148_v10 = vrot.slane %v147_v62, 1  ;;  %v276_v14 = vpop.f32.mrb[6].mxu1 }
  0xe4   :  { %v156_v11 = vadd.f32 %v155_v63, %v154_v58  ;;  %v220_v12 = vsel %vm74_vm4, %v219_v1, 0.0  ;;  %v280_v13 = vrot.slane %v279_v7, 4  ;;  %v1912_v15 = vpop.f32.mrb[7].mxu0  ;;  %v1918_v20 = vpop.f32.mrb[7].mxu1  ;;  %v288_v31 = vsel %vm74_vm4, %v287_v24, 0.0 }
  0xe5   :  { %v81_v16 = vadd.f32 %v80_v4, %v79_v59  ;;  %v89_v17 = vrot.slane %v88_v5, 1  ;;  %v213_v18 = vadd.f32 %v212_v6, %v211_v0  ;;  %v221_v19 = vrot.slane %v220_v12, 4 }
  0xe6   :  { %v149_v21 = vadd.f32 %v148_v10, %v147_v62  ;;  %v157_v22 = vrot.slane %v156_v11, 1  ;;  %v281_v23 = vadd.f32 %v280_v13, %v279_v7  ;;  %v289_v34 = vrot.slane %v288_v31, 4 }
  0xe7   :  { %v90_v25 = vadd.f32 %v89_v17, %v88_v5  ;;  %v214_v26 = vrot.slane %v213_v18, 2  ;;  %v222_v27 = vadd.f32 %v221_v19, %v220_v12 }
  0xe8   :  { %v150_v28 = vadd.f32 %v149_v21, %v81_v16  ;;  %v158_v29 = vadd.f32 %v157_v22, %v156_v11  ;;  %v282_v30 = vrot.slane %v281_v23, 2  ;;  %v290_v46 = vadd.f32 %v289_v34, %v288_v31 }
  0xe9   :  { %v215_v32 = vadd.f32 %v214_v26, %v213_v18  ;;  %v223_v33 = vrot.slane %v222_v27, 2  ;;  %v2267_v36 = vpop.f32.mrb[8].mxu0  ;;  %v2273_v42 = vpop.f32.mrb[8].mxu1 }
  0xea   :  { %v159_v37 = vadd.f32 %v158_v29, %v90_v25  ;;  %v283_v39 = vadd.f32 %v282_v30, %v281_v23  ;;  %v347_v40 = vsel %vm74_vm4, %v2267_v36, 0.0  ;;  %v355_v41 = vmul.f32 %v2267_v36, %v2267_v36  ;;  %v1923_v43 = vpop.f32.mrb[9].mxu0  ;;  %v1929_v48 = vpop.f32.mrb[9].mxu1 }
  0xeb   :  { %v216_v44 = vrot.slane %v215_v32, 1  ;;  %v224_v45 = vadd.f32 %v223_v33, %v222_v27  ;;  %v348_v47 = vrot.slane %v347_v40, 4  ;;  %v344_v49 = vpop.f32.mrb[10].mxu0  ;;  %v415_v52 = vsel %vm74_vm4, %v2273_v42, 0.0  ;;  %v412_v54 = vpop.f32.mrb[10].mxu1 }
  0xec   :  { %v284_v50 = vrot.slane %v283_v39, 1  ;;  %v356_v51 = vsel %vm74_vm4, %v355_v41, 0.0  ;;  %v423_v53 = vmul.f32 %v2273_v42, %v2273_v42  ;;  %v1924_v55 = vpop.f32.mrb[11].mxu0  ;;  %v291_v58 = vrot.slane %v290_v46, 2  ;;  %v1930_v60 = vpop.f32.mrb[11].mxu1 }
  0xed   :  { %v217_v56 = vadd.f32 %v216_v44, %v215_v32  ;;  %v225_v57 = vrot.slane %v224_v45, 1  ;;  %v349_v59 = vadd.f32 %v348_v47, %v347_v40  ;;  %v357_v63 = vrot.slane %v356_v51, 4 }
  0xee   :  { %v285_v62 = vadd.f32 %v284_v50, %v283_v39  ;;  %v416_v0 = vrot.slane %v415_v52, 4  ;;  %v424_v1 = vsel %vm74_vm4, %v423_v53, 0.0  ;;  %v292_v5 = vadd.f32 %v291_v58, %v290_v46 }
  0xef   :  { %v218_v3 = vadd.f32 %v217_v56, %v150_v28  ;;  %v226_v4 = vadd.f32 %v225_v57, %v224_v45  ;;  %v350_v6 = vrot.slane %v349_v59, 2  ;;  %v358_v7 = vadd.f32 %v357_v63, %v356_v51 }
  0xf0   :  { %v417_v8 = vadd.f32 %v416_v0, %v415_v52  ;;  %v425_v9 = vrot.slane %v424_v1, 4  ;;  %v293_v12 = vrot.slane %v292_v5, 1 }
  0xf1   :  { %v227_v10 = vadd.f32 %v226_v4, %v159_v37  ;;  %v286_v11 = vadd.f32 %v285_v62, %v218_v3  ;;  %v351_v13 = vadd.f32 %v350_v6, %v349_v59  ;;  %v2281_v14 = vpop.f32.mrb[12].mxu0  ;;  %v359_v15 = vrot.slane %v358_v7, 2  ;;  %v2285_v19 = vpop.f32.mrb[12].mxu1 }
  0xf2   :  { %v418_v16 = vrot.slane %v417_v8, 2  ;;  %v426_v17 = vadd.f32 %v425_v9, %v424_v1  ;;  %v483_v18 = vsel %vm74_vm4, %v2281_v14, 0.0  ;;  %v1935_v20 = vpop.f32.mrb[13].mxu0  ;;  %v294_v21 = vadd.f32 %v293_v12, %v292_v5  ;;  %v1941_v25 = vpop.f32.mrb[13].mxu1 }
  0xf3   :  { %v352_v22 = vrot.slane %v351_v13, 1  ;;  %v484_v23 = vrot.slane %v483_v18, 4  ;;  %v491_v24 = vmul.f32 %v2281_v14, %v2281_v14  ;;  %v480_v26 = vpop.f32.mrb[14].mxu0  ;;  %v360_v27 = vadd.f32 %v359_v15, %v358_v7  ;;  %v548_v31 = vpop.f32.mrb[14].mxu1 }
  0xf4   :  { %v419_v28 = vadd.f32 %v418_v16, %v417_v8  ;;  %v427_v29 = vrot.slane %v426_v17, 2  ;;  %v551_v30 = vsel %vm74_vm4, %v2285_v19, 0.0  ;;  %v1936_v32 = vpop.f32.mrb[15].mxu0  ;;  %v295_v33 = vadd.f32 %v294_v21, %v227_v10  ;;  %v1942_v40 = vpop.f32.mrb[15].mxu1 }
  0xf5   :  { %v353_v34 = vadd.f32 %v352_v22, %v351_v13  ;;  %v485_v37 = vadd.f32 %v484_v23, %v483_v18  ;;  %v492_v39 = vsel %vm74_vm4, %v491_v24, 0.0  ;;  %v361_v41 = vrot.slane %v360_v27, 1 }
  0xf6   :  { %v420_v43 = vrot.slane %v419_v28, 1  ;;  %v428_v44 = vadd.f32 %v427_v29, %v426_v17  ;;  %v493_v45 = vrot.slane %v492_v39, 4  ;;  %v552_v48 = vrot.slane %v551_v30, 4 }
  0xf7   :  { %v354_v46 = vadd.f32 %v353_v34, %v286_v11  ;;  %v486_v47 = vrot.slane %v485_v37, 2  ;;  %v559_v49 = vmul.f32 %v2285_v19, %v2285_v19  ;;  %v362_v50 = vadd.f32 %v361_v41, %v360_v27 }
  0xf8   :  { %v421_v51 = vadd.f32 %v420_v43, %v419_v28  ;;  %v429_v52 = vrot.slane %v428_v44, 1  ;;  %v494_v53 = vadd.f32 %v493_v45, %v492_v39  ;;  %v553_v55 = vadd.f32 %v552_v48, %v551_v30 }
  0xf9   :  { %v487_v54 = vadd.f32 %v486_v47, %v485_v37  ;;  %v560_v56 = vsel %vm74_vm4, %v559_v49, 0.0  ;;  %v2295_v57 = vpop.f32.mrb[16].mxu0  ;;  %v363_v58 = vadd.f32 %v362_v50, %v295_v33  ;;  %v2297_v63 = vpop.f32.mrb[16].mxu1 }
  0xfa   :  { %v422_v59 = vadd.f32 %v421_v51, %v354_v46  ;;  %v430_v60 = vadd.f32 %v429_v52, %v428_v44  ;;  %v495_v62 = vrot.slane %v494_v53, 2  ;;  %v1947_v0 = vpop.f32.mrb[17].mxu0  ;;  %v554_v3 = vrot.slane %v553_v55, 2  ;;  %v1953_v6 = vpop.f32.mrb[17].mxu1 }
  0xfb   :  { %v488_v1 = vrot.slane %v487_v54, 1  ;;  %v561_v4 = vrot.slane %v560_v56, 4  ;;  %v619_v5 = vsel %vm74_vm4, %v2295_v57, 0.0  ;;  %v616_v7 = vpop.f32.mrb[18].mxu0  ;;  %v627_v11 = vmul.f32 %v2295_v57, %v2295_v57  ;;  %v684_v12 = vpop.f32.mrb[18].mxu1 }
  0xfc   :  { %v431_v8 = vadd.f32 %v430_v60, %v363_v58  ;;  %v496_v9 = vadd.f32 %v495_v62, %v494_v53  ;;  %v620_v10 = vrot.slane %v619_v5, 4  ;;  %v1948_v13 = vpop.f32.mrb[19].mxu0  ;;  %v555_v16 = vadd.f32 %v554_v3, %v553_v55  ;;  %v1954_v20 = vpop.f32.mrb[19].mxu1 }
  0xfd   :  { %v489_v15 = vadd.f32 %v488_v1, %v487_v54  ;;  %v562_v17 = vadd.f32 %v561_v4, %v560_v56  ;;  %v687_v18 = vsel %vm74_vm4, %v2297_v63, 0.0  ;;  %v628_v23 = vsel %vm74_vm4, %v627_v11, 0.0 }
  0xfe   :  { %v497_v21 = vrot.slane %v496_v9, 1  ;;  %v621_v22 = vadd.f32 %v620_v10, %v619_v5  ;;  %v688_v24 = vrot.slane %v687_v18, 4  ;;  %v556_v26 = vrot.slane %v555_v16, 1 }
  0xff   :  { %v490_v25 = vadd.f32 %v489_v15, %v422_v59  ;;  %v563_v27 = vrot.slane %v562_v17, 2  ;;  %v629_v28 = vrot.slane %v628_v23, 4  ;;  %v695_v32 = vmul.f32 %v2297_v63, %v2297_v63 }
 0x100   :  { %v498_v29 = vadd.f32 %v497_v21, %v496_v9  ;;  %v622_v30 = vrot.slane %v621_v22, 2  ;;  %v689_v31 = vadd.f32 %v688_v24, %v687_v18  ;;  %v557_v33 = vadd.f32 %v556_v26, %v555_v16 }
 0x101   :  { %v564_v34 = vadd.f32 %v563_v27, %v562_v17  ;;  %v630_v37 = vadd.f32 %v629_v28, %v628_v23  ;;  %v2308_v39 = vpop.f32.mrb[20].mxu0  ;;  %v696_v44 = vsel %vm74_vm4, %v695_v32, 0.0  ;;  %v2311_v45 = vpop.f32.mrb[20].mxu1 }
 0x102   :  { %v499_v40 = vadd.f32 %v498_v29, %v431_v8  ;;  %v623_v41 = vadd.f32 %v622_v30, %v621_v22  ;;  %v690_v43 = vrot.slane %v689_v31, 2  ;;  %v1959_v46 = vpop.f32.mrb[21].mxu0  ;;  %v558_v47 = vadd.f32 %v557_v33, %v490_v25  ;;  %v1965_v51 = vpop.f32.mrb[21].mxu1 }
 0x103   :  { %v565_v48 = vrot.slane %v564_v34, 1  ;;  %v631_v49 = vrot.slane %v630_v37, 2  ;;  %v697_v50 = vrot.slane %v696_v44, 4  ;;  %v752_v52 = vpop.f32.mrb[22].mxu0  ;;  %v755_v55 = vsel %vm74_vm4, %v2308_v39, 0.0  ;;  %v820_v58 = vpop.f32.mrb[22].mxu1 }
 0x104   :  { %v624_v53 = vrot.slane %v623_v41, 1  ;;  %v691_v54 = vadd.f32 %v690_v43, %v689_v31  ;;  %v763_v56 = vmul.f32 %v2308_v39, %v2308_v39  ;;  %v1960_v59 = vpop.f32.mrb[23].mxu0  ;;  %v756_v1 = vrot.slane %v755_v55, 4  ;;  %v1966_v3 = vpop.f32.mrb[23].mxu1 }
 0x105   :  { %v566_v60 = vadd.f32 %v565_v48, %v564_v34  ;;  %v632_v62 = vadd.f32 %v631_v49, %v630_v37  ;;  %v698_v0 = vadd.f32 %v697_v50, %v696_v44  ;;  %v823_v7 = vsel %vm74_vm4, %v2311_v45, 0.0 }
 0x106   :  { %v625_v4 = vadd.f32 %v624_v53, %v623_v41  ;;  %v692_v5 = vrot.slane %v691_v54, 1  ;;  %v764_v6 = vsel %vm74_vm4, %v763_v56, 0.0  ;;  %v757_v11 = vadd.f32 %v756_v1, %v755_v55 }
 0x107   :  { %v567_v8 = vadd.f32 %v566_v60, %v499_v40  ;;  %v633_v9 = vrot.slane %v632_v62, 1  ;;  %v699_v10 = vrot.slane %v698_v0, 2  ;;  %v765_v15 = vrot.slane %v764_v6, 4 }
 0x108   :  { %v626_v12 = vadd.f32 %v625_v4, %v558_v47  ;;  %v693_v13 = vadd.f32 %v692_v5, %v691_v54  ;;  %v824_v16 = vrot.slane %v823_v7, 4  ;;  %v758_v20 = vrot.slane %v757_v11, 2 }
 0x109   :  { %v634_v17 = vadd.f32 %v633_v9, %v632_v62  ;;  %v700_v18 = vadd.f32 %v699_v10, %v698_v0  ;;  %v831_v21 = vmul.f32 %v2311_v45, %v2311_v45  ;;  %v2322_v22 = vpop.f32.mrb[24].mxu0  ;;  %v766_v24 = vadd.f32 %v765_v15, %v764_v6  ;;  %v2326_v27 = vpop.f32.mrb[24].mxu1 }
 0x10a   :  { %v694_v23 = vadd.f32 %v693_v13, %v626_v12  ;;  %v825_v25 = vadd.f32 %v824_v16, %v823_v7  ;;  %v891_v26 = vsel %vm74_vm4, %v2322_v22, 0.0  ;;  %v1971_v28 = vpop.f32.mrb[25].mxu0  ;;  %v759_v31 = vadd.f32 %v758_v20, %v757_v11  ;;  %v1977_v33 = vpop.f32.mrb[25].mxu1 }
 0x10b   :  { %v635_v29 = vadd.f32 %v634_v17, %v567_v8  ;;  %v701_v30 = vrot.slane %v700_v18, 1  ;;  %v832_v32 = vsel %vm74_vm4, %v831_v21, 0.0  ;;  %v888_v34 = vpop.f32.mrb[26].mxu0  ;;  %v767_v37 = vrot.slane %v766_v24, 2  ;;  %v956_v44 = vpop.f32.mrb[26].mxu1 }
 0x10c   :  { %v826_v40 = vrot.slane %v825_v25, 2  ;;  %v833_v41 = vrot.slane %v832_v32, 4  ;;  %v892_v43 = vrot.slane %v891_v26, 4  ;;  %v1972_v46 = vpop.f32.mrb[27].mxu0  ;;  %v760_v48 = vrot.slane %v759_v31, 1  ;;  %v1978_v51 = vpop.f32.mrb[27].mxu1 }
 0x10d   :  { %v702_v47 = vadd.f32 %v701_v30, %v700_v18  ;;  %v899_v49 = vmul.f32 %v2322_v22, %v2322_v22  ;;  %v959_v50 = vsel %vm74_vm4, %v2326_v27, 0.0  ;;  %v768_v52 = vadd.f32 %v767_v37, %v766_v24 }
 0x10e   :  { %v827_v53 = vadd.f32 %v826_v40, %v825_v25  ;;  %v834_v54 = vadd.f32 %v833_v41, %v832_v32  ;;  %v893_v55 = vadd.f32 %v892_v43, %v891_v26  ;;  %v761_v58 = vadd.f32 %v760_v48, %v759_v31 }
 0x10f   :  { %v703_v56 = vadd.f32 %v702_v47, %v635_v29  ;;  %v900_v59 = vsel %vm74_vm4, %v899_v49, 0.0  ;;  %v960_v60 = vrot.slane %v959_v50, 4  ;;  %v769_v62 = vrot.slane %v768_v52, 1 }
 0x110   :  { %v828_v0 = vrot.slane %v827_v53, 1  ;;  %v835_v1 = vrot.slane %v834_v54, 2  ;;  %v894_v3 = vrot.slane %v893_v55, 2  ;;  %v762_v4 = vadd.f32 %v761_v58, %v694_v23 }
 0x111   :  { %v901_v5 = vrot.slane %v900_v59, 4  ;;  %v961_v6 = vadd.f32 %v960_v60, %v959_v50  ;;  %v967_v7 = vmul.f32 %v2326_v27, %v2326_v27  ;;  %v2336_v8 = vpop.f32.mrb[28].mxu0  ;;  %v770_v9 = vadd.f32 %v769_v62, %v768_v52  ;;  %v2338_v13 = vpop.f32.mrb[28].mxu1 }
 0x112   :  { %v829_v10 = vadd.f32 %v828_v0, %v827_v53  ;;  %v836_v11 = vadd.f32 %v835_v1, %v834_v54  ;;  %v895_v12 = vadd.f32 %v894_v3, %v893_v55  ;;  %v1983_v15 = vpop.f32.mrb[29].mxu0  ;;  %v1027_v20 = vsel %vm74_vm4, %v2336_v8, 0.0  ;;  %v1989_v21 = vpop.f32.mrb[29].mxu1 }
 0x113   :  { %v902_v16 = vadd.f32 %v901_v5, %v900_v59  ;;  %v962_v17 = vrot.slane %v961_v6, 2  ;;  %v968_v18 = vsel %vm74_vm4, %v967_v7, 0.0  ;;  %v1024_v23 = vpop.f32.mrb[30].mxu0  ;;  %v771_v24 = vadd.f32 %v770_v9, %v703_v56  ;;  %v1092_v29 = vpop.f32.mrb[30].mxu1 }
 0x114   :  { %v830_v25 = vadd.f32 %v829_v10, %v762_v4  ;;  %v837_v26 = vrot.slane %v836_v11, 1  ;;  %v896_v28 = vrot.slane %v895_v12, 1  ;;  %v1984_v30 = vpop.f32.mrb[31].mxu0  ;;  %v969_v33 = vrot.slane %v968_v18, 4  ;;  %v1990_v37 = vpop.f32.mrb[31].mxu1 }
 0x115   :  { %v903_v31 = vrot.slane %v902_v16, 2  ;;  %v963_v32 = vadd.f32 %v962_v17, %v961_v6  ;;  %v1028_v34 = vrot.slane %v1027_v20, 4  ;;  %v1035_v43 = vmul.f32 %v2336_v8, %v2336_v8 }
 0x116   :  { %v838_v40 = vadd.f32 %v837_v26, %v836_v11  ;;  %v897_v41 = vadd.f32 %v896_v28, %v895_v12  ;;  %v1095_v44 = vsel %vm74_vm4, %v2338_v13, 0.0  ;;  %v970_v48 = vadd.f32 %v969_v33, %v968_v18 }
 0x117   :  { %v904_v46 = vadd.f32 %v903_v31, %v902_v16  ;;  %v964_v47 = vrot.slane %v963_v32, 1  ;;  %v1029_v49 = vadd.f32 %v1028_v34, %v1027_v20  ;;  %v1036_v52 = vsel %vm74_vm4, %v1035_v43, 0.0 }
 0x118   :  { %v839_v50 = vadd.f32 %v838_v40, %v771_v24  ;;  %v898_v51 = vadd.f32 %v897_v41, %v830_v25  ;;  %v1096_v53 = vrot.slane %v1095_v44, 4  ;;  %v971_v56 = vrot.slane %v970_v48, 2 }
 0x119   :  { %v905_v54 = vrot.slane %v904_v46, 1  ;;  %v965_v55 = vadd.f32 %v964_v47, %v963_v32  ;;  %v1030_v58 = vrot.slane %v1029_v49, 2  ;;  %v1037_v59 = vrot.slane %v1036_v52, 4 }
 0x11a   :  { %v1097_v60 = vadd.f32 %v1096_v53, %v1095_v44  ;;  %v1103_v62 = vmul.f32 %v2338_v13, %v2338_v13  ;;  %v972_v3 = vadd.f32 %v971_v56, %v970_v48  ;;  %v1137_v48 = vlaneseq }
 0x11b   :  { %v906_v0 = vadd.f32 %v905_v54, %v904_v46  ;;  %v966_v1 = vadd.f32 %v965_v55, %v898_v51  ;;  %v1031_v4 = vadd.f32 %v1030_v58, %v1029_v49  ;;  %v1038_v5 = vadd.f32 %v1037_v59, %v1036_v52  ;;  %v1116_v52 = vld [vmem:[%s2588_s2] sm:$0x1] }
 0x11c   :  { %v1098_v6 = vrot.slane %v1097_v60, 2  ;;  %v1104_v7 = vsel %vm74_vm4, %v1103_v62, 0.0  ;;  %v973_v10 = vrot.slane %v972_v3, 1  ;;  %v1138_v49 = vshrl.u32 %v1137_v48, 7  ;;  %v1120_v58 = vld [vmem:[%s2589_s3] sm:$0x1] }
 0x11d   :  { %v907_v9 = vadd.f32 %v906_v0, %v839_v50  ;;  %v1032_v11 = vrot.slane %v1031_v4, 1  ;;  %v1105_v12 = vrot.slane %v1104_v7, 4  ;;  %v1039_v15 = vrot.slane %v1038_v5, 2 }
 0x11e   :  { %v1099_v16 = vadd.f32 %v1098_v6, %v1097_v60  ;;  %v974_v17 = vadd.f32 %v973_v10, %v972_v3  ;;  %v2016_v50 = vmov 1966171168   ;;  %v2354_v53 = vsub.s32 0, %v1138_v49 }
 0x11f   :  { %v1033_v18 = vadd.f32 %v1032_v11, %v1031_v4  ;;  %v1106_v20 = vadd.f32 %v1105_v12, %v1104_v7  ;;  %v1040_v21 = vadd.f32 %v1039_v15, %v1038_v5  ;;  %v1153_v51 = vunpack.c.l.s4 %v2016_v50 }
 0x120   :  { %v1100_v23 = vrot.slane %v1099_v16, 1  ;;  %v975_v24 = vadd.f32 %v974_v17, %v907_v9 }
 0x121   :  { %v1034_v25 = vadd.f32 %v1033_v18, %v966_v1  ;;  %v1107_v26 = vrot.slane %v1106_v20, 2  ;;  %v1041_v28 = vrot.slane %v1040_v21, 1  ;;  %v1154_v55 = vunpack.c.0.s8 %v1153_v51 }
 0x122   :  { %v1101_v29 = vadd.f32 %v1100_v23, %v1099_v16 }
 0x123   :  { %v1108_v30 = vadd.f32 %v1107_v26, %v1106_v20  ;;  %v1042_v31 = vadd.f32 %v1041_v28, %v1040_v21  ;;  %v2362_v62 = vsub.s32 %v1154_v55, %v1138_v49 }
 0x124   :  { %v1102_v32 = vadd.f32 %v1101_v29, %v1034_v25 }
 0x125   :  { %v1109_v33 = vrot.slane %v1108_v30, 1  ;;  %v1043_v34 = vadd.f32 %v1042_v31, %v975_v24 }
 0x126   :  { %v1112_v37 = vmul.f32 0.03125, %v1102_v32 }
 0x127   :  { %v1110_v40 = vadd.f32 %v1109_v33, %v1108_v30 }
 0x128   :  { %v1114_v43 = vmul.f32 %v1112_v37, %v1112_v37 }
 0x129   :  { %v1111_v41 = vadd.f32 %v1110_v40, %v1043_v34 }
 0x12b   :  { %v1113_v44 = vmul.f32 0.03125, %v1111_v41 }
 0x12d   :  { %v1115_v46 = vsub.f32 %v1113_v44, %v1114_v43 }
 0x12f   :  { %v1117_v47 = vadd.f32 1e-05, %v1115_v46 }
 0x131   :  { %2011 = vrsqrt.f32 %v1117_v47 }
 0x13b   :  { %v2012_v54 = vpop.eup %2011 }
 0x13c   :  { %v1119_v56 = vmul.f32 %v2012_v54, %v1116_v52 }
 0x13e   :  { %v1121_v59 = vmul.f32 %v1119_v56, %v1112_v37  ;;  %v2360_v60 = vrot.slane %v1119_v56, %v2354_v53 }
 0x140   :  { %v1122_v0 = vsub.f32 %v1120_v58, %v1121_v59  ;;  %v1142_v1 = vmul.f32 %v2360_v60, %v2239_v35  ;;  %v1174_v3 = vmul.f32 %v2360_v60, %v2245_v38  ;;  %v1200_v4 = vmul.f32 %v2360_v60, %v2253_v61 }
 0x141   :  { %v1226_v5 = vmul.f32 %v2360_v60, %v2259_v2  ;;  %v1312_v6 = vmul.f32 %v2360_v60, %v2267_v36  ;;  %v1338_v7 = vmul.f32 %v2360_v60, %v2273_v42  ;;  %v1364_v9 = vmul.f32 %v2360_v60, %v2281_v14 }
 0x142   :  { %v2379_v35 = vrot.slane %v1122_v0, %v2354_v53  ;;  %v1390_v38 = vmul.f32 %v2360_v60, %v2285_v19  ;;  %v2385_v61 = vmul.f32 %v2360_v60, %v2295_v57  ;;  %v2389_v2 = vmul.f32 %v2360_v60, %v2297_v63 }
 0x143   :  { %v2393_v36 = vmul.f32 %v2360_v60, %v2308_v39  ;;  %v2397_v42 = vmul.f32 %v2360_v60, %v2311_v45  ;;  %v2401_v14 = vmul.f32 %v2360_v60, %v2322_v22  ;;  %v2405_v19 = vmul.f32 %v2360_v60, %v2326_v27 }
 0x144   :  { %v1149_v57 = vadd.f32 %v2379_v35, %v1142_v1  ;;  %v1175_v63 = vadd.f32 %v1174_v3, %v2379_v35  ;;  %v1201_v10 = vadd.f32 %v1200_v4, %v2379_v35  ;;  %v1227_v39 = vadd.f32 %v1226_v5, %v2379_v35 }
 0x145   :  { %v1313_v45 = vadd.f32 %v1312_v6, %v2379_v35  ;;  %v1339_v11 = vadd.f32 %v1338_v7, %v2379_v35  ;;  %v1365_v22 = vadd.f32 %v1364_v9, %v2379_v35  ;;  %v1391_v12 = vadd.f32 %v1390_v38, %v2379_v35 }
 0x146   :  { %v1150_v27 = vmax.f32 %v1149_v57, 0.0  ;;  %v1176_v15 = vmax.f32 %v1175_v63, 0.0  ;;  %v1202_v16 = vmax.f32 %v1201_v10, 0.0  ;;  %v1228_v17 = vmax.f32 %v1227_v39, 0.0 }
 0x147   :  { %v1314_v18 = vmax.f32 %v1313_v45, 0.0  ;;  %v1340_v20 = vmax.f32 %v1339_v11, 0.0  ;;  %v1366_v21 = vmax.f32 %v1365_v22, 0.0  ;;  %v1392_v23 = vmax.f32 %v1391_v12, 0.0 }
 0x148   :  { %v1158_v24 = vrot.slane %v1150_v27, %v2362_v62  ;;  %v1184_v25 = vrot.slane %v1176_v15, %v2362_v62  ;;  %v1210_v26 = vrot.slane %v1202_v16, %v2362_v62  ;;  %v1236_v28 = vrot.slane %v1228_v17, %v2362_v62 }
 0x149   :  { %v1322_v29 = vrot.slane %v1314_v18, %v2362_v62  ;;  %v1348_v30 = vrot.slane %v1340_v20, %v2362_v62  ;;  %v1374_v31 = vrot.slane %v1366_v21, %v2362_v62  ;;  %v1400_v32 = vrot.slane %v1392_v23, %v2362_v62 }
 0x14a   :  { %v1159_v33 = vcombine.high %v1158_v24, %v1158_v24  ;;  %v1166_v34 = vrot.slane %v1158_v24, %v2362_v62  ;;  %v1185_v37 = vcombine.high %v1184_v25, %v1184_v25  ;;  %v1192_v40 = vrot.slane %v1184_v25, %v2362_v62 }
 0x14b   :  { %v1211_v41 = vcombine.high %v1210_v26, %v1210_v26  ;;  %v1218_v43 = vrot.slane %v1210_v26, %v2362_v62  ;;  %v1237_v44 = vcombine.high %v1236_v28, %v1236_v28  ;;  %v1244_v46 = vrot.slane %v1236_v28, %v2362_v62 }
 0x14c   :  { %v1173_v47 = vrot.slane %v1159_v33, %v2362_v62  ;;  %v1199_v48 = vrot.slane %v1185_v37, %v2362_v62  ;;  %v1255_v49 = vrot.slane %v1166_v34, %v2354_v53  ;;  %v1265_v50 = vrot.slane %v1192_v40, %v2354_v53 }
 0x14d   :  { %v1225_v51 = vrot.slane %v1211_v41, %v2362_v62  ;;  %v1251_v52 = vrot.slane %v1237_v44, %v2362_v62  ;;  %v1275_v54 = vrot.slane %v1218_v43, %v2354_v53  ;;  %v1285_v55 = vrot.slane %v1244_v46, %v2354_v53 }
 0x14e   :  { %v1259_v56 = vrot.slane %v1173_v47, %v2354_v53  ;;  %v1269_v58 = vrot.slane %v1199_v48, %v2354_v53  ;;  %v1293_v59 = vsel %vm1292_vm5, 0.0, %v1255_v49  ;;  %v1323_v0 = vcombine.high %v1322_v29, %v1322_v29 }
 0x14f   :  { %v1279_v1 = vrot.slane %v1225_v51, %v2354_v53  ;;  %v1289_v3 = vrot.slane %v1251_v52, %v2354_v53  ;;  %v1296_v4 = vsel %vm1295_vm6, %v1293_v59, %v1265_v50  ;;  %v1330_v5 = vrot.slane %v1322_v29, %v2362_v62 }
 0x150   :  { %v1294_v6 = vsel %vm1292_vm5, 0.0, %v1259_v56  ;;  %v1299_v7 = vsel %vm1298_vm7, %v1296_v4, %v1275_v54  ;;  %v1337_v9 = vrot.slane %v1323_v0, %v2362_v62  ;;  %v1349_v38 = vcombine.high %v1348_v30, %v1348_v30 }
 0x151   :  { %v1297_v57 = vsel %vm1295_vm6, %v1294_v6, %v1269_v58  ;;  %v1302_v63 = vsel %vm1301_vm8, %v1299_v7, %v1285_v55  ;;  %v1356_v10 = vrot.slane %v1348_v30, %v2362_v62  ;;  %v1375_v39 = vcombine.high %v1374_v31, %v1374_v31 }
 0x152   :  { %v1300_v45 = vsel %vm1298_vm7, %v1297_v57, %v1279_v1  ;;  %v1305_v11 = vsel %vm1304_vm9, %v1302_v63, 0.0  ;;  %v1363_v22 = vrot.slane %v1349_v38, %v2362_v62  ;;  %v1382_v12 = vrot.slane %v1374_v31, %v2362_v62 }
 0x153   :  { %v1303_v27 = vsel %vm1301_vm8, %v1300_v45, %v1289_v3  ;;  %v1307_v15 = vpack.c.bf16 %v1305_v11, %v1305_v11  ;;  %v1389_v16 = vrot.slane %v1375_v39, %v2362_v62  ;;  %v1401_v17 = vcombine.high %v1400_v32, %v1400_v32 }
 0x154   :  { %v1306_v18 = vsel %vm1304_vm9, %v1303_v27, 0.0  ;;  %v1408_v20 = vrot.slane %v1400_v32, %v2362_v62  ;;  %v1419_v21 = vrot.slane %v1330_v5, %v2354_v53  ;;  %v1423_v23 = vrot.slane %v1337_v9, %v2354_v53 }
 0x155   :  { %v1308_v24 = vpack.c.bf16 %v1306_v18, %v1306_v18  ;;  %1855 = vst.msk [vmem:[%s2587_s4 + $0x4] sm:$0x7] %vm1123_vm3, %v1307_v15  ;;  %v1415_v25 = vrot.slane %v1401_v17, %v2362_v62  ;;  %v1429_v26 = vrot.slane %v1356_v10, %v2354_v53  ;;  %v1433_v28 = vrot.slane %v1363_v22, %v2354_v53 }
 0x156   :  { %v1439_v29 = vrot.slane %v1382_v12, %v2354_v53  ;;  %v1443_v30 = vrot.slane %v1389_v16, %v2354_v53  ;;  %v1449_v31 = vrot.slane %v1408_v20, %v2354_v53  ;;  %v1456_v32 = vsel %vm1292_vm5, 0.0, %v1419_v21 }
 0x157   :  { %1856 = vst.msk [vmem:[%s2587_s4 + $0x1c] sm:$0x7] %vm1123_vm3, %v1308_v24  ;;  %v1453_v33 = vrot.slane %v1415_v25, %v2354_v53  ;;  %v1457_v34 = vsel %vm1292_vm5, 0.0, %v1423_v23  ;;  %v1458_v37 = vsel %vm1295_vm6, %v1456_v32, %v1429_v26  ;;  %v1472_v40 = vadd.f32 %v2385_v61, %v2379_v35 }
 0x158   :  { %v1459_v41 = vsel %vm1295_vm6, %v1457_v34, %v1433_v28  ;;  %v1460_v43 = vsel %vm1298_vm7, %v1458_v37, %v1439_v29  ;;  %v1498_v44 = vadd.f32 %v2389_v2, %v2379_v35  ;;  %v1524_v46 = vadd.f32 %v2393_v36, %v2379_v35 }
 0x159   :  { %v1461_v47 = vsel %vm1298_vm7, %v1459_v41, %v1443_v30  ;;  %v1462_v48 = vsel %vm1301_vm8, %v1460_v43, %v1449_v31  ;;  %v1473_v49 = vmax.f32 %v1472_v40, 0.0  ;;  %v1550_v50 = vadd.f32 %v2397_v42, %v2379_v35 }
 0x15a   :  { %v1463_v61 = vsel %vm1301_vm8, %v1461_v47, %v1453_v33  ;;  %v1464_v51 = vsel %vm1304_vm9, %v1462_v48, 0.0  ;;  %v1499_v52 = vmax.f32 %v1498_v44, 0.0  ;;  %v1525_v54 = vmax.f32 %v1524_v46, 0.0 }
 0x15b   :  { %v1465_v55 = vsel %vm1304_vm9, %v1463_v61, 0.0  ;;  %v1466_v2 = vpack.c.bf16 %v1464_v51, %v1464_v51  ;;  %v1481_v56 = vrot.slane %v1473_v49, %v2362_v62  ;;  %v1551_v36 = vmax.f32 %v1550_v50, 0.0 }
 0x15c   :  { %v1467_v58 = vpack.c.bf16 %v1465_v55, %v1465_v55  ;;  %v1507_v59 = vrot.slane %v1499_v52, %v2362_v62  ;;  %v1533_v0 = vrot.slane %v1525_v54, %v2362_v62  ;;  %v1631_v42 = vadd.f32 %v2401_v14, %v2379_v35 }
 0x15d   :  { %1857 = vst.msk [vmem:[%s2587_s4 + $0x8] sm:$0x7] %vm1123_vm3, %v1466_v2  ;;  %v1482_v1 = vcombine.high %v1481_v56, %v1481_v56  ;;  %v1489_v3 = vrot.slane %v1481_v56, %v2362_v62  ;;  %v1559_v4 = vrot.slane %v1551_v36, %v2362_v62  ;;  %v1657_v5 = vadd.f32 %v2405_v19, %v2379_v35 }
 0x15e   :  { %1858 = vst.msk [vmem:[%s2587_s4 + $0x20] sm:$0x7] %vm1123_vm3, %v1467_v58  ;;  %v1508_v6 = vcombine.high %v1507_v59, %v1507_v59  ;;  %v1515_v14 = vrot.slane %v1507_v59, %v2362_v62  ;;  %v1534_v7 = vcombine.high %v1533_v0, %v1533_v0  ;;  %v1541_v9 = vrot.slane %v1533_v0, %v2362_v62 }
 0x15f   :  { %v1496_v38 = vrot.slane %v1482_v1, %v2362_v62  ;;  %v1560_v57 = vcombine.high %v1559_v4, %v1559_v4  ;;  %v1567_v63 = vrot.slane %v1559_v4, %v2362_v62  ;;  %v1578_v10 = vrot.slane %v1489_v3, %v2354_v53 }
 0x160   :  { %v1522_v19 = vrot.slane %v1508_v6, %v2362_v62  ;;  %v1548_v39 = vrot.slane %v1534_v7, %v2362_v62  ;;  %v1588_v45 = vrot.slane %v1515_v14, %v2354_v53  ;;  %v1598_v11 = vrot.slane %v1541_v9, %v2354_v53 }
 0x161   :  { %v1574_v22 = vrot.slane %v1560_v57, %v2362_v62  ;;  %v1582_v12 = vrot.slane %v1496_v38, %v2354_v53  ;;  %v1608_v27 = vrot.slane %v1567_v63, %v2354_v53  ;;  %v1615_v15 = vsel %vm1292_vm5, 0.0, %v1578_v10 }
 0x162   :  { %v1592_v16 = vrot.slane %v1522_v19, %v2354_v53  ;;  %v1602_v17 = vrot.slane %v1548_v39, %v2354_v53  ;;  %v1617_v18 = vsel %vm1295_vm6, %v1615_v15, %v1588_v45  ;;  %v1632_v20 = vmax.f32 %v1631_v42, 0.0 }
 0x163   :  { %v1612_v21 = vrot.slane %v1574_v22, %v2354_v53  ;;  %v1616_v23 = vsel %vm1292_vm5, 0.0, %v1582_v12  ;;  %v1619_v24 = vsel %vm1298_vm7, %v1617_v18, %v1598_v11  ;;  %v1658_v25 = vmax.f32 %v1657_v5, 0.0 }
 0x164   :  { %v1618_v26 = vsel %vm1295_vm6, %v1616_v23, %v1592_v16  ;;  %v1621_v28 = vsel %vm1301_vm8, %v1619_v24, %v1608_v27  ;;  %v1640_v29 = vrot.slane %v1632_v20, %v2362_v62  ;;  %v1682_v30 = vmul.f32 %v2360_v60, %v2336_v8 }
 0x165   :  { %v1620_v31 = vsel %vm1298_vm7, %v1618_v26, %v1602_v17  ;;  %v1623_v32 = vsel %vm1304_vm9, %v1621_v28, 0.0  ;;  %v1666_v33 = vrot.slane %v1658_v25, %v2362_v62  ;;  %v1708_v34 = vmul.f32 %v2360_v60, %v2338_v13 }
 0x166   :  { %v1622_v37 = vsel %vm1301_vm8, %v1620_v31, %v1612_v21  ;;  %v1625_v40 = vpack.c.bf16 %v1623_v32, %v1623_v32  ;;  %v1641_v41 = vcombine.high %v1640_v29, %v1640_v29  ;;  %v1648_v43 = vrot.slane %v1640_v29, %v2362_v62 }
 0x167   :  { %v1624_v44 = vsel %vm1304_vm9, %v1622_v37, 0.0  ;;  %v1667_v46 = vcombine.high %v1666_v33, %v1666_v33  ;;  %v1674_v8 = vrot.slane %v1666_v33, %v2362_v62  ;;  %v1683_v47 = vadd.f32 %v1682_v30, %v2379_v35 }
 0x168   :  { %v1626_v48 = vpack.c.bf16 %v1624_v44, %v1624_v44  ;;  %1859 = vst.msk [vmem:[%s2587_s4 + $0xc] sm:$0x7] %vm1123_vm3, %v1625_v40  ;;  %v1655_v13 = vrot.slane %v1641_v41, %v2362_v62  ;;  %v1709_v60 = vadd.f32 %v1708_v34, %v2379_v35  ;;  %v1737_v49 = vrot.slane %v1648_v43, %v2354_v53 }
 0x169   :  { %v1681_v50 = vrot.slane %v1667_v46, %v2362_v62  ;;  %v1684_v61 = vmax.f32 %v1683_v47, 0.0  ;;  %v1747_v51 = vrot.slane %v1674_v8, %v2354_v53 }
 0x16a   :  { %1860 = vst.msk [vmem:[%s2587_s4 + $0x24] sm:$0x7] %vm1123_vm3, %v1626_v48  ;;  %v1710_v52 = vmax.f32 %v1709_v60, 0.0  ;;  %v1741_v54 = vrot.slane %v1655_v13, %v2354_v53  ;;  %v1774_v55 = vsel %vm1292_vm5, 0.0, %v1737_v49 }
 0x16b   :  { %v1692_v2 = vrot.slane %v1684_v61, %v2362_v62  ;;  %v1751_v35 = vrot.slane %v1681_v50, %v2354_v53  ;;  %v1776_v56 = vsel %vm1295_vm6, %v1774_v55, %v1747_v51 }
 0x16c   :  { %v1718_v36 = vrot.slane %v1710_v52, %v2362_v62  ;;  %v1775_v58 = vsel %vm1292_vm5, 0.0, %v1741_v54 }
 0x16d   :  { %v1693_v59 = vcombine.high %v1692_v2, %v1692_v2  ;;  %v1700_v0 = vrot.slane %v1692_v2, %v2362_v62  ;;  %v1777_v42 = vsel %vm1295_vm6, %v1775_v58, %v1751_v35 }
 0x16e   :  { %v1719_v1 = vcombine.high %v1718_v36, %v1718_v36  ;;  %v1726_v3 = vrot.slane %v1718_v36, %v2362_v62 }
 0x16f   :  { %v1707_v4 = vrot.slane %v1693_v59, %v2362_v62  ;;  %v1757_v5 = vrot.slane %v1700_v0, %v2354_v53 }
 0x170   :  { %v1733_v6 = vrot.slane %v1719_v1, %v2362_v62  ;;  %v1767_v14 = vrot.slane %v1726_v3, %v2354_v53 }
 0x171   :  { %v1761_v7 = vrot.slane %v1707_v4, %v2354_v53  ;;  %v1778_v9 = vsel %vm1298_vm7, %v1776_v56, %v1757_v5 }
 0x172   :  { %v1771_v38 = vrot.slane %v1733_v6, %v2354_v53  ;;  %v1780_v57 = vsel %vm1301_vm8, %v1778_v9, %v1767_v14 }
 0x173   :  { %v1779_v63 = vsel %vm1298_vm7, %v1777_v42, %v1761_v7  ;;  %v1782_v10 = vsel %vm1304_vm9, %v1780_v57, 0.0 }
 0x174   :  { %v1781_v19 = vsel %vm1301_vm8, %v1779_v63, %v1771_v38  ;;  %v1784_v39 = vpack.c.bf16 %v1782_v10, %v1782_v10 }
 0x175   :  { %v1783_v45 = vsel %vm1304_vm9, %v1781_v19, 0.0 }
 0x176   :  { %v1785_v62 = vpack.c.bf16 %v1783_v45, %v1783_v45  ;;  %1861 = vst.msk [vmem:[%s2587_s4 + $0x10] sm:$0x7] %vm1123_vm3, %v1784_v39 }
 0x178   :  { %1862 = vst.msk [vmem:[%s2587_s4 + $0x28] sm:$0x7] %vm1123_vm3, %v1785_v62 }

// kernel: generator_forward.6
= control target key start
LH: loop header
LB: loop body
LE: loop exit
PB: predicated region body
PF: predicated region fallthrough
CT: control target
= control target key end

     0   :  { %vm15_vm0 = vcmask 60416   ;;  %vm17_vm1 = vcmask 57344   ;;  %v535_v0 = vmov 0   ;;  %vm199_vm2 = vcmask 1040384   ;;  %s942_s3 = inlined_call_operand.vmem [shape: bf16[2,10,10,8], index: 3, kind: output, shape index: {}]   ;;  %s943_s0 = inlined_call_operand.vmem [shape: bf16[2,8,8,8], index: 0, kind: input, shape index: {}]   ;;  %s944_s1 = inlined_call_operand.vmem [shape: f32[1,8], index: 1, kind: input, shape index: {}]   ;;  %s945_s2 = inlined_call_operand.vmem [shape: f32[1,8], index: 2, kind: input, shape index: {}]  }
   0x1   :  { %19 = vst.msk [vmem:[%s942_s3 + $0x8] sm:$0xf] %vm15_vm0, %v535_v0  ;;  %16 = vst.msk [vmem:[%s942_s3] sm:$0xf] %vm15_vm0, %v535_v0  ;;  %v496_v1 = vld [vmem:[%s943_s0] sm:$0xff]   ;;  %v527_v5 = vld [vmem:[%s943_s0 + $0x8] sm:$0xff]  }
   0x2   :  { %21 = vst.msk [vmem:[%s942_s3 + $0x10] sm:$0xf] %vm15_vm0, %v535_v0  ;;  %23 = vst.msk [vmem:[%s942_s3 + $0x18] sm:$0xf] %vm15_vm0, %v535_v0  ;;  %v722_v2 = vld [vmem:[%s944_s1] ss:$0 sm:$0xff]  ;;  %v497_v3 = vunpack.c.l.bf16 %v496_v1  ;;  %v498_v4 = vunpack.c.h.bf16 %v496_v1  ;;  %v501_v9 = vunpack.c.l.bf16 %v527_v5  ;;  %v502_v10 = vunpack.c.h.bf16 %v527_v5 }
   0x3   :  { %25 = vst.msk [vmem:[%s942_s3 + $0x20] sm:$0xf] %vm15_vm0, %v535_v0  ;;  %27 = vst.msk [vmem:[%s942_s3 + $0x28] sm:$0xf] %vm15_vm0, %v535_v0  ;;  %v528_v6 = vld [vmem:[%s943_s0 + $0x10] sm:$0xff]   ;;  %v529_v7 = vld [vmem:[%s943_s0 + $0x18] sm:$0xff]  }
   0x4   :  { %29 = vst.msk [vmem:[%s942_s3 + $0x30] sm:$0xf] %vm15_vm0, %v535_v0  ;;  %31 = vst.msk [vmem:[%s942_s3 + $0x38] sm:$0xf] %vm15_vm0, %v535_v0  ;;  %v736_v8 = vld [vmem:[%s945_s2] ss:$0 sm:$0xff]  ;;  %v505_v11 = vunpack.c.l.bf16 %v528_v6  ;;  %v506_v12 = vunpack.c.h.bf16 %v528_v6  ;;  %v96_v13 = vmul.f32 %v497_v3, %v722_v2  ;;  %v97_v14 = vmul.f32 %v498_v4, %v722_v2 }
   0x5   :  { %33 = vst.msk [vmem:[%s942_s3 + $0x40] sm:$0xf] %vm15_vm0, %v535_v0  ;;  %35 = vst.msk [vmem:[%s942_s3 + $0x48] sm:$0xf] %vm15_vm0, %v535_v0  ;;  %v509_v15 = vunpack.c.l.bf16 %v529_v7  ;;  %v510_v16 = vunpack.c.h.bf16 %v529_v7  ;;  %v98_v17 = vmul.f32 %v501_v9, %v722_v2  ;;  %v99_v18 = vmul.f32 %v502_v10, %v722_v2  ;;  %v530_v61 = vld [vmem:[%s943_s0 + $0x20] sm:$0xff]   ;;  %v531_v3 = vld [vmem:[%s943_s0 + $0x28] sm:$0xff]  }
   0x6   :  { %37 = vst.msk [vmem:[%s942_s3 + $0x50] sm:$0xf] %vm15_vm0, %v535_v0  ;;  %39 = vst.msk [vmem:[%s942_s3 + $0x58] sm:$0xf] %vm15_vm0, %v535_v0  ;;  %v100_v19 = vmul.f32 %v505_v11, %v722_v2  ;;  %v101_v20 = vmul.f32 %v506_v12, %v722_v2  ;;  %v119_v21 = vadd.f32 %v736_v8, %v96_v13  ;;  %v532_v4 = vld [vmem:[%s943_s0 + $0x30] sm:$0xff]   ;;  %v513_v12 = vunpack.c.l.bf16 %v530_v61 }
   0x7   :  { %41 = vst.msk [vmem:[%s942_s3 + $0x60] sm:$0xf] %vm15_vm0, %v535_v0  ;;  %43 = vst.msk [vmem:[%s942_s3 + $0x68] sm:$0xf] %vm15_vm0, %v535_v0  ;;  %v120_v22 = vadd.f32 %v736_v8, %v97_v14  ;;  %v102_v23 = vmul.f32 %v509_v15, %v722_v2  ;;  %v103_v24 = vmul.f32 %v510_v16, %v722_v2  ;;  %v514_v13 = vunpack.c.h.bf16 %v530_v61 }
   0x8   :  { %45 = vst.msk [vmem:[%s942_s3 + $0x70] sm:$0xf] %vm15_vm0, %v535_v0  ;;  %47 = vst.msk [vmem:[%s942_s3 + $0x78] sm:$0xf] %vm15_vm0, %v535_v0  ;;  %v121_v25 = vadd.f32 %v736_v8, %v98_v17  ;;  %v122_v26 = vadd.f32 %v736_v8, %v99_v18  ;;  %v123_v27 = vadd.f32 %v736_v8, %v100_v19  ;;  %v135_v29 = vmax.f32 %v119_v21, 0.0 }
   0x9   :  { %49 = vst.msk [vmem:[%s942_s3 + $0x80] sm:$0xf] %vm15_vm0, %v535_v0  ;;  %51 = vst.msk [vmem:[%s942_s3 + $0x88] sm:$0xf] %vm15_vm0, %v535_v0  ;;  %v124_v28 = vadd.f32 %v736_v8, %v101_v20  ;;  %v136_v30 = vmax.f32 %v120_v22, 0.0  ;;  %v125_v31 = vadd.f32 %v736_v8, %v102_v23  ;;  %v126_v32 = vadd.f32 %v736_v8, %v103_v24  ;;  %v533_v22 = vld [vmem:[%s943_s0 + $0x38] sm:$0xff]  }
   0xa   :  { %53 = vst.msk [vmem:[%s942_s3 + $0x90] sm:$0xf] %vm15_vm0, %v535_v0  ;;  %55 = vst.msk [vmem:[%s942_s3 + $0x98] sm:$0xf] %vm15_vm0, %v535_v0  ;;  %v137_v33 = vmax.f32 %v121_v25, 0.0  ;;  %v138_v34 = vmax.f32 %v122_v26, 0.0  ;;  %v517_v14 = vunpack.c.l.bf16 %v531_v3  ;;  %v518_v15 = vunpack.c.h.bf16 %v531_v3 }
   0xb   :  { %20 = vst.msk [vmem:[%s942_s3 + $0xc] sm:$0x1] %vm17_vm1, %v535_v0  ;;  %18 = vst.msk [vmem:[%s942_s3 + $0x4] sm:$0x1] %vm17_vm1, %v535_v0  ;;  %v139_v35 = vmax.f32 %v123_v27, 0.0  ;;  %v140_v36 = vmax.f32 %v124_v28, 0.0  ;;  %v521_v16 = vunpack.c.l.bf16 %v532_v4  ;;  %v522_v17 = vunpack.c.h.bf16 %v532_v4 }
   0xc   :  { %22 = vst.msk [vmem:[%s942_s3 + $0x14] sm:$0x1] %vm17_vm1, %v535_v0  ;;  %24 = vst.msk [vmem:[%s942_s3 + $0x1c] sm:$0x1] %vm17_vm1, %v535_v0  ;;  %v167_v37 = vrot.slane %v135_v29, 7  ;;  %v168_v38 = vrot.slane %v136_v30, 7  ;;  %v104_v27 = vmul.f32 %v513_v12, %v722_v2  ;;  %v105_v28 = vmul.f32 %v514_v13, %v722_v2 }
   0xd   :  { %26 = vst.msk [vmem:[%s942_s3 + $0x24] sm:$0x1] %vm17_vm1, %v535_v0  ;;  %28 = vst.msk [vmem:[%s942_s3 + $0x2c] sm:$0x1] %vm17_vm1, %v535_v0  ;;  %v141_v39 = vmax.f32 %v125_v31, 0.0  ;;  %v142_v40 = vmax.f32 %v126_v32, 0.0  ;;  %v106_v29 = vmul.f32 %v517_v14, %v722_v2  ;;  %v107_v30 = vmul.f32 %v518_v15, %v722_v2 }
   0xe   :  { %30 = vst.msk [vmem:[%s942_s3 + $0x34] sm:$0x1] %vm17_vm1, %v535_v0  ;;  %32 = vst.msk [vmem:[%s942_s3 + $0x3c] sm:$0x1] %vm17_vm1, %v535_v0  ;;  %v169_v41 = vrot.slane %v137_v33, 7  ;;  %v170_v42 = vrot.slane %v138_v34, 7  ;;  %v108_v31 = vmul.f32 %v521_v16, %v722_v2  ;;  %v109_v32 = vmul.f32 %v522_v17, %v722_v2 }
   0xf   :  { %34 = vst.msk [vmem:[%s942_s3 + $0x44] sm:$0x1] %vm17_vm1, %v535_v0  ;;  %36 = vst.msk [vmem:[%s942_s3 + $0x4c] sm:$0x1] %vm17_vm1, %v535_v0  ;;  %v171_v43 = vrot.slane %v139_v35, 7  ;;  %v172_v44 = vrot.slane %v140_v36, 7  ;;  %v525_v33 = vunpack.c.l.bf16 %v533_v22  ;;  %v526_v34 = vunpack.c.h.bf16 %v533_v22 }
  0x10   :  { %38 = vst.msk [vmem:[%s942_s3 + $0x54] sm:$0x1] %vm17_vm1, %v535_v0  ;;  %40 = vst.msk [vmem:[%s942_s3 + $0x5c] sm:$0x1] %vm17_vm1, %v535_v0  ;;  %v200_v45 = vsel %vm199_vm2, 0.0, %v167_v37  ;;  %v216_v46 = vsel %vm199_vm2, %v167_v37, 0.0  ;;  %v127_v35 = vadd.f32 %v736_v8, %v104_v27  ;;  %v128_v36 = vadd.f32 %v736_v8, %v105_v28 }
  0x11   :  { %42 = vst.msk [vmem:[%s942_s3 + $0x64] sm:$0x1] %vm17_vm1, %v535_v0  ;;  %44 = vst.msk [vmem:[%s942_s3 + $0x6c] sm:$0x1] %vm17_vm1, %v535_v0  ;;  %v201_v47 = vsel %vm199_vm2, 0.0, %v168_v38  ;;  %v217_v48 = vsel %vm199_vm2, %v168_v38, 0.0  ;;  %v463_v49 = vpack.c.bf16 %v200_v45, %v200_v45  ;;  %v464_v50 = vpack.c.bf16 %v216_v46, %v216_v46 }
  0x12   :  { %46 = vst.msk [vmem:[%s942_s3 + $0x74] sm:$0x1] %vm17_vm1, %v535_v0  ;;  %48 = vst.msk [vmem:[%s942_s3 + $0x7c] sm:$0x1] %vm17_vm1, %v535_v0  ;;  %v465_v51 = vpack.c.bf16 %v201_v47, %v201_v47  ;;  %v466_v52 = vpack.c.bf16 %v217_v48, %v217_v48  ;;  %v202_v53 = vsel %vm199_vm2, 0.0, %v169_v41  ;;  %v218_v54 = vsel %vm199_vm2, %v169_v41, 0.0 }
  0x13   :  { %50 = vst.msk [vmem:[%s942_s3 + $0x84] sm:$0x1] %vm17_vm1, %v535_v0  ;;  %52 = vst.msk [vmem:[%s942_s3 + $0x8c] sm:$0x1] %vm17_vm1, %v535_v0  ;;  %v203_v55 = vsel %vm199_vm2, 0.0, %v170_v42  ;;  %v219_v56 = vsel %vm199_vm2, %v170_v42, 0.0  ;;  %v467_v57 = vpack.c.bf16 %v202_v53, %v202_v53  ;;  %v468_v58 = vpack.c.bf16 %v218_v54, %v218_v54 }
  0x14   :  { %54 = vst.msk [vmem:[%s942_s3 + $0x94] sm:$0x1] %vm17_vm1, %v535_v0  ;;  %56 = vst.msk [vmem:[%s942_s3 + $0x9c] sm:$0x1] %vm17_vm1, %v535_v0  ;;  %v469_v59 = vpack.c.bf16 %v203_v55, %v203_v55  ;;  %v470_v60 = vpack.c.bf16 %v219_v56, %v219_v56  ;;  %v204_v62 = vsel %vm199_vm2, 0.0, %v171_v43  ;;  %v220_v63 = vsel %vm199_vm2, %v171_v43, 0.0 }
  0x15   :  { %431 = vst.msk [vmem:[%s942_s3 + $0x8] sm:$0xf] %vm15_vm0, %v463_v49  ;;  %433 = vst.msk [vmem:[%s942_s3 + $0x10] sm:$0xf] %vm15_vm0, %v465_v51  ;;  %v205_v0 = vsel %vm199_vm2, 0.0, %v172_v44  ;;  %v221_v1 = vsel %vm199_vm2, %v172_v44, 0.0  ;;  %v471_v5 = vpack.c.bf16 %v204_v62, %v204_v62  ;;  %v472_v6 = vpack.c.bf16 %v220_v63, %v220_v63 }
  0x16   :  { %432 = vst.msk [vmem:[%s942_s3 + $0xc] sm:$0x1] %vm17_vm1, %v464_v50  ;;  %434 = vst.msk [vmem:[%s942_s3 + $0x14] sm:$0x1] %vm17_vm1, %v466_v52  ;;  %v473_v7 = vpack.c.bf16 %v205_v0, %v205_v0  ;;  %v474_v9 = vpack.c.bf16 %v221_v1, %v221_v1  ;;  %v173_v10 = vrot.slane %v141_v39, 7  ;;  %v174_v11 = vrot.slane %v142_v40, 7 }
  0x17   :  { %435 = vst.msk [vmem:[%s942_s3 + $0x18] sm:$0xf] %vm15_vm0, %v467_v57  ;;  %437 = vst.msk [vmem:[%s942_s3 + $0x20] sm:$0xf] %vm15_vm0, %v469_v59  ;;  %v129_v37 = vadd.f32 %v736_v8, %v106_v29  ;;  %v130_v38 = vadd.f32 %v736_v8, %v107_v30  ;;  %v131_v39 = vadd.f32 %v736_v8, %v108_v31  ;;  %v143_v43 = vmax.f32 %v127_v35, 0.0 }
  0x18   :  { %436 = vst.msk [vmem:[%s942_s3 + $0x1c] sm:$0x1] %vm17_vm1, %v468_v58  ;;  %438 = vst.msk [vmem:[%s942_s3 + $0x24] sm:$0x1] %vm17_vm1, %v470_v60  ;;  %v206_v18 = vsel %vm199_vm2, 0.0, %v173_v10  ;;  %v222_v19 = vsel %vm199_vm2, %v173_v10, 0.0  ;;  %v132_v40 = vadd.f32 %v736_v8, %v109_v32  ;;  %v110_v41 = vmul.f32 %v525_v33, %v722_v2 }
  0x19   :  { %439 = vst.msk [vmem:[%s942_s3 + $0x28] sm:$0xf] %vm15_vm0, %v471_v5  ;;  %441 = vst.msk [vmem:[%s942_s3 + $0x30] sm:$0xf] %vm15_vm0, %v473_v7  ;;  %v207_v20 = vsel %vm199_vm2, 0.0, %v174_v11  ;;  %v223_v21 = vsel %vm199_vm2, %v174_v11, 0.0  ;;  %v475_v23 = vpack.c.bf16 %v206_v18, %v206_v18  ;;  %v476_v24 = vpack.c.bf16 %v222_v19, %v222_v19 }
  0x1a   :  { %440 = vst.msk [vmem:[%s942_s3 + $0x2c] sm:$0x1] %vm17_vm1, %v472_v6  ;;  %442 = vst.msk [vmem:[%s942_s3 + $0x34] sm:$0x1] %vm17_vm1, %v474_v9  ;;  %v477_v25 = vpack.c.bf16 %v207_v20, %v207_v20  ;;  %v478_v26 = vpack.c.bf16 %v223_v21, %v223_v21  ;;  %v111_v42 = vmul.f32 %v526_v34, %v722_v2  ;;  %v144_v44 = vmax.f32 %v128_v36, 0.0 }
  0x1b   :  { %443 = vst.msk [vmem:[%s942_s3 + $0x38] sm:$0xf] %vm15_vm0, %v475_v23  ;;  %v145_v45 = vmax.f32 %v129_v37, 0.0  ;;  %v146_v46 = vmax.f32 %v130_v38, 0.0  ;;  %v147_v47 = vmax.f32 %v131_v39, 0.0  ;;  %v148_v48 = vmax.f32 %v132_v40, 0.0 }
  0x1c   :  { %444 = vst.msk [vmem:[%s942_s3 + $0x3c] sm:$0x1] %vm17_vm1, %v476_v24  ;;  %446 = vst.msk [vmem:[%s942_s3 + $0x44] sm:$0x1] %vm17_vm1, %v478_v26  ;;  %v133_v49 = vadd.f32 %v736_v8, %v110_v41  ;;  %v134_v50 = vadd.f32 %v736_v8, %v111_v42  ;;  %v175_v51 = vrot.slane %v143_v43, 7  ;;  %v176_v52 = vrot.slane %v144_v44, 7 }
  0x1d   :  { %445 = vst.msk [vmem:[%s942_s3 + $0x40] sm:$0xf] %vm15_vm0, %v477_v25  ;;  %v177_v53 = vrot.slane %v145_v45, 7  ;;  %v178_v54 = vrot.slane %v146_v46, 7  ;;  %v179_v55 = vrot.slane %v147_v47, 7  ;;  %v180_v56 = vrot.slane %v148_v48, 7 }
  0x1e   :  { %v149_v57 = vmax.f32 %v133_v49, 0.0  ;;  %v150_v58 = vmax.f32 %v134_v50, 0.0  ;;  %v208_v2 = vsel %vm199_vm2, 0.0, %v175_v51  ;;  %v224_v59 = vsel %vm199_vm2, %v175_v51, 0.0 }
  0x1f   :  { %v209_v60 = vsel %vm199_vm2, 0.0, %v176_v52  ;;  %v225_v61 = vsel %vm199_vm2, %v176_v52, 0.0  ;;  %v479_v62 = vpack.c.bf16 %v208_v2, %v208_v2  ;;  %v480_v63 = vpack.c.bf16 %v224_v59, %v224_v59 }
  0x20   :  { %v481_v0 = vpack.c.bf16 %v209_v60, %v209_v60  ;;  %v482_v8 = vpack.c.bf16 %v225_v61, %v225_v61  ;;  %v210_v1 = vsel %vm199_vm2, 0.0, %v177_v53  ;;  %v226_v3 = vsel %vm199_vm2, %v177_v53, 0.0 }
  0x21   :  { %v211_v4 = vsel %vm199_vm2, 0.0, %v178_v54  ;;  %v227_v5 = vsel %vm199_vm2, %v178_v54, 0.0  ;;  %447 = vst.msk [vmem:[%s942_s3 + $0x58] sm:$0xf] %vm15_vm0, %v479_v62  ;;  %v483_v6 = vpack.c.bf16 %v210_v1, %v210_v1  ;;  %v484_v7 = vpack.c.bf16 %v226_v3, %v226_v3 }
  0x22   :  { %448 = vst.msk [vmem:[%s942_s3 + $0x5c] sm:$0x1] %vm17_vm1, %v480_v63  ;;  %450 = vst.msk [vmem:[%s942_s3 + $0x64] sm:$0x1] %vm17_vm1, %v482_v8  ;;  %v485_v9 = vpack.c.bf16 %v211_v4, %v211_v4  ;;  %v486_v10 = vpack.c.bf16 %v227_v5, %v227_v5  ;;  %v212_v11 = vsel %vm199_vm2, 0.0, %v179_v55  ;;  %v228_v12 = vsel %vm199_vm2, %v179_v55, 0.0 }
  0x23   :  { %449 = vst.msk [vmem:[%s942_s3 + $0x60] sm:$0xf] %vm15_vm0, %v481_v0  ;;  %v213_v13 = vsel %vm199_vm2, 0.0, %v180_v56  ;;  %v229_v14 = vsel %vm199_vm2, %v180_v56, 0.0  ;;  %451 = vst.msk [vmem:[%s942_s3 + $0x68] sm:$0xf] %vm15_vm0, %v483_v6  ;;  %v487_v15 = vpack.c.bf16 %v212_v11, %v212_v11  ;;  %v488_v16 = vpack.c.bf16 %v228_v12, %v228_v12 }
  0x24   :  { %452 = vst.msk [vmem:[%s942_s3 + $0x6c] sm:$0x1] %vm17_vm1, %v484_v7  ;;  %454 = vst.msk [vmem:[%s942_s3 + $0x74] sm:$0x1] %vm17_vm1, %v486_v10  ;;  %v489_v17 = vpack.c.bf16 %v213_v13, %v213_v13  ;;  %v490_v18 = vpack.c.bf16 %v229_v14, %v229_v14  ;;  %v181_v19 = vrot.slane %v149_v57, 7  ;;  %v182_v20 = vrot.slane %v150_v58, 7 }
  0x25   :  { %453 = vst.msk [vmem:[%s942_s3 + $0x70] sm:$0xf] %vm15_vm0, %v485_v9  ;;  %455 = vst.msk [vmem:[%s942_s3 + $0x78] sm:$0xf] %vm15_vm0, %v487_v15 }
  0x26   :  { %456 = vst.msk [vmem:[%s942_s3 + $0x7c] sm:$0x1] %vm17_vm1, %v488_v16  ;;  %458 = vst.msk [vmem:[%s942_s3 + $0x84] sm:$0x1] %vm17_vm1, %v490_v18  ;;  %v214_v21 = vsel %vm199_vm2, 0.0, %v181_v19  ;;  %v230_v22 = vsel %vm199_vm2, %v181_v19, 0.0 }
  0x27   :  { %457 = vst.msk [vmem:[%s942_s3 + $0x80] sm:$0xf] %vm15_vm0, %v489_v17  ;;  %v215_v23 = vsel %vm199_vm2, 0.0, %v182_v20  ;;  %v231_v24 = vsel %vm199_vm2, %v182_v20, 0.0  ;;  %v491_v25 = vpack.c.bf16 %v214_v21, %v214_v21  ;;  %v492_v26 = vpack.c.bf16 %v230_v22, %v230_v22 }
  0x28   :  { %v493_v27 = vpack.c.bf16 %v215_v23, %v215_v23  ;;  %v494_v28 = vpack.c.bf16 %v231_v24, %v231_v24 }
  0x29   :  { %459 = vst.msk [vmem:[%s942_s3 + $0x88] sm:$0xf] %vm15_vm0, %v491_v25 }
  0x2a   :  { %460 = vst.msk [vmem:[%s942_s3 + $0x8c] sm:$0x1] %vm17_vm1, %v492_v26  ;;  %462 = vst.msk [vmem:[%s942_s3 + $0x94] sm:$0x1] %vm17_vm1, %v494_v28 }
  0x2b   :  { %461 = vst.msk [vmem:[%s942_s3 + $0x90] sm:$0xf] %vm15_vm0, %v493_v27 }

// kernel: generator_forward.5
= control target key start
LH: loop header
LB: loop body
LE: loop exit
PB: predicated region body
PF: predicated region fallthrough
CT: control target
= control target key end

     0   :  { %v231_v0 = vlaneseq  ;;  %vm954_vm0 = vcmask 1040384   ;;  %v3485_v2 = vmov 1983009808   ;;  %vm955_vm1 = vcmask 1042434   ;;  %s4099_s1 = inlined_call_operand.vmem [shape: bf16[16,16,8], index: 1, kind: input, shape index: {}]   ;;  %s4100_s0 = inlined_call_operand.vmem [shape: bf16[2,6,6,16], index: 0, kind: input, shape index: {}]   ;;  %s4101_s3 = inlined_call_operand.vmem [shape: f32[1,2,8], index: 3, kind: output, shape index: {1}]   ;;  %s4102_s2 = inlined_call_operand.vmem [shape: bf16[8,2,4,16], index: 2, kind: output, shape index: {0}]  }
   0x1   :  { %v3437_v1 = vld [vmem:[%s4099_s1 + $0x28] sm:$0xff]   ;;  %v229_v3 = vunpack.c.l.s4 %v3485_v2  ;;  %v3041_v5 = vld.sshfl [vmem:[%s4100_s0] sm:$0x12 pattern:$0x76325410]  ;;  %vm956_vm2 = vmor %vm954_vm0, %vm955_vm1  ;;  %vm957_vm3 = vcmask 1044484  }
   0x2   :  { %v232_v4 = vshrl.u32 %v231_v0, 7  ;;  %3315 = vmatprep.subr.bf16.mxu1 %v3437_v1  ;;  %v3042_v7 = vld.sshfl [vmem:[%s4100_s0 + $0x4] sm:$0x12 pattern:$0x76325410]  ;;  %v897_v8 = vcombine.high %v3041_v5, %v3041_v5  ;;  %vm958_vm4 = vmor %vm956_vm2, %vm957_vm3  ;;  %vm959_vm5 = vcmask 1046534  }
   0x3   :  { %v230_v6 = vunpack.c.0.s8 %v229_v3  ;;  %v3049_v9 = vrot.slane %v3041_v5, 9  ;;  %3316 = vmatpush3.bf16.msra.mxu1 %v3437_v1  ;;  %v3043_v10 = vld.sshfl [vmem:[%s4100_s0 + $0x8] sm:$0x12 pattern:$0x76325410]  ;;  %v905_v11 = vcombine.high %v3042_v7, %v3042_v7  ;;  %vm3520_vm6 = vmor %vm958_vm4, %vm959_vm5  ;;  %v3050_v13 = vrot.slane %v3042_v7, 9 }
   0x4   :  { %v3527_v14 = vld [vmem:[%s4099_s1 + $0x20] sm:$0xff]   ;;  %v3044_v15 = vld.sshfl [vmem:[%s4100_s0 + $0xc] sm:$0x12 pattern:$0x76325410]  ;;  %v913_v16 = vcombine.high %v3043_v10, %v3043_v10  ;;  %v963_v17 = vrot.slane %v897_v8, 7 }
   0x5   :  { %v3051_v18 = vrot.slane %v3043_v10, 9  ;;  %v921_v19 = vcombine.high %v3044_v15, %v3044_v15  ;;  %v967_v20 = vrot.slane %v905_v11, 7  ;;  %v3052_v21 = vrot.slane %v3044_v15, 9  ;;  %3321 = vmatprep.subr.bf16.mxu1 %v3527_v14  ;;  %v3439_v25 = vld [vmem:[%s4099_s1 + $0x8] sm:$0xff]   ;;  %v3558_v34 = vld [vmem:[%s4099_s1] sm:$0xff]  }
   0x6   :  { %v3533_v22 = vsub.s32 %v230_v6, %v232_v4  ;;  %v964_v23 = vsel %vm3520_vm6, %v3049_v9, %v963_v17  ;;  %v971_v24 = vrot.slane %v913_v16, 7  ;;  %v3045_v28 = vld.sshfl [vmem:[%s4100_s0 + $0x18] sm:$0x12 pattern:$0x76325410]  ;;  %3291 = vmatprep.subr.bf16.mxu0 %v3439_v25  ;;  %vm266_vm7 = vcmask 130048  }
   0x7   :  { %v3542_v26 = vsel %vm3520_vm6, %v3050_v13, %v967_v20  ;;  %v975_v27 = vrot.slane %v921_v19, 7  ;;  %v3046_v31 = vld.sshfl [vmem:[%s4100_s0 + $0x1c] sm:$0x12 pattern:$0x76325410]  ;;  %v929_v32 = vcombine.high %v3045_v28, %v3045_v28  ;;  %v3053_v33 = vrot.slane %v3045_v28, 9  ;;  %3292 = vmatpush3.bf16.msra.mxu0 %v3439_v25 }
   0x8   :  { %v3549_v29 = vsel %vm3520_vm6, %v3051_v18, %v971_v24  ;;  %v996_v30 = vcombine.low %v964_v23, %v3542_v26  ;;  %v3047_v36 = vld.sshfl [vmem:[%s4100_s0 + $0x20] sm:$0x12 pattern:$0x76325410]  ;;  %v937_v37 = vcombine.high %v3046_v31, %v3046_v31  ;;  %v3054_v38 = vrot.slane %v3046_v31, 9  ;;  %3297 = vmatprep.subr.bf16.mxu0 %v3558_v34  ;;  %v3617_v23 = vld [vmem:[%s4099_s1 + $0x30] sm:$0xff]  }
   0x9   :  { %v3562_v35 = vsel %vm3520_vm6, %v3052_v21, %v975_v27  ;;  %v3048_v41 = vld.sshfl [vmem:[%s4100_s0 + $0x24] sm:$0x12 pattern:$0x76325410]  ;;  %v945_v42 = vcombine.high %v3047_v36, %v3047_v36  ;;  %v979_v43 = vrot.slane %v929_v32, 7  ;;  %v3055_v46 = vrot.slane %v3047_v36, 9 }
   0xa   :  { %v997_v39 = vcombine.low %v3549_v29, %v3562_v35  ;;  %v1004_v40 = vrot.slane %v996_v30, %v3533_v22  ;;  %v953_v44 = vcombine.high %v3048_v41, %v3048_v41  ;;  %v983_v45 = vrot.slane %v937_v37, 7  ;;  %v2989_v51 = vld.sshfl [vmem:[%s4100_s0] sm:$0x13 pattern:$0x76325410] }
   0xb   :  { %v3056_v47 = vrot.slane %v3048_v41, 9  ;;  %v980_v49 = vsel %vm3520_vm6, %v3053_v33, %v979_v43  ;;  %v987_v50 = vrot.slane %v945_v42, 7  ;;  %v2990_v54 = vld.sshfl [vmem:[%s4100_s0 + $0x4] sm:$0x13 pattern:$0x76325410]  ;;  %v47_v60 = vcombine.high %v2989_v51, %v2989_v51 }
   0xc   :  { %v1011_v48 = vrot.slane %v997_v39, %v3533_v22  ;;  %v3582_v52 = vsel %vm3520_vm6, %v3054_v38, %v983_v45  ;;  %v991_v53 = vrot.slane %v953_v44, 7  ;;  %v112_v55 = vshrl.u32 %v2989_v51, 16  ;;  %v2991_v59 = vld.sshfl [vmem:[%s4100_s0 + $0x8] sm:$0x13 pattern:$0x76325410] }
   0xd   :  { %v3589_v57 = vsel %vm3520_vm6, %v3055_v46, %v987_v50  ;;  %v1013_v58 = vcombine.low %v980_v49, %v3582_v52  ;;  %v2992_v62 = vld.sshfl [vmem:[%s4100_s0 + $0xc] sm:$0x13 pattern:$0x76325410]  ;;  %v55_v63 = vcombine.high %v2990_v54, %v2990_v54  ;;  %v63_v0 = vcombine.high %v2991_v59, %v2991_v59 }
   0xe   :  { %v1012_v56 = vcombine.low %v1004_v40, %v1011_v48  ;;  %v3597_v61 = vsel %vm3520_vm6, %v3056_v47, %v991_v53  ;;  %vm104_vm8 = vsmask.f32 1280  ;;  %v71_v3 = vcombine.high %v2992_v62, %v2992_v62  ;;  %v2993_v21 = vld.sshfl [vmem:[%s4100_s0 + $0x18] sm:$0x13 pattern:$0x76325410] }
   0xf   :  { %v1014_v1 = vcombine.low %v3589_v57, %v3597_v61  ;;  %v1021_v2 = vrot.slane %v1013_v58, %v3533_v22  ;;  %vm105_vm9 = vsmask.f32 3336  ;;  %vm107_vm11 = vsmask.f32 5392 }
  0x10   :  { %3317 = vmatprep.mubr.msk.bf16.mxu1 %vm266_vm7, %v1012_v56  ;;  %vm106_vm10 = vmor %vm104_vm8, %vm105_vm9  ;;  %vm109_vm12 = vsmask.f32 7448  ;;  %v114_v4 = vrot.slane %v112_v55, 6  ;;  %v115_v5 = vshll.u32 %v2989_v51, 16  ;;  %v121_v7 = vshll.u32 %v47_v60, 16 }
  0x11   :  { %v1028_v6 = vrot.slane %v1014_v1, %v3533_v22  ;;  %v126_v8 = vshrl.u32 %v2990_v54, 16  ;;  %v129_v9 = vshll.u32 %v2990_v54, 16  ;;  %vm3607_vm13 = vmor %vm106_vm10, %vm107_vm11  ;;  %v135_v13 = vshll.u32 %v55_v63, 16 }
  0x12   :  { %v117_v11 = vrot.slane %v115_v5, 7  ;;  %v140_v15 = vshrl.u32 %v2991_v59, 16  ;;  %v143_v16 = vshll.u32 %v2991_v59, 16  ;;  %v123_v18 = vrot.slane %v121_v7, 7  ;;  %vm3623_vm14 = vmor %vm3607_vm13, %vm109_vm12 }
  0x13   :  { %v1029_v17 = vcombine.low %v1021_v2, %v1028_v6  ;;  %v128_v19 = vrot.slane %v126_v8, 6  ;;  %v131_v20 = vrot.slane %v129_v9, 7  ;;  %v137_v25 = vrot.slane %v135_v13, 7 }
  0x14   :  { %v118_v24 = vor.u32 %v117_v11, %v114_v4  ;;  %v142_v27 = vrot.slane %v140_v15, 6  ;;  %v145_v28 = vrot.slane %v143_v16, 7  ;;  %v149_v32 = vshll.u32 %v63_v0, 16 }
  0x15   :  { %3318 = vmatmul.mubr.msk.bf16.vlgmr.msra.gmra.mrb[0].mxu1 %vm266_vm7, %v1029_v17  ;;  %v132_v31 = vor.u32 %v131_v20, %v128_v19  ;;  %v154_v33 = vshrl.u32 %v2992_v62, 16  ;;  %v157_v36 = vshll.u32 %v2992_v62, 16  ;;  %v163_v39 = vshll.u32 %v71_v3, 16 }
  0x16   :  { %3322 = vmatpush3.bf16.msra.mxu1 %v3527_v14  ;;  %v119_v37 = vrot.slane %v118_v24, 2  ;;  %v146_v38 = vor.u32 %v145_v28, %v142_v27  ;;  %v2994_v40 = vld.sshfl [vmem:[%s4100_s0 + $0x1c] sm:$0x13 pattern:$0x76325410]  ;;  %v79_v41 = vcombine.high %v2993_v21, %v2993_v21  ;;  %v151_v43 = vrot.slane %v149_v32, 7 }
  0x17   :  { %v133_v42 = vrot.slane %v132_v31, 2  ;;  %v156_v44 = vrot.slane %v154_v33, 6  ;;  %v159_v45 = vrot.slane %v157_v36, 7  ;;  %3327 = vmatprep.subr.bf16.mxu1 %v3617_v23  ;;  %v165_v48 = vrot.slane %v163_v39, 7 }
  0x18   :  { %v124_v46 = vsel %vm3623_vm14, %v119_v37, %v123_v18  ;;  %v147_v47 = vrot.slane %v146_v38, 2  ;;  %v2995_v14 = vld.sshfl [vmem:[%s4100_s0 + $0x20] sm:$0x13 pattern:$0x76325410]  ;;  %v87_v49 = vcombine.high %v2994_v40, %v2994_v40  ;;  %v168_v55 = vshrl.u32 %v2993_v21, 16 }
  0x19   :  { %v3639_v50 = vsel %vm3623_vm14, %v133_v42, %v137_v25  ;;  %v160_v51 = vor.u32 %v159_v45, %v156_v44  ;;  %v2996_v53 = vld.sshfl [vmem:[%s4100_s0 + $0x24] sm:$0x13 pattern:$0x76325410]  ;;  %v95_v54 = vcombine.high %v2995_v14, %v2995_v14  ;;  %v171_v60 = vshll.u32 %v2993_v21, 16 }
  0x1a   :  { %v3646_v56 = vsel %vm3623_vm14, %v147_v47, %v151_v43  ;;  %v226_v58 = vcombine.low %v124_v46, %v3639_v50  ;;  %v103_v59 = vcombine.high %v2996_v53, %v2996_v53  ;;  %v170_v63 = vrot.slane %v168_v55, 6  ;;  %v3029_v27 = vld.sshfl [vmem:[%s4100_s0 + $0x10] sm:$0x13 pattern:$0x76325410] }
  0x1b   :  { %v161_v62 = vrot.slane %v160_v51, 2  ;;  %v177_v0 = vshll.u32 %v79_v41, 16  ;;  %v182_v1 = vshrl.u32 %v2994_v40, 16  ;;  %v173_v3 = vrot.slane %v171_v60, 7 }
  0x1c   :  { %v234_v2 = vrot.slane %v226_v58, %v3533_v22  ;;  %v185_v4 = vshll.u32 %v2994_v40, 16  ;;  %v191_v5 = vshll.u32 %v87_v49, 16  ;;  %v196_v9 = vshrl.u32 %v2995_v14, 16 }
  0x1d   :  { %v3652_v6 = vsel %vm3623_vm14, %v161_v62, %v165_v48  ;;  %v179_v7 = vrot.slane %v177_v0, 7  ;;  %v184_v8 = vrot.slane %v182_v1, 6  ;;  %v174_v11 = vor.u32 %v173_v3, %v170_v63  ;;  %v3663_v33 = vld.sshfl [vmem:[%s4100_s0] sm:$0xf pattern:$0x76325410] }
  0x1e   :  { %v227_v10 = vcombine.low %v3646_v56, %v3652_v6  ;;  %v187_v13 = vrot.slane %v185_v4, 7  ;;  %v193_v15 = vrot.slane %v191_v5, 7  ;;  %v198_v16 = vrot.slane %v196_v9, 6 }
  0x1f   :  { %v199_v17 = vshll.u32 %v2995_v14, 16  ;;  %v205_v18 = vshll.u32 %v95_v54, 16  ;;  %v210_v19 = vshrl.u32 %v2996_v53, 16  ;;  %v175_v21 = vrot.slane %v174_v11, 2 }
  0x20   :  { %v241_v20 = vrot.slane %v227_v10, %v3533_v22  ;;  %v188_v24 = vor.u32 %v187_v13, %v184_v8  ;;  %v213_v25 = vshll.u32 %v2996_v53, 16  ;;  %v219_v32 = vshll.u32 %v103_v59, 16  ;;  %v3668_v36 = vld.sshfl [vmem:[%s4100_s0 + $0x8] sm:$0xf pattern:$0x76325410] }
  0x21   :  { %v201_v28 = vrot.slane %v199_v17, 7  ;;  %v212_v31 = vrot.slane %v210_v19, 6  ;;  %v180_v38 = vsel %vm3623_vm14, %v175_v21, %v179_v7  ;;  %v207_v42 = vrot.slane %v205_v18, 7  ;;  %v3446_v10 = vld [vmem:[%s4099_s1 + $0x38] sm:$0xff]  }
  0x22   :  { %v242_v37 = vcombine.low %v234_v2, %v241_v20  ;;  %v189_v39 = vrot.slane %v188_v24, 2  ;;  %v215_v40 = vrot.slane %v213_v25, 7  ;;  %v221_v45 = vrot.slane %v219_v32, 7  ;;  %v3447_v24 = vld [vmem:[%s4099_s1 + $0x10] sm:$0xff]  }
  0x23   :  { %v202_v41 = vor.u32 %v201_v28, %v198_v16  ;;  %v667_v46 = vshrl.u32 %v3029_v27, 16  ;;  %v3033_v47 = vld.sshfl [vmem:[%s4100_s0 + $0x28] sm:$0x13 pattern:$0x76325410]  ;;  %v591_v51 = vcombine.high %v3029_v27, %v3029_v27  ;;  %v670_v54 = vshll.u32 %v3029_v27, 16 }
  0x24   :  { %3293 = vmatprep.mubr.msk.bf16.mxu0 %vm266_vm7, %v242_v37  ;;  %v194_v43 = vsel %vm3623_vm14, %v189_v39, %v193_v15  ;;  %v216_v44 = vor.u32 %v215_v40, %v212_v31  ;;  %3323 = vmatprep.mubr.msk.bf16.mxu1 %vm266_vm7, %v242_v37  ;;  %v623_v62 = vcombine.high %v3033_v47, %v3033_v47  ;;  %v723_v1 = vshrl.u32 %v3033_v47, 16  ;;  %v3471_v8 = vld.sshfl [vmem:[%s4100_s0 + $0x18] sm:$0xf pattern:$0x76325410] }
  0x25   :  { %v203_v48 = vrot.slane %v202_v41, 2  ;;  %v243_v14 = vcombine.low %v180_v38, %v194_v43  ;;  %v669_v53 = vrot.slane %v667_v46, 6  ;;  %v672_v59 = vrot.slane %v670_v54, 7 }
  0x26   :  { %v217_v49 = vrot.slane %v216_v44, 2  ;;  %v676_v60 = vshll.u32 %v591_v51, 16  ;;  %v726_v2 = vshll.u32 %v3033_v47, 16  ;;  %v732_v5 = vshll.u32 %v623_v62, 16  ;;  %v3453_v51 = vld [vmem:[%s4099_s1 + $0x18] sm:$0xff]  }
  0x27   :  { %v208_v55 = vsel %vm3623_vm14, %v203_v48, %v207_v42  ;;  %v251_v0 = vrot.slane %v243_v14, %v3533_v22  ;;  %v673_v3 = vor.u32 %v672_v59, %v669_v53  ;;  %v739_v9 = vcombine.low %v3639_v50, %v3646_v56  ;;  %v3081_v15 = vld.sshfl [vmem:[%s4100_s0 + $0x10] sm:$0x12 pattern:$0x76325410] }
  0x28   :  { %v222_v58 = vsel %vm3623_vm14, %v217_v49, %v221_v45  ;;  %v678_v4 = vrot.slane %v676_v60, 7  ;;  %v725_v11 = vrot.slane %v723_v1, 6  ;;  %v728_v13 = vrot.slane %v726_v2, 7 }
  0x29   :  { %v244_v63 = vcombine.low %v208_v55, %v222_v58  ;;  %v3472_v16 = vld.sshfl [vmem:[%s4100_s0 + $0x20] sm:$0xf pattern:$0x76325410]  ;;  %v674_v17 = vrot.slane %v673_v3, 2  ;;  %v734_v18 = vrot.slane %v732_v5, 7  ;;  %v346_v50 = vcombine.low %v3663_v33, %v3668_v36 }
  0x2a   :  { %v729_v56 = vor.u32 %v728_v13, %v725_v11  ;;  %v3085_v20 = vld.sshfl [vmem:[%s4100_s0 + $0x28] sm:$0x12 pattern:$0x76325410]  ;;  %v756_v25 = vcombine.low %v194_v43, %v208_v55  ;;  %v1255_v27 = vcombine.high %v3081_v15, %v3081_v15  ;;  %v3089_v28 = vrot.slane %v3081_v15, 9 }
  0x2b   :  { %v258_v7 = vrot.slane %v244_v63, %v3533_v22  ;;  %v3706_v21 = vsel %vm3623_vm14, %v674_v17, %v678_v4  ;;  %v747_v32 = vrot.slane %v739_v9, %v3533_v22  ;;  %v3473_v36 = vld.sshfl [vmem:[%s4100_s0 + $0x4] sm:$0xf pattern:$0x76325410]  ;;  %v1287_v37 = vcombine.high %v3085_v20, %v3085_v20 }
  0x2c   :  { %v740_v31 = vcombine.low %v3652_v6, %v3706_v21  ;;  %v730_v33 = vrot.slane %v729_v56, 2  ;;  %v1302_v38 = vrot.slane %v1255_v27, 7  ;;  %v1323_v39 = vcombine.low %v3542_v26, %v3549_v29  ;;  %v3474_v41 = vld.sshfl [vmem:[%s4100_s0 + $0xc] sm:$0xf pattern:$0x76325410] }
  0x2d   :  { %v259_v19 = vcombine.low %v251_v0, %v258_v7  ;;  %v3093_v43 = vrot.slane %v3085_v20, 9  ;;  %v1318_v44 = vrot.slane %v1287_v37, 7  ;;  %v363_v48 = vcombine.low %v3471_v8, %v3472_v16  ;;  %v3475_v49 = vld.sshfl [vmem:[%s4100_s0 + $0x1c] sm:$0xf pattern:$0x76325410] }
  0x2e   :  { %v754_v6 = vrot.slane %v740_v31, %v3533_v22  ;;  %v3727_v40 = vsel %vm3623_vm14, %v730_v33, %v734_v18  ;;  %v3736_v26 = vsel %vm3520_vm6, %v3089_v28, %v1302_v38  ;;  %v1331_v46 = vrot.slane %v1323_v39, %v3533_v22  ;;  %v3154_v54 = vld.sshfl [vmem:[%s4100_s0 + $0x8] sm:$0x13 pattern:$0x76325410]  ;;  %v3454_v28 = vld [vmem:[%s4099_s1 + $0x60] sm:$0xff]  }
  0x2f   :  { %3294 = vmatmul.mubr.msk.bf16.vlgmr.msra.gmra.mrb[0].mxu0 %vm266_vm7, %v259_v19  ;;  %3324 = vmatmul.mubr.msk.bf16.vlgmr.msra.gmra.mrb[0].mxu1 %vm266_vm7, %v259_v19  ;;  %v1324_v42 = vcombine.low %v3562_v35, %v3736_v26  ;;  %v3452_v35 = vld [vmem:[%s4099_s1 + $0x68] sm:$0xff]   ;;  %v3760_v53 = vsel %vm3520_vm6, %v3093_v43, %v1318_v44  ;;  %v461_v55 = vcombine.low %v3473_v36, %v3474_v41  ;;  %v3157_v0 = vld.sshfl [vmem:[%s4100_s0 + $0x14] sm:$0x13 pattern:$0x76325410]  ;;  %v2107_v1 = vshrl.u32 %v3154_v54, 16 }
  0x30   :  { %3328 = vmatpush3.bf16.msra.mxu1 %v3617_v23  ;;  %3298 = vmatpush3.bf16.msra.mxu0 %v3558_v34  ;;  %v757_v34 = vcombine.low %v222_v58, %v3727_v40  ;;  %v764_v23 = vrot.slane %v756_v25, %v3533_v22  ;;  %v3738_v29 = vcombine.low %v747_v32, %v754_v6  ;;  %v3476_v58 = vld.sshfl [vmem:[%s4100_s0 + $0x24] sm:$0xf pattern:$0x76325410]  ;;  %v2110_v3 = vshll.u32 %v3154_v54, 16 }
  0x31   :  { %3299 = vmatprep.mubr.msk.bf16.mxu0 %vm266_vm7, %v346_v50  ;;  %3333 = vmatprep.subr.bf16.mxu1 %v3446_v10  ;;  %v1338_v47 = vrot.slane %v1324_v42, %v3533_v22  ;;  %v3155_v60 = vld.sshfl [vmem:[%s4100_s0 + $0xc] sm:$0x13 pattern:$0x76325410]  ;;  %v1340_v62 = vcombine.low %v3582_v52, %v3589_v57  ;;  %v1341_v63 = vcombine.low %v3597_v61, %v3760_v53  ;;  %v2149_v52 = vshrl.u32 %v3157_v0, 16 }
  0x32   :  { %3303 = vmatprep.subr.bf16.mxu0 %v3447_v24  ;;  %v771_v45 = vrot.slane %v757_v34, %v3533_v22  ;;  %3329 = vmatprep.mubr.msk.bf16.mxu1 %vm266_vm7, %v3738_v29  ;;  %v2049_v2 = vcombine.high %v3154_v54, %v3154_v54  ;;  %v2121_v4 = vshrl.u32 %v3155_v60, 16  ;;  %v2124_v5 = vshll.u32 %v3155_v60, 16  ;;  %v3158_v56 = vld.sshfl [vmem:[%s4100_s0 + $0x20] sm:$0x13 pattern:$0x76325410] }
  0x33   :  { %v1339_v59 = vcombine.low %v1331_v46, %v1338_v47  ;;  %v2152_v57 = vshll.u32 %v3157_v0, 16  ;;  %v1348_v61 = vrot.slane %v1340_v62, %v3533_v22  ;;  %v1355_v7 = vrot.slane %v1341_v63, %v3533_v22  ;;  %v3159_v20 = vld.sshfl [vmem:[%s4100_s0 + $0x24] sm:$0x13 pattern:$0x76325410]  ;;  %v3455_v31 = vld [vmem:[%s4099_s1 + $0x48] sm:$0xff]  }
  0x34   :  { %v3747_v14 = vcombine.low %v764_v23, %v771_v45  ;;  %v2057_v8 = vcombine.high %v3155_v60, %v3155_v60  ;;  %v2073_v9 = vcombine.high %v3157_v0, %v3157_v0  ;;  %v2112_v11 = vrot.slane %v2110_v3, 7  ;;  %v3161_v27 = vld.sshfl [vmem:[%s4100_s0 + $0x2c] sm:$0x13 pattern:$0x76325410]  ;;  %v3808_v54 = vld [vmem:[%s4099_s1 + $0x70] sm:$0xff]  }
  0x35   :  { %v2116_v13 = vshll.u32 %v2049_v2, 16  ;;  %v2123_v15 = vrot.slane %v2121_v4, 6  ;;  %v2126_v16 = vrot.slane %v2124_v5, 7  ;;  %v2151_v17 = vrot.slane %v2149_v52, 6 }
  0x36   :  { %v2154_v18 = vrot.slane %v2152_v57, 7  ;;  %v478_v19 = vcombine.low %v3475_v49, %v3476_v58  ;;  %v1356_v50 = vcombine.low %v1348_v61, %v1355_v7  ;;  %v2158_v25 = vshll.u32 %v2073_v9, 16  ;;  %v3813_v62 = vld.sshfl [vmem:[%s4100_s0 + $0x4] sm:$0xf pattern:$0x76325410] }
  0x37   :  { %v2127_v33 = vor.u32 %v2126_v16, %v2123_v15  ;;  %v2163_v37 = vshrl.u32 %v3158_v56, 16  ;;  %v2166_v38 = vshll.u32 %v3158_v56, 16  ;;  %v2177_v39 = vshrl.u32 %v3159_v20, 16 }
  0x38   :  { %v2155_v36 = vor.u32 %v2154_v18, %v2151_v17  ;;  %v2180_v6 = vshll.u32 %v3159_v20, 16  ;;  %v2205_v41 = vshrl.u32 %v3161_v27, 16  ;;  %v2208_v34 = vshll.u32 %v3161_v27, 16 }
  0x39   :  { %v2118_v23 = vrot.slane %v2116_v13, 7  ;;  %v2160_v43 = vrot.slane %v2158_v25, 7  ;;  %v2128_v45 = vrot.slane %v2127_v33, 2  ;;  %v2081_v47 = vcombine.high %v3158_v56, %v3158_v56 }
  0x3a   :  { %v2156_v46 = vrot.slane %v2155_v36, 2  ;;  %v2105_v49 = vcombine.high %v3161_v27, %v3161_v27  ;;  %v2182_v58 = vrot.slane %v2180_v6, 7  ;;  %v2210_v60 = vrot.slane %v2208_v34, 7 }
  0x3b   :  { %3300 = vmatmul.mubr.msk.bf16.vlgmr.msra.gmra.mrb[0].mxu0 %vm266_vm7, %v363_v48  ;;  %3330 = vmatmul.mubr.msk.bf16.vlgmr.msra.gmra.mrb[0].mxu1 %vm266_vm7, %v3747_v14  ;;  %v2089_v48 = vcombine.high %v3159_v20, %v3159_v20  ;;  %v3214_v63 = vld.sshfl [vmem:[%s4100_s0 + $0x8] sm:$0x12 pattern:$0x76325410]  ;;  %v2172_v5 = vshll.u32 %v2081_v47, 16  ;;  %vm838_vm15 = vcmask 64512  }
  0x3c   :  { %3334 = vmatpush3.bf16.msra.mxu1 %v3446_v10  ;;  %3304 = vmatpush3.bf16.msra.mxu0 %v3447_v24  ;;  %v2109_v10 = vrot.slane %v2107_v1, 6  ;;  %v2130_v24 = vshll.u32 %v2057_v8, 16  ;;  %v3821_v0 = vld.sshfl [vmem:[%s4100_s0 + $0xc] sm:$0xf pattern:$0x76325410]  ;;  %v2161_v3 = vsel %vm3623_vm14, %v2156_v46, %v2160_v43  ;;  %v2705_v15 = vcombine.high %v3214_v63, %v3214_v63 }
  0x3d   :  { %3305 = vmatprep.mubr.msk.bf16.mxu0 %vm266_vm7, %v461_v55  ;;  %3335 = vmatprep.mubr.msk.bf16.mxu1 %vm266_vm7, %v1339_v59  ;;  %v2179_v55 = vrot.slane %v2177_v39, 6  ;;  %v3215_v4 = vld.sshfl [vmem:[%s4100_s0 + $0xc] sm:$0x12 pattern:$0x76325410]  ;;  %v2186_v52 = vshll.u32 %v2089_v48, 16  ;;  %v2222_v13 = vcombine.low %v3706_v21, %v2161_v3 }
  0x3e   :  { %3363 = vmatprep.subr.bf16.mxu1 %v3452_v35  ;;  %3309 = vmatprep.subr.bf16.mxu0 %v3453_v51  ;;  %v2113_v32 = vor.u32 %v2112_v11, %v2109_v10  ;;  %v2132_v42 = vrot.slane %v2130_v24, 7  ;;  %v3217_v57 = vld.sshfl [vmem:[%s4100_s0 + $0x14] sm:$0x12 pattern:$0x76325410]  ;;  %v2214_v9 = vshll.u32 %v2105_v49, 16  ;;  %v2713_v16 = vcombine.high %v3215_v4, %v3215_v4 }
  0x3f   :  { %v2183_v7 = vor.u32 %v2182_v58, %v2179_v55  ;;  %v3457_v10 = vld [vmem:[%s4099_s1 + $0x40] sm:$0xff]   ;;  %v2729_v17 = vcombine.high %v3217_v57, %v3217_v57  ;;  %v2174_v18 = vrot.slane %v2172_v5, 7  ;;  %v2236_v21 = vrot.slane %v2222_v13, %v3533_v22  ;;  %v3481_v58 = vld.sshfl [vmem:[%s4100_s0 + $0x8] sm:$0xf pattern:$0x76325410] }
  0x40   :  { %v2114_v44 = vrot.slane %v2113_v32, 2  ;;  %v2133_v2 = vsel %vm3623_vm14, %v2128_v45, %v2132_v42  ;;  %v2216_v24 = vrot.slane %v2214_v9, 7  ;;  %v3222_v27 = vrot.slane %v3214_v63, 9 }
  0x41   :  { %v2184_v56 = vrot.slane %v2183_v7, 2  ;;  %v2764_v32 = vrot.slane %v2705_v15, 7  ;;  %v2768_v33 = vrot.slane %v2713_v16, 7  ;;  %v3225_v36 = vrot.slane %v3217_v57, 9 }
  0x42   :  { %v2119_v1 = vsel %vm3623_vm14, %v2114_v44, %v2118_v23  ;;  %v3219_v6 = vld.sshfl [vmem:[%s4100_s0 + $0x24] sm:$0x12 pattern:$0x76325410]  ;;  %v3462_v23 = vld [vmem:[%s4099_s1 + $0x78] sm:$0xff]   ;;  %v3463_v44 = vld [vmem:[%s4099_s1 + $0x50] sm:$0xff]  }
  0x43   :  { %v2221_v11 = vcombine.low %v2119_v1, %v2133_v2  ;;  %v3221_v42 = vld.sshfl [vmem:[%s4100_s0 + $0x2c] sm:$0x12 pattern:$0x76325410]  ;;  %v2765_v45 = vsel %vm3520_vm6, %v3222_v27, %v2764_v32  ;;  %vm2979_vm1 = vcmask 58368   ;;  %vm1494_vm2 = vcmask 123904  }
  0x44   :  { %v3479_v30 = vld.sshfl [vmem:[%s4100_s0 + $0x1c] sm:$0xf pattern:$0x76325410]  ;;  %v2761_v55 = vcombine.high %v3221_v42, %v3221_v42  ;;  %v3229_v2 = vrot.slane %v3221_v42, 9 }
  0x45   :  { %v2229_v25 = vrot.slane %v2221_v11, %v3533_v22  ;;  %v3480_v43 = vld.sshfl [vmem:[%s4100_s0 + $0x24] sm:$0xf pattern:$0x76325410] }
  0x46   :  { %v2792_v3 = vrot.slane %v2761_v55, 7  ;;  %v3483_v11 = vld.sshfl [vmem:[%s4100_s0 + $0x20] sm:$0xf pattern:$0x76325410] }
  0x47   :  { %3306 = vmatmul.mubr.msk.bf16.vlgmr.msra.gmra.mrb[0].mxu0 %vm266_vm7, %v478_v19  ;;  %3336 = vmatmul.mubr.msk.bf16.vlgmr.msra.gmra.mrb[0].mxu1 %vm266_vm7, %v1356_v50  ;;  %v2188_v19 = vrot.slane %v2186_v52, 7  ;;  %v2237_v34 = vcombine.low %v2229_v25, %v2236_v21  ;;  %v1845_v52 = vcombine.low %v3479_v30, %v3480_v43  ;;  %v3484_v13 = vld.sshfl [vmem:[%s4100_s0 + $0x28] sm:$0xf pattern:$0x76325410] }
  0x48   :  { %3364 = vmatpush3.bf16.msra.mxu1 %v3452_v35  ;;  %3310 = vmatpush3.bf16.msra.mxu0 %v3453_v51  ;;  %v2165_v35 = vrot.slane %v2163_v37, 6  ;;  %v2168_v51 = vrot.slane %v2166_v38, 7  ;;  %v2776_v37 = vrot.slane %v2729_v17, 7  ;;  %v2793_v7 = vsel %vm3520_vm6, %v3229_v2, %v2792_v3 }
  0x49   :  { %3311 = vmatprep.mubr.msk.bf16.mxu0 %vm266_vm7, %v3738_v29  ;;  %3365 = vmatprep.mubr.msk.bf16.mxu1 %vm266_vm7, %v1339_v59  ;;  %v2207_v59 = vrot.slane %v2205_v41, 6  ;;  %v2189_v38 = vsel %vm3623_vm14, %v2184_v56, %v2188_v19  ;;  %v1828_v41 = vcombine.low %v3813_v62, %v3821_v0  ;;  %v3227_v0 = vrot.slane %v3219_v6, 9 }
  0x4a   :  { %3369 = vmatprep.subr.bf16.mxu1 %v3454_v28  ;;  %3339 = vmatprep.subr.bf16.mxu0 %v3455_v31  ;;  %v2169_v61 = vor.u32 %v2168_v51, %v2165_v35  ;;  %v2777_v47 = vsel %vm3520_vm6, %v3225_v36, %v2776_v37  ;;  %v2745_v51 = vcombine.high %v3219_v6, %v3219_v6 }
  0x4b   :  { %v2211_v8 = vor.u32 %v2210_v60, %v2207_v59  ;;  %v2815_v15 = vcombine.low %v3760_v53, %v2793_v7 }
  0x4c   :  { %v2784_v1 = vrot.slane %v2745_v51, 7 }
  0x4d   :  { %v2212_v20 = vrot.slane %v2211_v8, 2  ;;  %v2829_v17 = vrot.slane %v2815_v15, %v3533_v22 }
  0x4f   :  { %3366 = vmatmul.mubr.msk.bf16.vlgmr.msra.gmra.mrb[4].mxu1 %vm266_vm7, %v1356_v50  ;;  %v2170_v50 = vrot.slane %v2169_v61, 2  ;;  %v2217_v39 = vsel %vm3623_vm14, %v2212_v20, %v2216_v24  ;;  %v2785_v61 = vsel %vm3520_vm6, %v3227_v0, %v2784_v1 }
  0x50   :  { %3370 = vmatpush3.bf16.msra.mxu1 %v3454_v28  ;;  %3371 = vmatprep.mubr.msk.bf16.mxu1 %vm266_vm7, %v3738_v29  ;;  %v3223_v28 = vrot.slane %v3215_v4, 9  ;;  %v2239_v49 = vcombine.low %v3727_v40, %v2217_v39  ;;  %v2798_v40 = vcombine.low %v3736_v26, %v2777_v47 }
  0x51   :  { %3375 = vmatprep.subr.bf16.mxu1 %v3808_v54 }
  0x52   :  { %v2769_v46 = vsel %vm3520_vm6, %v3223_v28, %v2768_v33  ;;  %v2253_v60 = vrot.slane %v2239_v49, %v3533_v22  ;;  %v2812_v5 = vrot.slane %v2798_v40, %v3533_v22 }
  0x53   :  { %3312 = vmatmul.mubr.msk.bf16.vlgmr.msra.gmra.mrb[0].mxu0 %vm266_vm7, %v3747_v14  ;;  %v2797_v59 = vcombine.low %v2765_v45, %v2769_v46 }
  0x54   :  { %3340 = vmatpush3.bf16.msra.mxu0 %v3455_v31  ;;  %3341 = vmatprep.mubr.msk.bf16.mxu0 %vm266_vm7, %v3738_v29  ;;  %v3218_v31 = vld.sshfl [vmem:[%s4100_s0 + $0x20] sm:$0x12 pattern:$0x76325410]  ;;  %v2175_v29 = vsel %vm3623_vm14, %v2170_v50, %v2174_v18  ;;  %v1960_v18 = vcombine.low %v3483_v11, %v3484_v13 }
  0x55   :  { %3345 = vmatprep.subr.bf16.mxu0 %v3457_v10  ;;  %v2238_v48 = vcombine.low %v2175_v29, %v2189_v38  ;;  %v2737_v35 = vcombine.high %v3218_v31, %v3218_v31  ;;  %v3226_v62 = vrot.slane %v3218_v31, 9  ;;  %v2805_v4 = vrot.slane %v2797_v59, %v3533_v22 }
  0x57   :  { %v2780_v63 = vrot.slane %v2737_v35, 7  ;;  %v2813_v9 = vcombine.low %v2805_v4, %v2812_v5 }
  0x59   :  { %v2781_v26 = vsel %vm3520_vm6, %v3226_v62, %v2780_v63 }
  0x5a   :  { %v2814_v12 = vcombine.low %v2781_v26, %v2785_v61 }
  0x5b   :  { %3342 = vmatmul.mubr.msk.bf16.vlgmr.msra.gmra.mrb[4].mxu0 %vm266_vm7, %v3747_v14  ;;  %3372 = vmatmul.mubr.msk.bf16.vlgmr.msra.gmra.mrb[4].mxu1 %vm266_vm7, %v3747_v14  ;;  %v3482_v14 = vld.sshfl [vmem:[%s4100_s0 + $0x10] sm:$0xf pattern:$0x76325410]  ;;  %s3486_s0 = smov 8  }
  0x5c   :  { %3376 = vmatpush3.bf16.msra.mxu1 %v3808_v54  ;;  %3346 = vmatpush3.bf16.msra.mxu0 %v3457_v10  ;;  %v2246_v54 = vrot.slane %v2238_v48, %v3533_v22  ;;  %v1943_v8 = vcombine.low %v3481_v58, %v3482_v14  ;;  %v3468_v10 = vld [vmem:[%s4099_s1 + $0x58] sm:$0xff]   ;;  %v2822_v16 = vrot.slane %v2814_v12, %v3533_v22 }
  0x5d   :  { %3347 = vmatprep.mubr.msk.bf16.mxu0 %vm266_vm7, %v1828_v41  ;;  %3377 = vmatprep.mubr.msk.bf16.mxu1 %vm266_vm7, %v2237_v34 }
  0x5e   :  { %3381 = vmatprep.subr.bf16.mxu1 %v3462_v23  ;;  %3351 = vmatprep.subr.bf16.mxu0 %v3463_v44  ;;  %v2254_v57 = vcombine.low %v2246_v54, %v2253_v60  ;;  %v2830_v19 = vcombine.low %v2822_v16, %v2829_v17 }
  0x67   :  { %3348 = vmatmul.mubr.msk.bf16.vlgmr.msra.gmra.mrb[4].mxu0 %vm266_vm7, %v1845_v52  ;;  %3378 = vmatmul.mubr.msk.bf16.vlgmr.msra.gmra.mrb[4].mxu1 %vm266_vm7, %v2254_v57 }
  0x68   :  { %3382 = vmatpush3.bf16.msra.mxu1 %v3462_v23  ;;  %3352 = vmatpush3.bf16.msra.mxu0 %v3463_v44 }
  0x69   :  { %3353 = vmatprep.mubr.msk.bf16.mxu0 %vm266_vm7, %v1943_v8  ;;  %3383 = vmatprep.mubr.msk.bf16.mxu1 %vm266_vm7, %v2813_v9 }
  0x6a   :  { %3357 = vmatprep.subr.bf16.mxu0 %v3468_v10 }
  0x73   :  { %3354 = vmatmul.mubr.msk.bf16.vlgmr.msra.gmra.mrb[4].mxu0 %vm266_vm7, %v1960_v18  ;;  %3384 = vmatmul.mubr.msk.bf16.vlgmr.msra.gmra.mrb[4].mxu1 %vm266_vm7, %v2830_v19 }
  0x74   :  { %3358 = vmatpush3.bf16.msra.mxu0 %v3468_v10  ;;  %3359 = vmatprep.mubr.msk.bf16.mxu0 %vm266_vm7, %v2237_v34 }
  0x7f   :  { %3360 = vmatmul.mubr.msk.bf16.vlgmr.msra.gmra.mrb[4].mxu0 %vm266_vm7, %v2254_v57 }
 0x11a   :  { %v3337_v53 = vpop.f32.mrb[0].mxu1 }
 0x11b   :  { %1462 = vrot.lane.b32.xlu1 %v3337_v53, %s3486_s0  ;;  %v1403_v50 = vpop.f32.mrb[1].mxu1  ;;  %v1438_v24 = vmul.f32 %v3337_v53, %v3337_v53  ;;  %v1425_v32 = vsel %vm838_vm15, %v3337_v53, 0.0 }
 0x11c   :  { %v1436_v56 = vmul.f32 %v1403_v50, %v1403_v50  ;;  %1458 = vrot.lane.b32.xlu0 %v1403_v50, %s3486_s0  ;;  %v3338_v22 = vpop.f32.mrb[2].mxu1  ;;  %v1422_v25 = vsel %vm838_vm15, %v1403_v50, 0.0 }
 0x11d   :  { %v1406_v20 = vpop.f32.mrb[3].mxu1  ;;  %v1439_v36 = vmul.f32 %v3338_v22, %v3338_v22  ;;  %v1443_v38 = vsel %vm838_vm15, %v1438_v24, 0.0  ;;  %v1427_v39 = vsel %vm838_vm15, %v3338_v22, 0.0 }
 0x11e   :  { %v1423_v21 = vsel %vm838_vm15, %v1406_v20, 0.0  ;;  %v1437_v27 = vmul.f32 %v1406_v20, %v1406_v20  ;;  %v1440_v33 = vsel %vm838_vm15, %v1436_v56, 0.0 }
 0x11f   :  { %v1424_v28 = vadd.f32 %v1423_v21, %v1422_v25  ;;  %1464 = vrot.lane.b32.xlu1 %v3338_v22, %s3486_s0  ;;  %v1445_v34 = vsel %vm838_vm15, %v1439_v36, 0.0 }
 0x120   :  { %v1441_v37 = vsel %vm838_vm15, %v1437_v27, 0.0  ;;  %1460 = vrot.lane.b32.xlu0 %v1406_v20, %s3486_s0 }
 0x121   :  { %v1426_v31 = vadd.f32 %v1425_v32, %v1424_v28  ;;  %v1442_v29 = vadd.f32 %v1441_v37, %v1440_v33 }
 0x123   :  { %v1428_v6 = vadd.f32 %v1427_v39, %v1426_v31  ;;  %v1444_v41 = vadd.f32 %v1443_v38, %v1442_v29 }
 0x125   :  { %v1446_v23 = vadd.f32 %v1445_v34, %v1444_v41  ;;  %v1429_v30 = vrot.slane %v1428_v6, 4 }
 0x126   :  { %v3941_v42 = vpop.f32.mrb[0].mxu0 }
 0x127   :  { %v3943_v43 = vpop.f32.mrb[1].mxu0  ;;  %v855_v44 = vmul.f32 %v3941_v42, %v3941_v42  ;;  %v1447_v48 = vrot.slane %v1446_v23, 4  ;;  %v842_v49 = vsel %vm838_vm15, %v3941_v42, 0.0  ;;  %v1430_v59 = vadd.f32 %v1429_v30, %v1428_v6 }
 0x128   :  { %v839_v45 = vsel %vm838_vm15, %v3943_v43, 0.0  ;;  %v853_v46 = vmul.f32 %v3943_v43, %v3943_v43  ;;  %v3951_v47 = vpop.f32.mrb[2].mxu0 }
 0x129   :  { %v3955_v35 = vpop.f32.mrb[3].mxu0  ;;  %v856_v55 = vmul.f32 %v3951_v47, %v3951_v47  ;;  %v860_v54 = vsel %vm838_vm15, %v855_v44, 0.0  ;;  %v844_v60 = vsel %vm838_vm15, %v3951_v47, 0.0  ;;  %v1448_v63 = vadd.f32 %v1447_v48, %v1446_v23 }
 0x12a   :  { %v857_v51 = vsel %vm838_vm15, %v853_v46, 0.0  ;;  %v840_v58 = vsel %vm838_vm15, %v3955_v35, 0.0  ;;  %v854_v14 = vmul.f32 %v3955_v35, %v3955_v35  ;;  %v1431_v3 = vrot.slane %v1430_v59, 2 }
 0x12b   :  { %v841_v40 = vadd.f32 %v840_v58, %v839_v45  ;;  %v862_v2 = vsel %vm838_vm15, %v856_v55, 0.0  ;;  %v1449_v52 = vrot.slane %v1448_v63, 2 }
 0x12c   :  { %v858_v62 = vsel %vm838_vm15, %v854_v14, 0.0  ;;  %v1432_v61 = vadd.f32 %v1431_v3, %v1430_v59 }
 0x12d   :  { %v843_v0 = vadd.f32 %v842_v49, %v841_v40  ;;  %v859_v1 = vadd.f32 %v858_v62, %v857_v51  ;;  %v1450_v9 = vadd.f32 %v1449_v52, %v1448_v63 }
 0x12e   :  { %v1433_v13 = vrot.slane %v1432_v61, 1 }
 0x12f   :  { %v845_v4 = vadd.f32 %v844_v60, %v843_v0  ;;  %v861_v5 = vadd.f32 %v860_v54, %v859_v1  ;;  %v1451_v16 = vrot.slane %v1450_v9, 1 }
 0x130   :  { %v1434_v19 = vadd.f32 %v1433_v13, %v1432_v61 }
 0x131   :  { %v846_v57 = vrot.slane %v845_v4, 4  ;;  %v863_v26 = vadd.f32 %v862_v2, %v861_v5  ;;  %v1452_v56 = vadd.f32 %v1451_v16, %v1450_v9 }
 0x133   :  { %v847_v7 = vadd.f32 %v846_v57, %v845_v4  ;;  %v864_v8 = vrot.slane %v863_v26, 4 }
 0x135   :  { %v848_v10 = vrot.slane %v847_v7, 2  ;;  %v865_v11 = vadd.f32 %v864_v8, %v863_v26 }
 0x137   :  { %v849_v12 = vadd.f32 %v848_v10, %v847_v7  ;;  %v866_v15 = vrot.slane %v865_v11, 2 }
 0x139   :  { %v850_v17 = vrot.slane %v849_v12, 1  ;;  %v867_v18 = vadd.f32 %v866_v15, %v865_v11 }
 0x13b   :  { %v851_v53 = vadd.f32 %v850_v17, %v849_v12  ;;  %v868_v50 = vrot.slane %v867_v18, 1 }
 0x13d   :  { %v869_v22 = vadd.f32 %v868_v50, %v867_v18  ;;  %v3969_v20 = vadd.f32 %v1434_v19, %v851_v53 }
 0x13f   :  { %v3971_v24 = vadd.f32 %v1452_v56, %v869_v22 }
 0x146   :  { %v3385_v25 = vpop.f32.mrb[4].mxu1 }
 0x147   :  { %v2877_v21 = vpop.f32.mrb[5].mxu1  ;;  %v2912_v33 = vmul.f32 %v3385_v25, %v3385_v25  ;;  %v2899_v38 = vsel %vm838_vm15, %v3385_v25, 0.0 }
 0x148   :  { %v2910_v27 = vmul.f32 %v2877_v21, %v2877_v21  ;;  %2932 = vrot.lane.b32.xlu0 %v2877_v21, %s3486_s0  ;;  %v3386_v28 = vpop.f32.mrb[6].mxu1  ;;  %v2896_v36 = vsel %vm838_vm15, %v2877_v21, 0.0 }
 0x149   :  { %v2880_v32 = vpop.f32.mrb[7].mxu1  ;;  %v2913_v6 = vmul.f32 %v3386_v28, %v3386_v28  ;;  %v2917_v30 = vsel %vm838_vm15, %v2912_v33, 0.0  ;;  %v2901_v44 = vsel %vm838_vm15, %v3386_v28, 0.0 }
 0x14a   :  { %v2897_v37 = vsel %vm838_vm15, %v2880_v32, 0.0  ;;  %v2911_v31 = vmul.f32 %v2880_v32, %v2880_v32  ;;  %2934 = vrot.lane.b32.xlu1 %v2880_v32, %s3486_s0  ;;  %v2914_v39 = vsel %vm838_vm15, %v2910_v27, 0.0 }
 0x14b   :  { %v2898_v29 = vadd.f32 %v2897_v37, %v2896_v36  ;;  %v2919_v48 = vsel %vm838_vm15, %v2913_v6, 0.0 }
 0x14c   :  { %v2915_v41 = vsel %vm838_vm15, %v2911_v31, 0.0  ;;  %2936 = vrot.lane.b32.xlu0 %v3385_v25, %s3486_s0 }
 0x14d   :  { %v2900_v34 = vadd.f32 %v2899_v38, %v2898_v29  ;;  %v2916_v23 = vadd.f32 %v2915_v41, %v2914_v39 }
 0x14e   :  { %2938 = vrot.lane.b32.xlu1 %v3386_v28, %s3486_s0 }
 0x14f   :  { %v2902_v45 = vadd.f32 %v2901_v44, %v2900_v34  ;;  %v2918_v46 = vadd.f32 %v2917_v30, %v2916_v23 }
 0x151   :  { %v2920_v49 = vadd.f32 %v2919_v48, %v2918_v46  ;;  %v2903_v54 = vrot.slane %v2902_v45, 4 }
 0x152   :  { %v3985_v51 = vpop.f32.mrb[4].mxu0 }
 0x153   :  { %v3987_v55 = vpop.f32.mrb[5].mxu0  ;;  %v2336_v58 = vmul.f32 %v3985_v51, %v3985_v51  ;;  %v2323_v60 = vsel %vm838_vm15, %v3985_v51, 0.0  ;;  %v2921_v3 = vrot.slane %v2920_v49, 4  ;;  %v2904_v26 = vadd.f32 %v2903_v54, %v2902_v45 }
 0x154   :  { %v2320_v14 = vsel %vm838_vm15, %v3987_v55, 0.0  ;;  %v2334_v59 = vmul.f32 %v3987_v55, %v3987_v55  ;;  %v3995_v40 = vpop.f32.mrb[6].mxu0 }
 0x155   :  { %v3999_v62 = vpop.f32.mrb[7].mxu0  ;;  %v2337_v0 = vmul.f32 %v3995_v40, %v3995_v40  ;;  %v2341_v5 = vsel %vm838_vm15, %v2336_v58, 0.0  ;;  %v2325_v52 = vsel %vm838_vm15, %v3995_v40, 0.0  ;;  %v2922_v9 = vadd.f32 %v2921_v3, %v2920_v49 }
 0x156   :  { %v2338_v63 = vsel %vm838_vm15, %v2334_v59, 0.0  ;;  %v2321_v1 = vsel %vm838_vm15, %v3999_v62, 0.0  ;;  %v2335_v2 = vmul.f32 %v3999_v62, %v3999_v62  ;;  %v2905_v13 = vrot.slane %v2904_v26, 2 }
 0x157   :  { %v2322_v4 = vadd.f32 %v2321_v1, %v2320_v14  ;;  %v2343_v8 = vsel %vm838_vm15, %v2337_v0, 0.0  ;;  %v2923_v16 = vrot.slane %v2922_v9, 2 }
 0x158   :  { %v2339_v57 = vsel %vm838_vm15, %v2335_v2, 0.0  ;;  %v2906_v19 = vadd.f32 %v2905_v13, %v2904_v26 }
 0x159   :  { %v2324_v61 = vadd.f32 %v2323_v60, %v2322_v4  ;;  %v2340_v7 = vadd.f32 %v2339_v57, %v2338_v63  ;;  %v2924_v56 = vadd.f32 %v2923_v16, %v2922_v9 }
 0x15a   :  { %v2907_v21 = vrot.slane %v2906_v19, 1 }
 0x15b   :  { %v2326_v10 = vadd.f32 %v2325_v52, %v2324_v61  ;;  %v2342_v11 = vadd.f32 %v2341_v5, %v2340_v7  ;;  %v2925_v32 = vrot.slane %v2924_v56, 1 }
 0x15c   :  { %v2908_v37 = vadd.f32 %v2907_v21, %v2906_v19 }
 0x15d   :  { %v2327_v12 = vrot.slane %v2326_v10, 4  ;;  %v2344_v15 = vadd.f32 %v2343_v8, %v2342_v11  ;;  %v2926_v38 = vadd.f32 %v2925_v32, %v2924_v56 }
 0x15f   :  { %v2328_v17 = vadd.f32 %v2327_v12, %v2326_v10  ;;  %v2345_v18 = vrot.slane %v2344_v15, 4 }
 0x161   :  { %v2329_v53 = vrot.slane %v2328_v17, 2  ;;  %v2346_v50 = vadd.f32 %v2345_v18, %v2344_v15 }
 0x163   :  { %v2330_v22 = vadd.f32 %v2329_v53, %v2328_v17  ;;  %v2347_v25 = vrot.slane %v2346_v50, 2 }
 0x165   :  { %v2331_v27 = vrot.slane %v2330_v22, 1  ;;  %v2348_v28 = vadd.f32 %v2347_v25, %v2346_v50 }
 0x167   :  { %v2332_v33 = vadd.f32 %v2331_v27, %v2330_v22  ;;  %v2349_v36 = vrot.slane %v2348_v28, 1 }
 0x169   :  { %v2333_v31 = vadd.f32 %v2332_v33, %v3969_v20  ;;  %v2350_v29 = vadd.f32 %v2349_v36, %v2348_v28 }
 0x16b   :  { %v2351_v39 = vadd.f32 %v2350_v29, %v3971_v24  ;;  %v2909_v6 = vadd.f32 %v2908_v37, %v2333_v31 }
 0x16d   :  { %v2927_v41 = vadd.f32 %v2926_v38, %v2351_v39 }
 0x16f   :  { %v2978_v34 = vsel %vm954_vm0, %v2909_v6, %v2927_v41 }
 0x170   :  { %2980 = vst.msk [vmem:[%s4101_s3] sm:$0x3] %vm2979_vm1, %v2978_v34 }
 0x18d   :  { %v1463_v23 = vpop.permute.xlu1 %1462 }
 0x18e   :  { %v1472_v30 = vsel %vm838_vm15, %v3941_v42, %v1463_v23  ;;  %v1459_v44 = vpop.permute.xlu0 %1458 }
 0x18f   :  { %v1480_v20 = vcombine.high %v1472_v30, %v1472_v30  ;;  %v1490_v45 = vpack.c.bf16 %v1472_v30, %v1472_v30  ;;  %v1470_v24 = vsel %vm838_vm15, %v3943_v43, %v1459_v44 }
 0x190   :  { %v1478_v46 = vcombine.high %v1470_v24, %v1470_v24  ;;  %v1486_v48 = vpack.c.bf16 %v1470_v24, %v1470_v24 }
 0x191   :  { %v1491_v49 = vpack.c.bf16 %v1480_v20, %v1480_v20  ;;  %1499 = vst.msk [vmem:[%s4102_s2 + $0x10] sm:$0x3] %vm1494_vm2, %v1490_v45  ;;  %v1465_v58 = vpop.permute.xlu1 %1464 }
 0x192   :  { %v1487_v14 = vpack.c.bf16 %v1478_v46, %v1478_v46  ;;  %1495 = vst.msk [vmem:[%s4102_s2] sm:$0x3] %vm1494_vm2, %v1486_v48  ;;  %v1473_v42 = vsel %vm838_vm15, %v3951_v47, %v1465_v58  ;;  %v1461_v59 = vpop.permute.xlu0 %1460 }
 0x193   :  { %1500 = vst.msk [vmem:[%s4102_s2 + $0x14] sm:$0x3] %vm1494_vm2, %v1491_v49  ;;  %v1481_v43 = vcombine.high %v1473_v42, %v1473_v42  ;;  %v1492_v54 = vpack.c.bf16 %v1473_v42, %v1473_v42  ;;  %v1471_v60 = vsel %vm838_vm15, %v3955_v35, %v1461_v59 }
 0x194   :  { %1496 = vst.msk [vmem:[%s4102_s2 + $0x4] sm:$0x3] %vm1494_vm2, %v1487_v14  ;;  %v1479_v63 = vcombine.high %v1471_v60, %v1471_v60  ;;  %v1488_v0 = vpack.c.bf16 %v1471_v60, %v1471_v60 }
 0x195   :  { %v1493_v1 = vpack.c.bf16 %v1481_v43, %v1481_v43  ;;  %1501 = vst.msk [vmem:[%s4102_s2 + $0x18] sm:$0x3] %vm1494_vm2, %v1492_v54 }
 0x196   :  { %v1489_v47 = vpack.c.bf16 %v1479_v63, %v1479_v63  ;;  %1497 = vst.msk [vmem:[%s4102_s2 + $0x8] sm:$0x3] %vm1494_vm2, %v1488_v0 }
 0x197   :  { %1502 = vst.msk [vmem:[%s4102_s2 + $0x1c] sm:$0x3] %vm1494_vm2, %v1493_v1 }
 0x198   :  { %1498 = vst.msk [vmem:[%s4102_s2 + $0xc] sm:$0x3] %vm1494_vm2, %v1489_v47 }
 0x1ba   :  { %v2933_v35 = vpop.permute.xlu0 %2932 }
 0x1bb   :  { %v2944_v2 = vsel %vm838_vm15, %v3987_v55, %v2933_v35 }
 0x1bc   :  { %v2952_v3 = vcombine.high %v2944_v2, %v2944_v2  ;;  %v2960_v4 = vpack.c.bf16 %v2944_v2, %v2944_v2  ;;  %v2935_v5 = vpop.permute.xlu1 %2934 }
 0x1bd   :  { %v2945_v52 = vsel %vm838_vm15, %v3999_v62, %v2935_v5 }
 0x1be   :  { %v2961_v57 = vpack.c.bf16 %v2952_v3, %v2952_v3  ;;  %3235 = vst.msk [vmem:[%s4102_s2 + $0x2] sm:$0x3] %vm1494_vm2, %v2960_v4  ;;  %v2953_v26 = vcombine.high %v2945_v52, %v2945_v52  ;;  %v2962_v61 = vpack.c.bf16 %v2945_v52, %v2945_v52  ;;  %v2937_v7 = vpop.permute.xlu0 %2936 }
 0x1bf   :  { %v2946_v8 = vsel %vm838_vm15, %v3985_v51, %v2937_v7 }
 0x1c0   :  { %3236 = vst.msk [vmem:[%s4102_s2 + $0x6] sm:$0x3] %vm1494_vm2, %v2961_v57  ;;  %v2963_v55 = vpack.c.bf16 %v2953_v26, %v2953_v26  ;;  %3237 = vst.msk [vmem:[%s4102_s2 + $0xa] sm:$0x3] %vm1494_vm2, %v2962_v61  ;;  %v2954_v62 = vcombine.high %v2946_v8, %v2946_v8  ;;  %v2964_v9 = vpack.c.bf16 %v2946_v8, %v2946_v8  ;;  %v2939_v10 = vpop.permute.xlu1 %2938 }
 0x1c1   :  { %v2947_v11 = vsel %vm838_vm15, %v3995_v40, %v2939_v10 }
 0x1c2   :  { %3238 = vst.msk [vmem:[%s4102_s2 + $0xe] sm:$0x3] %vm1494_vm2, %v2963_v55  ;;  %v2965_v51 = vpack.c.bf16 %v2954_v62, %v2954_v62  ;;  %3239 = vst.msk [vmem:[%s4102_s2 + $0x12] sm:$0x3] %vm1494_vm2, %v2964_v9  ;;  %v2955_v13 = vcombine.high %v2947_v11, %v2947_v11  ;;  %v2966_v12 = vpack.c.bf16 %v2947_v11, %v2947_v11 }
 0x1c4   :  { %3240 = vst.msk [vmem:[%s4102_s2 + $0x16] sm:$0x3] %vm1494_vm2, %v2965_v51  ;;  %v2967_v15 = vpack.c.bf16 %v2955_v13, %v2955_v13  ;;  %3241 = vst.msk [vmem:[%s4102_s2 + $0x1a] sm:$0x3] %vm1494_vm2, %v2966_v12 }
 0x1c6   :  { %3242 = vst.msk [vmem:[%s4102_s2 + $0x1e] sm:$0x3] %vm1494_vm2, %v2967_v15 }

// kernel: generator_forward.7
= control target key start
LH: loop header
LB: loop body
LE: loop exit
PB: predicated region body
PF: predicated region fallthrough
CT: control target
= control target key end

     0   :  { %vm326_vm0 = vcmask 1043456   ;;  %vm301_vm1 = vcmask 64512   ;;  %vm1301_vm2 = vcmask 1042432   ;;  %vm1302_vm3 = vcmask 1046532   ;;  %s7617_s1 = inlined_call_operand.vmem [shape: bf16[16,8,64], index: 1, kind: input, shape index: {}]   ;;  %s7618_s0 = inlined_call_operand.vmem [shape: bf16[2,10,10,8], index: 0, kind: input, shape index: {}]   ;;  %s7619_s2 = inlined_call_operand.vmem [shape: f32[1,64], index: 2, kind: input, shape index: {}]   ;;  %s7620_s3 = inlined_call_operand.vmem [shape: f32[16,2,8,128], index: 3, kind: output, shape index: {}]  }
   0x1   :  { %v4401_v0 = vld [vmem:[%s7617_s1 + $0x14] sm:$0xf]  ;;  %v5593_v1 = vld [vmem:[%s7618_s0 + $0x4] sm:$0x1]  ;;  %v5598_v2 = vld [vmem:[%s7618_s0 + $0xc] sm:$0x1] }
   0x2   :  { %5393 = vmatprep.subr.msk.bf16.mxu1 %vm326_vm0, %v4401_v0  ;;  %v1419_v3 = vsel %vm326_vm0, %v4401_v0, 0  ;;  %v1253_v4 = vld [vmem:[%s7618_s0] sm:$0xe]  ;;  %v1254_v5 = vld [vmem:[%s7618_s0 + $0x8] sm:$0xe]  ;;  %vm5608_vm4 = vmor %vm1301_vm2, %vm1302_vm3  ;;  %v1306_v7 = vrot.slane %v5593_v1, 5 }
   0x3   :  { %4982 = vmatpush3.bf16.msra.mxu1 %v1419_v3  ;;  %v4385_v8 = vrot.slane %v1253_v4, 9  ;;  %v4386_v9 = vrot.slane %v1254_v5, 9  ;;  %v1310_v10 = vrot.slane %v5598_v2, 5  ;;  %v4384_v11 = vld [vmem:[%s7617_s1 + $0x10] sm:$0xf]  ;;  %v61_v12 = vshll.u32 %v5593_v1, 16 }
   0x4   :  { %5394 = vmatprep.subr.msk.bf16.mxu1 %vm326_vm0, %v4384_v11  ;;  %v5622_v13 = vld [vmem:[%s7618_s0 + $0x14] sm:$0x1]  ;;  %v5627_v14 = vld [vmem:[%s7618_s0 + $0x1c] sm:$0x1]  ;;  %v1255_v15 = vld [vmem:[%s7618_s0 + $0x10] sm:$0xe] }
   0x5   :  { %v1307_v16 = vsel %vm5608_vm4, %v4385_v8, %v1306_v7  ;;  %v1311_v17 = vsel %vm5608_vm4, %v4386_v9, %v1310_v10  ;;  %v1256_v18 = vld [vmem:[%s7618_s0 + $0x18] sm:$0xe]  ;;  %v4387_v19 = vrot.slane %v1255_v15, 9  ;;  %v1314_v20 = vrot.slane %v5622_v13, 5  ;;  %v5643_v21 = vld [vmem:[%s7618_s0 + $0x24] sm:$0x1] }
   0x6   :  { %v4402_v22 = vcombine.low %v1307_v16, %v1311_v17  ;;  %v4388_v23 = vrot.slane %v1256_v18, 9  ;;  %v1318_v24 = vrot.slane %v5627_v14, 5  ;;  %v1519_v25 = vsel %vm326_vm0, %v4384_v11, 0  ;;  %v5650_v26 = vld [vmem:[%s7618_s0 + $0x2c] sm:$0x1] }
   0x7   :  { %v1315_v27 = vsel %vm5608_vm4, %v4387_v19, %v1314_v20  ;;  %v1257_v28 = vld [vmem:[%s7618_s0 + $0x20] sm:$0xe]  ;;  %v1258_v29 = vld [vmem:[%s7618_s0 + $0x28] sm:$0xe]  ;;  %v1322_v30 = vrot.slane %v5643_v21, 5  ;;  %v1326_v31 = vrot.slane %v5650_v26, 5 }
   0x8   :  { %4983 = vmatprep.mubr.msk.bf16.mxu1 %vm301_vm1, %v4402_v22  ;;  %v1319_v32 = vsel %vm5608_vm4, %v4388_v23, %v1318_v24  ;;  %v4389_v33 = vrot.slane %v1257_v28, 9  ;;  %v4390_v34 = vrot.slane %v1258_v29, 9  ;;  %v5668_v35 = vld [vmem:[%s7618_s0 + $0x34] sm:$0x1]  ;;  %v5673_v36 = vld [vmem:[%s7618_s0 + $0x3c] sm:$0x1] }
   0x9   :  { %v4403_v37 = vcombine.low %v1315_v27, %v1319_v32  ;;  %v1259_v38 = vld [vmem:[%s7618_s0 + $0x30] sm:$0xe]  ;;  %v1260_v39 = vld [vmem:[%s7618_s0 + $0x38] sm:$0xe]  ;;  %v1330_v40 = vrot.slane %v5668_v35, 5  ;;  %v1334_v41 = vrot.slane %v5673_v36, 5 }
   0xa   :  { %v1323_v42 = vsel %vm5608_vm4, %v4389_v33, %v1322_v30  ;;  %v1327_v43 = vsel %vm5608_vm4, %v4390_v34, %v1326_v31  ;;  %v4391_v44 = vrot.slane %v1259_v38, 9  ;;  %v4392_v45 = vrot.slane %v1260_v39, 9  ;;  %v5690_v46 = vld [vmem:[%s7618_s0 + $0x54] sm:$0x1]  ;;  %v5695_v47 = vld [vmem:[%s7618_s0 + $0x5c] sm:$0x1] }
   0xb   :  { %4984 = vmatmul.mubr.msk.bf16.vlgmr.msra.gmra.mrb[0].mxu1 %vm301_vm1, %v4403_v37  ;;  %v4404_v48 = vcombine.low %v1323_v42, %v1327_v43  ;;  %v1261_v49 = vld [vmem:[%s7618_s0 + $0x50] sm:$0xe]  ;;  %v1262_v50 = vld [vmem:[%s7618_s0 + $0x58] sm:$0xe]  ;;  %v1338_v51 = vrot.slane %v5690_v46, 5  ;;  %v1342_v52 = vrot.slane %v5695_v47, 5 }
   0xc   :  { %5000 = vmatpush3.bf16.msra.mxu1 %v1519_v25  ;;  %v1331_v53 = vsel %vm5608_vm4, %v4391_v44, %v1330_v40  ;;  %v1335_v54 = vsel %vm5608_vm4, %v4392_v45, %v1334_v41  ;;  %v4393_v55 = vrot.slane %v1261_v49, 9  ;;  %v4394_v56 = vrot.slane %v1262_v50, 9  ;;  %v4268_v57 = vld [vmem:[%s7617_s1 + $0x4] sm:$0xf]  ;;  %v5723_v60 = vld [vmem:[%s7618_s0 + $0x6c] sm:$0x1] }
   0xd   :  { %v5716_v58 = vld [vmem:[%s7618_s0 + $0x64] sm:$0x1]  ;;  %4987 = vmatprep.mubr.msk.bf16.mxu1 %vm301_vm1, %v4404_v48  ;;  %v4405_v59 = vcombine.low %v1331_v53, %v1335_v54  ;;  %5389 = vmatprep.subr.msk.bf16.mxu0 %vm326_vm0, %v4268_v57  ;;  %v1263_v61 = vld [vmem:[%s7618_s0 + $0x60] sm:$0xe]  ;;  %v1264_v62 = vld [vmem:[%s7618_s0 + $0x68] sm:$0xe] }
   0xe   :  { %v1339_v63 = vsel %vm5608_vm4, %v4393_v55, %v1338_v51  ;;  %v1343_v0 = vsel %vm5608_vm4, %v4394_v56, %v1342_v52  ;;  %v4395_v3 = vrot.slane %v1263_v61, 9  ;;  %v1346_v4 = vrot.slane %v5716_v58, 5  ;;  %v5739_v5 = vld [vmem:[%s7618_s0] sm:$0xf]  ;;  %v5744_v7 = vld [vmem:[%s7618_s0 + $0x8] sm:$0xf] }
   0xf   :  { %v4406_v8 = vcombine.low %v1339_v63, %v1343_v0  ;;  %v4396_v9 = vrot.slane %v1264_v62, 9  ;;  %v1350_v10 = vrot.slane %v5723_v60, 5  ;;  %v328_v11 = vsel %vm326_vm0, %v4268_v57, 0  ;;  %v5751_v15 = vld [vmem:[%s7618_s0 + $0x10] sm:$0xf] }
  0x10   :  { %v1347_v16 = vsel %vm5608_vm4, %v4395_v3, %v1346_v4  ;;  %4910 = vmatpush3.bf16.msra.mxu0 %v328_v11  ;;  %vm48_vm5 = vsmask.f32 3328  ;;  %vm49_vm6 = vsmask.f32 7440  ;;  %v52_v17 = vshrl.u32 %v5739_v5, 16 }
  0x11   :  { %v1351_v18 = vsel %vm5608_vm4, %v4396_v9, %v1350_v10  ;;  %v55_v19 = vshll.u32 %v5739_v5, 16  ;;  %v63_v20 = vrot.slane %v61_v12, 5  ;;  %v66_v22 = vshrl.u32 %v5744_v7, 16  ;;  %v5765_v23 = vld [vmem:[%s7618_s0 + $0x18] sm:$0xf]  ;;  %vm5789_vm7 = vmor %vm48_vm5, %vm49_vm6 }
  0x12   :  { %v4407_v24 = vcombine.low %v1347_v16, %v1351_v18  ;;  %v54_v25 = vrot.slane %v52_v17, 4  ;;  %v69_v27 = vshll.u32 %v5744_v7, 16  ;;  %v75_v28 = vshll.u32 %v5598_v2, 16  ;;  %v5775_v31 = vld [vmem:[%s7618_s0 + $0x74] sm:$0x1] }
  0x13   :  { %4988 = vmatmul.mubr.msk.bf16.gmra.mrb[4].mxu1 %vm301_vm1, %v4405_v59  ;;  %v57_v29 = vrot.slane %v55_v19, 5  ;;  %v68_v30 = vrot.slane %v66_v22, 4  ;;  %v80_v1 = vshrl.u32 %v5751_v15, 16  ;;  %v83_v12 = vshll.u32 %v5751_v15, 16  ;;  %v1265_v37 = vld [vmem:[%s7618_s0 + $0x70] sm:$0xe] }
  0x14   :  { %4991 = vmatprep.mubr.msk.bf16.mxu1 %vm301_vm1, %v4406_v8  ;;  %v71_v32 = vrot.slane %v69_v27, 5  ;;  %v77_v33 = vrot.slane %v75_v28, 5  ;;  %v89_v34 = vshll.u32 %v5622_v13, 16  ;;  %v94_v2 = vshrl.u32 %v5765_v23, 16  ;;  %v1266_v42 = vld [vmem:[%s7618_s0 + $0x78] sm:$0xe] }
  0x15   :  { %v58_v38 = vor.u32 %v57_v29, %v54_v25  ;;  %v82_v39 = vrot.slane %v80_v1, 4  ;;  %v85_v40 = vrot.slane %v83_v12, 5  ;;  %v97_v41 = vshll.u32 %v5765_v23, 16  ;;  %v5797_v49 = vld [vmem:[%s7618_s0 + $0x7c] sm:$0x1] }
  0x16   :  { %v72_v13 = vor.u32 %v71_v32, %v68_v30  ;;  %v91_v44 = vrot.slane %v89_v34, 5  ;;  %v96_v45 = vrot.slane %v94_v2, 4  ;;  %v103_v48 = vshll.u32 %v5627_v14, 16  ;;  %v5802_v54 = vld [vmem:[%s7618_s0 + $0x84] sm:$0x1] }
  0x17   :  { %v59_v50 = vrot.slane %v58_v38, 4  ;;  %v86_v51 = vor.u32 %v85_v40, %v82_v39  ;;  %v99_v52 = vrot.slane %v97_v41, 5  ;;  %v4397_v53 = vrot.slane %v1265_v37, 9  ;;  %v1267_v14 = vld [vmem:[%s7618_s0 + $0x80] sm:$0xe] }
  0x18   :  { %v73_v55 = vrot.slane %v72_v13, 4  ;;  %v105_v56 = vrot.slane %v103_v48, 5  ;;  %v1354_v57 = vrot.slane %v5775_v31, 5  ;;  %v4398_v59 = vrot.slane %v1266_v42, 9  ;;  %v5814_v3 = vld [vmem:[%s7618_s0 + $0x8c] sm:$0x1] }
  0x19   :  { %v64_v61 = vsel %vm5789_vm7, %v59_v50, %v63_v20  ;;  %v87_v62 = vrot.slane %v86_v51, 4  ;;  %v100_v63 = vor.u32 %v99_v52, %v96_v45  ;;  %v1358_v0 = vrot.slane %v5797_v49, 5  ;;  %v1268_v4 = vld [vmem:[%s7618_s0 + $0x88] sm:$0xe]  ;;  %v5827_v16 = vld [vmem:[%s7618_s0 + $0x20] sm:$0xf] }
  0x1a   :  { %v78_v8 = vsel %vm5789_vm7, %v73_v55, %v77_v33  ;;  %v1355_v9 = vsel %vm5608_vm4, %v4397_v53, %v1354_v57  ;;  %v4399_v10 = vrot.slane %v1267_v14, 9  ;;  %v1362_v11 = vrot.slane %v5802_v54, 5  ;;  %v5837_v22 = vld [vmem:[%s7618_s0 + $0x28] sm:$0xf]  ;;  %v4426_v25 = vld [vmem:[%s7617_s1 + $0x18] sm:$0xf] }
  0x1b   :  { %4992 = vmatmul.mubr.msk.bf16.gmra.mrb[8].mxu1 %vm301_vm1, %v4407_v24  ;;  %v4269_v17 = vcombine.low %v64_v61, %v78_v8  ;;  %v92_v18 = vsel %vm5789_vm7, %v87_v62, %v91_v44  ;;  %v101_v19 = vrot.slane %v100_v63, 4  ;;  %v1359_v20 = vsel %vm5608_vm4, %v4398_v59, %v1358_v0  ;;  %5395 = vmatprep.subr.msk.bf16.mxu1 %vm326_vm0, %v4426_v25  ;;  %v5855_v33 = vld [vmem:[%s7618_s0 + $0x30] sm:$0xf]  ;;  %v4705_v43 = vld [vmem:[%s7618_s0 + $0x38] sm:$0xe] }
  0x1c   :  { %v4408_v27 = vcombine.low %v1355_v9, %v1359_v20  ;;  %v1363_v24 = vsel %vm5608_vm4, %v4399_v10, %v1362_v11  ;;  %v4400_v28 = vrot.slane %v1268_v4, 9  ;;  %v1366_v29 = vrot.slane %v5814_v3, 5  ;;  %v5879_v55 = vld [vmem:[%s7618_s0 + $0x50] sm:$0xf]  ;;  %v7367_v6 = vld [vmem:[%s7619_s2] ss:$0 sm:$0xff] }
  0x1d   :  { %4911 = vmatprep.mubr.msk.bf16.mxu0 %vm301_vm1, %v4269_v17  ;;  %v106_v30 = vsel %vm5789_vm7, %v101_v19, %v105_v56  ;;  %v108_v1 = vshrl.u32 %v5827_v16, 16  ;;  %v111_v12 = vshll.u32 %v5827_v16, 16  ;;  %v117_v32 = vshll.u32 %v5643_v21, 16  ;;  %v5867_v21 = vld [vmem:[%s7618_s0 + $0x38] sm:$0xf]  ;;  %s5566_s2 = smov 64  }
  0x1e   :  { %v5857_v34 = vcombine.low %v92_v18, %v106_v30  ;;  %4995 = vmatprep.mubr.msk.bf16.mxu1 %vm301_vm1, %v4408_v27  ;;  %v1367_v2 = vsel %vm5608_vm4, %v4400_v28, %v1366_v29  ;;  %v122_v37 = vshrl.u32 %v5837_v22, 16  ;;  %v125_v38 = vshll.u32 %v5837_v22, 16  ;;  %v5898_v18 = vld [vmem:[%s7618_s0 + $0x58] sm:$0xf] }
  0x1f   :  { %v4409_v39 = vcombine.low %v1363_v24, %v1367_v2  ;;  %v110_v40 = vrot.slane %v108_v1, 4  ;;  %v113_v41 = vrot.slane %v111_v12, 5  ;;  %v119_v42 = vrot.slane %v117_v32, 5  ;;  %v5908_v24 = vld [vmem:[%s7618_s0 + $0x60] sm:$0xf] }
  0x20   :  { %4912 = vmatmul.mubr.msk.bf16.vlgmr.msra.gmra.mrb[0].mxu0 %vm301_vm1, %v5857_v34  ;;  %v124_v13 = vrot.slane %v122_v37, 4  ;;  %v127_v44 = vrot.slane %v125_v38, 5  ;;  %v131_v45 = vshll.u32 %v5650_v26, 16  ;;  %v136_v48 = vshrl.u32 %v5855_v33, 16  ;;  %v5885_v26 = vld [vmem:[%s7617_s1] sm:$0xf] }
  0x21   :  { %v114_v50 = vor.u32 %v113_v41, %v110_v40  ;;  %v139_v51 = vshll.u32 %v5855_v33, 16  ;;  %v145_v52 = vshll.u32 %v5668_v35, 16  ;;  %v150_v53 = vshrl.u32 %v5867_v21, 16  ;;  %5390 = vmatprep.subr.msk.bf16.mxu0 %vm326_vm0, %v5885_v26  ;;  %v5919_v40 = vld [vmem:[%s7618_s0 + $0x68] sm:$0xf] }
  0x22   :  { %v128_v56 = vor.u32 %v127_v44, %v124_v13  ;;  %v133_v57 = vrot.slane %v131_v45, 5  ;;  %v138_v59 = vrot.slane %v136_v48, 4  ;;  %v153_v14 = vshll.u32 %v5867_v21, 16 }
  0x23   :  { %4996 = vmatmul.mubr.msk.bf16.gmra.mrb[12].mxu1 %vm301_vm1, %v4409_v39  ;;  %v115_v35 = vrot.slane %v114_v50, 4  ;;  %v141_v61 = vrot.slane %v139_v51, 5  ;;  %v147_v62 = vrot.slane %v145_v52, 5  ;;  %v152_v63 = vrot.slane %v150_v53, 4 }
  0x24   :  { %v129_v0 = vrot.slane %v128_v56, 4  ;;  %v155_v4 = vrot.slane %v153_v14, 5  ;;  %v159_v8 = vshll.u32 %v5673_v36, 16  ;;  %5001 = vmatprep.mubr.msk.bf16.mxu1 %vm301_vm1, %v4269_v17  ;;  %v1621_v9 = vsel %vm326_vm0, %v4426_v25, 0 }
  0x25   :  { %v120_v10 = vsel %vm5789_vm7, %v115_v35, %v119_v42  ;;  %v142_v11 = vor.u32 %v141_v61, %v138_v59  ;;  %v164_v19 = vshrl.u32 %v5879_v55, 16  ;;  %v167_v20 = vshll.u32 %v5879_v55, 16  ;;  %v5925_v42 = vld [vmem:[%s7618_s0 + $0x70] sm:$0xf] }
  0x26   :  { %v134_v36 = vsel %vm5789_vm7, %v129_v0, %v133_v57  ;;  %v156_v27 = vor.u32 %v155_v4, %v152_v63  ;;  %v161_v17 = vrot.slane %v159_v8, 5  ;;  %v173_v25 = vshll.u32 %v5690_v46, 16 }
  0x27   :  { %v4271_v28 = vcombine.low %v120_v10, %v134_v36  ;;  %v143_v29 = vrot.slane %v142_v11, 4  ;;  %v166_v30 = vrot.slane %v164_v19, 4  ;;  %v169_v1 = vrot.slane %v167_v20, 5 }
  0x28   :  { %v157_v12 = vrot.slane %v156_v27, 4  ;;  %v175_v32 = vrot.slane %v173_v25, 5  ;;  %v178_v2 = vshrl.u32 %v5898_v18, 16  ;;  %v181_v37 = vshll.u32 %v5898_v18, 16 }
  0x29   :  { %4915 = vmatprep.mubr.msk.bf16.mxu0 %vm301_vm1, %v4271_v28  ;;  %v148_v46 = vsel %vm5789_vm7, %v143_v29, %v147_v62  ;;  %v170_v38 = vor.u32 %v169_v1, %v166_v30  ;;  %v187_v39 = vshll.u32 %v5695_v47, 16  ;;  %v192_v41 = vshrl.u32 %v5908_v24, 16  ;;  %v5933_v47 = vld [vmem:[%s7617_s1 + $0x1c] sm:$0xf]  ;;  %v5948_v62 = vld [vmem:[%s7618_s0 + $0x78] sm:$0xf] }
  0x2a   :  { %v162_v13 = vsel %vm5789_vm7, %v157_v12, %v161_v17  ;;  %v180_v44 = vrot.slane %v178_v2, 4  ;;  %v183_v45 = vrot.slane %v181_v37, 5  ;;  %v195_v48 = vshll.u32 %v5908_v24, 16  ;;  %v5961_v17 = vld [vmem:[%s7618_s0 + $0x80] sm:$0xf] }
  0x2b   :  { %v4272_v50 = vcombine.low %v148_v46, %v162_v13  ;;  %5002 = vmatmul.mubr.msk.bf16.vlgmr.msra.gmra.mrb[0].mxu1 %vm301_vm1, %v5857_v34  ;;  %v171_v51 = vrot.slane %v170_v38, 4  ;;  %v189_v52 = vrot.slane %v187_v39, 5  ;;  %v194_v53 = vrot.slane %v192_v41, 4  ;;  %v5967_v1 = vld [vmem:[%s7618_s0 + $0x88] sm:$0xf] }
  0x2c   :  { %5018 = vmatpush3.bf16.msra.mxu1 %v1621_v9  ;;  %v184_v56 = vor.u32 %v183_v45, %v180_v44  ;;  %v197_v57 = vrot.slane %v195_v48, 5  ;;  %v201_v59 = vshll.u32 %v5716_v58, 16  ;;  %v206_v14 = vshrl.u32 %v5919_v40, 16  ;;  %5005 = vmatprep.mubr.msk.bf16.mxu1 %vm301_vm1, %v4271_v28 }
  0x2d   :  { %4916 = vmatmul.mubr.msk.bf16.gmra.mrb[4].mxu0 %vm301_vm1, %v4272_v50  ;;  %v176_v35 = vsel %vm5789_vm7, %v171_v51, %v175_v32  ;;  %v209_v61 = vshll.u32 %v5919_v40, 16  ;;  %v215_v34 = vshll.u32 %v5723_v60, 16  ;;  %v220_v58 = vshrl.u32 %v5925_v42, 16  ;;  %5396 = vmatprep.subr.msk.bf16.mxu1 %vm326_vm0, %v5933_v47 }
  0x2e   :  { %v185_v63 = vrot.slane %v184_v56, 4  ;;  %v198_v0 = vor.u32 %v197_v57, %v194_v53  ;;  %v203_v4 = vrot.slane %v201_v59, 5  ;;  %v208_v8 = vrot.slane %v206_v14, 4  ;;  %v4336_v14 = vld [vmem:[%s7618_s0 + $0x10] sm:$0xf] }
  0x2f   :  { %v211_v9 = vrot.slane %v209_v61, 5  ;;  %v217_v10 = vrot.slane %v215_v34, 5  ;;  %v222_v11 = vrot.slane %v220_v58, 4  ;;  %v223_v19 = vshll.u32 %v5925_v42, 16 }
  0x30   :  { %v190_v60 = vsel %vm5789_vm7, %v185_v63, %v189_v52  ;;  %v199_v20 = vrot.slane %v198_v0, 4  ;;  %v229_v36 = vshll.u32 %v5775_v31, 16  ;;  %v234_v27 = vshrl.u32 %v5948_v62, 16  ;;  %v5999_v63 = vld [vmem:[%s7617_s1 + $0x8] sm:$0xf] }
  0x31   :  { %v4273_v25 = vcombine.low %v176_v35, %v190_v60  ;;  %v212_v28 = vor.u32 %v211_v9, %v208_v8  ;;  %v225_v29 = vrot.slane %v223_v19, 5  ;;  %v237_v30 = vshll.u32 %v5948_v62, 16  ;;  %v6015_v60 = vld [vmem:[%s7618_s0 + $0x14] sm:$0x1] }
  0x32   :  { %v204_v31 = vsel %vm5789_vm7, %v199_v20, %v203_v4  ;;  %v231_v12 = vrot.slane %v229_v36, 5  ;;  %v236_v32 = vrot.slane %v234_v27, 4  ;;  %v243_v2 = vshll.u32 %v5797_v49, 16  ;;  %v4338_v36 = vld [vmem:[%s7618_s0 + $0x18] sm:$0xf] }
  0x33   :  { %4919 = vmatprep.mubr.msk.bf16.mxu0 %vm301_vm1, %v4273_v25  ;;  %v213_v37 = vrot.slane %v212_v28, 4  ;;  %5006 = vmatmul.mubr.msk.bf16.gmra.mrb[4].mxu1 %vm301_vm1, %v4272_v50  ;;  %v226_v46 = vor.u32 %v225_v29, %v222_v11  ;;  %v239_v38 = vrot.slane %v237_v30, 5  ;;  %v248_v39 = vshrl.u32 %v5961_v17, 16  ;;  %v4334_v50 = vld [vmem:[%s7618_s0 + $0x8] sm:$0xf] }
  0x34   :  { %v245_v41 = vrot.slane %v243_v2, 5  ;;  %v251_v13 = vshll.u32 %v5961_v17, 16  ;;  %v257_v44 = vshll.u32 %v5802_v54, 16  ;;  %v262_v45 = vshrl.u32 %v5967_v1, 16  ;;  %5009 = vmatprep.mubr.msk.bf16.mxu1 %vm301_vm1, %v4273_v25  ;;  %v5987_v54 = vld [vmem:[%s7618_s0 + $0xc] sm:$0x1] }
  0x35   :  { %v218_v49 = vsel %vm5789_vm7, %v213_v37, %v217_v10  ;;  %v227_v48 = vrot.slane %v226_v46, 4  ;;  %v240_v51 = vor.u32 %v239_v38, %v236_v32  ;;  %v250_v52 = vrot.slane %v248_v39, 4  ;;  %v6029_v30 = vld [vmem:[%s7618_s0 + $0x1c] sm:$0x1]  ;;  %v4340_v37 = vld [vmem:[%s7618_s0 + $0x20] sm:$0xf] }
  0x36   :  { %v4274_v53 = vcombine.low %v204_v31, %v218_v49  ;;  %v253_v56 = vrot.slane %v251_v13, 5  ;;  %v259_v57 = vrot.slane %v257_v44, 5  ;;  %v264_v59 = vrot.slane %v262_v45, 4 }
  0x37   :  { %v232_v35 = vsel %vm5789_vm7, %v227_v48, %v231_v12  ;;  %v241_v61 = vrot.slane %v240_v51, 4  ;;  %v265_v34 = vshll.u32 %v5967_v1, 16  ;;  %v271_v58 = vshll.u32 %v5814_v3, 16 }
  0x38   :  { %4920 = vmatmul.mubr.msk.bf16.gmra.mrb[8].mxu0 %vm301_vm1, %v4274_v53  ;;  %v254_v0 = vor.u32 %v253_v56, %v250_v52  ;;  %v492_v4 = vsel %vm326_vm0, %v5885_v26, 0  ;;  %v4285_v8 = vcombine.low %v5739_v5, %v5744_v7  ;;  %v4286_v9 = vcombine.low %v5751_v15, %v5765_v23  ;;  %v6044_v52 = vld [vmem:[%s7618_s0 + $0x24] sm:$0x1] }
  0x39   :  { %v246_v3 = vsel %vm5789_vm7, %v241_v61, %v245_v41  ;;  %v267_v10 = vrot.slane %v265_v34, 5  ;;  %v273_v11 = vrot.slane %v271_v58, 5  ;;  %4928 = vmatpush3.bf16.msra.mxu0 %v492_v4  ;;  %v4287_v19 = vcombine.low %v5827_v16, %v5837_v22  ;;  %v6053_v61 = vld [vmem:[%s7618_s0 + $0x2c] sm:$0x1]  ;;  %v6130_v16 = vld [vmem:[%s7618_s0 + $0x5c] sm:$0x1] }
  0x3a   :  { %v4275_v26 = vcombine.low %v232_v35, %v246_v3  ;;  %v255_v20 = vrot.slane %v254_v0, 4  ;;  %v4288_v5 = vcombine.low %v5855_v33, %v5867_v21  ;;  %v823_v7 = vshrl.u32 %v4334_v50, 16  ;;  %5391 = vmatprep.subr.msk.bf16.mxu0 %vm326_vm0, %v5999_v63  ;;  %v4342_v35 = vld [vmem:[%s7618_s0 + $0x28] sm:$0xf]  ;;  %v4344_v3 = vld [vmem:[%s7618_s0 + $0x30] sm:$0xf] }
  0x3b   :  { %v268_v27 = vor.u32 %v267_v10, %v264_v59  ;;  %5010 = vmatmul.mubr.msk.bf16.gmra.mrb[8].mxu1 %vm301_vm1, %v4274_v53  ;;  %v826_v25 = vshll.u32 %v4334_v50, 16  ;;  %v832_v28 = vshll.u32 %v5987_v54, 16  ;;  %v837_v29 = vshrl.u32 %v4336_v14, 16  ;;  %v6180_v33 = vld [vmem:[%s7618_s0 + $0x74] sm:$0x1] }
  0x3c   :  { %4923 = vmatprep.mubr.msk.bf16.mxu0 %vm301_vm1, %v4275_v26  ;;  %v260_v31 = vsel %vm5789_vm7, %v255_v20, %v259_v57  ;;  %5013 = vmatprep.mubr.msk.bf16.mxu1 %vm301_vm1, %v4275_v26  ;;  %v825_v12 = vrot.slane %v823_v7, 4  ;;  %v840_v32 = vshll.u32 %v4336_v14, 16  ;;  %v846_v2 = vshll.u32 %v6015_v60, 16 }
  0x3d   :  { %v269_v46 = vrot.slane %v268_v27, 4  ;;  %v828_v38 = vrot.slane %v826_v25, 5  ;;  %v834_v39 = vrot.slane %v832_v28, 5  ;;  %v839_v41 = vrot.slane %v837_v29, 4  ;;  %v6073_v28 = vld [vmem:[%s7618_s0 + $0x34] sm:$0x1] }
  0x3e   :  { %v842_v13 = vrot.slane %v840_v32, 5  ;;  %v848_v44 = vrot.slane %v846_v2, 5  ;;  %v851_v45 = vshrl.u32 %v4338_v36, 16  ;;  %v854_v49 = vshll.u32 %v4338_v36, 16 }
  0x3f   :  { %v274_v48 = vsel %vm5789_vm7, %v269_v46, %v273_v11  ;;  %v829_v51 = vor.u32 %v828_v38, %v825_v12  ;;  %v860_v50 = vshll.u32 %v6029_v30, 16  ;;  %v865_v53 = vshrl.u32 %v4340_v37, 16  ;;  %v4346_v46 = vld [vmem:[%s7618_s0 + $0x38] sm:$0xf] }
  0x40   :  { %v4276_v56 = vcombine.low %v260_v31, %v274_v48  ;;  %v843_v57 = vor.u32 %v842_v13, %v839_v41  ;;  %v853_v59 = vrot.slane %v851_v45, 4  ;;  %v856_v14 = vrot.slane %v854_v49, 5 }
  0x41   :  { %v830_v34 = vrot.slane %v829_v51, 4  ;;  %v862_v58 = vrot.slane %v860_v50, 5  ;;  %v867_v0 = vrot.slane %v865_v53, 4  ;;  %v868_v4 = vshll.u32 %v4340_v37, 16  ;;  %v4348_v50 = vld [vmem:[%s7618_s0 + $0x40] sm:$0xf] }
  0x42   :  { %4924 = vmatmul.mubr.msk.bf16.gmra.mrb[12].mxu0 %vm301_vm1, %v4276_v56  ;;  %v844_v10 = vrot.slane %v843_v57, 4  ;;  %v857_v11 = vor.u32 %v856_v14, %v853_v59  ;;  %v874_v26 = vshll.u32 %v6044_v52, 16  ;;  %v1899_v20 = vsel %vm326_vm0, %v5933_v47, 0  ;;  %v6099_v57 = vld [vmem:[%s7618_s0 + $0x44] sm:$0x1] }
  0x43   :  { %4929 = vmatprep.mubr.msk.bf16.mxu0 %vm301_vm1, %v4285_v8  ;;  %5014 = vmatmul.mubr.msk.bf16.gmra.mrb[12].mxu1 %vm301_vm1, %v4276_v56  ;;  %v835_v7 = vsel %vm5789_vm7, %v830_v34, %v834_v39  ;;  %v870_v36 = vrot.slane %v868_v4, 5  ;;  %v4289_v27 = vcombine.low %v5879_v55, %v5898_v18  ;;  %v4290_v25 = vcombine.low %v5908_v24, %v5919_v40  ;;  %v4350_v4 = vld [vmem:[%s7618_s0 + $0x58] sm:$0xf]  ;;  %v6191_v18 = vld [vmem:[%s7618_s0 + $0x7c] sm:$0x1] }
  0x44   :  { %v849_v47 = vsel %vm5789_vm7, %v844_v10, %v848_v44  ;;  %v858_v8 = vrot.slane %v857_v11, 4  ;;  %v876_v29 = vrot.slane %v874_v26, 5  ;;  %v879_v31 = vshrl.u32 %v4342_v35, 16  ;;  %v6088_v44 = vld [vmem:[%s7618_s0 + $0x3c] sm:$0x1] }
  0x45   :  { %v6077_v12 = vcombine.low %v835_v7, %v849_v47  ;;  %v871_v32 = vor.u32 %v870_v36, %v867_v0  ;;  %v882_v2 = vshll.u32 %v4342_v35, 16  ;;  %v888_v37 = vshll.u32 %v6053_v61, 16  ;;  %v6116_v7 = vld [vmem:[%s7617_s1 + $0x34] sm:$0xf]  ;;  %v4358_v55 = vld [vmem:[%s7618_s0 + $0x78] sm:$0xf] }
  0x46   :  { %v863_v38 = vsel %vm5789_vm7, %v858_v8, %v862_v58  ;;  %v881_v39 = vrot.slane %v879_v31, 4  ;;  %v893_v41 = vshrl.u32 %v4344_v3, 16  ;;  %v896_v13 = vshll.u32 %v4344_v3, 16 }
  0x47   :  { %5019 = vmatprep.mubr.msk.bf16.mxu1 %vm301_vm1, %v6077_v12  ;;  %v872_v45 = vrot.slane %v871_v32, 4  ;;  %v884_v49 = vrot.slane %v882_v2, 5  ;;  %v890_v48 = vrot.slane %v888_v37, 5  ;;  %v902_v51 = vshll.u32 %v6073_v28, 16  ;;  %v4352_v37 = vld [vmem:[%s7618_s0 + $0x60] sm:$0xf] }
  0x48   :  { %v895_v53 = vrot.slane %v893_v41, 4  ;;  %v898_v56 = vrot.slane %v896_v13, 5  ;;  %v907_v59 = vshrl.u32 %v4346_v46, 16  ;;  %v910_v14 = vshll.u32 %v4346_v46, 16  ;;  %v6142_v46 = vld [vmem:[%s7618_s0 + $0x64] sm:$0x1] }
  0x49   :  { %v877_v35 = vsel %vm5789_vm7, %v872_v45, %v876_v29  ;;  %v885_v34 = vor.u32 %v884_v49, %v881_v39  ;;  %v904_v58 = vrot.slane %v902_v51, 5  ;;  %v916_v0 = vshll.u32 %v6088_v44, 16  ;;  %v4354_v13 = vld [vmem:[%s7618_s0 + $0x68] sm:$0xf] }
  0x4a   :  { %4930 = vmatmul.mubr.msk.bf16.vlgmr.msra.gmra.mrb[0].mxu0 %vm301_vm1, %v4286_v9  ;;  %v6111_v3 = vcombine.low %v863_v38, %v877_v35  ;;  %v899_v10 = vor.u32 %v898_v56, %v895_v53  ;;  %v909_v11 = vrot.slane %v907_v59, 4  ;;  %v912_v26 = vrot.slane %v910_v14, 5 }
  0x4b   :  { %4933 = vmatprep.mubr.msk.bf16.mxu0 %vm301_vm1, %v4287_v19  ;;  %v886_v36 = vrot.slane %v885_v34, 4  ;;  %v918_v47 = vrot.slane %v916_v0, 5  ;;  %v921_v15 = vshrl.u32 %v4348_v50, 16  ;;  %v924_v23 = vshll.u32 %v4348_v50, 16  ;;  %v6157_v50 = vld [vmem:[%s7618_s0 + $0x6c] sm:$0x1] }
  0x4c   :  { %5020 = vmatmul.mubr.msk.bf16.vlgmr.msra.gmra.mrb[0].mxu1 %vm301_vm1, %v6111_v3  ;;  %v900_v9 = vrot.slane %v899_v10, 4  ;;  %v913_v8 = vor.u32 %v912_v26, %v909_v11  ;;  %v930_v29 = vshll.u32 %v6099_v57, 16  ;;  %v4291_v31 = vcombine.low %v5925_v42, %v5948_v62  ;;  %v6247_v42 = vld [vmem:[%s7618_s0 + $0x94] sm:$0x1] }
  0x4d   :  { %5036 = vmatpush3.bf16.msra.mxu1 %v1899_v20  ;;  %v891_v22 = vsel %vm5789_vm7, %v886_v36, %v890_v48  ;;  %v923_v19 = vrot.slane %v921_v15, 4  ;;  %v926_v32 = vrot.slane %v924_v23, 5  ;;  %v4292_v2 = vcombine.low %v5961_v17, %v5967_v1 }
  0x4e   :  { %v905_v20 = vsel %vm5789_vm7, %v900_v9, %v904_v58  ;;  %v914_v38 = vrot.slane %v913_v8, 4  ;;  %v932_v39 = vrot.slane %v930_v29, 5  ;;  %v935_v41 = vshrl.u32 %v4350_v4, 16  ;;  %5401 = vmatprep.subr.msk.bf16.mxu1 %vm326_vm0, %v6116_v7 }
  0x4f   :  { %v6151_v45 = vcombine.low %v891_v22, %v905_v20  ;;  %v927_v49 = vor.u32 %v926_v32, %v923_v19  ;;  %v938_v48 = vshll.u32 %v4350_v4, 16  ;;  %v944_v51 = vshll.u32 %v6130_v16, 16  ;;  %v4356_v4 = vld [vmem:[%s7618_s0 + $0x70] sm:$0xf] }
  0x50   :  { %v919_v53 = vsel %vm5789_vm7, %v914_v38, %v918_v47  ;;  %v937_v56 = vrot.slane %v935_v41, 4  ;;  %v949_v59 = vshrl.u32 %v4352_v37, 16  ;;  %v952_v14 = vshll.u32 %v4352_v37, 16  ;;  %v6196_v37 = vld [vmem:[%s7617_s1 + $0xc] sm:$0xf] }
  0x51   :  { %5023 = vmatprep.mubr.msk.bf16.mxu1 %vm301_vm1, %v6151_v45  ;;  %v928_v35 = vrot.slane %v927_v49, 4  ;;  %v940_v34 = vrot.slane %v938_v48, 5  ;;  %v946_v58 = vrot.slane %v944_v51, 5  ;;  %v958_v0 = vshll.u32 %v6142_v46, 16 }
  0x52   :  { %4934 = vmatmul.mubr.msk.bf16.gmra.mrb[4].mxu0 %vm301_vm1, %v4288_v5  ;;  %v951_v10 = vrot.slane %v949_v59, 4  ;;  %v954_v11 = vrot.slane %v952_v14, 5  ;;  %v963_v26 = vshrl.u32 %v4354_v13, 16  ;;  %v966_v36 = vshll.u32 %v4354_v13, 16  ;;  %v4360_v13 = vld [vmem:[%s7618_s0 + $0x80] sm:$0xf] }
  0x53   :  { %4937 = vmatprep.mubr.msk.bf16.mxu0 %vm301_vm1, %v4289_v27  ;;  %v933_v47 = vsel %vm5789_vm7, %v928_v35, %v932_v39  ;;  %v941_v15 = vor.u32 %v940_v34, %v937_v56  ;;  %v960_v23 = vrot.slane %v958_v0, 5  ;;  %v972_v21 = vshll.u32 %v6157_v50, 16  ;;  %v4362_v34 = vld [vmem:[%s7618_s0 + $0x88] sm:$0xf] }
  0x54   :  { %v6183_v5 = vcombine.low %v919_v53, %v933_v47  ;;  %v955_v9 = vor.u32 %v954_v11, %v951_v10  ;;  %v965_v8 = vrot.slane %v963_v26, 4  ;;  %v968_v29 = vrot.slane %v966_v36, 5  ;;  %v6211_v53 = vld [vmem:[%s7618_s0 + $0x84] sm:$0x1] }
  0x55   :  { %v942_v27 = vrot.slane %v941_v15, 4  ;;  %v974_v22 = vrot.slane %v972_v21, 5  ;;  %v977_v19 = vshrl.u32 %v4356_v4, 16  ;;  %v980_v32 = vshll.u32 %v4356_v4, 16  ;;  %v6232_v15 = vld [vmem:[%s7618_s0 + $0x8c] sm:$0x1] }
  0x56   :  { %5024 = vmatmul.mubr.msk.bf16.gmra.mrb[4].mxu1 %vm301_vm1, %v6183_v5  ;;  %v956_v20 = vrot.slane %v955_v9, 4  ;;  %v969_v38 = vor.u32 %v968_v29, %v965_v8  ;;  %v986_v39 = vshll.u32 %v6180_v33, 16  ;;  %v675_v41 = vsel %vm326_vm0, %v5999_v63, 0 }
  0x57   :  { %v947_v49 = vsel %vm5789_vm7, %v942_v27, %v946_v58  ;;  %v979_v48 = vrot.slane %v977_v19, 4  ;;  %v982_v51 = vrot.slane %v980_v32, 5  ;;  %4946 = vmatpush3.bf16.msra.mxu0 %v675_v41  ;;  %v991_v56 = vshrl.u32 %v4358_v55, 16  ;;  %v4435_v19 = vld [vmem:[%s7618_s0 + $0x8] sm:$0xe] }
  0x58   :  { %v961_v59 = vsel %vm5789_vm7, %v956_v20, %v960_v23  ;;  %v970_v63 = vrot.slane %v969_v38, 4  ;;  %v988_v14 = vrot.slane %v986_v39, 5  ;;  %v994_v35 = vshll.u32 %v4358_v55, 16  ;;  %5392 = vmatprep.subr.msk.bf16.mxu0 %vm326_vm0, %v6196_v37  ;;  %v4364_v23 = vld [vmem:[%s7618_s0 + $0x90] sm:$0xf] }
  0x59   :  { %v6220_v58 = vcombine.low %v947_v49, %v961_v59  ;;  %v983_v0 = vor.u32 %v982_v51, %v979_v48  ;;  %v993_v4 = vrot.slane %v991_v56, 4  ;;  %v1000_v10 = vshll.u32 %v6191_v18, 16  ;;  %v5414_v20 = vld [vmem:[%s7618_s0 + $0x8] ss:$8 sps:$4 sm:$0xff]  }
  0x5a   :  { %4938 = vmatmul.mubr.msk.bf16.gmra.mrb[8].mxu0 %vm301_vm1, %v4290_v25  ;;  %v975_v11 = vsel %vm5789_vm7, %v970_v63, %v974_v22  ;;  %v996_v26 = vrot.slane %v994_v35, 5  ;;  %v1005_v36 = vshrl.u32 %v4360_v13, 16  ;;  %v1008_v47 = vshll.u32 %v4360_v13, 16  ;;  %v4436_v51 = vld [vmem:[%s7618_s0 + $0x10] sm:$0xe] }
  0x5b   :  { %4941 = vmatprep.mubr.msk.bf16.mxu0 %vm301_vm1, %v4291_v31  ;;  %5027 = vmatprep.mubr.msk.bf16.mxu1 %vm301_vm1, %v6220_v58  ;;  %v984_v24 = vrot.slane %v983_v0, 4  ;;  %v1002_v40 = vrot.slane %v1000_v10, 5  ;;  %v1014_v25 = vshll.u32 %v6211_v53, 16  ;;  %v1019_v21 = vshrl.u32 %v4362_v34, 16 }
  0x5c   :  { %v997_v9 = vor.u32 %v996_v26, %v993_v4  ;;  %v1007_v8 = vrot.slane %v1005_v36, 4  ;;  %v1010_v29 = vrot.slane %v1008_v47, 5  ;;  %v1022_v62 = vshll.u32 %v4362_v34, 16 }
  0x5d   :  { %v989_v31 = vsel %vm5789_vm7, %v984_v24, %v988_v14  ;;  %v1016_v55 = vrot.slane %v1014_v25, 5  ;;  %v1021_v27 = vrot.slane %v1019_v21, 4  ;;  %v1028_v22 = vshll.u32 %v6232_v15, 16 }
  0x5e   :  { %v6255_v32 = vcombine.low %v975_v11, %v989_v31  ;;  %v998_v38 = vrot.slane %v997_v9, 4  ;;  %v1011_v39 = vor.u32 %v1010_v29, %v1007_v8  ;;  %v1024_v41 = vrot.slane %v1022_v62, 5  ;;  %v4439_v8 = vld [vmem:[%s7618_s0 + $0x28] sm:$0xe]  ;;  %v4440_v29 = vld [vmem:[%s7618_s0 + $0x30] sm:$0xe] }
  0x5f   :  { %v1033_v13 = vshrl.u32 %v4364_v23, 16  ;;  %v1036_v49 = vshll.u32 %v4364_v23, 16  ;;  %v1042_v48 = vshll.u32 %v6247_v42, 16  ;;  %v4451_v14 = vrot.slane %v4435_v19, 9  ;;  %v5416_v31 = vld [vmem:[%s7618_s0 + $0x28] ss:$8 sps:$4 sm:$0xff]  }
  0x60   :  { %5028 = vmatmul.mubr.msk.bf16.gmra.mrb[8].mxu1 %vm301_vm1, %v6255_v32  ;;  %v1003_v56 = vsel %vm5789_vm7, %v998_v38, %v1002_v40  ;;  %v1012_v59 = vrot.slane %v1011_v39, 4  ;;  %v1025_v63 = vor.u32 %v1024_v41, %v1021_v27  ;;  %v1030_v35 = vrot.slane %v1028_v22, 5 }
  0x61   :  { %v1035_v34 = vrot.slane %v1033_v13, 4  ;;  %v1038_v0 = vrot.slane %v1036_v49, 5  ;;  %v1786_v4 = vrot.slane %v5987_v54, 5  ;;  %v4452_v26 = vrot.slane %v4436_v51, 9  ;;  %v4437_v54 = vld [vmem:[%s7618_s0 + $0x18] sm:$0xe] }
  0x62   :  { %4942 = vmatmul.mubr.msk.bf16.gmra.mrb[12].mxu0 %vm301_vm1, %v4292_v2  ;;  %v1017_v10 = vsel %vm5789_vm7, %v1012_v59, %v1016_v55  ;;  %v1026_v11 = vrot.slane %v1025_v63, 4  ;;  %v1790_v36 = vrot.slane %v6015_v60, 5  ;;  %v1044_v40 = vrot.slane %v1042_v48, 5  ;;  %v4438_v60 = vld [vmem:[%s7618_s0 + $0x20] sm:$0xe] }
  0x63   :  { %4947 = vmatprep.mubr.msk.bf16.mxu0 %vm301_vm1, %v5414_v20  ;;  %v6277_v47 = vcombine.low %v1003_v56, %v1017_v10  ;;  %v1039_v24 = vor.u32 %v1038_v0, %v1035_v34  ;;  %v1787_v17 = vsel %vm5608_vm4, %v4451_v14, %v1786_v4  ;;  %v5415_v2 = vld [vmem:[%s7618_s0 + $0x18] ss:$8 sps:$4 sm:$0xff]   ;;  %v4453_v21 = vrot.slane %v4437_v54, 9  ;;  %v6334_v49 = vld [vmem:[%s7617_s1 + $0x24] sm:$0xf] }
  0x64   :  { %v1791_v1 = vsel %vm5608_vm4, %v4452_v26, %v1790_v36  ;;  %v1031_v25 = vsel %vm5789_vm7, %v1026_v11, %v1030_v35  ;;  %v1794_v9 = vrot.slane %v6029_v30, 5  ;;  %v4454_v27 = vrot.slane %v4438_v60, 9  ;;  %v4443_v13 = vld [vmem:[%s7618_s0 + $0x58] sm:$0xe]  ;;  %v4444_v56 = vld [vmem:[%s7618_s0 + $0x60] sm:$0xe] }
  0x65   :  { %5031 = vmatprep.mubr.msk.bf16.mxu1 %vm301_vm1, %v6277_v47  ;;  %v1040_v23 = vrot.slane %v1039_v24, 4  ;;  %v4468_v55 = vcombine.low %v1787_v17, %v1791_v1  ;;  %v1798_v22 = vrot.slane %v6044_v52, 5  ;;  %v4455_v19 = vrot.slane %v4439_v8, 9  ;;  %v5417_v63 = vld [vmem:[%s7618_s0 + $0x38] ss:$8 sps:$4 sm:$0xff]  }
  0x66   :  { %v1802_v20 = vrot.slane %v6053_v61, 5  ;;  %v4456_v38 = vrot.slane %v4440_v29, 9  ;;  %v1806_v39 = vrot.slane %v6073_v28, 5  ;;  %v1795_v52 = vsel %vm5608_vm4, %v4453_v21, %v1794_v9  ;;  %v4441_v61 = vld [vmem:[%s7618_s0 + $0x38] sm:$0xe] }
  0x67   :  { %v1045_v62 = vsel %vm5789_vm7, %v1040_v23, %v1044_v40  ;;  %v1799_v41 = vsel %vm5608_vm4, %v4454_v27, %v1798_v22  ;;  %v4442_v28 = vld [vmem:[%s7618_s0 + $0x40] sm:$0xe]  ;;  %v1097_v59 = vsel %vm326_vm0, %v6196_v37, 0  ;;  %v3540_v35 = vsel %vm326_vm0, %v6116_v7, 0  ;;  %v6362_v40 = vld [vmem:[%s7617_s1 + $0x30] sm:$0xf] }
  0x68   :  { %v6309_v30 = vcombine.low %v1031_v25, %v1045_v62  ;;  %v1803_v48 = vsel %vm5608_vm4, %v4455_v19, %v1802_v20  ;;  %v1807_v51 = vsel %vm5608_vm4, %v4456_v38, %v1806_v39  ;;  %v4469_v14 = vcombine.low %v1795_v52, %v1799_v41  ;;  %v5418_v0 = vld [vmem:[%s7618_s0 + $0x58] ss:$8 sps:$4 sm:$0xff]   ;;  %v5419_v54 = vld [vmem:[%s7618_s0 + $0x68] ss:$8 sps:$4 sm:$0xff]  }
  0x69   :  { %v4457_v34 = vrot.slane %v4441_v61, 9  ;;  %v1810_v4 = vrot.slane %v6088_v44, 5  ;;  %v4458_v10 = vrot.slane %v4442_v28, 9  ;;  %v1814_v11 = vrot.slane %v6099_v57, 5  ;;  %v4445_v44 = vld [vmem:[%s7618_s0 + $0x68] sm:$0xe] }
  0x6a   :  { %4948 = vmatmul.mubr.msk.bf16.vlgmr.msra.gmra.mrb[0].mxu0 %vm301_vm1, %v5415_v2  ;;  %5032 = vmatmul.mubr.msk.bf16.gmra.mrb[12].mxu1 %vm301_vm1, %v6309_v30  ;;  %v4459_v37 = vrot.slane %v4443_v13, 9  ;;  %v4470_v26 = vcombine.low %v1803_v48, %v1807_v51  ;;  %v1818_v36 = vrot.slane %v6130_v16, 5  ;;  %v4460_v24 = vrot.slane %v4444_v56, 9  ;;  %v4446_v57 = vld [vmem:[%s7618_s0 + $0x70] sm:$0xe] }
  0x6b   :  { %4951 = vmatprep.mubr.msk.bf16.mxu0 %vm301_vm1, %v5416_v31  ;;  %5037 = vmatprep.mubr.msk.bf16.mxu1 %vm301_vm1, %v4468_v55  ;;  %v1822_v7 = vrot.slane %v6142_v46, 5  ;;  %v1811_v16 = vsel %vm5608_vm4, %v4457_v34, %v1810_v4  ;;  %v1815_v46 = vsel %vm5608_vm4, %v4458_v10, %v1814_v11  ;;  %v4447_v60 = vld [vmem:[%s7618_s0 + $0x78] sm:$0xe]  ;;  %v4461_v2 = vrot.slane %v4445_v44, 9  ;;  %v4448_v9 = vld [vmem:[%s7618_s0 + $0x80] sm:$0xe] }
  0x6c   :  { %4964 = vmatpush3.bf16.msra.mxu0 %v1097_v59  ;;  %v1819_v17 = vsel %vm5608_vm4, %v4459_v37, %v1818_v36  ;;  %v1826_v25 = vrot.slane %v6157_v50, 5  ;;  %v4462_v23 = vrot.slane %v4446_v57, 9  ;;  %v1830_v21 = vrot.slane %v6180_v33, 5  ;;  %v5420_v29 = vld [vmem:[%s7618_s0 + $0x78] ss:$8 sps:$4 sm:$0xff]  }
  0x6d   :  { %5397 = vmatprep.subr.msk.bf16.mxu0 %vm326_vm0, %v6334_v49  ;;  %v1823_v1 = vsel %vm5608_vm4, %v4460_v24, %v1822_v7  ;;  %v4471_v8 = vcombine.low %v1811_v16, %v1815_v46  ;;  %v4449_v62 = vld [vmem:[%s7618_s0 + $0x88] sm:$0xe]  ;;  %v4450_v50 = vld [vmem:[%s7618_s0 + $0x90] sm:$0xe]  ;;  %v6407_v33 = vld [vmem:[%s7618_s0 + $0xc] sm:$0x1] }
  0x6e   :  { %v4472_v31 = vcombine.low %v1819_v17, %v1823_v1  ;;  %v6412_v55 = vld [vmem:[%s7618_s0 + $0x14] sm:$0x1]  ;;  %v4634_v27 = vld [vmem:[%s7618_s0 + $0x8] sm:$0xe]  ;;  %v4463_v22 = vrot.slane %v4447_v60, 9  ;;  %v1834_v19 = vrot.slane %v6191_v18, 5  ;;  %v1827_v52 = vsel %vm5608_vm4, %v4461_v2, %v1826_v25 }
  0x6f   :  { %v4464_v20 = vrot.slane %v4448_v9, 9  ;;  %v1838_v38 = vrot.slane %v6211_v53, 5  ;;  %v4635_v39 = vld [vmem:[%s7618_s0 + $0x10] sm:$0xe]  ;;  %v1831_v41 = vsel %vm5608_vm4, %v4462_v23, %v1830_v21  ;;  %v6429_v61 = vld [vmem:[%s7618_s0 + $0x1c] sm:$0x1] }
  0x70   :  { %v6434_v18 = vld [vmem:[%s7618_s0 + $0x24] sm:$0x1]  ;;  %v4465_v53 = vrot.slane %v4449_v62, 9  ;;  %v1842_v28 = vrot.slane %v6232_v15, 5  ;;  %v4466_v13 = vrot.slane %v4450_v50, 9  ;;  %v1846_v48 = vrot.slane %v6247_v42, 5 }
  0x71   :  { %v4636_v51 = vld [vmem:[%s7618_s0 + $0x18] sm:$0xe]  ;;  %v4650_v56 = vrot.slane %v4634_v27, 9  ;;  %v3427_v59 = vrot.slane %v6407_v33, 5  ;;  %v4637_v15 = vld [vmem:[%s7618_s0 + $0x20] sm:$0xe]  ;;  %v1839_v34 = vsel %vm5608_vm4, %v4464_v20, %v1838_v38 }
  0x72   :  { %4952 = vmatmul.mubr.msk.bf16.gmra.mrb[4].mxu0 %vm301_vm1, %v5417_v63  ;;  %5038 = vmatmul.mubr.msk.bf16.vlgmr.msra.gmra.mrb[0].mxu1 %vm301_vm1, %v4469_v14  ;;  %v4651_v63 = vrot.slane %v4635_v39, 9  ;;  %v3431_v14 = vrot.slane %v6412_v55, 5  ;;  %v5421_v42 = vld [vmem:[%s7618_s0 + $0x88] ss:$8 sps:$4 sm:$0xff]   ;;  %v4652_v4 = vrot.slane %v4636_v51, 9  ;;  %v3435_v10 = vrot.slane %v6429_v61, 5 }
  0x73   :  { %5126 = vmatpush3.bf16.msra.mxu1 %v3540_v35  ;;  %4955 = vmatprep.mubr.msk.bf16.mxu0 %vm301_vm1, %v5418_v0  ;;  %v1835_v35 = vsel %vm5608_vm4, %v4463_v22, %v1834_v19  ;;  %v6460_v0 = vld [vmem:[%s7618_s0 + $0x2c] sm:$0x1]  ;;  %v6466_v11 = vld [vmem:[%s7618_s0 + $0x8] sm:$0xf]  ;;  %v6471_v37 = vld [vmem:[%s7618_s0 + $0x10] sm:$0xf]  ;;  %v6475_v36 = vsel %vm5608_vm4, %v4465_v53, %v1842_v28  ;;  %v6486_v46 = vsel %vm5608_vm4, %v4466_v13, %v1846_v48 }
  0x74   :  { %5041 = vmatprep.mubr.msk.bf16.mxu1 %vm301_vm1, %v4470_v26  ;;  %5402 = vmatprep.subr.msk.bf16.mxu1 %vm326_vm0, %v6362_v40  ;;  %v4473_v26 = vcombine.low %v1827_v52, %v1831_v41  ;;  %v4653_v24 = vrot.slane %v4637_v15, 9  ;;  %v3439_v7 = vrot.slane %v6434_v18, 5  ;;  %v4638_v44 = vld [vmem:[%s7618_s0 + $0x28] sm:$0xe]  ;;  %v4639_v57 = vld [vmem:[%s7618_s0 + $0x30] sm:$0xe]  ;;  %v4474_v16 = vcombine.low %v1835_v35, %v1839_v34 }
  0x75   :  { %v6494_v17 = vsel %vm5608_vm4, %v4651_v63, %v3431_v14  ;;  %v6499_v1 = vld [vmem:[%s7618_s0 + $0x34] sm:$0x1]  ;;  %v6504_v60 = vld [vmem:[%s7618_s0 + $0x3c] sm:$0x1]  ;;  %v4640_v2 = vld [vmem:[%s7618_s0 + $0x38] sm:$0xe]  ;;  %v4475_v39 = vcombine.low %v6475_v36, %v6486_v46 }
  0x76   :  { %v2178_v25 = vshrl.u32 %v6466_v11, 16  ;;  %v2181_v23 = vshll.u32 %v6466_v11, 16  ;;  %v2192_v21 = vshrl.u32 %v6471_v37, 16  ;;  %v2195_v9 = vshll.u32 %v6471_v37, 16  ;;  %v4641_v19 = vld [vmem:[%s7618_s0 + $0x40] sm:$0xe] }
  0x77   :  { %v3443_v62 = vrot.slane %v6460_v0, 5  ;;  %v4655_v50 = vrot.slane %v4639_v57, 9  ;;  %v6527_v27 = vsel %vm5608_vm4, %v4653_v24, %v3439_v7  ;;  %v3447_v22 = vrot.slane %v6499_v1, 5  ;;  %v6548_v53 = vld [vmem:[%s7618_s0 + $0x5c] sm:$0x1] }
  0x78   :  { %v4656_v20 = vrot.slane %v4640_v2, 9  ;;  %v3451_v38 = vrot.slane %v6504_v60, 5  ;;  %v6543_v41 = vsel %vm326_vm0, %v6362_v40, 0  ;;  %v6556_v28 = vld [vmem:[%s7618_s0 + $0x64] sm:$0x1]  ;;  %v2180_v40 = vrot.slane %v2178_v25, 4 }
  0x79   :  { %v4643_v13 = vld [vmem:[%s7618_s0 + $0x60] sm:$0xe]  ;;  %v2183_v48 = vrot.slane %v2181_v23, 5  ;;  %v2194_v51 = vrot.slane %v2192_v21, 4  ;;  %v4657_v15 = vrot.slane %v4641_v19, 9  ;;  %v3459_v36 = vrot.slane %v6548_v53, 5 }
  0x7a   :  { %4956 = vmatmul.mubr.msk.bf16.gmra.mrb[8].mxu0 %vm301_vm1, %v5419_v54  ;;  %5042 = vmatmul.mubr.msk.bf16.gmra.mrb[4].mxu1 %vm301_vm1, %v4471_v8  ;;  %v6490_v54 = vsel %vm5608_vm4, %v4650_v56, %v3427_v59  ;;  %v6515_v8 = vsel %vm5608_vm4, %v4652_v4, %v3435_v10  ;;  %v2197_v56 = vrot.slane %v2195_v9, 5  ;;  %v6564_v59 = vld [vmem:[%s7618_s0 + $0x18] sm:$0xf]  ;;  %v6576_v35 = vld [vmem:[%s7618_s0 + $0x6c] sm:$0x1]  ;;  %v6585_v4 = vsel %vm5608_vm4, %v4655_v50, %v3447_v22 }
  0x7b   :  { %4959 = vmatprep.mubr.msk.bf16.mxu0 %vm301_vm1, %v5420_v29  ;;  %5045 = vmatprep.mubr.msk.bf16.mxu1 %vm301_vm1, %v4472_v31  ;;  %v4654_v29 = vrot.slane %v4638_v44, 9  ;;  %v6521_v31 = vld [vmem:[%s7618_s0 + $0x44] sm:$0x1]  ;;  %v4667_v52 = vcombine.low %v6490_v54, %v6494_v17  ;;  %v4668_v63 = vcombine.low %v6515_v8, %v6527_v27  ;;  %v6581_v34 = vld [vmem:[%s7618_s0 + $0x20] sm:$0xf]  ;;  %v6589_v10 = vsel %vm5608_vm4, %v4656_v20, %v3451_v38 }
  0x7c   :  { %v6595_v24 = vld [vmem:[%s7618_s0 + $0x74] sm:$0x1]  ;;  %v4644_v7 = vld [vmem:[%s7618_s0 + $0x68] sm:$0xe]  ;;  %v4645_v44 = vld [vmem:[%s7618_s0 + $0x70] sm:$0xe]  ;;  %v2184_v17 = vor.u32 %v2183_v48, %v2180_v40  ;;  %v2198_v2 = vor.u32 %v2197_v56, %v2194_v51 }
  0x7d   :  { %v6570_v14 = vsel %vm5608_vm4, %v4654_v29, %v3443_v62  ;;  %v2187_v57 = vshll.u32 %v6407_v33, 16  ;;  %v2206_v46 = vshrl.u32 %v6564_v59, 16  ;;  %v2209_v54 = vshll.u32 %v6564_v59, 16  ;;  %v6624_v19 = vld [vmem:[%s7617_s1 + $0x20] sm:$0xf] }
  0x7e   :  { %v2220_v25 = vshrl.u32 %v6581_v34, 16  ;;  %v2223_v23 = vshll.u32 %v6581_v34, 16  ;;  %v4659_v9 = vrot.slane %v4643_v13, 9  ;;  %v3463_v29 = vrot.slane %v6556_v28, 5  ;;  %v6730_v8 = vld [vmem:[%s7618_s0 + $0x58] sm:$0xf] }
  0x7f   :  { %v2452_v33 = vsel %vm326_vm0, %v6334_v49, 0  ;;  %v3467_v62 = vrot.slane %v6576_v35, 5  ;;  %v4661_v50 = vrot.slane %v4645_v44, 9  ;;  %v3471_v22 = vrot.slane %v6595_v24, 5  ;;  %7626 = vst [vmem:[#allocation2_spill] sm:$0xff] %v6730_v8 }
  0x80   :  { %v2189_v49 = vrot.slane %v2187_v57, 5  ;;  %v2208_v20 = vrot.slane %v2206_v46, 4  ;;  %v2211_v38 = vrot.slane %v2209_v54, 5  ;;  %v2199_v13 = vrot.slane %v2198_v2, 4  ;;  %v6684_v2 = vld [vmem:[%s7618_s0 + $0x88] sm:$0xe] }
  0x81   :  { %v2222_v40 = vrot.slane %v2220_v25, 4  ;;  %v2225_v48 = vrot.slane %v2223_v23, 5  ;;  %v2215_v46 = vshll.u32 %v6429_v61, 16  ;;  %v2229_v54 = vshll.u32 %v6434_v18, 16  ;;  %v6694_v61 = vld [vmem:[%s7618_s0 + $0x38] sm:$0xf] }
  0x82   :  { %4960 = vmatmul.mubr.msk.bf16.gmra.mrb[12].mxu0 %vm301_vm1, %v5421_v42  ;;  %5046 = vmatmul.mubr.msk.bf16.gmra.mrb[8].mxu1 %vm301_vm1, %v4473_v26  ;;  %v3455_v42 = vrot.slane %v6521_v31, 5  ;;  %v6699_v18 = vld [vmem:[%s7617_s1 + $0x38] sm:$0xf]  ;;  %vm2110_vm8 = vcmask 523264  }
  0x83   :  { %4965 = vmatprep.mubr.msk.bf16.mxu0 %vm301_vm1, %v6077_v12  ;;  %5049 = vmatprep.mubr.msk.bf16.mxu1 %vm301_vm1, %v4474_v16  ;;  %v4642_v12 = vld [vmem:[%s7618_s0 + $0x58] sm:$0xe]  ;;  %v2201_v16 = vshll.u32 %v6412_v55, 16  ;;  %v4660_v55 = vrot.slane %v4644_v7, 9  ;;  %v6675_v7 = vld [vmem:[%s7618_s0 + $0x30] sm:$0xf] }
  0x84   :  { %v4658_v26 = vrot.slane %v4642_v12, 9  ;;  %v6611_v21 = vsel %vm5608_vm4, %v4657_v15, %v3455_v42  ;;  %v2185_v12 = vrot.slane %v2184_v17, 4  ;;  %v6647_v15 = vsel %vm5608_vm4, %v4659_v9, %v3463_v29  ;;  %v6652_v42 = vld [vmem:[%s7618_s0 + $0x7c] sm:$0x1] }
  0x85   :  { %v4670_v51 = vcombine.low %v6589_v10, %v6611_v21  ;;  %v2226_v9 = vor.u32 %v2225_v48, %v2222_v40  ;;  %v3475_v29 = vrot.slane %v6652_v42, 5  ;;  %v6741_v40 = vrot.slane %v2229_v54, 5  ;;  %v6746_v48 = vld [vmem:[%s7618_s0 + $0x94] sm:$0x1]  ;;  %v6800_v21 = vld [vmem:[%s7618_s0 + $0x68] sm:$0xf] }
  0x86   :  { %v6643_v56 = vsel %vm5608_vm4, %v4658_v26, %v3459_v36  ;;  %v6667_v26 = vsel %vm5608_vm4, %v4661_v50, %v3471_v22  ;;  %v4647_v36 = vld [vmem:[%s7618_s0 + $0x80] sm:$0xe]  ;;  %v2190_v25 = vsel %vm5789_vm7, %v2185_v12, %v2189_v49  ;;  %v2248_v50 = vshrl.u32 %v6675_v7, 16 }
  0x87   :  { %v6708_v22 = vld [vmem:[%s7618_s0 + $0x40] sm:$0xf] }
  0x88   :  { %v2279_v54 = vshll.u32 %v6708_v22, 16 }
  0x8a   :  { %4966 = vmatmul.mubr.msk.bf16.vlgmr.msra.gmra.mrb[0].mxu0 %vm301_vm1, %v6111_v3  ;;  %5050 = vmatmul.mubr.msk.bf16.gmra.mrb[12].mxu1 %vm301_vm1, %v4475_v39  ;;  %v2203_v3 = vrot.slane %v2201_v16, 5  ;;  %v6632_v39 = vld [vmem:[%s7618_s0 + $0x28] sm:$0xf]  ;;  %v2212_v16 = vor.u32 %v2211_v38, %v2208_v20  ;;  %v4649_v20 = vld [vmem:[%s7618_s0 + $0x90] sm:$0xe] }
  0x8b   :  { %4969 = vmatprep.mubr.msk.bf16.mxu0 %vm301_vm1, %v6151_v45  ;;  %5127 = vmatprep.mubr.msk.bf16.mxu1 %vm301_vm1, %v4667_v52  ;;  %v4646_v45 = vld [vmem:[%s7618_s0 + $0x78] sm:$0xe]  ;;  %v4669_v52 = vcombine.low %v6570_v14, %v6585_v4  ;;  %v6657_v14 = vld [vmem:[%s7618_s0 + $0x84] sm:$0x1]  ;;  %v6663_v4 = vsel %vm5608_vm4, %v4660_v55, %v3467_v62  ;;  %v2234_v44 = vshrl.u32 %v6632_v39, 16  ;;  %v2237_v57 = vshll.u32 %v6632_v39, 16 }
  0x8c   :  { %5054 = vmatpush3.bf16.msra.mxu0 %v2452_v33  ;;  %v4662_v17 = vrot.slane %v4646_v45, 9  ;;  %v2204_v23 = vsel %vm5789_vm7, %v2199_v13, %v2203_v3  ;;  %v4671_v33 = vcombine.low %v6643_v56, %v6647_v15  ;;  %v4663_v55 = vrot.slane %v4647_v36, 9  ;;  %v6721_v3 = vld [vmem:[%s7618_s0 + $0x8c] sm:$0x1] }
  0x8d   :  { %5398 = vmatprep.subr.msk.bf16.mxu0 %vm326_vm0, %v6624_v19  ;;  %v3479_v62 = vrot.slane %v6657_v14, 5  ;;  %v2236_v38 = vrot.slane %v2234_v44, 4  ;;  %v2239_v12 = vrot.slane %v2237_v57, 5  ;;  %v6735_v27 = vcombine.low %v2190_v25, %v2204_v23  ;;  %v6768_v57 = vld [vmem:[%s7618_s0 + $0x60] sm:$0xf] }
  0x8e   :  { %v6739_v13 = vrot.slane %v2215_v46, 5  ;;  %v6749_v45 = vrot.slane %v2226_v9, 4  ;;  %v2243_v56 = vshll.u32 %v6460_v0, 16  ;;  %v2250_v36 = vrot.slane %v2248_v50, 4 }
  0x8f   :  { %v6761_v15 = vsel %vm5608_vm4, %v4663_v55, %v3479_v62  ;;  %v2265_v44 = vshll.u32 %v6694_v61, 16  ;;  %v2276_v0 = vshrl.u32 %v6708_v22, 16  ;;  %v2290_v25 = vshrl.u32 %v6730_v8, 16 }
  0x90   :  { %v2293_v23 = vshll.u32 %v6730_v8, 16  ;;  %v3487_v9 = vrot.slane %v6746_v48, 5  ;;  %v2304_v55 = vshrl.u32 %v6768_v57, 16  ;;  %v2307_v62 = vshll.u32 %v6768_v57, 16 }
  0x91   :  { %v2257_v50 = vshll.u32 %v6499_v1, 16  ;;  %v2278_v49 = vrot.slane %v2276_v0, 4  ;;  %v2281_v8 = vrot.slane %v2279_v54, 5  ;;  %v2299_v0 = vshll.u32 %v6548_v53, 16 }
  0x92   :  { %4970 = vmatmul.mubr.msk.bf16.gmra.mrb[4].mxu0 %vm301_vm1, %v6183_v5  ;;  %5128 = vmatmul.mubr.msk.bf16.vlgmr.msra.gmra.mrb[16].mxu1 %vm301_vm1, %v4668_v63  ;;  %v2251_v5 = vshll.u32 %v6675_v7, 16  ;;  %v6737_v63 = vrot.slane %v2212_v16, 4  ;;  %v2240_v16 = vor.u32 %v2239_v12, %v2236_v38  ;;  %v2267_v12 = vrot.slane %v2265_v44, 5 }
  0x93   :  { %5144 = vmatpush3.bf16.msra.mxu1 %v6543_v41  ;;  %4973 = vmatprep.mubr.msk.bf16.mxu0 %vm301_vm1, %v6220_v58  ;;  %v6753_v58 = vsel %vm5608_vm4, %v4662_v17, %v3475_v29  ;;  %v4664_v41 = vrot.slane %v6684_v2, 9  ;;  %v3483_v17 = vrot.slane %v6721_v3, 5  ;;  %v4665_v2 = vrot.slane %v4649_v20, 9 }
  0x94   :  { %5131 = vmatprep.mubr.msk.bf16.mxu1 %vm301_vm1, %v4669_v52  ;;  %5403 = vmatprep.subr.msk.bf16.mxu1 %vm326_vm0, %v6699_v18  ;;  %v2262_v52 = vshrl.u32 %v6694_v61, 16  ;;  %v2253_v46 = vrot.slane %v2251_v5, 5  ;;  %v6776_v29 = vrot.slane %v2243_v56, 5  ;;  %v2271_v5 = vshll.u32 %v6504_v60, 16 }
  0x95   :  { %v2241_v20 = vrot.slane %v2240_v16, 4  ;;  %v2218_v1 = vsel %vm5789_vm7, %v6737_v63, %v6739_v13  ;;  %v2292_v60 = vrot.slane %v2290_v25, 4  ;;  %v2295_v10 = vrot.slane %v2293_v23, 5  ;;  %v6813_v13 = vld [vmem:[%s7618_s0 + $0x70] sm:$0xf] }
  0x96   :  { %v2264_v38 = vrot.slane %v2262_v52, 4  ;;  %v2254_v56 = vor.u32 %v2253_v46, %v2250_v36  ;;  %v2309_v63 = vrot.slane %v2307_v62, 5  ;;  %v2285_v52 = vshll.u32 %v6521_v31, 16  ;;  %v6834_v31 = vld [vmem:[%s7618_s0 + $0x80] sm:$0xf] }
  0x97   :  { %v2273_v44 = vrot.slane %v2271_v5, 5  ;;  %v2282_v16 = vor.u32 %v2281_v8, %v2278_v49  ;;  %v2296_v46 = vor.u32 %v2295_v10, %v2292_v60  ;;  %v2313_v54 = vshll.u32 %v6556_v28, 16 }
  0x98   :  { %v2268_v36 = vor.u32 %v2267_v12, %v2264_v38  ;;  %v2321_v25 = vshll.u32 %v6800_v21, 16  ;;  %v2332_v23 = vshrl.u32 %v6813_v13, 16  ;;  %v2287_v8 = vrot.slane %v2285_v52, 5 }
  0x99   :  { %v2283_v62 = vrot.slane %v2282_v16, 4  ;;  %v2363_v38 = vshll.u32 %v6834_v31, 16  ;;  %v2297_v12 = vrot.slane %v2296_v46, 4  ;;  %v2315_v5 = vrot.slane %v2313_v54, 5  ;;  %v6863_v16 = vld [vmem:[%s7618_s0 + $0x88] sm:$0xf] }
  0x9a   :  { %4974 = vmatmul.mubr.msk.bf16.gmra.mrb[8].mxu0 %vm301_vm1, %v6255_v32  ;;  %5132 = vmatmul.mubr.msk.bf16.gmra.mrb[20].mxu1 %vm301_vm1, %v4670_v51  ;;  %v4673_v32 = vcombine.low %v6753_v58, %v6761_v15  ;;  %v6808_v51 = vsel %vm5608_vm4, %v4664_v41, %v3483_v17  ;;  %v6817_v58 = vsel %vm5608_vm4, %v4665_v2, %v3487_v9  ;;  %v2259_v15 = vrot.slane %v2257_v50, 5  ;;  %v6877_v54 = vld [vmem:[%s7618_s0 + $0x90] sm:$0xf] }
  0x9b   :  { %4977 = vmatprep.mubr.msk.bf16.mxu0 %vm301_vm1, %v6277_v47  ;;  %5135 = vmatprep.mubr.msk.bf16.mxu1 %vm301_vm1, %v4671_v33  ;;  %v2232_v47 = vsel %vm5789_vm7, %v6749_v45, %v6741_v40  ;;  %v2306_v33 = vrot.slane %v2304_v55, 4  ;;  %v6823_v40 = vld [vmem:[%s7618_s0 + $0x78] sm:$0xf]  ;;  %v2246_v45 = vsel %vm5789_vm7, %v2241_v20, %v6776_v29  ;;  %v2255_v41 = vrot.slane %v2254_v56, 4 }
  0x9c   :  { %v2318_v17 = vshrl.u32 %v6800_v21, 16  ;;  %v2335_v9 = vshll.u32 %v6813_v13, 16  ;;  %v2269_v49 = vrot.slane %v2268_v36, 4  ;;  %v2346_v53 = vshrl.u32 %v6823_v40, 16 }
  0x9d   :  { %v2310_v2 = vor.u32 %v2309_v63, %v2306_v33  ;;  %v2349_v28 = vshll.u32 %v6823_v40, 16  ;;  %v7627_v29 = vcombine.low %v6663_v4, %v6667_v26  ;;  %v2260_v55 = vsel %vm5789_vm7, %v2255_v41, %v2259_v15 }
  0x9e   :  { %v2360_v50 = vshrl.u32 %v6834_v31, 16  ;;  %v2320_v20 = vrot.slane %v2318_v17, 4  ;;  %v2323_v26 = vrot.slane %v2321_v25, 5  ;;  %v2334_v56 = vrot.slane %v2332_v23, 4 }
  0x9f   :  { %v2311_v4 = vrot.slane %v2310_v2, 4  ;;  %v2337_v60 = vrot.slane %v2335_v9, 5  ;;  %v4519_v10 = vcombine.low %v2218_v1, %v2232_v47  ;;  %v4674_v33 = vcombine.low %v6808_v51, %v6817_v58  ;;  %v6895_v9 = vld [vmem:[%s7617_s1 + $0x28] sm:$0xf] }
  0xa0   :  { %v2348_v63 = vrot.slane %v2346_v53, 4  ;;  %v2351_v15 = vrot.slane %v2349_v28, 5  ;;  %v6856_v36 = vcombine.low %v2246_v45, %v2260_v55  ;;  %v2274_v52 = vsel %vm5789_vm7, %v2269_v49, %v2273_v44 }
  0xa1   :  { %v2365_v41 = vrot.slane %v2363_v38, 5  ;;  %v2288_v1 = vsel %vm5789_vm7, %v2283_v62, %v2287_v8  ;;  %v2327_v51 = vshll.u32 %v6576_v35, 16  ;;  %v2341_v58 = vshll.u32 %v6595_v24, 16  ;;  %v4583_v24 = vld [vmem:[%s7618_s0 + $0x10] sm:$0xf] }
  0xa2   :  { %4978 = vmatmul.mubr.msk.bf16.gmra.mrb[12].mxu0 %vm301_vm1, %v6309_v30  ;;  %5136 = vmatmul.mubr.msk.bf16.gmra.mrb[24].mxu1 %vm301_vm1, %v7627_v29  ;;  %v2301_v30 = vrot.slane %v2299_v0, 5  ;;  %v2316_v45 = vsel %vm5789_vm7, %v2311_v4, %v2315_v5  ;;  %v2324_v44 = vor.u32 %v2323_v26, %v2320_v20  ;;  %v2338_v46 = vor.u32 %v2337_v60, %v2334_v56 }
  0xa3   :  { %5055 = vmatprep.mubr.msk.bf16.mxu0 %vm301_vm1, %v6735_v27  ;;  %5139 = vmatprep.mubr.msk.bf16.mxu1 %vm301_vm1, %v4673_v32  ;;  %v2362_v32 = vrot.slane %v2360_v50, 4  ;;  %v2355_v0 = vshll.u32 %v6652_v42, 16  ;;  %v2352_v17 = vor.u32 %v2351_v15, %v2348_v63  ;;  %v2369_v2 = vshll.u32 %v6657_v14, 16  ;;  %v4585_v14 = vld [vmem:[%s7618_s0 + $0x18] sm:$0xf] }
  0xa4   :  { %v2302_v47 = vsel %vm5789_vm7, %v2297_v12, %v2301_v30  ;;  %v2374_v25 = vshrl.u32 %v6863_v16, 16  ;;  %v2616_v35 = vsel %vm326_vm0, %v6624_v19, 0  ;;  %v2377_v23 = vshll.u32 %v6863_v16, 16 }
  0xa5   :  { %v2366_v42 = vor.u32 %v2365_v41, %v2362_v32  ;;  %v6899_v19 = vcombine.low %v2274_v52, %v2288_v1  ;;  %v2329_v49 = vrot.slane %v2327_v51, 5  ;;  %v2388_v8 = vshrl.u32 %v6877_v54, 16  ;;  %v6921_v1 = vld [vmem:[%s7617_s1 + $0x3c] sm:$0xf] }
  0xa6   :  { %v2391_v53 = vshll.u32 %v6877_v54, 16  ;;  %v6905_v28 = vcombine.low %v2302_v47, %v2316_v45  ;;  %v2325_v29 = vrot.slane %v2324_v44, 4  ;;  %v2343_v55 = vrot.slane %v2341_v58, 5 }
  0xa7   :  { %v2357_v62 = vrot.slane %v2355_v0, 5  ;;  %v2339_v50 = vrot.slane %v2338_v46, 4  ;;  %v2353_v38 = vrot.slane %v2352_v17, 4  ;;  %v2371_v12 = vrot.slane %v2369_v2, 5  ;;  %v6947_v17 = vld [vmem:[%s7618_s0 + $0x1c] sm:$0x1] }
  0xa8   :  { %v2376_v30 = vrot.slane %v2374_v25, 4  ;;  %v2367_v5 = vrot.slane %v2366_v42, 4  ;;  %v2947_v20 = vshrl.u32 %v4583_v24, 16  ;;  %v2950_v4 = vshll.u32 %v4583_v24, 16 }
  0xa9   :  { %v2390_v26 = vrot.slane %v2388_v8, 4  ;;  %v2393_v56 = vrot.slane %v2391_v53, 5  ;;  %v2961_v60 = vshrl.u32 %v4585_v14, 16  ;;  %v3742_v63 = vsel %vm326_vm0, %v6699_v18, 0  ;;  %v4587_v18 = vld [vmem:[%s7618_s0 + $0x20] sm:$0xf] }
  0xaa   :  { %5056 = vmatmul.mubr.msk.bf16.vlgmr.msra.gmra.mrb[16].mxu0 %vm301_vm1, %v4519_v10  ;;  %5140 = vmatmul.mubr.msk.bf16.gmra.mrb[28].mxu1 %vm301_vm1, %v4674_v33  ;;  %v2964_v33 = vshll.u32 %v4585_v14, 16  ;;  %v2330_v15 = vsel %vm5789_vm7, %v2325_v29, %v2329_v49  ;;  %v2344_v52 = vsel %vm5789_vm7, %v2339_v50, %v2343_v55  ;;  %v2358_v32 = vsel %vm5789_vm7, %v2353_v38, %v2357_v62  ;;  %v4591_v14 = vld [vmem:[%s7618_s0 + $0x30] sm:$0xf]  ;;  %v4593_v29 = vld [vmem:[%s7618_s0 + $0x38] sm:$0xf] }
  0xab   :  { %5059 = vmatprep.mubr.msk.bf16.mxu0 %vm301_vm1, %v6856_v36  ;;  %5145 = vmatprep.mubr.msk.bf16.mxu1 %vm301_vm1, %v6735_v27  ;;  %v2379_v27 = vrot.slane %v2377_v23, 5  ;;  %v2383_v41 = vshll.u32 %v6721_v3, 16  ;;  %v2397_v51 = vshll.u32 %v6746_v48, 16  ;;  %v2949_v58 = vrot.slane %v2947_v20, 4  ;;  %v4589_v3 = vld [vmem:[%s7618_s0 + $0x28] sm:$0xf] }
  0xac   :  { %5072 = vmatpush3.bf16.msra.mxu0 %v2616_v35  ;;  %v2952_v45 = vrot.slane %v2950_v4, 5  ;;  %v2372_v44 = vsel %vm5789_vm7, %v2367_v5, %v2371_v12  ;;  %v2394_v46 = vor.u32 %v2393_v56, %v2390_v26  ;;  %v2963_v48 = vrot.slane %v2961_v60, 4  ;;  %v6966_v12 = vld [vmem:[%s7618_s0 + $0x24] sm:$0x1] }
  0xad   :  { %5399 = vmatprep.subr.msk.bf16.mxu0 %vm326_vm0, %v6895_v9  ;;  %v2380_v47 = vor.u32 %v2379_v27, %v2376_v30  ;;  %v2966_v0 = vrot.slane %v2964_v33, 5  ;;  %v2975_v2 = vshrl.u32 %v4587_v18, 16  ;;  %v2978_v25 = vshll.u32 %v4587_v18, 16  ;;  %v4595_v18 = vld [vmem:[%s7618_s0 + $0x40] sm:$0xf] }
  0xae   :  { %v6951_v35 = vcombine.low %v2330_v15, %v2344_v52  ;;  %v2385_v24 = vrot.slane %v2383_v41, 5  ;;  %v2989_v42 = vshrl.u32 %v4589_v3, 16  ;;  %v2992_v23 = vshll.u32 %v4589_v3, 16  ;;  %v6977_v52 = vld [vmem:[%s7618_s0 + $0x2c] sm:$0x1] }
  0xaf   :  { %v2399_v49 = vrot.slane %v2397_v51, 5  ;;  %v2953_v8 = vor.u32 %v2952_v45, %v2949_v58  ;;  %v2381_v55 = vrot.slane %v2380_v47, 4  ;;  %v2395_v62 = vrot.slane %v2394_v46, 4  ;;  %v4597_v3 = vld [vmem:[%s7618_s0 + $0x48] sm:$0xf] }
  0xb0   :  { %v2967_v50 = vor.u32 %v2966_v0, %v2963_v48  ;;  %v2970_v38 = vshll.u32 %v6947_v17, 16  ;;  %v2977_v30 = vrot.slane %v2975_v2, 4  ;;  %v2980_v5 = vrot.slane %v2978_v25, 5 }
  0xb1   :  { %v3003_v27 = vshrl.u32 %v4591_v14, 16  ;;  %v3006_v20 = vshll.u32 %v4591_v14, 16  ;;  %v2991_v4 = vrot.slane %v2989_v42, 4  ;;  %v2994_v26 = vrot.slane %v2992_v23, 5  ;;  %v7011_v23 = vld [vmem:[%s7618_s0 + $0x3c] sm:$0x1] }
  0xb2   :  { %5060 = vmatmul.mubr.msk.bf16.gmra.mrb[20].mxu0 %vm301_vm1, %v6899_v19  ;;  %5146 = vmatmul.mubr.msk.bf16.vlgmr.msra.gmra.mrb[16].mxu1 %vm301_vm1, %v4519_v10  ;;  %v6940_v10 = vld [vmem:[%s7618_s0 + $0x14] sm:$0x1]  ;;  %v3017_v56 = vshrl.u32 %v4593_v29, 16  ;;  %v3020_v60 = vshll.u32 %v4593_v29, 16  ;;  %v4534_v33 = vcombine.low %v6466_v11, %v6471_v37  ;;  %v2386_v41 = vsel %vm5789_vm7, %v2381_v55, %v2385_v24  ;;  %v4599_v14 = vld [vmem:[%s7618_s0 + $0x60] sm:$0xf] }
  0xb3   :  { %5162 = vmatpush3.bf16.msra.mxu1 %v3742_v63  ;;  %5063 = vmatprep.mubr.msk.bf16.mxu0 %vm301_vm1, %v6905_v28  ;;  %v2956_v53 = vshll.u32 %v6940_v10, 16  ;;  %v2954_v63 = vrot.slane %v2953_v8, 4  ;;  %v4535_v11 = vcombine.low %v6564_v59, %v6581_v34  ;;  %v2972_v37 = vrot.slane %v2970_v38, 5  ;;  %v4601_v55 = vld [vmem:[%s7618_s0 + $0x68] sm:$0xf] }
  0xb4   :  { %5149 = vmatprep.mubr.msk.bf16.mxu1 %vm301_vm1, %v6856_v36  ;;  %5404 = vmatprep.subr.msk.bf16.mxu1 %vm326_vm0, %v6921_v1  ;;  %v6956_v36 = vcombine.low %v2358_v32, %v2372_v44  ;;  %v2984_v32 = vshll.u32 %v6966_v12, 16  ;;  %v2968_v47 = vrot.slane %v2967_v50, 4  ;;  %v2981_v51 = vor.u32 %v2980_v5, %v2977_v30 }
  0xb5   :  { %v2958_v15 = vrot.slane %v2956_v53, 5  ;;  %v3005_v58 = vrot.slane %v3003_v27, 4  ;;  %v3008_v45 = vrot.slane %v3006_v20, 5  ;;  %v2995_v44 = vor.u32 %v2994_v26, %v2991_v4  ;;  %v7026_v26 = vld [vmem:[%s7618_s0 + $0x44] sm:$0x1] }
  0xb6   :  { %v2998_v46 = vshll.u32 %v6977_v52, 16  ;;  %v3019_v48 = vrot.slane %v3017_v56, 4  ;;  %v3022_v0 = vrot.slane %v3020_v60, 5  ;;  %v4536_v25 = vcombine.low %v6632_v39, %v6675_v7 }
  0xb7   :  { %v2959_v24 = vsel %vm5789_vm7, %v2954_v63, %v2958_v15  ;;  %v2986_v42 = vrot.slane %v2984_v32, 5  ;;  %v3034_v8 = vshll.u32 %v4595_v18, 16  ;;  %v3045_v53 = vshrl.u32 %v4597_v3, 16 }
  0xb8   :  { %v3048_v29 = vshll.u32 %v4597_v3, 16  ;;  %v2982_v50 = vrot.slane %v2981_v51, 4  ;;  %v3009_v38 = vor.u32 %v3008_v45, %v3005_v58  ;;  %v2996_v5 = vrot.slane %v2995_v44, 4  ;;  %v7052_v44 = vld [vmem:[%s7618_s0 + $0x64] sm:$0x1] }
  0xb9   :  { %v3000_v27 = vrot.slane %v2998_v46, 5  ;;  %v3023_v20 = vor.u32 %v3022_v0, %v3019_v48  ;;  %v3026_v4 = vshll.u32 %v7011_v23, 16  ;;  %v3059_v56 = vshrl.u32 %v4599_v14, 16  ;;  %v7057_v46 = vld [vmem:[%s7618_s0 + $0x6c] sm:$0x1] }
  0xba   :  { %5064 = vmatmul.mubr.msk.bf16.gmra.mrb[24].mxu0 %vm301_vm1, %v6951_v35  ;;  %5150 = vmatmul.mubr.msk.bf16.gmra.mrb[20].mxu1 %vm301_vm1, %v6899_v19  ;;  %v2400_v19 = vsel %vm5789_vm7, %v2395_v62, %v2399_v49  ;;  %v3031_v49 = vshrl.u32 %v4595_v18, 16  ;;  %v2973_v62 = vsel %vm5789_vm7, %v2968_v47, %v2972_v37  ;;  %v3062_v60 = vshll.u32 %v4599_v14, 16 }
  0xbb   :  { %5067 = vmatprep.mubr.msk.bf16.mxu0 %vm301_vm1, %v6956_v36  ;;  %5153 = vmatprep.mubr.msk.bf16.mxu1 %vm301_vm1, %v6905_v28  ;;  %v7000_v28 = vld [vmem:[%s7618_s0 + $0x34] sm:$0x1]  ;;  %v7002_v2 = vcombine.low %v2386_v41, %v2400_v19  ;;  %v3073_v63 = vshrl.u32 %v4601_v55, 16  ;;  %v3076_v15 = vshll.u32 %v4601_v55, 16  ;;  %v3036_v41 = vrot.slane %v3034_v8, 5 }
  0xbc   :  { %v3012_v30 = vshll.u32 %v7000_v28, 16  ;;  %v3033_v32 = vrot.slane %v3031_v49, 4  ;;  %v3047_v19 = vrot.slane %v3045_v53, 4  ;;  %v3050_v37 = vrot.slane %v3048_v29, 5  ;;  %v4605_v55 = vld [vmem:[%s7618_s0 + $0x78] sm:$0xf] }
  0xbd   :  { %v4537_v18 = vcombine.low %v6694_v61, %v6708_v22  ;;  %v3010_v47 = vrot.slane %v3009_v38, 4  ;;  %v3040_v58 = vshll.u32 %v7026_v26, 16  ;;  %v3001_v45 = vsel %vm5789_vm7, %v2996_v5, %v3000_v27  ;;  %v4607_v5 = vld [vmem:[%s7618_s0 + $0x80] sm:$0xf] }
  0xbe   :  { %v3014_v51 = vrot.slane %v3012_v30, 5  ;;  %v3028_v3 = vrot.slane %v3026_v4, 5  ;;  %v3061_v48 = vrot.slane %v3059_v56, 4  ;;  %v3064_v0 = vrot.slane %v3062_v60, 5  ;;  %v4609_v60 = vld [vmem:[%s7618_s0 + $0x88] sm:$0xf] }
  0xbf   :  { %v3078_v14 = vrot.slane %v3076_v15, 5  ;;  %v3024_v49 = vrot.slane %v3023_v20, 4  ;;  %v3037_v8 = vor.u32 %v3036_v41, %v3033_v32  ;;  %v3051_v53 = vor.u32 %v3050_v37, %v3047_v19 }
  0xc0   :  { %v7070_v38 = vrot.slane %v3040_v58, 5  ;;  %v3068_v30 = vshll.u32 %v7052_v44, 16  ;;  %v3082_v27 = vshll.u32 %v7057_v46, 16  ;;  %v2799_v56 = vsel %vm326_vm0, %v6895_v9, 0  ;;  %v7091_v9 = vld [vmem:[%s7617_s1 + $0x2c] sm:$0xf] }
  0xc1   :  { %v3101_v32 = vshrl.u32 %v4605_v55, 16  ;;  %v3104_v41 = vshll.u32 %v4605_v55, 16  ;;  %v3029_v59 = vsel %vm5789_vm7, %v3024_v49, %v3028_v3  ;;  %v3038_v34 = vrot.slane %v3037_v8, 4  ;;  %v7106_v3 = vld [vmem:[%s7618_s0 + $0x74] sm:$0x1] }
  0xc2   :  { %5068 = vmatmul.mubr.msk.bf16.gmra.mrb[28].mxu0 %vm301_vm1, %v7002_v2  ;;  %5154 = vmatmul.mubr.msk.bf16.gmra.mrb[24].mxu1 %vm301_vm1, %v6951_v35  ;;  %v7040_v35 = vld [vmem:[%s7618_s0 + $0x4c] sm:$0x1]  ;;  %v3115_v19 = vshrl.u32 %v4607_v5, 16  ;;  %v3118_v37 = vshll.u32 %v4607_v5, 16  ;;  %v3070_v58 = vrot.slane %v3068_v30, 5 }
  0xc3   :  { %5073 = vmatprep.mubr.msk.bf16.mxu0 %vm301_vm1, %v4534_v33  ;;  %5157 = vmatprep.mubr.msk.bf16.mxu1 %vm301_vm1, %v6956_v36  ;;  %v7043_v33 = vcombine.low %v2959_v24, %v2973_v62  ;;  %v2987_v36 = vsel %vm5789_vm7, %v2982_v50, %v2986_v42  ;;  %v3075_v24 = vrot.slane %v3073_v63, 4  ;;  %v4603_v42 = vld [vmem:[%s7618_s0 + $0x70] sm:$0xf]  ;;  %v3054_v29 = vshll.u32 %v7040_v35, 16  ;;  %v7117_v8 = vld [vmem:[%s7618_s0 + $0x7c] sm:$0x1] }
  0xc4   :  { %v7066_v62 = vcombine.low %v2987_v36, %v3001_v45  ;;  %v3015_v50 = vsel %vm5789_vm7, %v3010_v47, %v3014_v51  ;;  %v3087_v20 = vshrl.u32 %v4603_v42, 16  ;;  %v3090_v4 = vshll.u32 %v4603_v42, 16 }
  0xc5   :  { %v3065_v63 = vor.u32 %v3064_v0, %v3061_v48  ;;  %v3079_v15 = vor.u32 %v3078_v14, %v3075_v24  ;;  %v3129_v47 = vshrl.u32 %v4609_v60, 16  ;;  %v3132_v51 = vshll.u32 %v4609_v60, 16  ;;  %v7628_v14 = vld [vmem:[#allocation2_spill] sm:$0xff] }
  0xc6   :  { %v3084_v36 = vrot.slane %v3082_v27, 5  ;;  %v3089_v45 = vrot.slane %v3087_v20, 4  ;;  %v3092_v39 = vrot.slane %v3090_v4, 5  ;;  %v3103_v48 = vrot.slane %v3101_v32, 4  ;;  %v7134_v4 = vld [vmem:[%s7618_s0 + $0x84] sm:$0x1] }
  0xc7   :  { %v3066_v7 = vrot.slane %v3065_v63, 4  ;;  %v3106_v0 = vrot.slane %v3104_v41, 5  ;;  %v4020_v24 = vsel %vm326_vm0, %v6921_v1, 0  ;;  %v4538_v42 = vcombine.low %v7628_v14, %v6768_v57  ;;  %v4613_v1 = vld [vmem:[%s7618_s0 + $0x98] sm:$0xf] }
  0xc8   :  { %v7112_v49 = vcombine.low %v3015_v50, %v3029_v59  ;;  %v3120_v55 = vrot.slane %v3118_v37, 5  ;;  %v3131_v30 = vrot.slane %v3129_v47, 4  ;;  %v3134_v5 = vrot.slane %v3132_v51, 5 }
  0xc9   :  { %v3043_v57 = vsel %vm5789_vm7, %v3038_v34, %v7070_v38  ;;  %v3093_v27 = vor.u32 %v3092_v39, %v3089_v45  ;;  %v3096_v20 = vshll.u32 %v7106_v3, 16  ;;  %v3071_v38 = vsel %vm5789_vm7, %v3066_v7, %v3070_v58  ;;  %v7168_v39 = vld [vmem:[%s7618_s0 + $0x94] sm:$0x1] }
  0xca   :  { %5074 = vmatmul.mubr.msk.bf16.vlgmr.msra.gmra.mrb[16].mxu0 %vm301_vm1, %v4535_v11  ;;  %5158 = vmatmul.mubr.msk.bf16.gmra.mrb[28].mxu1 %vm301_vm1, %v7002_v2  ;;  %v3052_v11 = vrot.slane %v3051_v53, 4  ;;  %v3056_v2 = vrot.slane %v3054_v29, 5  ;;  %v4611_v53 = vld [vmem:[%s7618_s0 + $0x90] sm:$0xf]  ;;  %v3117_v29 = vrot.slane %v3115_v19, 4  ;;  %v3107_v63 = vor.u32 %v3106_v0, %v3103_v48 }
  0xcb   :  { %5077 = vmatprep.mubr.msk.bf16.mxu0 %vm301_vm1, %v4536_v25  ;;  %5163 = vmatprep.mubr.msk.bf16.mxu1 %vm301_vm1, %v7043_v33  ;;  %v3080_v25 = vrot.slane %v3079_v15, 4  ;;  %v3110_v15 = vshll.u32 %v7117_v8, 16  ;;  %v3143_v32 = vshrl.u32 %v4611_v53, 16  ;;  %v3146_v41 = vshll.u32 %v4611_v53, 16 }
  0xcc   :  { %5090 = vmatpush3.bf16.msra.mxu0 %v2799_v56  ;;  %v3057_v50 = vsel %vm5789_vm7, %v3052_v11, %v3056_v2  ;;  %v7139_v56 = vld [vmem:[%s7618_s0 + $0x8c] sm:$0x1]  ;;  %v3157_v61 = vshrl.u32 %v4613_v1, 16  ;;  %v3160_v22 = vshll.u32 %v4613_v1, 16  ;;  %v3124_v59 = vshll.u32 %v7134_v4, 16 }
  0xcd   :  { %5400 = vmatprep.subr.msk.bf16.mxu0 %vm326_vm0, %v7091_v9  ;;  %v3085_v60 = vsel %vm5789_vm7, %v3080_v25, %v3084_v36  ;;  %v3135_v34 = vor.u32 %v3134_v5, %v3131_v30  ;;  %v3138_v11 = vshll.u32 %v7139_v56, 16  ;;  %v4539_v2 = vcombine.low %v6800_v21, %v6813_v13 }
  0xce   :  { %v7159_v19 = vcombine.low %v3043_v57, %v3057_v50  ;;  %v4540_v37 = vcombine.low %v6823_v40, %v6834_v31  ;;  %v3098_v47 = vrot.slane %v3096_v20, 5  ;;  %v7163_v51 = vcombine.low %v3071_v38, %v3085_v60  ;;  %v7173_v40 = vld [vmem:[%s7618_s0 + $0x9c] sm:$0x1]  ;;  %v4700_v57 = vld [vmem:[%s7618_s0 + $0x10] sm:$0xe] }
  0xcf   :  { %v3094_v58 = vrot.slane %v3093_v27, 4  ;;  %v3108_v36 = vrot.slane %v3107_v63, 4  ;;  %v3112_v45 = vrot.slane %v3110_v15, 5  ;;  %v3145_v7 = vrot.slane %v3143_v32, 4  ;;  %v4701_v50 = vld [vmem:[%s7618_s0 + $0x18] sm:$0xe] }
  0xd0   :  { %v3148_v25 = vrot.slane %v3146_v41, 5  ;;  %v3159_v48 = vrot.slane %v3157_v61, 4  ;;  %v3162_v21 = vrot.slane %v3160_v22, 5  ;;  %v3126_v0 = vrot.slane %v3124_v59, 5  ;;  %v5430_v60 = vld [vmem:[%s7618_s0 + $0x10] ss:$8 sps:$4 sm:$0xff]  }
  0xd1   :  { %v3140_v14 = vrot.slane %v3138_v11, 5  ;;  %v3099_v31 = vsel %vm5789_vm7, %v3094_v58, %v3098_v47  ;;  %v3113_v53 = vsel %vm5789_vm7, %v3108_v36, %v3112_v45  ;;  %v3166_v30 = vshll.u32 %v7173_v40, 16  ;;  %v4703_v11 = vld [vmem:[%s7618_s0 + $0x28] sm:$0xe]  ;;  %v5432_v36 = vld [vmem:[%s7618_s0 + $0x30] ss:$8 sps:$4 sm:$0xff]  }
  0xd2   :  { %5078 = vmatmul.mubr.msk.bf16.gmra.mrb[20].mxu0 %vm301_vm1, %v4537_v18  ;;  %5164 = vmatmul.mubr.msk.bf16.vlgmr.msra.gmra.mrb[16].mxu1 %vm301_vm1, %v7066_v62  ;;  %v3121_v18 = vor.u32 %v3120_v55, %v3117_v29  ;;  %v3149_v29 = vor.u32 %v3148_v25, %v3145_v7  ;;  %v3163_v55 = vor.u32 %v3162_v21, %v3159_v48  ;;  %v4716_v61 = vrot.slane %v4700_v57, 9 }
  0xd3   :  { %5180 = vmatpush3.bf16.msra.mxu1 %v4020_v24  ;;  %5081 = vmatprep.mubr.msk.bf16.mxu0 %vm301_vm1, %v4538_v42  ;;  %v3136_v24 = vrot.slane %v3135_v34, 4  ;;  %v3152_v42 = vshll.u32 %v7168_v39, 16  ;;  %v4541_v27 = vcombine.low %v6863_v16, %v6877_v54  ;;  %v7199_v20 = vcombine.low %v3099_v31, %v3113_v53  ;;  %v4707_v31 = vld [vmem:[%s7618_s0 + $0x48] sm:$0xe] }
  0xd4   :  { %5167 = vmatprep.mubr.msk.bf16.mxu1 %vm301_vm1, %v7112_v49  ;;  %v3122_v13 = vrot.slane %v3121_v18, 4  ;;  %v3150_v15 = vrot.slane %v3149_v29, 4  ;;  %v3164_v32 = vrot.slane %v3163_v55, 4  ;;  %v3168_v41 = vrot.slane %v3166_v30, 5  ;;  %v4709_v53 = vld [vmem:[%s7618_s0 + $0x68] sm:$0xe] }
  0xd5   :  { %v3141_v1 = vsel %vm5789_vm7, %v3136_v24, %v3140_v14  ;;  %v3154_v38 = vrot.slane %v3152_v42, 5  ;;  %v3907_v22 = vrot.slane %v6940_v10, 5  ;;  %v4717_v18 = vrot.slane %v4701_v50, 9  ;;  %v4702_v10 = vld [vmem:[%s7618_s0 + $0x20] sm:$0xe] }
  0xd6   :  { %v3127_v5 = vsel %vm5789_vm7, %v3122_v13, %v3126_v0  ;;  %v3911_v59 = vrot.slane %v6947_v17, 5  ;;  %v3169_v54 = vsel %vm5789_vm7, %v3164_v32, %v3168_v41  ;;  %v4718_v58 = vrot.slane %v4702_v10, 9  ;;  %v4708_v42 = vld [vmem:[%s7618_s0 + $0x60] sm:$0xe] }
  0xd7   :  { %v7204_v63 = vcombine.low %v3127_v5, %v3141_v1  ;;  %v3155_v16 = vsel %vm5789_vm7, %v3150_v15, %v3154_v38  ;;  %v3908_v17 = vsel %vm5608_vm4, %v4716_v61, %v3907_v22  ;;  %v3915_v7 = vrot.slane %v6966_v12, 5  ;;  %v5433_v29 = vld [vmem:[%s7618_s0 + $0x40] ss:$8 sps:$4 sm:$0xff]   ;;  %v4711_v61 = vld [vmem:[%s7618_s0 + $0x78] sm:$0xe] }
  0xd8   :  { %v3912_v34 = vsel %vm5608_vm4, %v4717_v18, %v3911_v59  ;;  %v7237_v47 = vcombine.low %v3155_v16, %v3169_v54  ;;  %v4719_v25 = vrot.slane %v4703_v11, 9  ;;  %v3919_v48 = vrot.slane %v6977_v52, 5  ;;  %v5434_v5 = vld [vmem:[%s7618_s0 + $0x60] ss:$8 sps:$4 sm:$0xff]   ;;  %v5435_v59 = vld [vmem:[%s7618_s0 + $0x70] ss:$8 sps:$4 sm:$0xff]  }
  0xd9   :  { %v4733_v45 = vcombine.low %v3908_v17, %v3912_v34  ;;  %v3923_v13 = vrot.slane %v7000_v28, 5  ;;  %v4721_v0 = vrot.slane %v4705_v43, 9  ;;  %v3927_v24 = vrot.slane %v7011_v23, 5  ;;  %v4706_v28 = vld [vmem:[%s7618_s0 + $0x40] sm:$0xe] }
  0xda   :  { %5082 = vmatmul.mubr.msk.bf16.gmra.mrb[24].mxu0 %vm301_vm1, %v4539_v2  ;;  %5168 = vmatmul.mubr.msk.bf16.gmra.mrb[20].mxu1 %vm301_vm1, %v7159_v19  ;;  %v4704_v2 = vld [vmem:[%s7618_s0 + $0x30] sm:$0xe]  ;;  %v3221_v14 = vsel %vm326_vm0, %v7091_v9, 0  ;;  %v3916_v12 = vsel %vm5608_vm4, %v4718_v58, %v3915_v7  ;;  %v3920_v52 = vsel %vm5608_vm4, %v4719_v25, %v3919_v48  ;;  %v4722_v30 = vrot.slane %v4706_v28, 9  ;;  %v4712_v22 = vld [vmem:[%s7618_s0 + $0x80] sm:$0xe] }
  0xdb   :  { %5085 = vmatprep.mubr.msk.bf16.mxu0 %vm301_vm1, %v4540_v37  ;;  %5171 = vmatprep.mubr.msk.bf16.mxu1 %vm301_vm1, %v7163_v51  ;;  %v5431_v37 = vld [vmem:[%s7618_s0 + $0x20] ss:$8 sps:$4 sm:$0xff]   ;;  %v4720_v21 = vrot.slane %v4704_v2, 9  ;;  %v3928_v9 = vsel %vm5608_vm4, %v4721_v0, %v3927_v24  ;;  %v4734_v55 = vcombine.low %v3916_v12, %v3920_v52  ;;  %v3931_v57 = vrot.slane %v7026_v26, 5  ;;  %v4715_v7 = vld [vmem:[%s7618_s0 + $0x98] sm:$0xe] }
  0xdc   :  { %v4723_v50 = vrot.slane %v4707_v31, 9  ;;  %v4724_v38 = vrot.slane %v4708_v42, 9  ;;  %v4725_v15 = vrot.slane %v4709_v53, 9  ;;  %v3943_v32 = vrot.slane %v7057_v46, 5  ;;  %v4713_v18 = vld [vmem:[%s7618_s0 + $0x88] sm:$0xe] }
  0xdd   :  { %v3924_v23 = vsel %vm5608_vm4, %v4720_v21, %v3923_v13  ;;  %v3932_v26 = vsel %vm5608_vm4, %v4722_v30, %v3931_v57  ;;  %v5436_v10 = vld [vmem:[%s7618_s0 + $0x80] ss:$8 sps:$4 sm:$0xff]   ;;  %v3947_v34 = vrot.slane %v7106_v3, 5  ;;  %v4727_v11 = vrot.slane %v4711_v61, 9  ;;  %v5437_v25 = vld [vmem:[%s7618_s0 + $0x90] ss:$8 sps:$4 sm:$0xff]  }
  0xde   :  { %v4735_v1 = vcombine.low %v3924_v23, %v3928_v9  ;;  %v3944_v41 = vsel %vm5608_vm4, %v4725_v15, %v3943_v32  ;;  %v3951_v2 = vrot.slane %v7117_v8, 5  ;;  %v4728_v43 = vrot.slane %v4712_v22, 9 }
  0xdf   :  { %v4729_v58 = vrot.slane %v4713_v18, 9  ;;  %v3963_v0 = vrot.slane %v7168_v39, 5  ;;  %v4731_v24 = vrot.slane %v4715_v7, 9 }
  0xe0   :  { %v3952_v8 = vsel %vm5608_vm4, %v4727_v11, %v3951_v2 }
  0xe2   :  { %5086 = vmatmul.mubr.msk.bf16.gmra.mrb[28].mxu0 %vm301_vm1, %v4541_v27  ;;  %5172 = vmatmul.mubr.msk.bf16.gmra.mrb[24].mxu1 %vm301_vm1, %v7199_v20  ;;  %v3935_v27 = vrot.slane %v7040_v35, 5 }
  0xe3   :  { %5091 = vmatprep.mubr.msk.bf16.mxu0 %vm301_vm1, %v5430_v60  ;;  %5175 = vmatprep.mubr.msk.bf16.mxu1 %vm301_vm1, %v7204_v63  ;;  %v3939_v60 = vrot.slane %v7052_v44, 5  ;;  %v4710_v44 = vld [vmem:[%s7618_s0 + $0x70] sm:$0xe] }
  0xe4   :  { %v3936_v35 = vsel %vm5608_vm4, %v4723_v50, %v3935_v27  ;;  %v4726_v54 = vrot.slane %v4710_v44, 9 }
  0xe5   :  { %v3940_v46 = vsel %vm5608_vm4, %v4724_v38, %v3939_v60  ;;  %v4736_v16 = vcombine.low %v3932_v26, %v3936_v35 }
  0xe6   :  { %v4737_v17 = vcombine.low %v3940_v46, %v3944_v41  ;;  %v3948_v3 = vsel %vm5608_vm4, %v4726_v54, %v3947_v34 }
  0xe7   :  { %v4738_v48 = vcombine.low %v3948_v3, %v3952_v8 }
  0xea   :  { %5092 = vmatmul.mubr.msk.bf16.vlgmr.msra.gmra.mrb[16].mxu0 %vm301_vm1, %v5431_v37  ;;  %5176 = vmatmul.mubr.msk.bf16.gmra.mrb[28].mxu1 %vm301_vm1, %v7237_v47  ;;  %v3955_v37 = vrot.slane %v7134_v4, 5  ;;  %v4714_v4 = vld [vmem:[%s7618_s0 + $0x90] sm:$0xe] }
  0xeb   :  { %5095 = vmatprep.mubr.msk.bf16.mxu0 %vm301_vm1, %v5432_v36  ;;  %5181 = vmatprep.mubr.msk.bf16.mxu1 %vm301_vm1, %v4733_v45  ;;  %v3959_v36 = vrot.slane %v7139_v56, 5  ;;  %v4730_v21 = vrot.slane %v4714_v4, 9 }
  0xec   :  { %5108 = vmatpush3.bf16.msra.mxu0 %v3221_v14  ;;  %v3956_v56 = vsel %vm5608_vm4, %v4728_v43, %v3955_v37  ;;  %v3967_v14 = vrot.slane %v7173_v40, 5 }
  0xed   :  { %v3960_v45 = vsel %vm5608_vm4, %v4729_v58, %v3959_v36  ;;  %v3964_v12 = vsel %vm5608_vm4, %v4730_v21, %v3963_v0 }
  0xee   :  { %v4739_v13 = vcombine.low %v3956_v56, %v3960_v45  ;;  %v3968_v52 = vsel %vm5608_vm4, %v4731_v24, %v3967_v14 }
  0xef   :  { %v4740_v28 = vcombine.low %v3964_v12, %v3968_v52 }
  0xf2   :  { %5096 = vmatmul.mubr.msk.bf16.gmra.mrb[20].mxu0 %vm301_vm1, %v5433_v29  ;;  %5182 = vmatmul.mubr.msk.bf16.vlgmr.msra.gmra.mrb[16].mxu1 %vm301_vm1, %v4734_v55 }
  0xf3   :  { %5099 = vmatprep.mubr.msk.bf16.mxu0 %vm301_vm1, %v5434_v5  ;;  %5185 = vmatprep.mubr.msk.bf16.mxu1 %vm301_vm1, %v4735_v1 }
  0xfa   :  { %5100 = vmatmul.mubr.msk.bf16.gmra.mrb[24].mxu0 %vm301_vm1, %v5435_v59  ;;  %5186 = vmatmul.mubr.msk.bf16.gmra.mrb[20].mxu1 %vm301_vm1, %v4736_v16 }
  0xfb   :  { %5103 = vmatprep.mubr.msk.bf16.mxu0 %vm301_vm1, %v5436_v10  ;;  %5189 = vmatprep.mubr.msk.bf16.mxu1 %vm301_vm1, %v4737_v17 }
 0x102   :  { %5104 = vmatmul.mubr.msk.bf16.gmra.mrb[28].mxu0 %vm301_vm1, %v5437_v25  ;;  %5190 = vmatmul.mubr.msk.bf16.gmra.mrb[24].mxu1 %vm301_vm1, %v4738_v48 }
 0x103   :  { %5109 = vmatprep.mubr.msk.bf16.mxu0 %vm301_vm1, %v7043_v33  ;;  %5193 = vmatprep.mubr.msk.bf16.mxu1 %vm301_vm1, %v4739_v13 }
 0x10a   :  { %5110 = vmatmul.mubr.msk.bf16.vlgmr.msra.gmra.mrb[16].mxu0 %vm301_vm1, %v7066_v62  ;;  %5194 = vmatmul.mubr.msk.bf16.gmra.mrb[28].mxu1 %vm301_vm1, %v4740_v28 }
 0x10b   :  { %5113 = vmatprep.mubr.msk.bf16.mxu0 %vm301_vm1, %v7112_v49 }
 0x112   :  { %5114 = vmatmul.mubr.msk.bf16.gmra.mrb[20].mxu0 %vm301_vm1, %v7159_v19 }
 0x113   :  { %5117 = vmatprep.mubr.msk.bf16.mxu0 %vm301_vm1, %v7163_v51 }
 0x11a   :  { %5118 = vmatmul.mubr.msk.bf16.gmra.mrb[24].mxu0 %vm301_vm1, %v7199_v20 }
 0x11b   :  { %5121 = vmatprep.mubr.msk.bf16.mxu0 %vm301_vm1, %v7204_v63 }
 0x122   :  { %5122 = vmatmul.mubr.msk.bf16.gmra.mrb[28].mxu0 %vm301_vm1, %v7237_v47 }
 0x145   :  { %v5039_v33 = vpop.f32.mrb[0].mxu1 }
 0x146   :  { %v2016_v62 = vadd.f32 %v5039_v33, %v7367_v6  ;;  %v1935_v49 = vpop.f32.mrb[1].mxu1 }
 0x147   :  { %v2014_v19 = vadd.f32 %v7367_v6, %v1935_v49  ;;  %v5040_v51 = vpop.f32.mrb[2].mxu1 }
 0x148   :  { %5438 = vtanh.f32 %v2016_v62  ;;  %v2017_v39 = vadd.f32 %v5040_v51, %v7367_v6  ;;  %v1938_v40 = vpop.f32.mrb[3].mxu1 }
 0x149   :  { %5440 = vtanh.f32 %v2014_v19  ;;  %v2015_v20 = vadd.f32 %v7367_v6, %v1938_v40 }
 0x14a   :  { %5442 = vtanh.f32 %v2017_v39 }
 0x14b   :  { %5444 = vtanh.f32 %v2015_v20 }
 0x14d   :  { %v5043_v63 = vpop.f32.mrb[4].mxu1 }
 0x14e   :  { %v2020_v47 = vadd.f32 %v5043_v63, %v7367_v6  ;;  %v1951_v23 = vpop.f32.mrb[5].mxu1 }
 0x14f   :  { %v5044_v9 = vpop.f32.mrb[6].mxu1  ;;  %v2018_v53 = vadd.f32 %v7367_v6, %v1951_v23 }
 0x150   :  { %5446 = vtanh.f32 %v2020_v47  ;;  %v2021_v31 = vadd.f32 %v5044_v9, %v7367_v6  ;;  %v1954_v42 = vpop.f32.mrb[7].mxu1 }
 0x151   :  { %v2019_v55 = vadd.f32 %v7367_v6, %v1954_v42 }
 0x152   :  { %v5439_v29 = vpop.eup %5438  ;;  %5448 = vtanh.f32 %v2021_v31 }
 0x153   :  { %v5441_v30 = vpop.eup %5440  ;;  %2066 = vrot.lane.b32.xlu1 %v5439_v29, %s5566_s2  ;;  %5450 = vtanh.f32 %v2018_v53 }
 0x154   :  { %2062 = vrot.lane.b32.xlu0 %v5441_v30, %s5566_s2  ;;  %v5443_v1 = vpop.eup %5442  ;;  %5452 = vtanh.f32 %v2019_v55 }
 0x155   :  { %v5047_v5 = vpop.f32.mrb[8].mxu1  ;;  %v5445_v27 = vpop.eup %5444 }
 0x156   :  { %v2024_v57 = vadd.f32 %v5047_v5, %v7367_v6  ;;  %v1967_v50 = vpop.f32.mrb[9].mxu1 }
 0x157   :  { %2068 = vrot.lane.b32.xlu1 %v5443_v1, %s5566_s2  ;;  %v5048_v38 = vpop.f32.mrb[10].mxu1  ;;  %v2022_v32 = vadd.f32 %v7367_v6, %v1967_v50 }
 0x158   :  { %5454 = vtanh.f32 %v2024_v57  ;;  %v2025_v60 = vadd.f32 %v5048_v38, %v7367_v6  ;;  %2064 = vrot.lane.b32.xlu0 %v5445_v27, %s5566_s2  ;;  %v1970_v15 = vpop.f32.mrb[11].mxu1 }
 0x159   :  { %v2023_v35 = vadd.f32 %v7367_v6, %v1970_v15 }
 0x15a   :  { %v5447_v26 = vpop.eup %5446  ;;  %5456 = vtanh.f32 %v2025_v60 }
 0x15b   :  { %5458 = vtanh.f32 %v2022_v32 }
 0x15c   :  { %v5449_v44 = vpop.eup %5448  ;;  %2074 = vrot.lane.b32.xlu0 %v5447_v26, %s5566_s2  ;;  %5460 = vtanh.f32 %v2023_v35 }
 0x15d   :  { %v4967_v46 = vpop.f32.mrb[0].mxu0  ;;  %2076 = vrot.lane.b32.xlu1 %v5449_v44, %s5566_s2  ;;  %v5051_v41 = vpop.f32.mrb[12].mxu1 }
 0x15e   :  { %v1133_v61 = vpop.f32.mrb[1].mxu0  ;;  %v1983_v22 = vpop.f32.mrb[13].mxu1  ;;  %v2028_v17 = vadd.f32 %v5051_v41, %v7367_v6  ;;  %v1221_v62 = vadd.f32 %v4967_v46, %v7367_v6 }
 0x15f   :  { %v5451_v18 = vpop.eup %5450  ;;  %v4968_v59 = vpop.f32.mrb[2].mxu0  ;;  %v2026_v37 = vadd.f32 %v7367_v6, %v1983_v22  ;;  %v1219_v49 = vadd.f32 %v7367_v6, %v1133_v61 }
 0x160   :  { %v5052_v16 = vpop.f32.mrb[14].mxu1  ;;  %v5453_v54 = vpop.eup %5452  ;;  %2070 = vrot.lane.b32.xlu0 %v5451_v18, %s5566_s2  ;;  %5462 = vtanh.f32 %v2028_v17  ;;  %v1222_v19 = vadd.f32 %v4968_v59, %v7367_v6 }
 0x161   :  { %v1136_v10 = vpop.f32.mrb[3].mxu0  ;;  %v1986_v34 = vpop.f32.mrb[15].mxu1  ;;  %2072 = vrot.lane.b32.xlu1 %v5453_v54, %s5566_s2  ;;  %v2029_v2 = vadd.f32 %v5052_v16, %v7367_v6 }
 0x162   :  { %v5455_v11 = vpop.eup %5454  ;;  %v2027_v36 = vadd.f32 %v7367_v6, %v1986_v34  ;;  %v1220_v51 = vadd.f32 %v7367_v6, %v1136_v10 }
 0x163   :  { %5464 = vtanh.f32 %v2029_v2 }
 0x164   :  { %v5457_v43 = vpop.eup %5456  ;;  %2082 = vrot.lane.b32.xlu0 %v5455_v11, %s5566_s2  ;;  %5466 = vtanh.f32 %v2026_v37 }
 0x165   :  { %v4971_v58 = vpop.f32.mrb[4].mxu0  ;;  %2084 = vrot.lane.b32.xlu1 %v5457_v43, %s5566_s2  ;;  %v5459_v8 = vpop.eup %5458  ;;  %5468 = vtanh.f32 %v2027_v36 }
 0x166   :  { %v1149_v3 = vpop.f32.mrb[5].mxu0  ;;  %v5461_v56 = vpop.eup %5460  ;;  %5470 = vtanh.f32 %v1221_v62  ;;  %v1225_v39 = vadd.f32 %v4971_v58, %v7367_v6 }
 0x167   :  { %v4972_v4 = vpop.f32.mrb[6].mxu0  ;;  %5472 = vtanh.f32 %v1219_v49  ;;  %v1223_v20 = vadd.f32 %v7367_v6, %v1149_v3 }
 0x168   :  { %v1152_v45 = vpop.f32.mrb[7].mxu0  ;;  %2078 = vrot.lane.b32.xlu0 %v5459_v8, %s5566_s2  ;;  %5474 = vtanh.f32 %v1222_v19  ;;  %v1226_v40 = vadd.f32 %v4972_v4, %v7367_v6 }
 0x169   :  { %2080 = vrot.lane.b32.xlu1 %v5461_v56, %s5566_s2  ;;  %5476 = vtanh.f32 %v1220_v51  ;;  %v1224_v47 = vadd.f32 %v7367_v6, %v1152_v45 }
 0x16a   :  { %v5463_v25 = vpop.eup %5462  ;;  %5478 = vtanh.f32 %v1225_v39 }
 0x16b   :  { %5480 = vtanh.f32 %v1226_v40 }
 0x16c   :  { %2090 = vrot.lane.b32.xlu0 %v5463_v25, %s5566_s2  ;;  %5482 = vtanh.f32 %v1223_v20 }
 0x16d   :  { %v4975_v7 = vpop.f32.mrb[8].mxu0  ;;  %v5465_v13 = vpop.eup %5464 }
 0x16e   :  { %v1165_v48 = vpop.f32.mrb[9].mxu0  ;;  %2092 = vrot.lane.b32.xlu1 %v5465_v13, %s5566_s2  ;;  %v5467_v24 = vpop.eup %5466  ;;  %v1229_v30 = vadd.f32 %v4975_v7, %v7367_v6 }
 0x16f   :  { %v4976_v21 = vpop.f32.mrb[10].mxu0  ;;  %v5469_v14 = vpop.eup %5468  ;;  %v1227_v46 = vadd.f32 %v7367_v6, %v1165_v48 }
 0x170   :  { %v1168_v0 = vpop.f32.mrb[11].mxu0  ;;  %2086 = vrot.lane.b32.xlu0 %v5467_v24, %s5566_s2  ;;  %v5471_v63 = vpop.eup %5470  ;;  %v1230_v60 = vadd.f32 %v4976_v21, %v7367_v6 }
 0x171   :  { %v5473_v31 = vpop.eup %5472  ;;  %v1228_v61 = vadd.f32 %v7367_v6, %v1168_v0 }
 0x172   :  { %2088 = vrot.lane.b32.xlu1 %v5469_v14, %s5566_s2  ;;  %v5475_v38 = vpop.eup %5474 }
 0x173   :  { %v5477_v32 = vpop.eup %5476 }
 0x174   :  { %v5479_v18 = vpop.eup %5478 }
 0x175   :  { %v7401_v12 = vpop.f32.mrb[12].mxu0  ;;  %v5481_v10 = vpop.eup %5480 }
 0x176   :  { %v7403_v52 = vpop.f32.mrb[13].mxu0  ;;  %v5483_v36 = vpop.eup %5482  ;;  %v1233_v45 = vadd.f32 %v7401_v12, %v7367_v6 }
 0x177   :  { %v7405_v28 = vpop.f32.mrb[14].mxu0  ;;  %v1231_v51 = vadd.f32 %v7367_v6, %v7403_v52 }
 0x178   :  { %v7407_v33 = vpop.f32.mrb[15].mxu0  ;;  %v1234_v0 = vadd.f32 %v7405_v28, %v7367_v6 }
 0x1c5   :  { %v2067_v23 = vpop.permute.xlu1 %2066  ;;  %v5183_v9 = vpop.f32.mrb[16].mxu1 }
 0x1c6   :  { %v2113_v42 = vsel %vm2110_vm8, %v5471_v63, %v2067_v23  ;;  %v4137_v53 = vadd.f32 %v5183_v9, %v7367_v6  ;;  %v2063_v29 = vpop.permute.xlu0 %2062  ;;  %v4056_v55 = vpop.f32.mrb[17].mxu1 }
 0x1c7   :  { %2129 = vst [vmem:[%s7620_s3 + $0x20] sm:$0xff] %v2113_v42  ;;  %v2111_v5 = vsel %vm2110_vm8, %v5473_v31, %v2063_v29  ;;  %v5184_v1 = vpop.f32.mrb[18].mxu1  ;;  %v4135_v57 = vadd.f32 %v7367_v6, %v4056_v55  ;;  %v1232_v31 = vadd.f32 %v7367_v6, %v7407_v33 }
 0x1c8   :  { %5484 = vtanh.f32 %v4137_v53  ;;  %2127 = vst [vmem:[%s7620_s3] sm:$0xff] %v2111_v5  ;;  %v4138_v50 = vadd.f32 %v5184_v1, %v7367_v6  ;;  %v4059_v27 = vpop.f32.mrb[19].mxu1 }
 0x1c9   :  { %5486 = vtanh.f32 %v1224_v47  ;;  %v2069_v15 = vpop.permute.xlu1 %2068  ;;  %v4136_v26 = vadd.f32 %v7367_v6, %v4059_v27 }
 0x1ca   :  { %5488 = vtanh.f32 %v4138_v50  ;;  %v2114_v35 = vsel %vm2110_vm8, %v5475_v38, %v2069_v15  ;;  %v2065_v44 = vpop.permute.xlu0 %2064 }
 0x1cb   :  { %5490 = vtanh.f32 %v1229_v30  ;;  %2130 = vst [vmem:[%s7620_s3 + $0x30] sm:$0xff] %v2114_v35  ;;  %v2112_v41 = vsel %vm2110_vm8, %v5477_v32, %v2065_v44 }
 0x1cc   :  { %5492 = vtanh.f32 %v4135_v57  ;;  %2128 = vst [vmem:[%s7620_s3 + $0x10] sm:$0xff] %v2112_v41 }
 0x1cd   :  { %5494 = vtanh.f32 %v1230_v60  ;;  %v5187_v22 = vpop.f32.mrb[20].mxu1 }
 0x1ce   :  { %5496 = vtanh.f32 %v4136_v26  ;;  %v4141_v59 = vadd.f32 %v5187_v22, %v7367_v6  ;;  %v2075_v16 = vpop.permute.xlu0 %2074  ;;  %v4072_v54 = vpop.f32.mrb[21].mxu1 }
 0x1cf   :  { %5498 = vtanh.f32 %v1227_v46  ;;  %v2117_v17 = vsel %vm2110_vm8, %v5479_v18, %v2075_v16  ;;  %v2077_v34 = vpop.permute.xlu1 %2076  ;;  %v5188_v11 = vpop.f32.mrb[22].mxu1  ;;  %v4139_v2 = vadd.f32 %v7367_v6, %v4072_v54 }
 0x1d0   :  { %5500 = vtanh.f32 %v4141_v59  ;;  %2133 = vst [vmem:[%s7620_s3 + $0x60] sm:$0xff] %v2117_v17  ;;  %v2118_v43 = vsel %vm2110_vm8, %v5481_v10, %v2077_v34  ;;  %v4142_v37 = vadd.f32 %v5188_v11, %v7367_v6  ;;  %v4075_v58 = vpop.f32.mrb[23].mxu1 }
 0x1d1   :  { %5502 = vtanh.f32 %v1228_v61  ;;  %2134 = vst [vmem:[%s7620_s3 + $0x70] sm:$0xff] %v2118_v43  ;;  %v4140_v8 = vadd.f32 %v7367_v6, %v4075_v58 }
 0x1d2   :  { %v5485_v3 = vpop.eup %5484  ;;  %5504 = vtanh.f32 %v4142_v37  ;;  %v2071_v4 = vpop.permute.xlu0 %2070 }
 0x1d3   :  { %v5487_v56 = vpop.eup %5486  ;;  %v2115_v7 = vsel %vm2110_vm8, %v5483_v36, %v2071_v4  ;;  %v2073_v25 = vpop.permute.xlu1 %2072  ;;  %4187 = vrot.lane.b32.xlu0 %v5485_v3, %s5566_s2  ;;  %5506 = vtanh.f32 %v4139_v2 }
 0x1d4   :  { %v5489_v48 = vpop.eup %5488  ;;  %2131 = vst [vmem:[%s7620_s3 + $0x40] sm:$0xff] %v2115_v7  ;;  %v2116_v21 = vsel %vm2110_vm8, %v5487_v56, %v2073_v25  ;;  %5508 = vtanh.f32 %v4140_v8 }
 0x1d5   :  { %v5491_v13 = vpop.eup %5490  ;;  %2132 = vst [vmem:[%s7620_s3 + $0x50] sm:$0xff] %v2116_v21  ;;  %v5191_v24 = vpop.f32.mrb[24].mxu1  ;;  %4189 = vrot.lane.b32.xlu1 %v5489_v48, %s5566_s2  ;;  %5510 = vtanh.f32 %v1233_v45 }
 0x1d6   :  { %v5493_v14 = vpop.eup %5492  ;;  %v4145_v12 = vadd.f32 %v5191_v24, %v7367_v6  ;;  %v2083_v62 = vpop.permute.xlu0 %2082 }
 0x1d7   :  { %v4088_v49 = vpop.f32.mrb[25].mxu1  ;;  %v5495_v19 = vpop.eup %5494  ;;  %v2121_v28 = vsel %vm2110_vm8, %v5491_v13, %v2083_v62  ;;  %4183 = vrot.lane.b32.xlu0 %v5493_v14, %s5566_s2 }
 0x1d8   :  { %v2085_v39 = vpop.permute.xlu1 %2084  ;;  %v5192_v40 = vpop.f32.mrb[26].mxu1  ;;  %5512 = vtanh.f32 %v4145_v12  ;;  %2137 = vst [vmem:[%s7620_s3 + $0xa0] sm:$0xff] %v2121_v28  ;;  %v4143_v63 = vadd.f32 %v7367_v6, %v4088_v49 }
 0x1d9   :  { %v5497_v20 = vpop.eup %5496  ;;  %v2122_v47 = vsel %vm2110_vm8, %v5495_v19, %v2085_v39  ;;  %v4146_v23 = vadd.f32 %v5192_v40, %v7367_v6  ;;  %v4091_v9 = vpop.f32.mrb[27].mxu1  ;;  %5514 = vtanh.f32 %v1234_v0 }
 0x1da   :  { %v5499_v52 = vpop.eup %5498  ;;  %2138 = vst [vmem:[%s7620_s3 + $0xb0] sm:$0xff] %v2122_v47  ;;  %4185 = vrot.lane.b32.xlu1 %v5497_v20, %s5566_s2  ;;  %v4144_v53 = vadd.f32 %v7367_v6, %v4091_v9  ;;  %v2079_v29 = vpop.permute.xlu0 %2078 }
 0x1db   :  { %v5501_v42 = vpop.eup %5500  ;;  %5516 = vtanh.f32 %v4146_v23  ;;  %v2119_v30 = vsel %vm2110_vm8, %v5499_v52, %v2079_v29 }
 0x1dc   :  { %v5503_v55 = vpop.eup %5502  ;;  %5518 = vtanh.f32 %v1231_v51  ;;  %v2081_v5 = vpop.permute.xlu1 %2080  ;;  %4195 = vrot.lane.b32.xlu0 %v5501_v42, %s5566_s2  ;;  %2135 = vst [vmem:[%s7620_s3 + $0x80] sm:$0xff] %v2119_v30 }
 0x1dd   :  { %v5505_v1 = vpop.eup %5504  ;;  %5520 = vtanh.f32 %v4143_v63  ;;  %v2120_v33 = vsel %vm2110_vm8, %v5503_v55, %v2081_v5  ;;  %v7491_v57 = vpop.f32.mrb[16].mxu0 }
 0x1de   :  { %5522 = vtanh.f32 %v1232_v31  ;;  %2136 = vst [vmem:[%s7620_s3 + $0x90] sm:$0xff] %v2120_v33  ;;  %v5195_v50 = vpop.f32.mrb[28].mxu1  ;;  %4197 = vrot.lane.b32.xlu1 %v5505_v1, %s5566_s2  ;;  %v5507_v27 = vpop.eup %5506  ;;  %v3345_v39 = vadd.f32 %v7491_v57, %v7367_v6 }
 0x1df   :  { %5524 = vtanh.f32 %v4144_v53  ;;  %v7497_v38 = vpop.f32.mrb[17].mxu0  ;;  %v4104_v60 = vpop.f32.mrb[29].mxu1  ;;  %v4149_v11 = vadd.f32 %v5195_v50, %v7367_v6 }
 0x1e0   :  { %v5112_v15 = vpop.f32.mrb[18].mxu0  ;;  %4191 = vrot.lane.b32.xlu0 %v5507_v27, %s5566_s2  ;;  %v5196_v32 = vpop.f32.mrb[30].mxu1  ;;  %v4147_v61 = vadd.f32 %v7367_v6, %v4104_v60  ;;  %v3343_v20 = vadd.f32 %v7367_v6, %v7497_v38 }
 0x1e1   :  { %v5509_v26 = vpop.eup %5508  ;;  %v3260_v35 = vpop.f32.mrb[19].mxu0  ;;  %v4150_v8 = vadd.f32 %v5196_v32, %v7367_v6  ;;  %v3346_v40 = vadd.f32 %v5112_v15, %v7367_v6 }
 0x1e2   :  { %v4107_v44 = vpop.f32.mrb[31].mxu1  ;;  %v5511_v46 = vpop.eup %5510  ;;  %4193 = vrot.lane.b32.xlu1 %v5509_v26, %s5566_s2  ;;  %5526 = vtanh.f32 %v4147_v61  ;;  %v3344_v63 = vadd.f32 %v7367_v6, %v3260_v35 }
 0x1e3   :  { %v2091_v41 = vpop.permute.xlu0 %2090  ;;  %v5513_v22 = vpop.eup %5512  ;;  %v4148_v54 = vadd.f32 %v7367_v6, %v4107_v44 }
 0x1e4   :  { %v2125_v18 = vsel %vm2110_vm8, %v5511_v46, %v2091_v41  ;;  %v5515_v59 = vpop.eup %5514  ;;  %v2093_v16 = vpop.permute.xlu1 %2092  ;;  %4203 = vrot.lane.b32.xlu0 %v5513_v22, %s5566_s2 }
 0x1e5   :  { %2141 = vst [vmem:[%s7620_s3 + $0xe0] sm:$0xff] %v2125_v18  ;;  %v5517_v10 = vpop.eup %5516  ;;  %v2126_v17 = vsel %vm2110_vm8, %v5515_v59, %v2093_v16  ;;  %v5115_v2 = vpop.f32.mrb[20].mxu0  ;;  %5528 = vtanh.f32 %v4148_v54 }
 0x1e6   :  { %v5519_v34 = vpop.eup %5518  ;;  %2142 = vst [vmem:[%s7620_s3 + $0xf0] sm:$0xff] %v2126_v17  ;;  %4205 = vrot.lane.b32.xlu1 %v5517_v10, %s5566_s2  ;;  %v3273_v36 = vpop.f32.mrb[21].mxu0  ;;  %5530 = vtanh.f32 %v4149_v11  ;;  %v3349_v47 = vadd.f32 %v5115_v2, %v7367_v6 }
 0x1e7   :  { %v2087_v43 = vpop.permute.xlu0 %2086  ;;  %v5521_v37 = vpop.eup %5520  ;;  %5532 = vtanh.f32 %v4150_v8  ;;  %v3347_v9 = vadd.f32 %v7367_v6, %v3273_v36 }
 0x1e8   :  { %v2123_v58 = vsel %vm2110_vm8, %v5519_v34, %v2087_v43  ;;  %v5523_v3 = vpop.eup %5522  ;;  %v2089_v4 = vpop.permute.xlu1 %2088  ;;  %4199 = vrot.lane.b32.xlu0 %v5521_v37, %s5566_s2  ;;  %5534 = vtanh.f32 %v3345_v39 }
 0x1e9   :  { %2139 = vst [vmem:[%s7620_s3 + $0xc0] sm:$0xff] %v2123_v58  ;;  %v5116_v56 = vpop.f32.mrb[22].mxu0  ;;  %v5525_v45 = vpop.eup %5524  ;;  %v2124_v7 = vsel %vm2110_vm8, %v5523_v3, %v2089_v4  ;;  %5536 = vtanh.f32 %v3346_v40 }
 0x1ea   :  { %v3276_v25 = vpop.f32.mrb[23].mxu0  ;;  %2140 = vst [vmem:[%s7620_s3 + $0xd0] sm:$0xff] %v2124_v7  ;;  %4201 = vrot.lane.b32.xlu1 %v5525_v45, %s5566_s2  ;;  %5538 = vtanh.f32 %v3343_v20  ;;  %v3350_v23 = vadd.f32 %v5116_v56, %v7367_v6 }
 0x1eb   :  { %5540 = vtanh.f32 %v3344_v63  ;;  %v3348_v31 = vadd.f32 %v7367_v6, %v3276_v25 }
 0x1ec   :  { %v5527_v13 = vpop.eup %5526  ;;  %5542 = vtanh.f32 %v3349_v47 }
 0x1ed   :  { %v5119_v48 = vpop.f32.mrb[24].mxu0  ;;  %4207 = vrot.lane.b32.xlu0 %v5527_v13, %s5566_s2  ;;  %5544 = vtanh.f32 %v3350_v23 }
 0x1ee   :  { %v3289_v21 = vpop.f32.mrb[25].mxu0  ;;  %5546 = vtanh.f32 %v3347_v9  ;;  %v3353_v55 = vadd.f32 %v5119_v48, %v7367_v6 }
 0x1ef   :  { %v5120_v0 = vpop.f32.mrb[26].mxu0  ;;  %v5529_v14 = vpop.eup %5528  ;;  %5548 = vtanh.f32 %v3348_v31  ;;  %v3351_v38 = vadd.f32 %v7367_v6, %v3289_v21 }
 0x1f0   :  { %v3292_v24 = vpop.f32.mrb[27].mxu0  ;;  %4209 = vrot.lane.b32.xlu1 %v5529_v14, %s5566_s2  ;;  %v5531_v12 = vpop.eup %5530  ;;  %v3354_v33 = vadd.f32 %v5120_v0, %v7367_v6  ;;  %5550 = vtanh.f32 %v3353_v55 }
 0x1f1   :  { %4211 = vrot.lane.b32.xlu0 %v5531_v12, %s5566_s2  ;;  %v5533_v62 = vpop.eup %5532  ;;  %v3352_v26 = vadd.f32 %v7367_v6, %v3292_v24 }
 0x1f2   :  { %v5535_v52 = vpop.eup %5534  ;;  %5552 = vtanh.f32 %v3354_v33 }
 0x1f3   :  { %v5537_v29 = vpop.eup %5536  ;;  %5554 = vtanh.f32 %v3351_v38 }
 0x1f4   :  { %4213 = vrot.lane.b32.xlu1 %v5533_v62, %s5566_s2  ;;  %v5539_v1 = vpop.eup %5538  ;;  %5556 = vtanh.f32 %v3352_v26 }
 0x1f5   :  { %v7528_v49 = vpop.f32.mrb[28].mxu0  ;;  %v5541_v27 = vpop.eup %5540 }
 0x1f6   :  { %v3305_v19 = vpop.f32.mrb[29].mxu0  ;;  %v5543_v32 = vpop.eup %5542  ;;  %v3357_v36 = vadd.f32 %v7528_v49, %v7367_v6 }
 0x1f7   :  { %v7531_v51 = vpop.f32.mrb[30].mxu0  ;;  %v5545_v46 = vpop.eup %5544  ;;  %v3355_v10 = vadd.f32 %v7367_v6, %v3305_v19 }
 0x1f8   :  { %v3308_v28 = vpop.f32.mrb[31].mxu0  ;;  %v5547_v22 = vpop.eup %5546  ;;  %v3358_v56 = vadd.f32 %v7531_v51, %v7367_v6 }
 0x1f9   :  { %v5549_v16 = vpop.eup %5548  ;;  %v3356_v2 = vadd.f32 %v7367_v6, %v3308_v28  ;;  %5558 = vtanh.f32 %v3355_v10 }
 0x1fa   :  { %v5551_v34 = vpop.eup %5550 }
 0x1fb   :  { %5560 = vtanh.f32 %v3356_v2 }
 0x1fc   :  { %v5553_v37 = vpop.eup %5552  ;;  %5562 = vtanh.f32 %v3357_v36 }
 0x1fd   :  { %v5555_v8 = vpop.eup %5554  ;;  %5564 = vtanh.f32 %v3358_v56 }
 0x1fe   :  { %v5557_v7 = vpop.eup %5556 }
 0x203   :  { %v5559_v21 = vpop.eup %5558 }
 0x205   :  { %v5561_v0 = vpop.eup %5560 }
 0x206   :  { %v5563_v12 = vpop.eup %5562 }
 0x207   :  { %v5565_v19 = vpop.eup %5564 }
 0x245   :  { %v4188_v42 = vpop.permute.xlu0 %4187 }
 0x246   :  { %v4233_v53 = vsel %vm2110_vm8, %v5535_v52, %v4188_v42 }
 0x247   :  { %4751 = vst [vmem:[%s7620_s3 + $0x28] sm:$0xff] %v4233_v53  ;;  %v4190_v30 = vpop.permute.xlu1 %4189 }
 0x248   :  { %v4234_v5 = vsel %vm2110_vm8, %v5537_v29, %v4190_v30 }
 0x249   :  { %4752 = vst [vmem:[%s7620_s3 + $0x38] sm:$0xff] %v4234_v5  ;;  %v4184_v57 = vpop.permute.xlu0 %4183 }
 0x24a   :  { %v4231_v50 = vsel %vm2110_vm8, %v5539_v1, %v4184_v57 }
 0x24b   :  { %4749 = vst [vmem:[%s7620_s3 + $0x8] sm:$0xff] %v4231_v50 }
 0x24c   :  { %v4186_v60 = vpop.permute.xlu1 %4185 }
 0x24d   :  { %v4232_v15 = vsel %vm2110_vm8, %v5541_v27, %v4186_v60 }
 0x24e   :  { %4750 = vst [vmem:[%s7620_s3 + $0x18] sm:$0xff] %v4232_v15  ;;  %v4196_v35 = vpop.permute.xlu0 %4195 }
 0x24f   :  { %v4237_v44 = vsel %vm2110_vm8, %v5543_v32, %v4196_v35 }
 0x250   :  { %4755 = vst [vmem:[%s7620_s3 + $0x68] sm:$0xff] %v4237_v44  ;;  %v4198_v41 = vpop.permute.xlu1 %4197 }
 0x251   :  { %v4238_v61 = vsel %vm2110_vm8, %v5545_v46, %v4198_v41 }
 0x252   :  { %4756 = vst [vmem:[%s7620_s3 + $0x78] sm:$0xff] %v4238_v61  ;;  %v4192_v18 = vpop.permute.xlu0 %4191 }
 0x253   :  { %v4235_v59 = vsel %vm2110_vm8, %v5547_v22, %v4192_v18 }
 0x254   :  { %4753 = vst [vmem:[%s7620_s3 + $0x48] sm:$0xff] %v4235_v59  ;;  %v4194_v54 = vpop.permute.xlu1 %4193 }
 0x255   :  { %v4236_v17 = vsel %vm2110_vm8, %v5549_v16, %v4194_v54 }
 0x256   :  { %4754 = vst [vmem:[%s7620_s3 + $0x58] sm:$0xff] %v4236_v17  ;;  %v4204_v11 = vpop.permute.xlu0 %4203 }
 0x257   :  { %v4241_v43 = vsel %vm2110_vm8, %v5551_v34, %v4204_v11 }
 0x258   :  { %4759 = vst [vmem:[%s7620_s3 + $0xa8] sm:$0xff] %v4241_v43  ;;  %v4206_v58 = vpop.permute.xlu1 %4205 }
 0x259   :  { %v4242_v3 = vsel %vm2110_vm8, %v5553_v37, %v4206_v58 }
 0x25a   :  { %4760 = vst [vmem:[%s7620_s3 + $0xb8] sm:$0xff] %v4242_v3  ;;  %v4200_v4 = vpop.permute.xlu0 %4199 }
 0x25b   :  { %v4239_v45 = vsel %vm2110_vm8, %v5555_v8, %v4200_v4 }
 0x25c   :  { %4757 = vst [vmem:[%s7620_s3 + $0x88] sm:$0xff] %v4239_v45  ;;  %v4202_v25 = vpop.permute.xlu1 %4201 }
 0x25d   :  { %v4240_v48 = vsel %vm2110_vm8, %v5557_v7, %v4202_v25 }
 0x25e   :  { %4758 = vst [vmem:[%s7620_s3 + $0x98] sm:$0xff] %v4240_v48 }
 0x25f   :  { %v4208_v13 = vpop.permute.xlu0 %4207 }
 0x260   :  { %v4243_v6 = vsel %vm2110_vm8, %v5559_v21, %v4208_v13 }
 0x261   :  { %4761 = vst [vmem:[%s7620_s3 + $0xc8] sm:$0xff] %v4243_v6 }
 0x262   :  { %v4210_v24 = vpop.permute.xlu1 %4209 }
 0x263   :  { %v4244_v14 = vsel %vm2110_vm8, %v5561_v0, %v4210_v24  ;;  %v4212_v62 = vpop.permute.xlu0 %4211 }
 0x264   :  { %4762 = vst [vmem:[%s7620_s3 + $0xd8] sm:$0xff] %v4244_v14  ;;  %v4245_v49 = vsel %vm2110_vm8, %v5563_v12, %v4212_v62 }
 0x265   :  { %4763 = vst [vmem:[%s7620_s3 + $0xe8] sm:$0xff] %v4245_v49 }
 0x266   :  { %v4214_v51 = vpop.permute.xlu1 %4213 }
 0x267   :  { %v4246_v28 = vsel %vm2110_vm8, %v5565_v19, %v4214_v51 }
 0x268   :  { %4764 = vst [vmem:[%s7620_s3 + $0xf8] sm:$0xff] %v4246_v28 }

</bundles_post_ra>
